<compile_context>
chip_gen: v7x
topology: tpu7x:2x2x1
jax: 0.10.0
libtpu: 0.0.40
codegen_flags: <defaults>
</compile_context>

<pallas_src>
import jax
import jax.numpy as jnp
from jax.experimental import pallas as pl
from jax.experimental.pallas import tpu as pltpu


def _round_up(x, m):
    return (x + m - 1) // m * m


def _pick_band_rows(H, band_rows):
    """Largest divisor of H <= band_rows, avoiding the TH->1 perf cliff."""
    t = max(1, min(band_rows, H))
    while H % t:
        t -= 1
    if t < min(8, H):
        # Awkward H (e.g. prime): degrading toward 1-row bands costs ~0.35us/step
        # fixed overhead plus ~5x halo re-read per row; take the smallest divisor
        # of H that is >= 8 instead (possibly the whole image).
        # TODO(synk): a masked/clamped last band would decouple TH from H % TH == 0.
        for d in range(8, H + 1):
            if H % d == 0:
                t = d
                break
    return t


def _is_v5e():
    try:
        kind = jax.devices()[0].device_kind.lower()
    except Exception:
        return False
    return ("v5e" in kind) or ("v5 lite" in kind) or ("v5litepod" in kind)


# stage-2 (3x3 conv) row taps: for output row phase ph and dy in (-1, 0, +1):
# (row-phase plane of y_sc, pair-row offset).
_ROW_TAPS = (((1, 0), (0, 1), (1, 1)),   # out rows 2r   read y rows 2r-1, 2r, 2r+1
             ((0, 1), (1, 1), (0, 2)))   # out rows 2r+1 read y rows 2r, 2r+1, 2r+2
# stage-2 column taps (unfused / v5e path): for output col phase pw and
# dx in (-1, 0, +1): (col-phase lane block of y_sc, pair-col offset).
_COL_TAPS = (((1, 0), (0, 1), (1, 1)),
             ((0, 1), (1, 1), (0, 2)))


def _make_upsample_kernel(TH, W, Wk, Cp, use_conv, fuse, cdt, LB, WPA):
    """Fused Upsample kernel body for one (batch, row-band) grid step."""
    R = TH + 2 if use_conv else TH        # pair rows produced by stage 1 per band
    row0 = 0 if use_conv else 1

    def stage1(xb, slot, wup_ref, bup_ref, ph, nrows):
        """Polyphase ConvTranspose2d(k=4, s=2, p=1): 2x2 kernels on un-dilated x."""
        def tap(dh, cw):
            r0 = row0 + ph + dh
            return xb[slot, r0:r0 + nrows, cw:cw + Wk, :]

        if fuse:
            # Both column phases in one MXU dot: K = 6*Cp, N = 2*Cp.
            lhs = jnp.concatenate(
                [tap(dh, cw) for dh in range(2) for cw in range(3)],
                axis=-1).reshape(nrows * Wk, 6 * Cp)
            acc = jnp.dot(lhs, wup_ref[ph], preferred_element_type=jnp.float32)
            return (acc + bup_ref[...]).reshape(nrows, Wk, 2 * Cp)
        outs = []
        for pw in range(2):
            lhs = jnp.concatenate(
                [tap(dh, pw + dw) for dh in range(2) for dw in range(2)],
                axis=-1).reshape(nrows * Wk, 4 * Cp)
            acc = jnp.dot(lhs, wup_ref[ph, pw], preferred_element_type=jnp.float32)
            outs.append((acc + bup_ref[...]).reshape(nrows, Wk, Cp))
        return outs

    def stage2(y_ref, wc_ref, bc_ref, ph):
        """3x3 conv on the VMEM-resident 2x band (K split per row tap, f32 acc)."""
        taps = _ROW_TAPS[ph]
        if fuse:
            acc = bc_ref[...]
            for t, (rpl, roff) in enumerate(taps):
                # Union of both output col phases' taps: y cols 2c-1 .. 2c+2
                # -> K = 4*Cp per row tap (middle two taps are one 2*Cp slice).
                lhs = jnp.concatenate(
                    [y_ref[rpl, roff:roff + TH, LB - 1:LB - 1 + Wk, Cp:2 * Cp],
                     y_ref[rpl, roff:roff + TH, LB:LB + Wk, :],
                     y_ref[rpl, roff:roff + TH, LB + 1:LB + 1 + Wk, 0:Cp]],
                    axis=-1).reshape(TH * Wk, 4 * Cp)
                acc = acc + jnp.dot(lhs, wc_ref[t],
                                    preferred_element_type=jnp.float32)
            return acc.reshape(TH, Wk, 2 * Cp)
        outs = []
        for pw in range(2):
            acc = bc_ref[...]
            for t, (rpl, roff) in enumerate(taps):
                lhs = jnp.concatenate(
                    [y_ref[rpl, roff:roff + TH,
                           LB - 1 + coff:LB - 1 + coff + Wk,
                           cpl * Cp:(cpl + 1) * Cp]
                     for (cpl, coff) in _COL_TAPS[pw]],
                    axis=-1).reshape(TH * Wk, 3 * Cp)
                acc = acc + jnp.dot(lhs, wc_ref[t],
                                    preferred_element_type=jnp.float32)
            outs.append(acc.reshape(TH, Wk, Cp))
        return outs

    def dma(x_hbm, xb, sem, n, band, slot):
        return pltpu.make_async_copy(
            x_hbm.at[n, pl.ds(band * TH, TH + 4)], xb.at[slot], sem.at[slot])

    def fetch_and_prefetch(x_hbm, xb, sem):
        # Double-buffered input-band DMA.  The band axis is "arbitrary", so for a
        # fixed n the bands run in order on one core: prefetch band i+1 while
        # computing band i; only band 0 of each image pays an exposed DMA.
        n = pl.program_id(0)
        i = pl.program_id(1)
        nb = pl.num_programs(1)
        slot = i % 2

        @pl.when(i == 0)
        def _():
            dma(x_hbm, xb, sem, n, 0, 0).start()

        dma(x_hbm, xb, sem, n, i, slot).wait()

        @pl.when(i + 1 < nb)
        def _():
            dma(x_hbm, xb, sem, n, i + 1, 1 - slot).start()

        return i, slot

    def store_out(out_ref, ph, val):
        if fuse:
            out_ref[0, :, ph, :, :] = val.astype(out_ref.dtype)
        else:
            for pw in range(2):
                out_ref[0, :, ph, :, pw * Cp:(pw + 1) * Cp] = (
                    val[pw].astype(out_ref.dtype))

    if use_conv:
        def kernel(x_hbm, wup_ref, bup_ref, wc_ref, bc_ref,
                   out_ref, xb, y_ref, sem):
            i, slot = fetch_and_prefetch(x_hbm, xb, sem)
            nb = pl.num_programs(1)

            # ---- stage 1: transposed conv -> 2x band, kept in VMEM ----
            for ph in range(2):
                y = stage1(xb, slot, wup_ref, bup_ref, ph, R)
                if fuse:
                    y_ref[ph, :, LB:LB + Wk, :] = y.astype(cdt)
                else:
                    for pw in range(2):
                        y_ref[ph, :, LB:LB + Wk, pw * Cp:(pw + 1) * Cp] = (
                            y[pw].astype(cdt))

            # Zero the borders the 3x3 conv (pad=1) sees.  The right-hand zeroing
            # also covers x's width padding: outputs at y cols >= 2W are discarded
            # by the wrapper, but y col 2W itself must read as 0 for output 2W-1.
            for ph in range(2):
                y_ref[ph, :, 0:LB, :] = jnp.zeros((R, LB, 2 * Cp), cdt)
                y_ref[ph, :, LB + W:WPA, :] = jnp.zeros(
                    (R, WPA - LB - W, 2 * Cp), cdt)

            @pl.when(i == 0)
            def _():
                y_ref[1, 0, :, :] = jnp.zeros((WPA, 2 * Cp), cdt)       # y row -1

            @pl.when(i == nb - 1)
            def _():
                y_ref[0, R - 1, :, :] = jnp.zeros((WPA, 2 * Cp), cdt)   # y row 2H

            # ---- stage 2: 3x3 conv, read from VMEM, lane-dense output store ----
            for ph in range(2):
                store_out(out_ref, ph, stage2(y_ref, wc_ref, bc_ref, ph))
        return kernel

    def kernel(x_hbm, wup_ref, bup_ref, out_ref, xb, sem):
        _, slot = fetch_and_prefetch(x_hbm, xb, sem)
        for ph in range(2):
            store_out(out_ref, ph, stage1(xb, slot, wup_ref, bup_ref, ph, TH))
    return kernel


def _prep_weights(params, C, Cp, use_conv, fuse, cdt):
    """Pack weights for the kernel's matmul layouts (zero-padded to Cp channels)."""
    zblk = jnp.zeros((Cp, Cp), cdt)
    wt = jnp.pad(params["up_w"],
                 ((0, Cp - C), (0, Cp - C), (0, 0), (0, 0))).astype(cdt)

    def up_blk(ph, pw, dh, dw):                       # (Cp in, Cp out)
        return wt[:, :, 3 - ph - 2 * dh, 3 - pw - 2 * dw]

    b_up1 = jnp.pad(params["up_b"].astype(jnp.float32), (0, Cp - C))
    if fuse:
        # Fused over both output col phases: rows = (dh, x-col offset cw in 0..2),
        # cols = [pw=0 | pw=1]; unused (cw, pw) pairs are zero blocks.
        w_up = jnp.stack([
            jnp.concatenate([
                jnp.concatenate(
                    [up_blk(ph, pw, dh, cw - pw) if 0 <= cw - pw <= 1 else zblk
                     for pw in range(2)], axis=1)
                for dh in range(2) for cw in range(3)], axis=0)
            for ph in range(2)], axis=0)                              # (2, 6Cp, 2Cp)
        b_up = jnp.concatenate([b_up1, b_up1]).reshape(1, 2 * Cp)
    else:
        w_up = jnp.stack([
            jnp.stack([
                jnp.concatenate([up_blk(ph, pw, dh, dw)
                                 for dh in range(2) for dw in range(2)], axis=0)
                for pw in range(2)], axis=0)
            for ph in range(2)], axis=0)                              # (2, 2, 4Cp, Cp)
        b_up = b_up1.reshape(1, Cp)

    weights = [w_up, b_up]
    if use_conv:
        w3 = jnp.transpose(params["conv_w"], (2, 3, 1, 0))            # HWIO (3,3,C,C)
        w3 = jnp.pad(w3, ((0, 0), (0, 0), (0, Cp - C), (0, Cp - C))).astype(cdt)
        b_c1 = jnp.pad(params["conv_b"].astype(jnp.float32), (0, Cp - C))
        if fuse:
            # Per 3x3 row tap t: rows = union col taps (y cols 2c-1..2c+2),
            # cols = [out pw=0 | out pw=1].
            wc = jnp.stack([
                jnp.concatenate([
                    jnp.concatenate([w3[t, 0], zblk], axis=1),
                    jnp.concatenate([w3[t, 1], w3[t, 0]], axis=1),
                    jnp.concatenate([w3[t, 2], w3[t, 1]], axis=1),
                    jnp.concatenate([zblk, w3[t, 2]], axis=1)], axis=0)
                for t in range(3)], axis=0)                           # (3, 4Cp, 2Cp)
            b_c = jnp.concatenate([b_c1, b_c1]).reshape(1, 2 * Cp)
        else:
            wc = jnp.stack([w3[t].reshape(3 * Cp, Cp) for t in range(3)],
                           axis=0)                                    # (3, 3Cp, Cp)
            b_c = b_c1.reshape(1, Cp)
        weights += [wc, b_c]
    return weights


def upsample_forward(x_nchw, params, use_conv=True, dims=2, band_rows=16,
                     compute_dtype=jnp.bfloat16, fuse_col_phases=None):
    """Pallas TPU implementation of Upsample.forward (dims=2 path)."""
    if dims == 3:
        # TODO(synk): dims==3 nearest-neighbour F.interpolate path not implemented
        # (module default dims=2 is the path exercised here).
        raise NotImplementedError("dims=3 path not implemented")
    N, C, H, W = x_nchw.shape
    assert C == params["up_w"].shape[0]
    out_dtype = x_nchw.dtype
    cdt = jnp.dtype(compute_dtype)
    if fuse_col_phases is None:
        # v6e/v7x MXUs are 256 wide: filling N with both column phases is a win;
        # on v5e (128-wide MXU) it is pure extra MACs, so keep phases separate.
        fuse_col_phases = not _is_v5e()

    Cp = _round_up(C, 128)                 # lane-dense channels
    Wk = _round_up(W, 8)                   # sublane-friendly width
    TH = _pick_band_rows(H, band_rows)     # input rows per grid step
    nb = H // TH
    LB = 8                                 # left border pad -> aligned y_sc stores
    WPA = _round_up(LB + Wk + 1, 8)        # y_sc pair-col slots (= LB + Wk + 8)
    R = TH + 2 if use_conv else TH

    # NCHW -> NHWC, cast to the compute dtype and pad (2 halo rows top/bottom,
    # 1 col left, 1+(Wk-W) right, channels -> Cp) in a single XLA pass.
    # TODO(synk): an NHWC end-to-end model would let the transposes/pad fuse away.
    x = jnp.transpose(x_nchw, (0, 2, 3, 1)).astype(cdt)
    xpp = jnp.pad(x, ((0, 0), (2, 2), (1, 1 + Wk - W), (0, Cp - C)))

    weights = _prep_weights(params, C, Cp, use_conv, fuse_col_phases, cdt)

    in_specs = [pl.BlockSpec(memory_space=pl.ANY)]        # raw HBM ref, manual DMA
    for wgt in weights:
        in_specs.append(
            pl.BlockSpec(wgt.shape, lambda n, i, _r=wgt.ndim: (0,) * _r))

    scratch_shapes = [pltpu.VMEM((2, TH + 4, Wk + 2, Cp), cdt)]  # dbl-buffered band
    if use_conv:
        scratch_shapes.append(pltpu.VMEM((2, R, WPA, 2 * Cp), cdt))  # 2x band
    scratch_shapes.append(pltpu.SemaphoreType.DMA((2,)))

    # Cost / VMEM bookkeeping.
    cd = cdt.itemsize
    od = jnp.dtype(out_dtype).itemsize
    if fuse_col_phases:
        step_flops = 2 * (R * Wk) * (6 * Cp) * (2 * Cp) * 2
        if use_conv:
            step_flops += 2 * (TH * Wk) * 3 * (4 * Cp) * (2 * Cp) * 2
    else:
        step_flops = 4 * (R * Wk) * (4 * Cp) * Cp * 2
        if use_conv:
            step_flops += 4 * (TH * Wk) * (9 * Cp) * Cp * 2
    flops = N * nb * step_flops
    w_bytes = sum(int(wgt.size) * wgt.dtype.itemsize for wgt in weights)
    bytes_accessed = int(xpp.size) * cd + N * H * 2 * Wk * 2 * Cp * od + w_bytes

    vmem_est = (2 * (TH + 4) * _round_up(Wk + 2, 8) * Cp * cd          # xb
                + (2 * R * WPA * 2 * Cp * cd if use_conv else 0)       # y_sc
                + 2 * w_bytes                                          # dbl-buffered
                + 2 * TH * 2 * Wk * 2 * Cp * od                        # out block x2
                + R * Wk * 6 * Cp * cd + 2 * TH * Wk * 2 * Cp * 4)     # staging
    vmem_limit = None
    if vmem_est > 24 << 20:
        # Raise the scoped-VMEM limit past the 16/32 MiB defaults but stay under
        # v7x's 64 MiB ceiling; shrink band_rows if this still does not fit.
        vmem_limit = int(min(max(2 * vmem_est, 32 << 20), 64 << 20))

    out = pl.pallas_call(
        _make_upsample_kernel(TH, W, Wk, Cp, use_conv, fuse_col_phases, cdt,
                              LB, WPA),
        out_shape=jax.ShapeDtypeStruct((N, H, 2, Wk, 2 * Cp), out_dtype),
        grid_spec=pltpu.PrefetchScalarGridSpec(
            num_scalar_prefetch=0,
            grid=(N, nb),
            in_specs=in_specs,
            out_specs=pl.BlockSpec((1, TH, 2, Wk, 2 * Cp),
                                   lambda n, i: (n, i, 0, 0, 0)),
            scratch_shapes=scratch_shapes),
        compiler_params=pltpu.CompilerParams(
            # batch axis parallel (megacore / v7x 2-TC split); the band axis is
            # sequential per image so the in-kernel DMA prefetch is valid.
            dimension_semantics=("parallel", "arbitrary"),
            vmem_limit_bytes=vmem_limit),
        cost_estimate=pl.CostEstimate(flops=int(flops), transcendentals=0,
                                      bytes_accessed=int(bytes_accessed)),
    )(xpp, *weights)

    # (N, H, 2, Wk, 2*Cp) row-major == (N, 2H, 2Wk, Cp): free phase interleave.
    y = out.reshape(N, 2 * H, 2 * Wk, Cp)[:, :, :2 * W, :C]
    return jnp.transpose(y, (0, 3, 1, 2))                             # NHWC -> NCHW


def upsample_reference(x_nchw, params, use_conv=True):
    """Pure-JAX reference matching the PyTorch module (for validation)."""
    w_eq = jnp.transpose(params["up_w"], (1, 0, 2, 3))[:, :, ::-1, ::-1]   # OIHW
    y = jax.lax.conv_general_dilated(
        x_nchw, w_eq, window_strides=(1, 1), padding=((2, 2), (2, 2)),
        lhs_dilation=(2, 2), dimension_numbers=("NCHW", "OIHW", "NCHW"))
    y = y + params["up_b"].reshape(1, -1, 1, 1)
    if use_conv:
        y = jax.lax.conv_general_dilated(
            y, params["conv_w"], window_strides=(1, 1), padding=((1, 1), (1, 1)),
            dimension_numbers=("NCHW", "OIHW", "NCHW"))
        y = y + params["conv_b"].reshape(1, -1, 1, 1)
    return y


if __name__ == "__main__":
    C, N, H, W = 4, 2, 16, 16
    key = jax.random.PRNGKey(0)
    k1, k2, k3, k4, kx = jax.random.split(key, 5)
    params = {
        # nn.ConvTranspose2d(C, C, kernel_size=4, stride=2, padding=1)
        "up_w": jax.random.normal(k1, (C, C, 4, 4), jnp.float32) * 0.1,
        "up_b": jax.random.normal(k2, (C,), jnp.float32) * 0.1,
        # nn.Conv2d(C, C, 3, padding=1)
        "conv_w": jax.random.normal(k3, (C, C, 3, 3), jnp.float32) * 0.1,
        "conv_b": jax.random.normal(k4, (C,), jnp.float32) * 0.1,
    }
    x = jax.random.normal(kx, (N, C, H, W), jnp.float32)   # NCHW, PyTorch layout

    ref_conv = jax.block_until_ready(upsample_reference(x, params, use_conv=True))
    ref_up = jax.block_until_ready(upsample_reference(x, params, use_conv=False))

    # f32-compute runs validate the kernel logic tightly on both MXU-fusion
    # branches; two row bands exercise halo / border / DMA-prefetch machinery.
    for fuse in (True, False):
        out = jax.block_until_ready(
            upsample_forward(x, params, use_conv=True, band_rows=8,
                             compute_dtype=jnp.float32, fuse_col_phases=fuse))
        assert out.shape == (N, C, 2 * H, 2 * W), out.shape
        err = float(jnp.max(jnp.abs(out - ref_conv)))
        assert err < 1e-4, f"use_conv=True fuse={fuse} f32 max abs err {err}"

    # bf16-compute fast path (default), f32 MXU accumulation -> looser tolerance.
    out = jax.block_until_ready(
        upsample_forward(x, params, use_conv=True, band_rows=16,
                         compute_dtype=jnp.bfloat16))
    err = float(jnp.max(jnp.abs(out.astype(jnp.float32) - ref_conv)))
    assert err < 5e-2, f"use_conv=True bf16 max abs err {err}"

    # use_conv=False path (transposed conv only), both fusion branches.
    out2 = jax.block_until_ready(
        upsample_forward(x, params, use_conv=False, band_rows=8,
                         compute_dtype=jnp.float32, fuse_col_phases=True))
    err2 = float(jnp.max(jnp.abs(out2 - ref_up)))
    assert err2 < 1e-4, f"use_conv=False f32 max abs err {err2}"

    out3 = jax.block_until_ready(
        upsample_forward(x, params, use_conv=False, band_rows=16,
                         compute_dtype=jnp.bfloat16, fuse_col_phases=False))
    err3 = float(jnp.max(jnp.abs(out3.astype(jnp.float32) - ref_up)))
    assert err3 < 5e-2, f"use_conv=False bf16 max abs err {err3}"

    print("KERNEL_OK")
</pallas_src>

<mosaic_0001>
module attributes {stable_mosaic.version = 11 : i64} {
  func.func @kernel(%arg0: i32, %arg1: i32, %arg2: memref<2x20x18x128xf32, #tpu.memory_space<any>>, %arg3: memref<2x768x256xf32, #tpu.memory_space<vmem>>, %arg4: memref<1x256xf32, #tpu.memory_space<vmem>>, %arg5: memref<3x512x256xf32, #tpu.memory_space<vmem>>, %arg6: memref<1x256xf32, #tpu.memory_space<vmem>>, %arg7: memref<1x8x2x16x256xf32, #tpu.memory_space<vmem>>, %arg8: memref<2x12x18x128xf32, #tpu.memory_space<vmem>>, %arg9: memref<2x10x32x256xf32, #tpu.memory_space<vmem>>, %arg10: memref<2x!tpu.dma_semaphore, #tpu.memory_space<semaphore_mem>>) attributes {dimension_semantics = [#tpu.dimension_semantics<parallel>, #tpu.dimension_semantics<arbitrary>], iteration_bounds = array<i64: 2, 2>, scalar_prefetch = 0 : i64, scratch_operands = 3 : i64, tpu.core_type = #tpu.core_type<tc>, window_params = [{}, {pipeline_mode = #tpu.pipeline_mode<synchronous>, transform_indices = @transform_1, window_bounds = array<i64: 2, 768, 256>}, {pipeline_mode = #tpu.pipeline_mode<synchronous>, transform_indices = @transform_2, window_bounds = array<i64: 1, 256>}, {pipeline_mode = #tpu.pipeline_mode<synchronous>, transform_indices = @transform_3, window_bounds = array<i64: 3, 512, 256>}, {pipeline_mode = #tpu.pipeline_mode<synchronous>, transform_indices = @transform_4, window_bounds = array<i64: 1, 256>}, {transform_indices = @transform_5, window_bounds = array<i64: 1, 8, 2, 16, 256>}]} {
    %c2_i32 = arith.constant 2 : i32
    %c0_i32 = arith.constant 0 : i32
    %0 = arith.cmpi eq, %c2_i32, %c0_i32 : i32
    %c1_i32 = arith.constant 1 : i32
    %1 = arith.select %0, %c1_i32, %c2_i32 : i32
    %2 = arith.remsi %arg1, %1 : i32
    %c0_i32_0 = arith.constant 0 : i32
    %3 = arith.cmpi ne, %2, %c0_i32_0 : i32
    %c0_i32_1 = arith.constant 0 : i32
    %4 = arith.cmpi slt, %2, %c0_i32_1 : i32
    %c0_i32_2 = arith.constant 0 : i32
    %5 = arith.cmpi slt, %1, %c0_i32_2 : i32
    %6 = arith.xori %4, %5 : i1
    %7 = arith.andi %6, %3 : i1
    %8 = arith.addi %2, %1 : i32
    %9 = arith.select %7, %8, %2 : i32
    %c0_i32_3 = arith.constant 0 : i32
    %10 = arith.cmpi eq, %arg1, %c0_i32_3 : i32
    %11 = arith.extui %10 : i1 to i32
    %c0_i32_4 = arith.constant 0 : i32
    %12 = arith.cmpi ne, %11, %c0_i32_4 : i32
    scf.if %12 {
      %c0_i32_194 = arith.constant 0 : i32
      %c0_i32_195 = arith.constant 0 : i32
      %c0_i32_196 = arith.constant 0 : i32
      %c0_i32_197 = arith.constant 0 : i32
      %c0_i32_198 = arith.constant 0 : i32
      %190 = tpu.memref_slice %arg2[%arg0, %c0_i32_196, %c0_i32_197, %c0_i32_198] : memref<2x20x18x128xf32, #tpu.memory_space<any>> -> memref<1x12x18x128xf32, #tpu.memory_space<any>>
      %191 = tpu.memref_squeeze %190 : memref<1x12x18x128xf32, #tpu.memory_space<any>> -> memref<12x18x128xf32, #tpu.memory_space<any>>
      %c0_i32_199 = arith.constant 0 : i32
      %c0_i32_200 = arith.constant 0 : i32
      %c0_i32_201 = arith.constant 0 : i32
      %192 = tpu.memref_slice %arg8[%c0_i32_194, %c0_i32_199, %c0_i32_200, %c0_i32_201] : memref<2x12x18x128xf32, #tpu.memory_space<vmem>> -> memref<1x12x18x128xf32, #tpu.memory_space<vmem>>
      %193 = tpu.memref_squeeze %192 : memref<1x12x18x128xf32, #tpu.memory_space<vmem>> -> memref<12x18x128xf32, #tpu.memory_space<vmem>>
      %194 = tpu.memref_slice %arg10[%c0_i32_195] : memref<2x!tpu.dma_semaphore, #tpu.memory_space<semaphore_mem>> -> memref<1x!tpu.dma_semaphore, #tpu.memory_space<semaphore_mem>>
      %195 = tpu.memref_squeeze %194 : memref<1x!tpu.dma_semaphore, #tpu.memory_space<semaphore_mem>> -> memref<!tpu.dma_semaphore, #tpu.memory_space<semaphore_mem>>
      tpu.enqueue_dma source(%191 : memref<12x18x128xf32, #tpu.memory_space<any>>) target(%193 : memref<12x18x128xf32, #tpu.memory_space<vmem>>) target_semaphore(%195 : memref<!tpu.dma_semaphore, #tpu.memory_space<semaphore_mem>>)
    } else {
    }
    %c8_i32 = arith.constant 8 : i32
    %13 = arith.muli %arg1, %c8_i32 : i32
    %c0_i32_5 = arith.constant 0 : i32
    %c0_i32_6 = arith.constant 0 : i32
    %14 = tpu.memref_slice %arg2[%arg0, %13, %c0_i32_5, %c0_i32_6] : memref<2x20x18x128xf32, #tpu.memory_space<any>> -> memref<1x12x18x128xf32, #tpu.memory_space<any>>
    %15 = tpu.memref_squeeze %14 : memref<1x12x18x128xf32, #tpu.memory_space<any>> -> memref<12x18x128xf32, #tpu.memory_space<any>>
    %c0_i32_7 = arith.constant 0 : i32
    %c0_i32_8 = arith.constant 0 : i32
    %c0_i32_9 = arith.constant 0 : i32
    %16 = tpu.memref_slice %arg8[%9, %c0_i32_7, %c0_i32_8, %c0_i32_9] : memref<2x12x18x128xf32, #tpu.memory_space<vmem>> -> memref<1x12x18x128xf32, #tpu.memory_space<vmem>>
    %17 = tpu.memref_squeeze %16 : memref<1x12x18x128xf32, #tpu.memory_space<vmem>> -> memref<12x18x128xf32, #tpu.memory_space<vmem>>
    %18 = tpu.memref_slice %arg10[%9] : memref<2x!tpu.dma_semaphore, #tpu.memory_space<semaphore_mem>> -> memref<1x!tpu.dma_semaphore, #tpu.memory_space<semaphore_mem>>
    %19 = tpu.memref_squeeze %18 : memref<1x!tpu.dma_semaphore, #tpu.memory_space<semaphore_mem>> -> memref<!tpu.dma_semaphore, #tpu.memory_space<semaphore_mem>>
    tpu.wait_dma2 semaphore(%19 : memref<!tpu.dma_semaphore, #tpu.memory_space<semaphore_mem>>) src(%15 : memref<12x18x128xf32, #tpu.memory_space<any>>) dst(%17 : memref<12x18x128xf32, #tpu.memory_space<vmem>>)
    %c1_i32_10 = arith.constant 1 : i32
    %20 = arith.addi %arg1, %c1_i32_10 : i32
    %c2_i32_11 = arith.constant 2 : i32
    %21 = arith.cmpi slt, %20, %c2_i32_11 : i32
    %22 = arith.extui %21 : i1 to i32
    %c0_i32_12 = arith.constant 0 : i32
    %23 = arith.cmpi ne, %22, %c0_i32_12 : i32
    scf.if %23 {
      %c1_i32_194 = arith.constant 1 : i32
      %190 = arith.addi %arg1, %c1_i32_194 : i32
      %c1_i32_195 = arith.constant 1 : i32
      %191 = arith.subi %c1_i32_195, %9 : i32
      %c8_i32_196 = arith.constant 8 : i32
      %192 = arith.muli %190, %c8_i32_196 : i32
      %c0_i32_197 = arith.constant 0 : i32
      %c0_i32_198 = arith.constant 0 : i32
      %193 = tpu.memref_slice %arg2[%arg0, %192, %c0_i32_197, %c0_i32_198] : memref<2x20x18x128xf32, #tpu.memory_space<any>> -> memref<1x12x18x128xf32, #tpu.memory_space<any>>
      %194 = tpu.memref_squeeze %193 : memref<1x12x18x128xf32, #tpu.memory_space<any>> -> memref<12x18x128xf32, #tpu.memory_space<any>>
      %c0_i32_199 = arith.constant 0 : i32
      %c0_i32_200 = arith.constant 0 : i32
      %c0_i32_201 = arith.constant 0 : i32
      %195 = tpu.memref_slice %arg8[%191, %c0_i32_199, %c0_i32_200, %c0_i32_201] : memref<2x12x18x128xf32, #tpu.memory_space<vmem>> -> memref<1x12x18x128xf32, #tpu.memory_space<vmem>>
      %196 = tpu.memref_squeeze %195 : memref<1x12x18x128xf32, #tpu.memory_space<vmem>> -> memref<12x18x128xf32, #tpu.memory_space<vmem>>
      %197 = tpu.memref_slice %arg10[%191] : memref<2x!tpu.dma_semaphore, #tpu.memory_space<semaphore_mem>> -> memref<1x!tpu.dma_semaphore, #tpu.memory_space<semaphore_mem>>
      %198 = tpu.memref_squeeze %197 : memref<1x!tpu.dma_semaphore, #tpu.memory_space<semaphore_mem>> -> memref<!tpu.dma_semaphore, #tpu.memory_space<semaphore_mem>>
      tpu.enqueue_dma source(%194 : memref<12x18x128xf32, #tpu.memory_space<any>>) target(%196 : memref<12x18x128xf32, #tpu.memory_space<vmem>>) target_semaphore(%198 : memref<!tpu.dma_semaphore, #tpu.memory_space<semaphore_mem>>)
    } else {
    }
    %24 = arith.index_cast %9 : i32 to index
    %c0 = arith.constant 0 : index
    %c0_13 = arith.constant 0 : index
    %c0_14 = arith.constant 0 : index
    %25 = vector.load %arg8[%24, %c0, %c0_13, %c0_14] : memref<2x12x18x128xf32, #tpu.memory_space<vmem>>, vector<1x10x16x128xf32>
    %26 = vector.shape_cast %25 : vector<1x10x16x128xf32> to vector<10x16x128xf32>
    %27 = arith.index_cast %9 : i32 to index
    %c0_15 = arith.constant 0 : index
    %c1 = arith.constant 1 : index
    %c0_16 = arith.constant 0 : index
    %28 = vector.load %arg8[%27, %c0_15, %c1, %c0_16] : memref<2x12x18x128xf32, #tpu.memory_space<vmem>>, vector<1x10x16x128xf32>
    %29 = vector.shape_cast %28 : vector<1x10x16x128xf32> to vector<10x16x128xf32>
    %30 = arith.index_cast %9 : i32 to index
    %c0_17 = arith.constant 0 : index
    %c2 = arith.constant 2 : index
    %c0_18 = arith.constant 0 : index
    %31 = vector.load %arg8[%30, %c0_17, %c2, %c0_18] : memref<2x12x18x128xf32, #tpu.memory_space<vmem>>, vector<1x10x16x128xf32>
    %32 = vector.shape_cast %31 : vector<1x10x16x128xf32> to vector<10x16x128xf32>
    %33 = arith.index_cast %9 : i32 to index
    %c1_19 = arith.constant 1 : index
    %c0_20 = arith.constant 0 : index
    %c0_21 = arith.constant 0 : index
    %34 = vector.load %arg8[%33, %c1_19, %c0_20, %c0_21] : memref<2x12x18x128xf32, #tpu.memory_space<vmem>>, vector<1x10x16x128xf32>
    %35 = vector.shape_cast %34 : vector<1x10x16x128xf32> to vector<10x16x128xf32>
    %36 = arith.index_cast %9 : i32 to index
    %c1_22 = arith.constant 1 : index
    %c1_23 = arith.constant 1 : index
    %c0_24 = arith.constant 0 : index
    %37 = vector.load %arg8[%36, %c1_22, %c1_23, %c0_24] : memref<2x12x18x128xf32, #tpu.memory_space<vmem>>, vector<1x10x16x128xf32>
    %38 = vector.shape_cast %37 : vector<1x10x16x128xf32> to vector<10x16x128xf32>
    %39 = arith.index_cast %9 : i32 to index
    %c1_25 = arith.constant 1 : index
    %c2_26 = arith.constant 2 : index
    %c0_27 = arith.constant 0 : index
    %40 = vector.load %arg8[%39, %c1_25, %c2_26, %c0_27] : memref<2x12x18x128xf32, #tpu.memory_space<vmem>>, vector<1x10x16x128xf32>
    %41 = vector.shape_cast %40 : vector<1x10x16x128xf32> to vector<10x16x128xf32>
    %42 = tpu.concatenate %26, %29, %32, %35, %38, %41 in 2 : vector<10x16x128xf32>, vector<10x16x128xf32>, vector<10x16x128xf32>, vector<10x16x128xf32>, vector<10x16x128xf32>, vector<10x16x128xf32> -> vector<10x16x768xf32>
    %43 = vector.shape_cast %42 : vector<10x16x768xf32> to vector<160x768xf32>
    %c0_28 = arith.constant 0 : index
    %c0_29 = arith.constant 0 : index
    %c0_30 = arith.constant 0 : index
    %44 = vector.load %arg3[%c0_28, %c0_29, %c0_30] : memref<2x768x256xf32, #tpu.memory_space<vmem>>, vector<1x768x256xf32>
    %45 = vector.shape_cast %44 : vector<1x768x256xf32> to vector<768x256xf32>
    %cst = arith.constant dense<0.000000e+00> : vector<160x256xf32>
    %46 = tpu.matmul %43, %45, %cst {dimension_numbers = #tpu.dot_dimension_numbers<[1], [0], [0], [1], [0, 0, 1, 1], [], []>} : vector<160x768xf32>, vector<768x256xf32>, vector<160x256xf32> -> vector<160x256xf32>
    %c0_31 = arith.constant 0 : index
    %c0_32 = arith.constant 0 : index
    %47 = vector.load %arg4[%c0_31, %c0_32] : memref<1x256xf32, #tpu.memory_space<vmem>>, vector<1x256xf32>
    %48 = vector.broadcast %47 : vector<1x256xf32> to vector<160x256xf32>
    %49 = arith.addf %46, %48 : vector<160x256xf32>
    %50 = vector.shape_cast %49 : vector<160x256xf32> to vector<10x16x256xf32>
    %c0_33 = arith.constant 0 : index
    %c0_34 = arith.constant 0 : index
    %c8 = arith.constant 8 : index
    %c0_35 = arith.constant 0 : index
    %51 = vector.load %arg9[%c0_33, %c0_34, %c8, %c0_35] : memref<2x10x32x256xf32, #tpu.memory_space<vmem>>, vector<1x10x16x256xf32>
    %52 = vector.shape_cast %51 : vector<1x10x16x256xf32> to vector<10x16x256xf32>
    %53 = vector.shape_cast %50 : vector<10x16x256xf32> to vector<1x10x16x256xf32>
    tpu.vector_store %arg9[%c0_33, %c0_34, %c8, %c0_35], %53 {strides = array<i32>} : memref<2x10x32x256xf32, #tpu.memory_space<vmem>>, vector<1x10x16x256xf32>,
    %54 = arith.index_cast %9 : i32 to index
    %c1_36 = arith.constant 1 : index
    %c0_37 = arith.constant 0 : index
    %c0_38 = arith.constant 0 : index
    %55 = vector.load %arg8[%54, %c1_36, %c0_37, %c0_38] : memref<2x12x18x128xf32, #tpu.memory_space<vmem>>, vector<1x10x16x128xf32>
    %56 = vector.shape_cast %55 : vector<1x10x16x128xf32> to vector<10x16x128xf32>
    %57 = arith.index_cast %9 : i32 to index
    %c1_39 = arith.constant 1 : index
    %c1_40 = arith.constant 1 : index
    %c0_41 = arith.constant 0 : index
    %58 = vector.load %arg8[%57, %c1_39, %c1_40, %c0_41] : memref<2x12x18x128xf32, #tpu.memory_space<vmem>>, vector<1x10x16x128xf32>
    %59 = vector.shape_cast %58 : vector<1x10x16x128xf32> to vector<10x16x128xf32>
    %60 = arith.index_cast %9 : i32 to index
    %c1_42 = arith.constant 1 : index
    %c2_43 = arith.constant 2 : index
    %c0_44 = arith.constant 0 : index
    %61 = vector.load %arg8[%60, %c1_42, %c2_43, %c0_44] : memref<2x12x18x128xf32, #tpu.memory_space<vmem>>, vector<1x10x16x128xf32>
    %62 = vector.shape_cast %61 : vector<1x10x16x128xf32> to vector<10x16x128xf32>
    %63 = arith.index_cast %9 : i32 to index
    %c2_45 = arith.constant 2 : index
    %c0_46 = arith.constant 0 : index
    %c0_47 = arith.constant 0 : index
    %64 = vector.load %arg8[%63, %c2_45, %c0_46, %c0_47] : memref<2x12x18x128xf32, #tpu.memory_space<vmem>>, vector<1x10x16x128xf32>
    %65 = vector.shape_cast %64 : vector<1x10x16x128xf32> to vector<10x16x128xf32>
    %66 = arith.index_cast %9 : i32 to index
    %c2_48 = arith.constant 2 : index
    %c1_49 = arith.constant 1 : index
    %c0_50 = arith.constant 0 : index
    %67 = vector.load %arg8[%66, %c2_48, %c1_49, %c0_50] : memref<2x12x18x128xf32, #tpu.memory_space<vmem>>, vector<1x10x16x128xf32>
    %68 = vector.shape_cast %67 : vector<1x10x16x128xf32> to vector<10x16x128xf32>
    %69 = arith.index_cast %9 : i32 to index
    %c2_51 = arith.constant 2 : index
    %c2_52 = arith.constant 2 : index
    %c0_53 = arith.constant 0 : index
    %70 = vector.load %arg8[%69, %c2_51, %c2_52, %c0_53] : memref<2x12x18x128xf32, #tpu.memory_space<vmem>>, vector<1x10x16x128xf32>
    %71 = vector.shape_cast %70 : vector<1x10x16x128xf32> to vector<10x16x128xf32>
    %72 = tpu.concatenate %56, %59, %62, %65, %68, %71 in 2 : vector<10x16x128xf32>, vector<10x16x128xf32>, vector<10x16x128xf32>, vector<10x16x128xf32>, vector<10x16x128xf32>, vector<10x16x128xf32> -> vector<10x16x768xf32>
    %73 = vector.shape_cast %72 : vector<10x16x768xf32> to vector<160x768xf32>
    %c1_54 = arith.constant 1 : index
    %c0_55 = arith.constant 0 : index
    %c0_56 = arith.constant 0 : index
    %74 = vector.load %arg3[%c1_54, %c0_55, %c0_56] : memref<2x768x256xf32, #tpu.memory_space<vmem>>, vector<1x768x256xf32>
    %75 = vector.shape_cast %74 : vector<1x768x256xf32> to vector<768x256xf32>
    %cst_57 = arith.constant dense<0.000000e+00> : vector<160x256xf32>
    %76 = tpu.matmul %73, %75, %cst_57 {dimension_numbers = #tpu.dot_dimension_numbers<[1], [0], [0], [1], [0, 0, 1, 1], [], []>} : vector<160x768xf32>, vector<768x256xf32>, vector<160x256xf32> -> vector<160x256xf32>
    %c0_58 = arith.constant 0 : index
    %c0_59 = arith.constant 0 : index
    %77 = vector.load %arg4[%c0_58, %c0_59] : memref<1x256xf32, #tpu.memory_space<vmem>>, vector<1x256xf32>
    %78 = vector.broadcast %77 : vector<1x256xf32> to vector<160x256xf32>
    %79 = arith.addf %76, %78 : vector<160x256xf32>
    %80 = vector.shape_cast %79 : vector<160x256xf32> to vector<10x16x256xf32>
    %c1_60 = arith.constant 1 : index
    %c0_61 = arith.constant 0 : index
    %c8_62 = arith.constant 8 : index
    %c0_63 = arith.constant 0 : index
    %81 = vector.load %arg9[%c1_60, %c0_61, %c8_62, %c0_63] : memref<2x10x32x256xf32, #tpu.memory_space<vmem>>, vector<1x10x16x256xf32>
    %82 = vector.shape_cast %81 : vector<1x10x16x256xf32> to vector<10x16x256xf32>
    %83 = vector.shape_cast %80 : vector<10x16x256xf32> to vector<1x10x16x256xf32>
    tpu.vector_store %arg9[%c1_60, %c0_61, %c8_62, %c0_63], %83 {strides = array<i32>} : memref<2x10x32x256xf32, #tpu.memory_space<vmem>>, vector<1x10x16x256xf32>,
    %cst_64 = arith.constant 0.000000e+00 : f32
    %84 = vector.broadcast %cst_64 : f32 to vector<10x8x256xf32>
    %c0_65 = arith.constant 0 : index
    %c0_66 = arith.constant 0 : index
    %c0_67 = arith.constant 0 : index
    %c0_68 = arith.constant 0 : index
    %85 = vector.load %arg9[%c0_65, %c0_66, %c0_67, %c0_68] : memref<2x10x32x256xf32, #tpu.memory_space<vmem>>, vector<1x10x8x256xf32>
    %86 = vector.shape_cast %85 : vector<1x10x8x256xf32> to vector<10x8x256xf32>
    %87 = vector.shape_cast %84 : vector<10x8x256xf32> to vector<1x10x8x256xf32>
    tpu.vector_store %arg9[%c0_65, %c0_66, %c0_67, %c0_68], %87 {strides = array<i32>} : memref<2x10x32x256xf32, #tpu.memory_space<vmem>>, vector<1x10x8x256xf32>,
    %cst_69 = arith.constant 0.000000e+00 : f32
    %88 = vector.broadcast %cst_69 : f32 to vector<10x8x256xf32>
    %c0_70 = arith.constant 0 : index
    %c0_71 = arith.constant 0 : index
    %c24 = arith.constant 24 : index
    %c0_72 = arith.constant 0 : index
    %89 = vector.load %arg9[%c0_70, %c0_71, %c24, %c0_72] : memref<2x10x32x256xf32, #tpu.memory_space<vmem>>, vector<1x10x8x256xf32>
    %90 = vector.shape_cast %89 : vector<1x10x8x256xf32> to vector<10x8x256xf32>
    %91 = vector.shape_cast %88 : vector<10x8x256xf32> to vector<1x10x8x256xf32>
    tpu.vector_store %arg9[%c0_70, %c0_71, %c24, %c0_72], %91 {strides = array<i32>} : memref<2x10x32x256xf32, #tpu.memory_space<vmem>>, vector<1x10x8x256xf32>,
    %cst_73 = arith.constant 0.000000e+00 : f32
    %92 = vector.broadcast %cst_73 : f32 to vector<10x8x256xf32>
    %c1_74 = arith.constant 1 : index
    %c0_75 = arith.constant 0 : index
    %c0_76 = arith.constant 0 : index
    %c0_77 = arith.constant 0 : index
    %93 = vector.load %arg9[%c1_74, %c0_75, %c0_76, %c0_77] : memref<2x10x32x256xf32, #tpu.memory_space<vmem>>, vector<1x10x8x256xf32>
    %94 = vector.shape_cast %93 : vector<1x10x8x256xf32> to vector<10x8x256xf32>
    %95 = vector.shape_cast %92 : vector<10x8x256xf32> to vector<1x10x8x256xf32>
    tpu.vector_store %arg9[%c1_74, %c0_75, %c0_76, %c0_77], %95 {strides = array<i32>} : memref<2x10x32x256xf32, #tpu.memory_space<vmem>>, vector<1x10x8x256xf32>,
    %cst_78 = arith.constant 0.000000e+00 : f32
    %96 = vector.broadcast %cst_78 : f32 to vector<10x8x256xf32>
    %c1_79 = arith.constant 1 : index
    %c0_80 = arith.constant 0 : index
    %c24_81 = arith.constant 24 : index
    %c0_82 = arith.constant 0 : index
    %97 = vector.load %arg9[%c1_79, %c0_80, %c24_81, %c0_82] : memref<2x10x32x256xf32, #tpu.memory_space<vmem>>, vector<1x10x8x256xf32>
    %98 = vector.shape_cast %97 : vector<1x10x8x256xf32> to vector<10x8x256xf32>
    %99 = vector.shape_cast %96 : vector<10x8x256xf32> to vector<1x10x8x256xf32>
    tpu.vector_store %arg9[%c1_79, %c0_80, %c24_81, %c0_82], %99 {strides = array<i32>} : memref<2x10x32x256xf32, #tpu.memory_space<vmem>>, vector<1x10x8x256xf32>,
    %c0_i32_83 = arith.constant 0 : i32
    %100 = arith.cmpi eq, %arg1, %c0_i32_83 : i32
    %101 = arith.extui %100 : i1 to i32
    %c0_i32_84 = arith.constant 0 : i32
    %102 = arith.cmpi ne, %101, %c0_i32_84 : i32
    scf.if %102 {
      %cst_194 = arith.constant 0.000000e+00 : f32
      %190 = vector.broadcast %cst_194 : f32 to vector<32x256xf32>
      %c1_195 = arith.constant 1 : index
      %c0_196 = arith.constant 0 : index
      %c0_197 = arith.constant 0 : index
      %c0_198 = arith.constant 0 : index
      %191 = vector.load %arg9[%c1_195, %c0_196, %c0_197, %c0_198] : memref<2x10x32x256xf32, #tpu.memory_space<vmem>>, vector<1x1x32x256xf32>
      %192 = vector.shape_cast %191 : vector<1x1x32x256xf32> to vector<32x256xf32>
      %193 = vector.shape_cast %190 : vector<32x256xf32> to vector<1x1x32x256xf32>
      tpu.vector_store %arg9[%c1_195, %c0_196, %c0_197, %c0_198], %193 {strides = array<i32>} : memref<2x10x32x256xf32, #tpu.memory_space<vmem>>, vector<1x1x32x256xf32>,
    } else {
    }
    %c1_i32_85 = arith.constant 1 : i32
    %103 = arith.cmpi eq, %arg1, %c1_i32_85 : i32
    %104 = arith.extui %103 : i1 to i32
    %c0_i32_86 = arith.constant 0 : i32
    %105 = arith.cmpi ne, %104, %c0_i32_86 : i32
    scf.if %105 {
      %cst_194 = arith.constant 0.000000e+00 : f32
      %190 = vector.broadcast %cst_194 : f32 to vector<32x256xf32>
      %c0_195 = arith.constant 0 : index
      %c9_196 = arith.constant 9 : index
      %c0_197 = arith.constant 0 : index
      %c0_198 = arith.constant 0 : index
      %191 = vector.load %arg9[%c0_195, %c9_196, %c0_197, %c0_198] : memref<2x10x32x256xf32, #tpu.memory_space<vmem>>, vector<1x1x32x256xf32>
      %192 = vector.shape_cast %191 : vector<1x1x32x256xf32> to vector<32x256xf32>
      %193 = vector.shape_cast %190 : vector<32x256xf32> to vector<1x1x32x256xf32>
      tpu.vector_store %arg9[%c0_195, %c9_196, %c0_197, %c0_198], %193 {strides = array<i32>} : memref<2x10x32x256xf32, #tpu.memory_space<vmem>>, vector<1x1x32x256xf32>,
    } else {
    }
    %c0_87 = arith.constant 0 : index
    %c0_88 = arith.constant 0 : index
    %106 = vector.load %arg6[%c0_87, %c0_88] : memref<1x256xf32, #tpu.memory_space<vmem>>, vector<1x256xf32>
    %c1_89 = arith.constant 1 : index
    %c0_90 = arith.constant 0 : index
    %c7 = arith.constant 7 : index
    %c128 = arith.constant 128 : index
    %107 = vector.load %arg9[%c1_89, %c0_90, %c7, %c128] : memref<2x10x32x256xf32, #tpu.memory_space<vmem>>, vector<1x8x16x128xf32>
    %108 = vector.shape_cast %107 : vector<1x8x16x128xf32> to vector<8x16x128xf32>
    %c1_91 = arith.constant 1 : index
    %c0_92 = arith.constant 0 : index
    %c8_93 = arith.constant 8 : index
    %c0_94 = arith.constant 0 : index
    %109 = vector.load %arg9[%c1_91, %c0_92, %c8_93, %c0_94] : memref<2x10x32x256xf32, #tpu.memory_space<vmem>>, vector<1x8x16x256xf32>
    %110 = vector.shape_cast %109 : vector<1x8x16x256xf32> to vector<8x16x256xf32>
    %c1_95 = arith.constant 1 : index
    %c0_96 = arith.constant 0 : index
    %c9 = arith.constant 9 : index
    %c0_97 = arith.constant 0 : index
    %111 = vector.load %arg9[%c1_95, %c0_96, %c9, %c0_97] : memref<2x10x32x256xf32, #tpu.memory_space<vmem>>, vector<1x8x16x128xf32>
    %112 = vector.shape_cast %111 : vector<1x8x16x128xf32> to vector<8x16x128xf32>
    %113 = tpu.concatenate %108, %110, %112 in 2 : vector<8x16x128xf32>, vector<8x16x256xf32>, vector<8x16x128xf32> -> vector<8x16x512xf32>
    %114 = vector.shape_cast %113 : vector<8x16x512xf32> to vector<128x512xf32>
    %c0_98 = arith.constant 0 : index
    %c0_99 = arith.constant 0 : index
    %c0_100 = arith.constant 0 : index
    %115 = vector.load %arg5[%c0_98, %c0_99, %c0_100] : memref<3x512x256xf32, #tpu.memory_space<vmem>>, vector<1x512x256xf32>
    %116 = vector.shape_cast %115 : vector<1x512x256xf32> to vector<512x256xf32>
    %cst_101 = arith.constant dense<0.000000e+00> : vector<128x256xf32>
    %117 = tpu.matmul %114, %116, %cst_101 {dimension_numbers = #tpu.dot_dimension_numbers<[1], [0], [0], [1], [0, 0, 1, 1], [], []>} : vector<128x512xf32>, vector<512x256xf32>, vector<128x256xf32> -> vector<128x256xf32>
    %118 = vector.broadcast %106 : vector<1x256xf32> to vector<128x256xf32>
    %119 = arith.addf %118, %117 : vector<128x256xf32>
    %c0_102 = arith.constant 0 : index
    %c1_103 = arith.constant 1 : index
    %c7_104 = arith.constant 7 : index
    %c128_105 = arith.constant 128 : index
    %120 = vector.load %arg9[%c0_102, %c1_103, %c7_104, %c128_105] : memref<2x10x32x256xf32, #tpu.memory_space<vmem>>, vector<1x8x16x128xf32>
    %121 = vector.shape_cast %120 : vector<1x8x16x128xf32> to vector<8x16x128xf32>
    %c0_106 = arith.constant 0 : index
    %c1_107 = arith.constant 1 : index
    %c8_108 = arith.constant 8 : index
    %c0_109 = arith.constant 0 : index
    %122 = vector.load %arg9[%c0_106, %c1_107, %c8_108, %c0_109] : memref<2x10x32x256xf32, #tpu.memory_space<vmem>>, vector<1x8x16x256xf32>
    %123 = vector.shape_cast %122 : vector<1x8x16x256xf32> to vector<8x16x256xf32>
    %c0_110 = arith.constant 0 : index
    %c1_111 = arith.constant 1 : index
    %c9_112 = arith.constant 9 : index
    %c0_113 = arith.constant 0 : index
    %124 = vector.load %arg9[%c0_110, %c1_111, %c9_112, %c0_113] : memref<2x10x32x256xf32, #tpu.memory_space<vmem>>, vector<1x8x16x128xf32>
    %125 = vector.shape_cast %124 : vector<1x8x16x128xf32> to vector<8x16x128xf32>
    %126 = tpu.concatenate %121, %123, %125 in 2 : vector<8x16x128xf32>, vector<8x16x256xf32>, vector<8x16x128xf32> -> vector<8x16x512xf32>
    %127 = vector.shape_cast %126 : vector<8x16x512xf32> to vector<128x512xf32>
    %c1_114 = arith.constant 1 : index
    %c0_115 = arith.constant 0 : index
    %c0_116 = arith.constant 0 : index
    %128 = vector.load %arg5[%c1_114, %c0_115, %c0_116] : memref<3x512x256xf32, #tpu.memory_space<vmem>>, vector<1x512x256xf32>
    %129 = vector.shape_cast %128 : vector<1x512x256xf32> to vector<512x256xf32>
    %cst_117 = arith.constant dense<0.000000e+00> : vector<128x256xf32>
    %130 = tpu.matmul %127, %129, %cst_117 {dimension_numbers = #tpu.dot_dimension_numbers<[1], [0], [0], [1], [0, 0, 1, 1], [], []>} : vector<128x512xf32>, vector<512x256xf32>, vector<128x256xf32> -> vector<128x256xf32>
    %131 = arith.addf %119, %130 : vector<128x256xf32>
    %c1_118 = arith.constant 1 : index
    %c1_119 = arith.constant 1 : index
    %c7_120 = arith.constant 7 : index
    %c128_121 = arith.constant 128 : index
    %132 = vector.load %arg9[%c1_118, %c1_119, %c7_120, %c128_121] : memref<2x10x32x256xf32, #tpu.memory_space<vmem>>, vector<1x8x16x128xf32>
    %133 = vector.shape_cast %132 : vector<1x8x16x128xf32> to vector<8x16x128xf32>
    %c1_122 = arith.constant 1 : index
    %c1_123 = arith.constant 1 : index
    %c8_124 = arith.constant 8 : index
    %c0_125 = arith.constant 0 : index
    %134 = vector.load %arg9[%c1_122, %c1_123, %c8_124, %c0_125] : memref<2x10x32x256xf32, #tpu.memory_space<vmem>>, vector<1x8x16x256xf32>
    %135 = vector.shape_cast %134 : vector<1x8x16x256xf32> to vector<8x16x256xf32>
    %c1_126 = arith.constant 1 : index
    %c1_127 = arith.constant 1 : index
    %c9_128 = arith.constant 9 : index
    %c0_129 = arith.constant 0 : index
    %136 = vector.load %arg9[%c1_126, %c1_127, %c9_128, %c0_129] : memref<2x10x32x256xf32, #tpu.memory_space<vmem>>, vector<1x8x16x128xf32>
    %137 = vector.shape_cast %136 : vector<1x8x16x128xf32> to vector<8x16x128xf32>
    %138 = tpu.concatenate %133, %135, %137 in 2 : vector<8x16x128xf32>, vector<8x16x256xf32>, vector<8x16x128xf32> -> vector<8x16x512xf32>
    %139 = vector.shape_cast %138 : vector<8x16x512xf32> to vector<128x512xf32>
    %c2_130 = arith.constant 2 : index
    %c0_131 = arith.constant 0 : index
    %c0_132 = arith.constant 0 : index
    %140 = vector.load %arg5[%c2_130, %c0_131, %c0_132] : memref<3x512x256xf32, #tpu.memory_space<vmem>>, vector<1x512x256xf32>
    %141 = vector.shape_cast %140 : vector<1x512x256xf32> to vector<512x256xf32>
    %cst_133 = arith.constant dense<0.000000e+00> : vector<128x256xf32>
    %142 = tpu.matmul %139, %141, %cst_133 {dimension_numbers = #tpu.dot_dimension_numbers<[1], [0], [0], [1], [0, 0, 1, 1], [], []>} : vector<128x512xf32>, vector<512x256xf32>, vector<128x256xf32> -> vector<128x256xf32>
    %143 = arith.addf %131, %142 : vector<128x256xf32>
    %144 = vector.shape_cast %143 : vector<128x256xf32> to vector<8x16x256xf32>
    %c0_134 = arith.constant 0 : index
    %c0_135 = arith.constant 0 : index
    %c0_136 = arith.constant 0 : index
    %c0_137 = arith.constant 0 : index
    %c0_138 = arith.constant 0 : index
    %145 = vector.load %arg7[%c0_134, %c0_135, %c0_136, %c0_137, %c0_138] : memref<1x8x2x16x256xf32, #tpu.memory_space<vmem>>, vector<1x8x1x16x256xf32>
    %146 = vector.shape_cast %145 : vector<1x8x1x16x256xf32> to vector<8x16x256xf32>
    %147 = vector.shape_cast %144 : vector<8x16x256xf32> to vector<1x8x1x16x256xf32>
    tpu.vector_store %arg7[%c0_134, %c0_135, %c0_136, %c0_137, %c0_138], %147 {strides = array<i32>} : memref<1x8x2x16x256xf32, #tpu.memory_space<vmem>>, vector<1x8x1x16x256xf32>,
    %c0_139 = arith.constant 0 : index
    %c0_140 = arith.constant 0 : index
    %148 = vector.load %arg6[%c0_139, %c0_140] : memref<1x256xf32, #tpu.memory_space<vmem>>, vector<1x256xf32>
    %c0_141 = arith.constant 0 : index
    %c1_142 = arith.constant 1 : index
    %c7_143 = arith.constant 7 : index
    %c128_144 = arith.constant 128 : index
    %149 = vector.load %arg9[%c0_141, %c1_142, %c7_143, %c128_144] : memref<2x10x32x256xf32, #tpu.memory_space<vmem>>, vector<1x8x16x128xf32>
    %150 = vector.shape_cast %149 : vector<1x8x16x128xf32> to vector<8x16x128xf32>
    %c0_145 = arith.constant 0 : index
    %c1_146 = arith.constant 1 : index
    %c8_147 = arith.constant 8 : index
    %c0_148 = arith.constant 0 : index
    %151 = vector.load %arg9[%c0_145, %c1_146, %c8_147, %c0_148] : memref<2x10x32x256xf32, #tpu.memory_space<vmem>>, vector<1x8x16x256xf32>
    %152 = vector.shape_cast %151 : vector<1x8x16x256xf32> to vector<8x16x256xf32>
    %c0_149 = arith.constant 0 : index
    %c1_150 = arith.constant 1 : index
    %c9_151 = arith.constant 9 : index
    %c0_152 = arith.constant 0 : index
    %153 = vector.load %arg9[%c0_149, %c1_150, %c9_151, %c0_152] : memref<2x10x32x256xf32, #tpu.memory_space<vmem>>, vector<1x8x16x128xf32>
    %154 = vector.shape_cast %153 : vector<1x8x16x128xf32> to vector<8x16x128xf32>
    %155 = tpu.concatenate %150, %152, %154 in 2 : vector<8x16x128xf32>, vector<8x16x256xf32>, vector<8x16x128xf32> -> vector<8x16x512xf32>
    %156 = vector.shape_cast %155 : vector<8x16x512xf32> to vector<128x512xf32>
    %c0_153 = arith.constant 0 : index
    %c0_154 = arith.constant 0 : index
    %c0_155 = arith.constant 0 : index
    %157 = vector.load %arg5[%c0_153, %c0_154, %c0_155] : memref<3x512x256xf32, #tpu.memory_space<vmem>>, vector<1x512x256xf32>
    %158 = vector.shape_cast %157 : vector<1x512x256xf32> to vector<512x256xf32>
    %cst_156 = arith.constant dense<0.000000e+00> : vector<128x256xf32>
    %159 = tpu.matmul %156, %158, %cst_156 {dimension_numbers = #tpu.dot_dimension_numbers<[1], [0], [0], [1], [0, 0, 1, 1], [], []>} : vector<128x512xf32>, vector<512x256xf32>, vector<128x256xf32> -> vector<128x256xf32>
    %160 = vector.broadcast %148 : vector<1x256xf32> to vector<128x256xf32>
    %161 = arith.addf %160, %159 : vector<128x256xf32>
    %c1_157 = arith.constant 1 : index
    %c1_158 = arith.constant 1 : index
    %c7_159 = arith.constant 7 : index
    %c128_160 = arith.constant 128 : index
    %162 = vector.load %arg9[%c1_157, %c1_158, %c7_159, %c128_160] : memref<2x10x32x256xf32, #tpu.memory_space<vmem>>, vector<1x8x16x128xf32>
    %163 = vector.shape_cast %162 : vector<1x8x16x128xf32> to vector<8x16x128xf32>
    %c1_161 = arith.constant 1 : index
    %c1_162 = arith.constant 1 : index
    %c8_163 = arith.constant 8 : index
    %c0_164 = arith.constant 0 : index
    %164 = vector.load %arg9[%c1_161, %c1_162, %c8_163, %c0_164] : memref<2x10x32x256xf32, #tpu.memory_space<vmem>>, vector<1x8x16x256xf32>
    %165 = vector.shape_cast %164 : vector<1x8x16x256xf32> to vector<8x16x256xf32>
    %c1_165 = arith.constant 1 : index
    %c1_166 = arith.constant 1 : index
    %c9_167 = arith.constant 9 : index
    %c0_168 = arith.constant 0 : index
    %166 = vector.load %arg9[%c1_165, %c1_166, %c9_167, %c0_168] : memref<2x10x32x256xf32, #tpu.memory_space<vmem>>, vector<1x8x16x128xf32>
    %167 = vector.shape_cast %166 : vector<1x8x16x128xf32> to vector<8x16x128xf32>
    %168 = tpu.concatenate %163, %165, %167 in 2 : vector<8x16x128xf32>, vector<8x16x256xf32>, vector<8x16x128xf32> -> vector<8x16x512xf32>
    %169 = vector.shape_cast %168 : vector<8x16x512xf32> to vector<128x512xf32>
    %c1_169 = arith.constant 1 : index
    %c0_170 = arith.constant 0 : index
    %c0_171 = arith.constant 0 : index
    %170 = vector.load %arg5[%c1_169, %c0_170, %c0_171] : memref<3x512x256xf32, #tpu.memory_space<vmem>>, vector<1x512x256xf32>
    %171 = vector.shape_cast %170 : vector<1x512x256xf32> to vector<512x256xf32>
    %cst_172 = arith.constant dense<0.000000e+00> : vector<128x256xf32>
    %172 = tpu.matmul %169, %171, %cst_172 {dimension_numbers = #tpu.dot_dimension_numbers<[1], [0], [0], [1], [0, 0, 1, 1], [], []>} : vector<128x512xf32>, vector<512x256xf32>, vector<128x256xf32> -> vector<128x256xf32>
    %173 = arith.addf %161, %172 : vector<128x256xf32>
    %c0_173 = arith.constant 0 : index
    %c2_174 = arith.constant 2 : index
    %c7_175 = arith.constant 7 : index
    %c128_176 = arith.constant 128 : index
    %174 = vector.load %arg9[%c0_173, %c2_174, %c7_175, %c128_176] : memref<2x10x32x256xf32, #tpu.memory_space<vmem>>, vector<1x8x16x128xf32>
    %175 = vector.shape_cast %174 : vector<1x8x16x128xf32> to vector<8x16x128xf32>
    %c0_177 = arith.constant 0 : index
    %c2_178 = arith.constant 2 : index
    %c8_179 = arith.constant 8 : index
    %c0_180 = arith.constant 0 : index
    %176 = vector.load %arg9[%c0_177, %c2_178, %c8_179, %c0_180] : memref<2x10x32x256xf32, #tpu.memory_space<vmem>>, vector<1x8x16x256xf32>
    %177 = vector.shape_cast %176 : vector<1x8x16x256xf32> to vector<8x16x256xf32>
    %c0_181 = arith.constant 0 : index
    %c2_182 = arith.constant 2 : index
    %c9_183 = arith.constant 9 : index
    %c0_184 = arith.constant 0 : index
    %178 = vector.load %arg9[%c0_181, %c2_182, %c9_183, %c0_184] : memref<2x10x32x256xf32, #tpu.memory_space<vmem>>, vector<1x8x16x128xf32>
    %179 = vector.shape_cast %178 : vector<1x8x16x128xf32> to vector<8x16x128xf32>
    %180 = tpu.concatenate %175, %177, %179 in 2 : vector<8x16x128xf32>, vector<8x16x256xf32>, vector<8x16x128xf32> -> vector<8x16x512xf32>
    %181 = vector.shape_cast %180 : vector<8x16x512xf32> to vector<128x512xf32>
    %c2_185 = arith.constant 2 : index
    %c0_186 = arith.constant 0 : index
    %c0_187 = arith.constant 0 : index
    %182 = vector.load %arg5[%c2_185, %c0_186, %c0_187] : memref<3x512x256xf32, #tpu.memory_space<vmem>>, vector<1x512x256xf32>
    %183 = vector.shape_cast %182 : vector<1x512x256xf32> to vector<512x256xf32>
    %cst_188 = arith.constant dense<0.000000e+00> : vector<128x256xf32>
    %184 = tpu.matmul %181, %183, %cst_188 {dimension_numbers = #tpu.dot_dimension_numbers<[1], [0], [0], [1], [0, 0, 1, 1], [], []>} : vector<128x512xf32>, vector<512x256xf32>, vector<128x256xf32> -> vector<128x256xf32>
    %185 = arith.addf %173, %184 : vector<128x256xf32>
    %186 = vector.shape_cast %185 : vector<128x256xf32> to vector<8x16x256xf32>
    %c0_189 = arith.constant 0 : index
    %c0_190 = arith.constant 0 : index
    %c1_191 = arith.constant 1 : index
    %c0_192 = arith.constant 0 : index
    %c0_193 = arith.constant 0 : index
    %187 = vector.load %arg7[%c0_189, %c0_190, %c1_191, %c0_192, %c0_193] : memref<1x8x2x16x256xf32, #tpu.memory_space<vmem>>, vector<1x8x1x16x256xf32>
    %188 = vector.shape_cast %187 : vector<1x8x1x16x256xf32> to vector<8x16x256xf32>
    %189 = vector.shape_cast %186 : vector<8x16x256xf32> to vector<1x8x1x16x256xf32>
    tpu.vector_store %arg7[%c0_189, %c0_190, %c1_191, %c0_192, %c0_193], %189 {strides = array<i32>} : memref<1x8x2x16x256xf32, #tpu.memory_space<vmem>>, vector<1x8x1x16x256xf32>,
    return
  }
  func.func @transform_1(%arg0: i32, %arg1: i32) -> (i32, i32, i32) {
    %c0_i32 = arith.constant 0 : i32
    %c0_i32_0 = arith.constant 0 : i32
    %c0_i32_1 = arith.constant 0 : i32
    %c0_i32_2 = arith.constant 0 : i32
    return %c0_i32, %c0_i32_0, %c0_i32_1 : i32, i32, i32
  }
  func.func @transform_2(%arg0: i32, %arg1: i32) -> (i32, i32) {
    %c0_i32 = arith.constant 0 : i32
    %c0_i32_0 = arith.constant 0 : i32
    %c0_i32_1 = arith.constant 0 : i32
    return %c0_i32, %c0_i32_0 : i32, i32
  }
  func.func @transform_3(%arg0: i32, %arg1: i32) -> (i32, i32, i32) {
    %c0_i32 = arith.constant 0 : i32
    %c0_i32_0 = arith.constant 0 : i32
    %c0_i32_1 = arith.constant 0 : i32
    %c0_i32_2 = arith.constant 0 : i32
    return %c0_i32, %c0_i32_0, %c0_i32_1 : i32, i32, i32
  }
  func.func @transform_4(%arg0: i32, %arg1: i32) -> (i32, i32) {
    %c0_i32 = arith.constant 0 : i32
    %c0_i32_0 = arith.constant 0 : i32
    %c0_i32_1 = arith.constant 0 : i32
    return %c0_i32, %c0_i32_0 : i32, i32
  }
  func.func @transform_5(%arg0: i32, %arg1: i32) -> (i32, i32, i32, i32, i32) {
    %c0_i32 = arith.constant 0 : i32
    %c0_i32_0 = arith.constant 0 : i32
    %c0_i32_1 = arith.constant 0 : i32
    %c0_i32_2 = arith.constant 0 : i32
    return %arg0, %arg1, %c0_i32, %c0_i32_0, %c0_i32_1 : i32, i32, i32, i32, i32
  }
}

</mosaic_0001>

<bundles_post_ra>
// kernel: tpu_custom_call.1
= control target key start
LH: loop header
LB: loop body
LE: loop exit
PB: predicated region body
PF: predicated region fallthrough
CT: control target
= control target key end

     0   :  { %s14635_s0 = inlined_call_operand.vmem [shape: f32[2,20,18,128], index: 0, kind: input, shape index: {}]   ;;  %s14636_s1 = inlined_call_operand.hbm [shape: f32[2,768,256], index: 1, kind: input, shape index: {}]   ;;  %s14637_s2 = inlined_call_operand.hbm [shape: f32[1,256], index: 2, kind: input, shape index: {}]   ;;  %s14638_s3 = inlined_call_operand.hbm [shape: f32[3,512,256], index: 3, kind: input, shape index: {}]   ;;  %s14639_s4 = inlined_call_operand.hbm [shape: f32[1,256], index: 4, kind: input, shape index: {}]   ;;  %s14640_s5 = inlined_call_operand.hbm [shape: f32[2,16,2,16,256], index: 5, kind: output, shape index: {}]  }
   0x1   :  { %14717 = sst [smem:[#allocation72_spill]] %s14637_s2 }
   0x2   :  { %10 = vsyncpa [#allocation6], 0 }
   0x3   :  { %11 = vsyncpa [#allocation9], 0 }
   0x4   :  { %12 = vsyncpa [#allocation12], 0 }
   0x5   :  { %13 = vsyncpa [#allocation7], 0 }
   0x6   :  { %15 = vsyncpa [#allocation7 + $0x1], 0  ;;  %s10868_s18 = smov 0   ;;  %s10870_s19 = smov 0  }
   0x7   :  { %s10872_s20 = smov 0   ;;  %s10874_s21 = smov 0  }
   0x8   :  { %s10876_s22 = smov 0   ;;  %s10878_s23 = smov 0  }
   0x9   :  { %s10880_s24 = smov 0   ;;  %s10882_s25 = smov 0  }
   0xa LB: > { %14718 = sst [smem:[#allocation21_spill]] %s10804_s20  ;;  %s8334_s26 = sadd.s32 4294967295, %s10824_s25   ;;  %s10824_s25 = sphi %s10882_s25, %s21_s25   ;;  %s10820_s24 = sphi %s10880_s24, %s14948_s24   ;;  %s10816_s23 = sphi %s10878_s23, %s14947_s23   ;;  %s10812_s22 = sphi %s10876_s22, %s14946_s22   ;;  %s10808_s21 = sphi %s10874_s21, %s14952_s21   ;;  %s10804_s20 = sphi %s10872_s20, %s14951_s20   ;;  %s10800_s19 = sphi %s10870_s19, %s14950_s19   ;;  %s10796_s18 = sphi %s10868_s18, %s14949_s18  }
   0xb   : > { %14719 = sst [smem:[#allocation22_spill]] %s10816_s23  ;;  %s8335_s27 = sadd.s32 4294967294, %s10824_s25  }
   0xc   : > { %14720 = sst [smem:[#allocation23_spill]] %s10820_s24  ;;  %s30_s28 = sadd.s32 1, %s10816_s23 }
   0xd   : > { %s33_s29 = sadd.s32 1, %s10820_s24  ;;  %p31_p0 = scmp.ge.s32.totalorder %s30_s28, 2 }
   0xe   : > { %s126_s30 = sadd.s32 1, %s10804_s20  ;;  %p136_p1 = scmp.ne.s32.totalorder %s10804_s20, %s10800_s19 }
   0xf   : > { %p137_p2 = scmp.eq.s32.totalorder %s8334_s26, 3  ;;  %s14954_s28 = smov (%p31_p0, %s30_s28), 0 }
  0x10   : > { %14721 = sst [smem:[#allocation24_spill]] %s14954_s28  ;;  %s14956_s29 = smov (!%p31_p0, %s33_s29), %s10820_s24 }
  0x11   : > { %s122_s6 = ssub.s32 %s10816_s23, %s14954_s28  ;;  %p10920_p3 = por %p137_p2, %p136_p1 }
  0x12   : > { %p35_p4 = scmp.ge.s32.totalorder %s14956_s29, 2  ;;  %p142_p5 = scmp.ne.s32.totalorder %s10800_s19, %s10796_s18 }
  0x13   : > { %s14722_s7 = scalar_select %p10920_p3, 1, 0 }
  0x14   : > { %p143_p6 = scmp.eq.s32.totalorder %s8335_s27, 3  ;;  %p8336_p7 = scmp.ge.s32.totalorder %s10824_s25, 1 }
  0x15   : > { %s14958_s29 = smov (%p35_p4, %s14956_s29), 0  ;;  %p150_p9 = scmp.lt.s32.totalorder %s10824_s25, 5 }
  0x16   : > { %14723 = sst [smem:[#allocation25_spill]] %s14958_s29  ;;  %p10929_p8 = por %p143_p6, %p142_p5 }
  0x17   : > { %s121_s9 = ssub.s32 %s10820_s24, %s14958_s29  ;;  %p10936_p10 = pnand %p8336_p7, %p150_p9 }
  0x18   : > { %s14724_s8 = scalar_select %p10929_p8, 1, 0 }
  0x19   : > { %s123_s10 = sor.u32 %s122_s6, %s121_s9  ;;  %p10940_p12 = scmp.eq.s32.totalorder %s8334_s26, 0 }
  0x1a   : > { %14725 = sst [smem:[#allocation26_spill]] %s14724_s8  ;;  %p124_p11 = scmp.eq.s32.totalorder %s123_s10, 0 }
  0x1b   : > { %s14726_s11 = scalar_select %p10936_p10, 1, 0 }
  0x1c   : > { %s14727_s12 = scalar_select %p10940_p12, 1, 0 }
  0x1d   : > { %p10443_p13 = pneg %p10936_p10  ;;  %s10826_s15 = smov [#allocation8]  }
  0x1e   : > { %s10947_s13 = scalar_select %p124_p11, %s10804_s20, %s126_s30  }
  0x1f   : > { %p10951_p0 = pnand %p10940_p12, %p10443_p13  ;;  %s176_s16 = sshll.u32 %s10826_s15, 4  ;;  %s177_s16 = int_to_ptr.vmem [resolvable:$true] %s176_s16 }
  0x20   : > { %14728 = sst [smem:[#allocation27_spill]] %s10947_s13  ;;  %s14730_s2 = sld [smem:[#allocation72_spill]] }
  0x21   : > { %p10963_p2 = pneg %p10951_p0 }
  0x26   : > { %s10604_s26 = scalar_lea.hbm %s14730_s2, 32 }
  0x27   : > { %p10605_p1 = scmp.ne.s32.totalorder %s14730_s2, %s10604_s26  ;;  %p10611_p6 = scmp.lt.u32.totalorder %s10604_s26, %s14730_s2 }
  0x29   : > { %p10607_p4 = pnand %p10963_p2, %p10605_p1 }
  0x2b   : > { %p10608_p5 = pneg %p10607_p4 }
  0x2d   : > { %p10613_p7 = pnand %p10611_p6, %p10608_p5 }
  0x2f   : > { %10616 = shalt.err (!%p10613_p7)
}
  0x30   : > { %s10617_s17 = scalar_lea.vmem %s177_s16, 32  ;;  %p10625_p8 = scmp.lt.s32.totalorder %s177_s16, %s177_s16 }
  0x31   : > { %p10618_p9 = scmp.ne.s32.totalorder %s177_s16, %s10617_s17  ;;  %p10626_p3 = scmp.lt.s32.totalorder %s10617_s17, %s10617_s17 }
  0x33   : > { %p10620_p11 = pnand %p10618_p9, %p10963_p2  ;;  %p10627_p12 = por %p10626_p3, %p10625_p8 }
  0x35   : > { %p10621_p13 = pneg %p10620_p11 }
  0x37   : > { %p10628_p10 = pnand %p10627_p12, %p10621_p13 }
  0x39   : > { %10631 = shalt.err (!%p10628_p10)
}
  0x3a   : > { %10449 = dma.hbm_to_vmem [thread:$0]  (!%p10951_p0), %s14730_s2, 32, %s177_s16, [#allocation9]  }
  0x3b   : > { %s10827_s26 = smov [#allocation5]   ;;  %s10632_s29 = scalar_lea.hbm %s14636_s1, 49152 }
  0x3c   : > { %s162_s9 = sshll.u32 %s10827_s26, 4  ;;  %p10633_p3 = scmp.ne.s32.totalorder %s14636_s1, %s10632_s29  ;;  %s163_s9 = int_to_ptr.vmem [resolvable:$true] %s162_s9 }
  0x3d   : > { %p10639_p12 = scmp.lt.u32.totalorder %s10632_s29, %s14636_s1 }
  0x3e   : > { %p10635_p8 = pnand %p10633_p3, %p10963_p2 }
  0x40   : > { %p10636_p10 = pneg %p10635_p8 }
  0x42   : > { %p10641_p1 = pnand %p10639_p12, %p10636_p10 }
  0x44   : > { %10644 = shalt.err (!%p10641_p1)
}
  0x45   : > { %s10645_s16 = scalar_lea.vmem %s163_s9, 49152  ;;  %p10653_p7 = scmp.lt.s32.totalorder %s163_s9, %s163_s9 }
  0x46   : > { %p10646_p4 = scmp.ne.s32.totalorder %s163_s9, %s10645_s16  ;;  %p10654_p9 = scmp.lt.s32.totalorder %s10645_s16, %s10645_s16 }
  0x48   : > { %p10648_p5 = pnand %p10646_p4, %p10963_p2  ;;  %p10655_p11 = por %p10654_p9, %p10653_p7 }
  0x4a   : > { %p10649_p6 = pneg %p10648_p5 }
  0x4c   : > { %p10656_p13 = pnand %p10655_p11, %p10649_p6 }
  0x4e   : > { %10659 = shalt.err (!%p10656_p13)
}
  0x4f   : > { %s10828_s24 = smov 256   ;;  %s10829_s28 = smov 16  }
  0x50   : > { %10446 = dma.hbm_to_vmem [thread:$0]  (!%p10951_p0), %s14636_s1, 49152, %s163_s9, [#allocation6], %s10828_s24, %s10828_s24, %s10829_s28  }
  0x51   : > { %s10830_s27 = smov [#allocation10]   ;;  %s10831_s26 = smov [#allocation11]  }
  0x52   : > { %s186_s6 = sshll.u32 %s10830_s27, 4  ;;  %s200_s10 = sshll.u32 %s10831_s26, 4  ;;  %s187_s6 = int_to_ptr.vmem [resolvable:$true] %s186_s6  ;;  %s201_s10 = int_to_ptr.vmem [resolvable:$true] %s200_s10 }
  0x53   : > { %s10660_s16 = scalar_lea.hbm %s14638_s3, 49152 }
  0x54   : > { %p10661_p3 = scmp.ne.s32.totalorder %s14638_s3, %s10660_s16  ;;  %p10667_p12 = scmp.lt.u32.totalorder %s10660_s16, %s14638_s3 }
  0x56   : > { %p10663_p8 = pnand %p10661_p3, %p10963_p2 }
  0x58   : > { %p10664_p10 = pneg %p10663_p8 }
  0x5a   : > { %p10669_p1 = pnand %p10667_p12, %p10664_p10 }
  0x5c   : > { %10672 = shalt.err (!%p10669_p1)
}
  0x5d   : > { %s10673_s9 = scalar_lea.vmem %s187_s6, 49152  ;;  %p10681_p7 = scmp.lt.s32.totalorder %s187_s6, %s187_s6 }
  0x5e   : > { %p10674_p4 = scmp.ne.s32.totalorder %s187_s6, %s10673_s9  ;;  %p10682_p9 = scmp.lt.s32.totalorder %s10673_s9, %s10673_s9 }
  0x60   : > { %p10676_p5 = pnand %p10674_p4, %p10963_p2  ;;  %p10683_p11 = por %p10682_p9, %p10681_p7 }
  0x62   : > { %p10677_p6 = pneg %p10676_p5 }
  0x64   : > { %p10684_p13 = pnand %p10683_p11, %p10677_p6 }
  0x66   : > { %10687 = shalt.err (!%p10684_p13)
}
  0x67   : > { %10452 = dma.hbm_to_vmem [thread:$0]  (!%p10951_p0), %s14638_s3, 49152, %s187_s6, [#allocation9], %s10828_s24, %s10828_s24, %s10829_s28  }
  0x68   : > { %s10688_s23 = scalar_lea.hbm %s14639_s4, 32 }
  0x69   : > { %p10689_p3 = scmp.ne.s32.totalorder %s14639_s4, %s10688_s23  ;;  %p10695_p12 = scmp.lt.u32.totalorder %s10688_s23, %s14639_s4 }
  0x6b   : > { %p10691_p8 = pnand %p10689_p3, %p10963_p2 }
  0x6d   : > { %p10692_p10 = pneg %p10691_p8 }
  0x6f   : > { %p10697_p1 = pnand %p10695_p12, %p10692_p10 }
  0x71   : > { %10700 = shalt.err (!%p10697_p1)
}
  0x72   : > { %s10701_s17 = scalar_lea.vmem %s201_s10, 32  ;;  %p10709_p7 = scmp.lt.s32.totalorder %s201_s10, %s201_s10 }
  0x73   : > { %p10702_p4 = scmp.ne.s32.totalorder %s201_s10, %s10701_s17  ;;  %p10710_p9 = scmp.lt.s32.totalorder %s10701_s17, %s10701_s17 }
  0x75   : > { %p10704_p5 = pnand %p10702_p4, %p10963_p2  ;;  %p10711_p11 = por %p10710_p9, %p10709_p7 }
  0x77   : > { %p10705_p6 = pneg %p10704_p5 }
  0x79   : > { %p10712_p13 = pnand %p10711_p11, %p10705_p6 }
  0x7b   : > { %10715 = shalt.err (!%p10712_p13)
}
  0x7c   : > { %10455 = dma.hbm_to_vmem [thread:$0]  (!%p10951_p0), %s14639_s4, 32, %s201_s10, [#allocation12]  }
  0x7d   : > { %p14732_p3 = scmp.ne.s32.totalorder %s14726_s11, 0 }
  0x7f   : > { %213 = sbr.rel (%p14732_p3) target bundleno = 1417 (0x589), region = 36 }
  0x86   : > { %p14733_p8 = scmp.ne.s32.totalorder %s14727_s12, 0 }
  0x88   : > { %10777 = dma.done.wait (%p14733_p8), [#allocation6], 49152  }
  0x89   : > { %10779 = vsyncadd (%p14733_p8), [#allocation6], 4294918144 }
  0x8a   : > { %10781 = dma.done.wait (%p14733_p8), [#allocation9], 49184  }
  0x8b   : > { %10783 = vsyncadd (%p14733_p8), [#allocation9], 4294918112 }
  0x8c   : > { %10785 = dma.done.wait (%p14733_p8), [#allocation12], 32  }
  0x8d   : > { %10787 = vsyncadd (%p14733_p8), [#allocation12], 4294967264  ;;  %s243_s11 = sand.u32 1, %s10800_s19   ;;  %p247_p0 = scmp.lt.s32.totalorder %s10808_s21, 0 }
  0x8e   : > { %s8346_s14 = sshll.u32 %s243_s11, 9  ;;  %s248_s30 = ssub.s32 0, %s10808_s21 }
  0x8f   : > { %s8347_s6 = smin.u32 %s10808_s21, %s248_s30  ;;  %s11055_s12 = scalar_lea.vmem [#allocation13], %s8346_s14 }
  0x90   : > { %s250_s10 = sand.u32 1, %s8347_s6   ;;  %p8350_p10 = scmp.ne.s32.totalorder %s10808_s21, 0 }
  0x91   : > { %s251_s16 = ssub.s32 0, %s250_s10  ;;  %s263_s2 = smul.u32 (!%p8350_p10), 480, %s10812_s22 }
  0x92   : > { %s14960_s16 = smov (!%p247_p0, %s251_s16), %s250_s10  ;;  %262 = sbr.rel (%p8350_p10) target bundleno = 171 (0xab), region = 56 }
  0x93   : > { %p8349_p2 = scmp.lt.s32.totalorder %s14960_s16, 0  ;;  %s257_s9 = sadd.s32 2, %s14960_s16 }
  0x94   : > { %s11064_s8 = scalar_lea.vmem (!%p8350_p10), %s14635_s0, %s263_s2 }
  0x95   : > { %s14962_s9 = smov (!%p8349_p2, %s257_s9), %s14960_s16  ;;  %v324_v0 = vld [vmem:[%s11064_s8] sm:$0xff] (!%p8350_p10)  ;;  %v326_v1 = vld [vmem:[%s11064_s8 + $0x8] sm:$0xff] (!%p8350_p10)  ;;  %v328_v2 = vld [vmem:[%s11064_s8 + $0x18] sm:$0xff] (!%p8350_p10) }
  0x96   : > { %325 = vst [vmem:[#allocation2] sm:$0xff] (!%p8350_p10), %v324_v0  ;;  %327 = vst [vmem:[#allocation2 + $0x8] sm:$0xff] (!%p8350_p10), %v326_v1  ;;  %v330_v3 = vld [vmem:[%s11064_s8 + $0x20] sm:$0xff] (!%p8350_p10)  ;;  %v332_v4 = vld [vmem:[%s11064_s8 + $0x30] sm:$0xff] (!%p8350_p10) }
  0x97   : > { %329 = vst [vmem:[#allocation2 + $0x18] sm:$0xff] (!%p8350_p10), %v328_v2  ;;  %v334_v5 = vld [vmem:[%s11064_s8 + $0x38] sm:$0xff] (!%p8350_p10)  ;;  %331 = vst [vmem:[#allocation2 + $0x20] sm:$0xff] (!%p8350_p10), %v330_v3  ;;  %v336_v6 = vld [vmem:[%s11064_s8 + $0x48] sm:$0xff] (!%p8350_p10) }
  0x98   : > { %333 = vst [vmem:[#allocation2 + $0x30] sm:$0xff] (!%p8350_p10), %v332_v4  ;;  %335 = vst [vmem:[#allocation2 + $0x38] sm:$0xff] (!%p8350_p10), %v334_v5  ;;  %v338_v7 = vld [vmem:[%s11064_s8 + $0x50] sm:$0xff] (!%p8350_p10)  ;;  %v340_v8 = vld [vmem:[%s11064_s8 + $0x60] sm:$0xff] (!%p8350_p10) }
  0x99   : > { %337 = vst [vmem:[#allocation2 + $0x48] sm:$0xff] %v336_v6  ;;  %339 = vst [vmem:[#allocation2 + $0x50] sm:$0xff] %v338_v7  ;;  %v342_v9 = vld [vmem:[%s11064_s8 + $0x68] sm:$0xff]  ;;  %v344_v10 = vld [vmem:[%s11064_s8 + $0x78] sm:$0xff] }
  0x9a   : > { %341 = vst [vmem:[#allocation2 + $0x60] sm:$0xff] %v340_v8  ;;  %v346_v11 = vld [vmem:[%s11064_s8 + $0x80] sm:$0xff]  ;;  %343 = vst [vmem:[#allocation2 + $0x68] sm:$0xff] %v342_v9  ;;  %v348_v12 = vld [vmem:[%s11064_s8 + $0x90] sm:$0xff] }
  0x9b   : > { %345 = vst [vmem:[#allocation2 + $0x78] sm:$0xff] %v344_v10  ;;  %347 = vst [vmem:[#allocation2 + $0x80] sm:$0xff] %v346_v11  ;;  %v350_v13 = vld [vmem:[%s11064_s8 + $0x98] sm:$0xff]  ;;  %v352_v14 = vld [vmem:[%s11064_s8 + $0xa8] sm:$0xff] }
  0x9c   : > { %349 = vst [vmem:[#allocation2 + $0x90] sm:$0xff] %v348_v12  ;;  %351 = vst [vmem:[#allocation2 + $0x98] sm:$0xff] %v350_v13  ;;  %v354_v15 = vld [vmem:[%s11064_s8 + $0xb0] sm:$0xff]  ;;  %v356_v16 = vld [vmem:[%s11064_s8 + $0xc0] sm:$0xff] }
  0x9d   : > { %353 = vst [vmem:[#allocation2 + $0xa8] sm:$0xff] %v352_v14  ;;  %v358_v17 = vld [vmem:[%s11064_s8 + $0xc8] sm:$0xff]  ;;  %355 = vst [vmem:[#allocation2 + $0xb0] sm:$0xff] %v354_v15  ;;  %v360_v18 = vld [vmem:[%s11064_s8 + $0xd8] sm:$0xff] }
  0x9e   : > { %357 = vst [vmem:[#allocation2 + $0xc0] sm:$0xff] %v356_v16  ;;  %359 = vst [vmem:[#allocation2 + $0xc8] sm:$0xff] %v358_v17  ;;  %v362_v19 = vld [vmem:[%s11064_s8 + $0xe0] sm:$0xff]  ;;  %v364_v20 = vld [vmem:[%s11064_s8 + $0xf0] sm:$0xff] }
  0x9f   : > { %361 = vst [vmem:[#allocation2 + $0xd8] sm:$0xff] %v360_v18  ;;  %363 = vst [vmem:[#allocation2 + $0xe0] sm:$0xff] %v362_v19  ;;  %v366_v21 = vld [vmem:[%s11064_s8 + $0xf8] sm:$0xff]  ;;  %v368_v22 = vld [vmem:[%s11064_s8 + $0x108] sm:$0xff] }
  0xa0   : > { %365 = vst [vmem:[#allocation2 + $0xf0] sm:$0xff] %v364_v20  ;;  %v370_v23 = vld [vmem:[%s11064_s8 + $0x110] sm:$0xff]  ;;  %367 = vst [vmem:[#allocation2 + $0xf8] sm:$0xff] %v366_v21  ;;  %v8352_v25 = vld [vmem:[%s11064_s8 + $0x28] sm:$0x3] }
  0xa1   : > { %369 = vst [vmem:[#allocation2 + $0x108] sm:$0xff] %v368_v22  ;;  %371 = vst [vmem:[#allocation2 + $0x110] sm:$0xff] %v370_v23  ;;  %v8351_v24 = vld [vmem:[%s11064_s8 + $0x10] sm:$0x3]  ;;  %v8353_v26 = vld [vmem:[%s11064_s8 + $0x40] sm:$0x3] }
  0xa2   : > { %382 = vst [vmem:[#allocation2 + $0x10] sm:$0x3] %v8351_v24  ;;  %384 = vst [vmem:[#allocation2 + $0x28] sm:$0x3] %v8352_v25  ;;  %v8354_v27 = vld [vmem:[%s11064_s8 + $0x58] sm:$0x3] }
  0xa3   : > { %386 = vst [vmem:[#allocation2 + $0x40] sm:$0x3] %v8353_v26  ;;  %v8355_v28 = vld [vmem:[%s11064_s8 + $0x70] sm:$0x3]  ;;  %v8356_v29 = vld [vmem:[%s11064_s8 + $0x88] sm:$0x3] }
  0xa4   : > { %388 = vst [vmem:[#allocation2 + $0x58] sm:$0x3] %v8354_v27  ;;  %390 = vst [vmem:[#allocation2 + $0x70] sm:$0x3] %v8355_v28  ;;  %v8357_v30 = vld [vmem:[%s11064_s8 + $0xa0] sm:$0x3] }
  0xa5   : > { %392 = vst [vmem:[#allocation2 + $0x88] sm:$0x3] %v8356_v29  ;;  %v8358_v31 = vld [vmem:[%s11064_s8 + $0xb8] sm:$0x3]  ;;  %v8359_v32 = vld [vmem:[%s11064_s8 + $0xd0] sm:$0x3] }
  0xa6   : > { %394 = vst [vmem:[#allocation2 + $0xa0] sm:$0x3] %v8357_v30  ;;  %396 = vst [vmem:[#allocation2 + $0xb8] sm:$0x3] %v8358_v31  ;;  %v8360_v33 = vld [vmem:[%s11064_s8 + $0xe8] sm:$0x3] }
  0xa7   : > { %398 = vst [vmem:[#allocation2 + $0xd0] sm:$0x3] %v8359_v32  ;;  %v8361_v34 = vld [vmem:[%s11064_s8 + $0x100] sm:$0x3]  ;;  %v8362_v35 = vld [vmem:[%s11064_s8 + $0x118] sm:$0x3] }
  0xa8   : > { %400 = vst [vmem:[#allocation2 + $0xe8] sm:$0x3] %v8360_v33  ;;  %402 = vst [vmem:[#allocation2 + $0x100] sm:$0x3] %v8361_v34 }
  0xa9   : > { %404 = vst [vmem:[#allocation2 + $0x118] sm:$0x3] %v8362_v35 }
  0xaa   : > { %408 = vsyncadd [#allocation4], 3456 }
  0xab PF: > { %s409_s23 = scalar_lea.sflag [#allocation4], %s14962_s9 }
  0xac   : > { %10788 = dma.done.wait %s409_s23, 3456 }
  0xad   : > { %10789 = vsyncadd %s409_s23, 4294963840  ;;  %s414_s29 = sadd.s32 1, %s10808_s21 }
  0xae   : > { %p8363_p12 = scmp.ge.s32.totalorder %s414_s29, 2 }
  0xaf   : > { %s419_s27 = ssub.s32 (!%p8363_p12), 1, %s14962_s9  ;;  %s8218_s26 = smul.u32 (!%p8363_p12), 192, %s10808_s21 }
  0xb0   : > { %418 = sbr.rel (%p8363_p12) target bundleno = 203 (0xcb), region = 97  ;;  %s427_s10 = scalar_lea.sflag (!%p8363_p12), [#allocation4], %s419_s27 }
  0xb1   : > { %s8219_s15 = smul.u32 (!%p8363_p12), 480, %s10812_s22 }
  0xb2   : > { %s425_s17 = smul.u32 (!%p8363_p12), 288, %s419_s27 }
  0xb3   : > { %s8220_s24 = sadd.s32 (!%p8363_p12), %s8219_s15, %s8218_s26 }
  0xb4   : > { %s11112_s30 = scalar_lea.vmem (!%p8363_p12), %s14635_s0, %s8220_s24  ;;  %s11117_s6 = scalar_lea.vmem (!%p8363_p12), [#allocation2], %s425_s17 }
  0xb5   : > { %v8365_v36 = vld [vmem:[%s11112_s30 + $0xc0] sm:$0xff] (!%p8363_p12)  ;;  %v8366_v37 = vld [vmem:[%s11112_s30 + $0xc8] sm:$0xff] (!%p8363_p12)  ;;  %v8367_v38 = vld [vmem:[%s11112_s30 + $0xd8] sm:$0xff] (!%p8363_p12) }
  0xb6   : > { %488 = vst [vmem:[%s11117_s6] sm:$0xff] (!%p8363_p12), %v8365_v36  ;;  %490 = vst [vmem:[%s11117_s6 + $0x8] sm:$0xff] (!%p8363_p12), %v8366_v37  ;;  %v8368_v39 = vld [vmem:[%s11112_s30 + $0xe0] sm:$0xff] (!%p8363_p12)  ;;  %v8369_v40 = vld [vmem:[%s11112_s30 + $0xf0] sm:$0xff] (!%p8363_p12) }
  0xb7   : > { %492 = vst [vmem:[%s11117_s6 + $0x18] sm:$0xff] %v8367_v38  ;;  %v8370_v41 = vld [vmem:[%s11112_s30 + $0xf8] sm:$0xff]  ;;  %494 = vst [vmem:[%s11117_s6 + $0x20] sm:$0xff] %v8368_v39  ;;  %v8371_v42 = vld [vmem:[%s11112_s30 + $0x108] sm:$0xff] }
  0xb8   : > { %496 = vst [vmem:[%s11117_s6 + $0x30] sm:$0xff] %v8369_v40  ;;  %498 = vst [vmem:[%s11117_s6 + $0x38] sm:$0xff] %v8370_v41  ;;  %v8372_v43 = vld [vmem:[%s11112_s30 + $0x110] sm:$0xff]  ;;  %v8373_v44 = vld [vmem:[%s11112_s30 + $0x120] sm:$0xff] }
  0xb9   : > { %500 = vst [vmem:[%s11117_s6 + $0x48] sm:$0xff] %v8371_v42  ;;  %502 = vst [vmem:[%s11117_s6 + $0x50] sm:$0xff] %v8372_v43  ;;  %v8374_v45 = vld [vmem:[%s11112_s30 + $0x128] sm:$0xff]  ;;  %v8375_v46 = vld [vmem:[%s11112_s30 + $0x138] sm:$0xff] }
  0xba   : > { %504 = vst [vmem:[%s11117_s6 + $0x60] sm:$0xff] %v8373_v44  ;;  %v8376_v47 = vld [vmem:[%s11112_s30 + $0x140] sm:$0xff]  ;;  %506 = vst [vmem:[%s11117_s6 + $0x68] sm:$0xff] %v8374_v45  ;;  %v8377_v48 = vld [vmem:[%s11112_s30 + $0x150] sm:$0xff] }
  0xbb   : > { %508 = vst [vmem:[%s11117_s6 + $0x78] sm:$0xff] %v8375_v46  ;;  %510 = vst [vmem:[%s11117_s6 + $0x80] sm:$0xff] %v8376_v47  ;;  %v8378_v49 = vld [vmem:[%s11112_s30 + $0x158] sm:$0xff]  ;;  %v8379_v50 = vld [vmem:[%s11112_s30 + $0x168] sm:$0xff] }
  0xbc   : > { %512 = vst [vmem:[%s11117_s6 + $0x90] sm:$0xff] %v8377_v48  ;;  %514 = vst [vmem:[%s11117_s6 + $0x98] sm:$0xff] %v8378_v49  ;;  %v8380_v51 = vld [vmem:[%s11112_s30 + $0x170] sm:$0xff]  ;;  %v8381_v52 = vld [vmem:[%s11112_s30 + $0x180] sm:$0xff] }
  0xbd   : > { %516 = vst [vmem:[%s11117_s6 + $0xa8] sm:$0xff] %v8379_v50  ;;  %v8382_v53 = vld [vmem:[%s11112_s30 + $0x188] sm:$0xff]  ;;  %518 = vst [vmem:[%s11117_s6 + $0xb0] sm:$0xff] %v8380_v51  ;;  %v8383_v54 = vld [vmem:[%s11112_s30 + $0x198] sm:$0xff] }
  0xbe   : > { %520 = vst [vmem:[%s11117_s6 + $0xc0] sm:$0xff] %v8381_v52  ;;  %522 = vst [vmem:[%s11117_s6 + $0xc8] sm:$0xff] %v8382_v53  ;;  %v8384_v55 = vld [vmem:[%s11112_s30 + $0x1a0] sm:$0xff]  ;;  %v8385_v56 = vld [vmem:[%s11112_s30 + $0x1b0] sm:$0xff] }
  0xbf   : > { %524 = vst [vmem:[%s11117_s6 + $0xd8] sm:$0xff] %v8383_v54  ;;  %526 = vst [vmem:[%s11117_s6 + $0xe0] sm:$0xff] %v8384_v55  ;;  %v8386_v57 = vld [vmem:[%s11112_s30 + $0x1b8] sm:$0xff]  ;;  %v8387_v58 = vld [vmem:[%s11112_s30 + $0x1c8] sm:$0xff] }
  0xc0   : > { %528 = vst [vmem:[%s11117_s6 + $0xf0] sm:$0xff] %v8385_v56  ;;  %v8388_v59 = vld [vmem:[%s11112_s30 + $0x1d0] sm:$0xff]  ;;  %530 = vst [vmem:[%s11117_s6 + $0xf8] sm:$0xff] %v8386_v57  ;;  %v8391_v61 = vld [vmem:[%s11112_s30 + $0xe8] sm:$0x3] }
  0xc1   : > { %532 = vst [vmem:[%s11117_s6 + $0x108] sm:$0xff] %v8387_v58  ;;  %534 = vst [vmem:[%s11117_s6 + $0x110] sm:$0xff] %v8388_v59  ;;  %v8389_v60 = vld [vmem:[%s11112_s30 + $0xd0] sm:$0x3]  ;;  %v8393_v62 = vld [vmem:[%s11112_s30 + $0x100] sm:$0x3] }
  0xc2   : > { %8390 = vst [vmem:[%s11117_s6 + $0x10] sm:$0x3] %v8389_v60  ;;  %8392 = vst [vmem:[%s11117_s6 + $0x28] sm:$0x3] %v8391_v61  ;;  %v8395_v63 = vld [vmem:[%s11112_s30 + $0x118] sm:$0x3] }
  0xc3   : > { %8394 = vst [vmem:[%s11117_s6 + $0x40] sm:$0x3] %v8393_v62  ;;  %v8397_v0 = vld [vmem:[%s11112_s30 + $0x130] sm:$0x3]  ;;  %v8399_v1 = vld [vmem:[%s11112_s30 + $0x148] sm:$0x3] }
  0xc4   : > { %8396 = vst [vmem:[%s11117_s6 + $0x58] sm:$0x3] %v8395_v63  ;;  %8398 = vst [vmem:[%s11117_s6 + $0x70] sm:$0x3] %v8397_v0  ;;  %v8401_v2 = vld [vmem:[%s11112_s30 + $0x160] sm:$0x3] }
  0xc5   : > { %8400 = vst [vmem:[%s11117_s6 + $0x88] sm:$0x3] %v8399_v1  ;;  %v8403_v3 = vld [vmem:[%s11112_s30 + $0x178] sm:$0x3]  ;;  %v8405_v4 = vld [vmem:[%s11112_s30 + $0x190] sm:$0x3] }
  0xc6   : > { %8402 = vst [vmem:[%s11117_s6 + $0xa0] sm:$0x3] %v8401_v2  ;;  %8404 = vst [vmem:[%s11117_s6 + $0xb8] sm:$0x3] %v8403_v3  ;;  %v8407_v5 = vld [vmem:[%s11112_s30 + $0x1a8] sm:$0x3] }
  0xc7   : > { %8406 = vst [vmem:[%s11117_s6 + $0xd0] sm:$0x3] %v8405_v4  ;;  %v8409_v6 = vld [vmem:[%s11112_s30 + $0x1c0] sm:$0x3]  ;;  %v8411_v7 = vld [vmem:[%s11112_s30 + $0x1d8] sm:$0x3] }
  0xc8   : > { %8408 = vst [vmem:[%s11117_s6 + $0xe8] sm:$0x3] %v8407_v5  ;;  %8410 = vst [vmem:[%s11117_s6 + $0x100] sm:$0x3] %v8409_v6 }
  0xc9   : > { %8412 = vst [vmem:[%s11117_s6 + $0x118] sm:$0x3] %v8411_v7 }
  0xca   : > { %571 = vsyncadd %s427_s10, 3456 }
  0xcb PF: > { %v697_v8 = vld [vmem:[#allocation5 + $0x8] sm:$0xff]  ;;  %v699_v9 = vld [vmem:[#allocation5 + $0x18] sm:$0xff]  ;;  %v696_v13 = vld [vmem:[#allocation5] sm:$0xff]  ;;  %s572_s16 = smul.u32 288, %s14962_s9 }
  0xcc   : > { %v1619_v10 = vld [vmem:[#allocation5 + $0x608] sm:$0xff]  ;;  %v8649_v11 = vpack.c.bf16 %v699_v9, %v697_v8  ;;  %v1621_v12 = vld [vmem:[#allocation5 + $0x618] sm:$0xff]  ;;  %v698_v14 = vld [vmem:[#allocation5 + $0x10] sm:$0xff] }
  0xcd   : > { %v8841_v15 = vpack.c.bf16 %v1621_v12, %v1619_v10  ;;  %v8651_v16 = vpack.c.bf16 %v698_v14, %v696_v13  ;;  %v1618_v17 = vld [vmem:[#allocation5 + $0x600] sm:$0xff]  ;;  %v1620_v18 = vld [vmem:[#allocation5 + $0x610] sm:$0xff]  ;;  %v701_v19 = vld [vmem:[#allocation5 + $0x28] sm:$0xff]  ;;  %s11193_s2 = scalar_lea.vmem [#allocation2], %s572_s16 }
  0xce   : > { %8650 = vmatprep.subr.bf16.mxu0 %v8649_v11  ;;  %v8843_v20 = vpack.c.bf16 %v1620_v18, %v1618_v17  ;;  %v703_v21 = vld [vmem:[#allocation5 + $0x38] sm:$0xff]  ;;  %v1623_v22 = vld [vmem:[#allocation5 + $0x628] sm:$0xff]  ;;  %v700_v26 = vld [vmem:[#allocation5 + $0x20] sm:$0xff] }
  0xcf   : > { %v1625_v23 = vld [vmem:[#allocation5 + $0x638] sm:$0xff]  ;;  %8842 = vmatprep.subr.bf16.mxu1 %v8841_v15  ;;  %8652 = vmatpush1.bf16.msra.mxu0 %v8651_v16  ;;  %v8653_v24 = vpack.c.bf16 %v703_v21, %v701_v19  ;;  %v702_v27 = vld [vmem:[#allocation5 + $0x30] sm:$0xff]  ;;  %v1622_v28 = vld [vmem:[#allocation5 + $0x620] sm:$0xff] }
  0xd0   : > { %v8845_v25 = vpack.c.bf16 %v1625_v23, %v1623_v22  ;;  %8844 = vmatpush1.bf16.msra.mxu1 %v8843_v20  ;;  %v8655_v29 = vpack.c.bf16 %v702_v27, %v700_v26  ;;  %v1624_v30 = vld [vmem:[#allocation5 + $0x630] sm:$0xff]  ;;  %v705_v31 = vld [vmem:[#allocation5 + $0x48] sm:$0xff]  ;;  %v707_v32 = vld [vmem:[#allocation5 + $0x58] sm:$0xff] }
  0xd1   : > { %8654 = vmatprep.subr.bf16.mxu0 %v8653_v24  ;;  %v8847_v33 = vpack.c.bf16 %v1624_v30, %v1622_v28  ;;  %v8657_v34 = vpack.c.bf16 %v707_v32, %v705_v31  ;;  %v1627_v35 = vld [vmem:[#allocation5 + $0x648] sm:$0xff]  ;;  %v1629_v36 = vld [vmem:[#allocation5 + $0x658] sm:$0xff]  ;;  %v704_v37 = vld [vmem:[#allocation5 + $0x40] sm:$0xff] }
  0xd2   : > { %8846 = vmatprep.subr.bf16.mxu1 %v8845_v25  ;;  %v8849_v38 = vpack.c.bf16 %v1629_v36, %v1627_v35  ;;  %v706_v39 = vld [vmem:[#allocation5 + $0x50] sm:$0xff]  ;;  %v1626_v40 = vld [vmem:[#allocation5 + $0x640] sm:$0xff]  ;;  %v709_v43 = vld [vmem:[#allocation5 + $0x68] sm:$0xff] }
  0xd3   : > { %v1628_v41 = vld [vmem:[#allocation5 + $0x650] sm:$0xff]  ;;  %8656 = vmatpush1.bf16.msra.mxu0 %v8655_v29  ;;  %v8659_v42 = vpack.c.bf16 %v706_v39, %v704_v37  ;;  %v711_v44 = vld [vmem:[#allocation5 + $0x78] sm:$0xff]  ;;  %v1631_v45 = vld [vmem:[#allocation5 + $0x668] sm:$0xff] }
  0xd4   : > { %8848 = vmatpush1.bf16.msra.mxu1 %v8847_v33  ;;  %8658 = vmatprep.subr.bf16.mxu0 %v8657_v34  ;;  %v8851_v46 = vpack.c.bf16 %v1628_v41, %v1626_v40  ;;  %v8661_v47 = vpack.c.bf16 %v711_v44, %v709_v43  ;;  %v1633_v48 = vld [vmem:[#allocation5 + $0x678] sm:$0xff]  ;;  %v708_v49 = vld [vmem:[#allocation5 + $0x60] sm:$0xff]  ;;  %v710_v50 = vld [vmem:[#allocation5 + $0x70] sm:$0xff] }
  0xd5   : > { %8850 = vmatprep.subr.bf16.mxu1 %v8849_v38  ;;  %v8853_v51 = vpack.c.bf16 %v1633_v48, %v1631_v45  ;;  %v1630_v52 = vld [vmem:[#allocation5 + $0x660] sm:$0xff]  ;;  %v1632_v53 = vld [vmem:[#allocation5 + $0x670] sm:$0xff]  ;;  %v713_v54 = vld [vmem:[#allocation5 + $0x88] sm:$0xff]  ;;  %v8663_v58 = vpack.c.bf16 %v710_v50, %v708_v49 }
  0xd6   : > { %v715_v55 = vld [vmem:[#allocation5 + $0x98] sm:$0xff]  ;;  %v1635_v56 = vld [vmem:[#allocation5 + $0x688] sm:$0xff]  ;;  %v8855_v59 = vpack.c.bf16 %v1632_v53, %v1630_v52  ;;  %v712_v61 = vld [vmem:[#allocation5 + $0x80] sm:$0xff] }
  0xd7   : > { %v1637_v57 = vld [vmem:[#allocation5 + $0x698] sm:$0xff]  ;;  %8660 = vmatpush1.bf16.msra.mxu0 %v8659_v42  ;;  %v8665_v60 = vpack.c.bf16 %v715_v55, %v713_v54  ;;  %v714_v62 = vld [vmem:[#allocation5 + $0x90] sm:$0xff]  ;;  %v1634_v63 = vld [vmem:[#allocation5 + $0x680] sm:$0xff] }
  0xd8   : > { %8852 = vmatpush1.bf16.msra.mxu1 %v8851_v46  ;;  %8662 = vmatprep.subr.bf16.mxu0 %v8661_v47  ;;  %v8857_v0 = vpack.c.bf16 %v1637_v57, %v1635_v56  ;;  %v1636_v1 = vld [vmem:[#allocation5 + $0x690] sm:$0xff]  ;;  %v717_v2 = vld [vmem:[#allocation5 + $0xa8] sm:$0xff]  ;;  %v719_v3 = vld [vmem:[#allocation5 + $0xb8] sm:$0xff]  ;;  %v8667_v6 = vpack.c.bf16 %v714_v62, %v712_v61 }
  0xd9   : > { %8854 = vmatprep.subr.bf16.mxu1 %v8853_v51  ;;  %v1639_v4 = vld [vmem:[#allocation5 + $0x6a8] sm:$0xff]  ;;  %v1641_v5 = vld [vmem:[#allocation5 + $0x6b8] sm:$0xff]  ;;  %v8859_v7 = vpack.c.bf16 %v1636_v1, %v1634_v63  ;;  %v8669_v8 = vpack.c.bf16 %v719_v3, %v717_v2  ;;  %v716_v9 = vld [vmem:[#allocation5 + $0xa0] sm:$0xff] }
  0xda   : > { %v718_v10 = vld [vmem:[#allocation5 + $0xb0] sm:$0xff]  ;;  %v1638_v11 = vld [vmem:[#allocation5 + $0x6a0] sm:$0xff]  ;;  %v8861_v12 = vpack.c.bf16 %v1641_v5, %v1639_v4  ;;  %v721_v14 = vld [vmem:[#allocation5 + $0xc8] sm:$0xff] }
  0xdb   : > { %8664 = vmatpush1.bf16.msra.mxu0 %v8663_v58  ;;  %v1640_v13 = vld [vmem:[#allocation5 + $0x6b0] sm:$0xff]  ;;  %v723_v15 = vld [vmem:[#allocation5 + $0xd8] sm:$0xff]  ;;  %v1643_v16 = vld [vmem:[#allocation5 + $0x6c8] sm:$0xff]  ;;  %v8671_v18 = vpack.c.bf16 %v718_v10, %v716_v9 }
  0xdc   : > { %8856 = vmatpush1.bf16.msra.mxu1 %v8855_v59  ;;  %8666 = vmatprep.subr.bf16.mxu0 %v8665_v60  ;;  %v1645_v17 = vld [vmem:[#allocation5 + $0x6d8] sm:$0xff]  ;;  %v8863_v19 = vpack.c.bf16 %v1640_v13, %v1638_v11  ;;  %v8673_v20 = vpack.c.bf16 %v723_v15, %v721_v14  ;;  %v720_v21 = vld [vmem:[#allocation5 + $0xc0] sm:$0xff]  ;;  %v722_v22 = vld [vmem:[#allocation5 + $0xd0] sm:$0xff] }
  0xdd   : > { %8858 = vmatprep.subr.bf16.mxu1 %v8857_v0  ;;  %v1642_v23 = vld [vmem:[#allocation5 + $0x6c0] sm:$0xff]  ;;  %v8865_v24 = vpack.c.bf16 %v1645_v17, %v1643_v16  ;;  %v1644_v25 = vld [vmem:[#allocation5 + $0x6d0] sm:$0xff]  ;;  %v725_v26 = vld [vmem:[#allocation5 + $0xe8] sm:$0xff]  ;;  %v8675_v30 = vpack.c.bf16 %v722_v22, %v720_v21 }
  0xde   : > { %v727_v27 = vld [vmem:[#allocation5 + $0xf8] sm:$0xff]  ;;  %v1647_v28 = vld [vmem:[#allocation5 + $0x6e8] sm:$0xff]  ;;  %v8867_v31 = vpack.c.bf16 %v1644_v25, %v1642_v23  ;;  %v724_v33 = vld [vmem:[#allocation5 + $0xe0] sm:$0xff] }
  0xdf   : > { %8668 = vmatpush1.bf16.msra.mxu0 %v8667_v6  ;;  %v1649_v29 = vld [vmem:[#allocation5 + $0x6f8] sm:$0xff]  ;;  %v8677_v32 = vpack.c.bf16 %v727_v27, %v725_v26  ;;  %v726_v34 = vld [vmem:[#allocation5 + $0xf0] sm:$0xff]  ;;  %v1646_v35 = vld [vmem:[#allocation5 + $0x6e0] sm:$0xff] }
  0xe0   : > { %8860 = vmatpush1.bf16.msra.mxu1 %v8859_v7  ;;  %8670 = vmatprep.subr.bf16.mxu0 %v8669_v8  ;;  %v8869_v36 = vpack.c.bf16 %v1649_v29, %v1647_v28  ;;  %v1648_v37 = vld [vmem:[#allocation5 + $0x6f0] sm:$0xff]  ;;  %v729_v38 = vld [vmem:[#allocation5 + $0x108] sm:$0xff]  ;;  %v731_v39 = vld [vmem:[#allocation5 + $0x118] sm:$0xff]  ;;  %v8679_v42 = vpack.c.bf16 %v726_v34, %v724_v33 }
  0xe1   : > { %8862 = vmatprep.subr.bf16.mxu1 %v8861_v12  ;;  %v1651_v40 = vld [vmem:[#allocation5 + $0x708] sm:$0xff]  ;;  %v1653_v41 = vld [vmem:[#allocation5 + $0x718] sm:$0xff]  ;;  %v8871_v43 = vpack.c.bf16 %v1648_v37, %v1646_v35  ;;  %v8681_v44 = vpack.c.bf16 %v731_v39, %v729_v38  ;;  %v728_v45 = vld [vmem:[#allocation5 + $0x100] sm:$0xff] }
  0xe2   : > { %v730_v46 = vld [vmem:[#allocation5 + $0x110] sm:$0xff]  ;;  %v1650_v47 = vld [vmem:[#allocation5 + $0x700] sm:$0xff]  ;;  %v8873_v48 = vpack.c.bf16 %v1653_v41, %v1651_v40  ;;  %v733_v50 = vld [vmem:[#allocation5 + $0x128] sm:$0xff] }
  0xe3   : > { %8672 = vmatpush1.bf16.msra.mxu0 %v8671_v18  ;;  %v1652_v49 = vld [vmem:[#allocation5 + $0x710] sm:$0xff]  ;;  %v735_v51 = vld [vmem:[#allocation5 + $0x138] sm:$0xff]  ;;  %v1655_v52 = vld [vmem:[#allocation5 + $0x728] sm:$0xff]  ;;  %v8683_v54 = vpack.c.bf16 %v730_v46, %v728_v45 }
  0xe4   : > { %8864 = vmatpush1.bf16.msra.mxu1 %v8863_v19  ;;  %8674 = vmatprep.subr.bf16.mxu0 %v8673_v20  ;;  %v1657_v53 = vld [vmem:[#allocation5 + $0x738] sm:$0xff]  ;;  %v8875_v55 = vpack.c.bf16 %v1652_v49, %v1650_v47  ;;  %v8685_v56 = vpack.c.bf16 %v735_v51, %v733_v50  ;;  %v732_v57 = vld [vmem:[#allocation5 + $0x120] sm:$0xff]  ;;  %v734_v58 = vld [vmem:[#allocation5 + $0x130] sm:$0xff] }
  0xe5   : > { %8866 = vmatprep.subr.bf16.mxu1 %v8865_v24  ;;  %v1654_v59 = vld [vmem:[#allocation5 + $0x720] sm:$0xff]  ;;  %v8877_v60 = vpack.c.bf16 %v1657_v53, %v1655_v52  ;;  %v1656_v61 = vld [vmem:[#allocation5 + $0x730] sm:$0xff]  ;;  %v737_v62 = vld [vmem:[#allocation5 + $0x148] sm:$0xff]  ;;  %v8687_v2 = vpack.c.bf16 %v734_v58, %v732_v57 }
  0xe6   : > { %v739_v63 = vld [vmem:[#allocation5 + $0x158] sm:$0xff]  ;;  %v1659_v0 = vld [vmem:[#allocation5 + $0x748] sm:$0xff]  ;;  %v8879_v3 = vpack.c.bf16 %v1656_v61, %v1654_v59  ;;  %v736_v5 = vld [vmem:[#allocation5 + $0x140] sm:$0xff] }
  0xe7   : > { %8676 = vmatpush1.bf16.msra.mxu0 %v8675_v30  ;;  %v1661_v1 = vld [vmem:[#allocation5 + $0x758] sm:$0xff]  ;;  %v8689_v4 = vpack.c.bf16 %v739_v63, %v737_v62  ;;  %v738_v6 = vld [vmem:[#allocation5 + $0x150] sm:$0xff]  ;;  %v1658_v7 = vld [vmem:[#allocation5 + $0x740] sm:$0xff] }
  0xe8   : > { %8868 = vmatpush1.bf16.msra.mxu1 %v8867_v31  ;;  %8678 = vmatprep.subr.bf16.mxu0 %v8677_v32  ;;  %v8881_v8 = vpack.c.bf16 %v1661_v1, %v1659_v0  ;;  %v1660_v9 = vld [vmem:[#allocation5 + $0x750] sm:$0xff]  ;;  %v741_v10 = vld [vmem:[#allocation5 + $0x168] sm:$0xff]  ;;  %v743_v11 = vld [vmem:[#allocation5 + $0x178] sm:$0xff]  ;;  %v8691_v14 = vpack.c.bf16 %v738_v6, %v736_v5 }
  0xe9   : > { %8870 = vmatprep.subr.bf16.mxu1 %v8869_v36  ;;  %v1663_v12 = vld [vmem:[#allocation5 + $0x768] sm:$0xff]  ;;  %v1665_v13 = vld [vmem:[#allocation5 + $0x778] sm:$0xff]  ;;  %v740_v15 = vld [vmem:[#allocation5 + $0x160] sm:$0xff]  ;;  %v8883_v16 = vpack.c.bf16 %v1660_v9, %v1658_v7  ;;  %v8693_v17 = vpack.c.bf16 %v743_v11, %v741_v10 }
  0xea   : > { %v742_v18 = vld [vmem:[#allocation5 + $0x170] sm:$0xff]  ;;  %v1662_v19 = vld [vmem:[#allocation5 + $0x760] sm:$0xff]  ;;  %v8885_v21 = vpack.c.bf16 %v1665_v13, %v1663_v12  ;;  %v745_v22 = vld [vmem:[#allocation5 + $0x188] sm:$0xff] }
  0xeb   : > { %8680 = vmatpush1.bf16.msra.mxu0 %v8679_v42  ;;  %v1664_v20 = vld [vmem:[#allocation5 + $0x770] sm:$0xff]  ;;  %v747_v23 = vld [vmem:[#allocation5 + $0x198] sm:$0xff]  ;;  %v594_v24 = vld [vmem:[%s11193_s2 + $0x1] sm:$0xff]  ;;  %v8695_v28 = vpack.c.bf16 %v742_v18, %v740_v15 }
  0xec   : > { %8872 = vmatpush1.bf16.msra.mxu1 %v8871_v43  ;;  %8682 = vmatprep.subr.bf16.mxu0 %v8681_v44  ;;  %v1667_v25 = vld [vmem:[#allocation5 + $0x788] sm:$0xff]  ;;  %v1669_v26 = vld [vmem:[#allocation5 + $0x798] sm:$0xff]  ;;  %v8887_v29 = vpack.c.bf16 %v1664_v20, %v1662_v19  ;;  %v8697_v30 = vpack.c.bf16 %v747_v23, %v745_v22  ;;  %v744_v31 = vld [vmem:[#allocation5 + $0x180] sm:$0xff] }
  0xed   : > { %8874 = vmatprep.subr.bf16.mxu1 %v8873_v48  ;;  %964 = vmatprep.mubr.f32.mxu0 %v594_v24  ;;  %v11197_v27 = vld [vmem:[%s11193_s2 + $0x19] sm:$0xff]  ;;  %v746_v32 = vld [vmem:[#allocation5 + $0x190] sm:$0xff]  ;;  %v8889_v34 = vpack.c.bf16 %v1669_v26, %v1667_v25  ;;  %v749_v36 = vld [vmem:[#allocation5 + $0x1a8] sm:$0xff] }
  0xee   : > { %1886 = vmatprep.mubr.f32.mxu1 %v11197_v27  ;;  %v1666_v33 = vld [vmem:[#allocation5 + $0x780] sm:$0xff]  ;;  %v1668_v35 = vld [vmem:[#allocation5 + $0x790] sm:$0xff]  ;;  %v751_v37 = vld [vmem:[#allocation5 + $0x1b8] sm:$0xff]  ;;  %v8699_v40 = vpack.c.bf16 %v746_v32, %v744_v31 }
  0xef   : > { %8684 = vmatpush1.bf16.msra.mxu0 %v8683_v54  ;;  %v1671_v38 = vld [vmem:[#allocation5 + $0x7a8] sm:$0xff]  ;;  %v1673_v39 = vld [vmem:[#allocation5 + $0x7b8] sm:$0xff]  ;;  %v8891_v41 = vpack.c.bf16 %v1668_v35, %v1666_v33  ;;  %v8701_v42 = vpack.c.bf16 %v751_v37, %v749_v36  ;;  %v748_v43 = vld [vmem:[#allocation5 + $0x1a0] sm:$0xff] }
  0xf0   : > { %8876 = vmatpush1.bf16.msra.mxu1 %v8875_v55  ;;  %8686 = vmatprep.subr.bf16.mxu0 %v8685_v56  ;;  %v750_v44 = vld [vmem:[#allocation5 + $0x1b0] sm:$0xff]  ;;  %v1670_v45 = vld [vmem:[#allocation5 + $0x7a0] sm:$0xff]  ;;  %v8893_v46 = vpack.c.bf16 %v1673_v39, %v1671_v38  ;;  %v753_v48 = vld [vmem:[#allocation5 + $0x1c8] sm:$0xff] }
  0xf1   : > { %8878 = vmatprep.subr.bf16.mxu1 %v8877_v60  ;;  %v1672_v47 = vld [vmem:[#allocation5 + $0x7b0] sm:$0xff]  ;;  %v755_v49 = vld [vmem:[#allocation5 + $0x1d8] sm:$0xff]  ;;  %v1675_v50 = vld [vmem:[#allocation5 + $0x7c8] sm:$0xff]  ;;  %v8703_v52 = vpack.c.bf16 %v750_v44, %v748_v43 }
  0xf2   : > { %v1677_v51 = vld [vmem:[#allocation5 + $0x7d8] sm:$0xff]  ;;  %v8895_v53 = vpack.c.bf16 %v1672_v47, %v1670_v45  ;;  %v8705_v54 = vpack.c.bf16 %v755_v49, %v753_v48  ;;  %v752_v55 = vld [vmem:[#allocation5 + $0x1c0] sm:$0xff]  ;;  %v754_v56 = vld [vmem:[#allocation5 + $0x1d0] sm:$0xff] }
  0xf3   : > { %8688 = vmatpush1.bf16.msra.mxu0 %v8687_v2  ;;  %v1674_v57 = vld [vmem:[#allocation5 + $0x7c0] sm:$0xff]  ;;  %v8897_v58 = vpack.c.bf16 %v1677_v51, %v1675_v50  ;;  %v1676_v59 = vld [vmem:[#allocation5 + $0x7d0] sm:$0xff]  ;;  %v757_v60 = vld [vmem:[#allocation5 + $0x1e8] sm:$0xff]  ;;  %v8707_v0 = vpack.c.bf16 %v754_v56, %v752_v55 }
  0xf4   : > { %8880 = vmatpush1.bf16.msra.mxu1 %v8879_v3  ;;  %8690 = vmatprep.subr.bf16.mxu0 %v8689_v4  ;;  %v759_v61 = vld [vmem:[#allocation5 + $0x1f8] sm:$0xff]  ;;  %v1679_v62 = vld [vmem:[#allocation5 + $0x7e8] sm:$0xff]  ;;  %v8899_v1 = vpack.c.bf16 %v1676_v59, %v1674_v57  ;;  %v756_v3 = vld [vmem:[#allocation5 + $0x1e0] sm:$0xff] }
  0xf5   : > { %8882 = vmatprep.subr.bf16.mxu1 %v8881_v8  ;;  %v1681_v63 = vld [vmem:[#allocation5 + $0x7f8] sm:$0xff]  ;;  %v8709_v2 = vpack.c.bf16 %v759_v61, %v757_v60  ;;  %v758_v4 = vld [vmem:[#allocation5 + $0x1f0] sm:$0xff]  ;;  %v1678_v5 = vld [vmem:[#allocation5 + $0x7e0] sm:$0xff] }
  0xf6   : > { %v8901_v6 = vpack.c.bf16 %v1681_v63, %v1679_v62  ;;  %v1680_v7 = vld [vmem:[#allocation5 + $0x7f0] sm:$0xff]  ;;  %v761_v8 = vld [vmem:[#allocation5 + $0x208] sm:$0xff]  ;;  %v763_v9 = vld [vmem:[#allocation5 + $0x218] sm:$0xff]  ;;  %v8711_v12 = vpack.c.bf16 %v758_v4, %v756_v3 }
  0xf7   : > { %8692 = vmatpush1.bf16.msra.mxu0 %v8691_v14  ;;  %v1683_v10 = vld [vmem:[#allocation5 + $0x808] sm:$0xff]  ;;  %v1685_v11 = vld [vmem:[#allocation5 + $0x818] sm:$0xff]  ;;  %v8903_v13 = vpack.c.bf16 %v1680_v7, %v1678_v5  ;;  %v8713_v14 = vpack.c.bf16 %v763_v9, %v761_v8  ;;  %v760_v15 = vld [vmem:[#allocation5 + $0x200] sm:$0xff] }
  0xf8   : > { %8884 = vmatpush1.bf16.msra.mxu1 %v8883_v16  ;;  %8694 = vmatprep.subr.bf16.mxu0 %v8693_v17  ;;  %v762_v16 = vld [vmem:[#allocation5 + $0x210] sm:$0xff]  ;;  %v8905_v17 = vpack.c.bf16 %v1685_v11, %v1683_v10  ;;  %v1682_v18 = vld [vmem:[#allocation5 + $0x800] sm:$0xff]  ;;  %v765_v20 = vld [vmem:[#allocation5 + $0x228] sm:$0xff] }
  0xf9   : > { %8886 = vmatprep.subr.bf16.mxu1 %v8885_v21  ;;  %v1684_v19 = vld [vmem:[#allocation5 + $0x810] sm:$0xff]  ;;  %v767_v21 = vld [vmem:[#allocation5 + $0x238] sm:$0xff]  ;;  %v574_v22 = vld [vmem:[%s11193_s2] sm:$0xff]  ;;  %v8715_v23 = vpack.c.bf16 %v762_v16, %v760_v15 }
  0xfa   : > { %v1687_v24 = vld [vmem:[#allocation5 + $0x828] sm:$0xff]  ;;  %v1689_v25 = vld [vmem:[#allocation5 + $0x838] sm:$0xff]  ;;  %v8717_v32 = vpack.c.bf16 %v767_v21, %v765_v20  ;;  %v1686_v33 = vld [vmem:[#allocation5 + $0x820] sm:$0xff] }
  0xfb   : > { %8696 = vmatpush1.bf16.msra.mxu0 %v8695_v28  ;;  %v11202_v26 = vld [vmem:[%s11193_s2 + $0x18] sm:$0xff]  ;;  %v8907_v28 = vpack.c.bf16 %v1684_v19, %v1682_v18  ;;  %v595_v31 = vld [vmem:[%s11193_s2 + $0x9] sm:$0xff]  ;;  %v8506_v35 = vld [vmem:[%s11193_s2 + $0x21] sm:$0xff]  ;;  %v8909_v36 = vpack.c.bf16 %v1689_v25, %v1687_v24 }
  0xfc   : > { %8888 = vmatpush1.bf16.msra.mxu1 %v8887_v29  ;;  %8698 = vmatprep.subr.bf16.mxu0 %v8697_v30  ;;  %v764_v29 = vld [vmem:[#allocation5 + $0x220] sm:$0xff]  ;;  %v766_v30 = vld [vmem:[#allocation5 + $0x230] sm:$0xff]  ;;  %v769_v37 = vld [vmem:[#allocation5 + $0x248] sm:$0xff] }
  0xfd   : > { %8890 = vmatprep.subr.bf16.mxu1 %v8889_v34  ;;  %v1688_v34 = vld [vmem:[#allocation5 + $0x830] sm:$0xff]  ;;  %v771_v38 = vld [vmem:[#allocation5 + $0x258] sm:$0xff]  ;;  %v575_v39 = vld [vmem:[%s11193_s2 + $0x8] sm:$0xff] }
  0xfe   : > { %v11209_v43 = vld [vmem:[%s11193_s2 + $0x20] sm:$0xff]  ;;  %v8911_v44 = vpack.c.bf16 %v1688_v34, %v1686_v33  ;;  %v8507_v45 = vld [vmem:[%s11193_s2 + $0x31] sm:$0xff]  ;;  %v1699_v3 = vld [vmem:[#allocation5 + $0x888] sm:$0xff] }
  0xff   : > { %8700 = vmatpush1.bf16.msra.mxu0 %v8699_v40  ;;  %v8719_v40 = vpack.c.bf16 %v766_v30, %v764_v29  ;;  %v768_v47 = vld [vmem:[#allocation5 + $0x240] sm:$0xff]  ;;  %v770_v48 = vld [vmem:[#allocation5 + $0x250] sm:$0xff]  ;;  %v1697_v55 = vld [vmem:[#allocation5 + $0x878] sm:$0xff] }
 0x100   : > { %8892 = vmatpush1.bf16.msra.mxu1 %v8891_v41  ;;  %8702 = vmatprep.subr.bf16.mxu0 %v8701_v42  ;;  %v1691_v41 = vld [vmem:[#allocation5 + $0x848] sm:$0xff]  ;;  %v1693_v42 = vld [vmem:[#allocation5 + $0x858] sm:$0xff]  ;;  %v1690_v49 = vld [vmem:[#allocation5 + $0x840] sm:$0xff]  ;;  %v8723_v57 = vpack.c.bf16 %v770_v48, %v768_v47 }
 0x101   : > { %8894 = vmatprep.subr.bf16.mxu1 %v8893_v46  ;;  %v8721_v46 = vpack.c.bf16 %v771_v38, %v769_v37  ;;  %v8913_v50 = vpack.c.bf16 %v1693_v42, %v1691_v41  ;;  %v1692_v51 = vld [vmem:[#allocation5 + $0x850] sm:$0xff]  ;;  %v772_v61 = vld [vmem:[#allocation5 + $0x260] sm:$0xff]  ;;  %v1701_v4 = vld [vmem:[#allocation5 + $0x898] sm:$0xff] }
 0x102   : > { %v11215_v56 = vld [vmem:[%s11193_s2 + $0x30] sm:$0xff]  ;;  %v8915_v59 = vpack.c.bf16 %v1692_v51, %v1690_v49  ;;  %v1694_v63 = vld [vmem:[#allocation5 + $0x860] sm:$0xff]  ;;  %v11221_v5 = vld [vmem:[%s11193_s2 + $0x38] sm:$0xff] }
 0x103   : > { %8704 = vmatpush1.bf16.msra.mxu0 %v8703_v52  ;;  %v773_v52 = vld [vmem:[#allocation5 + $0x268] sm:$0xff]  ;;  %v774_v62 = vld [vmem:[#allocation5 + $0x270] sm:$0xff]  ;;  %v776_v10 = vld [vmem:[#allocation5 + $0x280] sm:$0xff] }
 0x104   : > { %8896 = vmatpush1.bf16.msra.mxu1 %v8895_v53  ;;  %8706 = vmatprep.subr.bf16.mxu0 %v8705_v54  ;;  %v775_v53 = vld [vmem:[#allocation5 + $0x278] sm:$0xff]  ;;  %v1695_v54 = vld [vmem:[#allocation5 + $0x868] sm:$0xff]  ;;  %v8727_v7 = vpack.c.bf16 %v774_v62, %v772_v61  ;;  %v778_v11 = vld [vmem:[#allocation5 + $0x290] sm:$0xff] }
 0x105   : > { %8898 = vmatprep.subr.bf16.mxu1 %v8897_v58  ;;  %v8508_v58 = vld [vmem:[%s11193_s2 + $0x39] sm:$0xff]  ;;  %v8725_v60 = vpack.c.bf16 %v775_v53, %v773_v52  ;;  %v781_v15 = vld [vmem:[#allocation5 + $0x2a8] sm:$0xff]  ;;  %v8510_v20 = vld [vmem:[%s11193_s2 + $0x51] sm:$0xff]  ;;  %v8731_v21 = vpack.c.bf16 %v778_v11, %v776_v10 }
 0x106   : > { %v783_v16 = vld [vmem:[#allocation5 + $0x2b8] sm:$0xff]  ;;  %v11227_v19 = vld [vmem:[%s11193_s2 + $0x48] sm:$0xff]  ;;  %v780_v24 = vld [vmem:[#allocation5 + $0x2a0] sm:$0xff] }
 0x107   : > { %8708 = vmatpush1.bf16.msra.mxu0 %v8707_v0  ;;  %v8917_v0 = vpack.c.bf16 %v1697_v55, %v1695_v54  ;;  %v1705_v18 = vld [vmem:[#allocation5 + $0x8b8] sm:$0xff]  ;;  %v782_v25 = vld [vmem:[#allocation5 + $0x2b0] sm:$0xff]  ;;  %v1707_v33 = vld [vmem:[#allocation5 + $0x8c8] sm:$0xff] }
 0x108   : > { %8900 = vmatpush1.bf16.msra.mxu1 %v8899_v1  ;;  %8710 = vmatprep.subr.bf16.mxu0 %v8709_v2  ;;  %v1696_v1 = vld [vmem:[#allocation5 + $0x870] sm:$0xff]  ;;  %v777_v2 = vld [vmem:[#allocation5 + $0x288] sm:$0xff]  ;;  %v1709_v34 = vld [vmem:[#allocation5 + $0x8d8] sm:$0xff]  ;;  %v8735_v37 = vpack.c.bf16 %v782_v25, %v780_v24 }
 0x109   : > { %8902 = vmatprep.subr.bf16.mxu1 %v8901_v6  ;;  %v8509_v6 = vld [vmem:[%s11193_s2 + $0x49] sm:$0xff]  ;;  %v8919_v8 = vpack.c.bf16 %v1696_v1, %v1694_v63  ;;  %v1706_v42 = vld [vmem:[#allocation5 + $0x8c0] sm:$0xff]  ;;  %v791_v47 = vld [vmem:[#allocation5 + $0x2f8] sm:$0xff] }
 0x10a   : > { %v1704_v30 = vld [vmem:[#allocation5 + $0x8b0] sm:$0xff]  ;;  %v1711_v48 = vld [vmem:[#allocation5 + $0x8e8] sm:$0xff]  ;;  %v1713_v49 = vld [vmem:[#allocation5 + $0x8f8] sm:$0xff] }
 0x10b   : > { %8712 = vmatpush1.bf16.msra.mxu0 %v8711_v12  ;;  %v1698_v12 = vld [vmem:[#allocation5 + $0x880] sm:$0xff]  ;;  %v786_v41 = vld [vmem:[#allocation5 + $0x2d0] sm:$0xff]  ;;  %v793_v61 = vld [vmem:[#allocation5 + $0x308] sm:$0xff] }
 0x10c   : > { %8904 = vmatpush1.bf16.msra.mxu1 %v8903_v13  ;;  %8714 = vmatprep.subr.bf16.mxu0 %v8713_v14  ;;  %v8921_v13 = vpack.c.bf16 %v1701_v4, %v1699_v3  ;;  %v1700_v14 = vld [vmem:[#allocation5 + $0x890] sm:$0xff]  ;;  %v788_v55 = vld [vmem:[#allocation5 + $0x2e0] sm:$0xff]  ;;  %v795_v62 = vld [vmem:[#allocation5 + $0x318] sm:$0xff] }
 0x10d   : > { %8906 = vmatprep.subr.bf16.mxu1 %v8905_v17  ;;  %v1703_v17 = vld [vmem:[#allocation5 + $0x8a8] sm:$0xff]  ;;  %v8745_v4 = vpack.c.bf16 %v795_v62, %v793_v61  ;;  %v1716_v10 = vld [vmem:[#allocation5 + $0x910] sm:$0xff]  ;;  %v811_v61 = vld [vmem:[#allocation5 + $0x398] sm:$0xff] }
 0x10e   : > { %965 = vmatmul.mubr.f32.vlgmr.msra.gmra.mrb[0].mxu0 %v574_v22  ;;  %v8923_v22 = vpack.c.bf16 %v1700_v14, %v1698_v12  ;;  %v8925_v29 = vpack.c.bf16 %v1705_v18, %v1703_v17  ;;  %v8512_v51 = vld [vmem:[%s11193_s2 + $0x69] sm:$0xff]  ;;  %v799_v12 = vld [vmem:[#allocation5 + $0x338] sm:$0xff] }
 0x10f   : > { %1887 = vmatmul.mubr.f32.vlgmr.msra.gmra.mrb[0].mxu1 %v11202_v26  ;;  %8716 = vmatpush1.bf16.msra.mxu0 %v8715_v23  ;;  %v8733_v23 = vpack.c.bf16 %v783_v16, %v781_v15  ;;  %v1715_v63 = vld [vmem:[#allocation5 + $0x908] sm:$0xff]  ;;  %v1721_v14 = vld [vmem:[#allocation5 + $0x938] sm:$0xff]  ;;  %v1720_v25 = vld [vmem:[#allocation5 + $0x930] sm:$0xff] }
 0x110   : > { %8908 = vmatpush1.bf16.msra.mxu1 %v8907_v28  ;;  %970 = vmatprep.mubr.f32.mxu0 %v595_v31  ;;  %v1702_v28 = vld [vmem:[#allocation5 + $0x8a0] sm:$0xff]  ;;  %v785_v31 = vld [vmem:[#allocation5 + $0x2c8] sm:$0xff]  ;;  %v11251_v15 = vld [vmem:[%s11193_s2 + $0x78] sm:$0xff] }
 0x111   : > { %1892 = vmatprep.mubr.f32.mxu1 %v8506_v35  ;;  %8718 = vmatprep.subr.bf16.mxu0 %v8717_v32  ;;  %v787_v32 = vld [vmem:[#allocation5 + $0x2d8] sm:$0xff]  ;;  %v8927_v38 = vpack.c.bf16 %v1704_v30, %v1702_v28  ;;  %v11245_v1 = vld [vmem:[%s11193_s2 + $0x68] sm:$0xff] }
 0x112   : > { %971 = vmatmul.mubr.f32.gmra.mrb[2].mxu0 %v575_v39  ;;  %8910 = vmatprep.subr.bf16.mxu1 %v8909_v36  ;;  %v8511_v36 = vld [vmem:[%s11193_s2 + $0x61] sm:$0xff]  ;;  %v8737_v39 = vpack.c.bf16 %v787_v32, %v785_v31  ;;  %v1725_v31 = vld [vmem:[#allocation5 + $0x958] sm:$0xff] }
 0x113   : > { %1893 = vmatmul.mubr.f32.gmra.mrb[2].mxu1 %v11209_v43  ;;  %8720 = vmatpush1.bf16.msra.mxu0 %v8719_v40  ;;  %v784_v40 = vld [vmem:[#allocation5 + $0x2c0] sm:$0xff]  ;;  %v797_v11 = vld [vmem:[#allocation5 + $0x328] sm:$0xff] }
 0x114   : > { %8912 = vmatpush1.bf16.msra.mxu1 %v8911_v44  ;;  %976 = vmatprep.mubr.f32.mxu0 %v11197_v27  ;;  %v779_v27 = vld [vmem:[#allocation5 + $0x298] sm:$0xff]  ;;  %v8929_v44 = vpack.c.bf16 %v1709_v34, %v1707_v33  ;;  %v8739_v52 = vpack.c.bf16 %v786_v41, %v784_v40  ;;  %v8514_v16 = vld [vmem:[%s11193_s2 + $0x81] sm:$0xff] }
 0x115   : > { %1898 = vmatprep.mubr.f32.mxu1 %v8507_v45  ;;  %8722 = vmatprep.subr.bf16.mxu0 %v8721_v46  ;;  %v8729_v9 = vpack.c.bf16 %v779_v27, %v777_v2  ;;  %v789_v46 = vld [vmem:[#allocation5 + $0x2e8] sm:$0xff]  ;;  %v8513_v2 = vld [vmem:[%s11193_s2 + $0x79] sm:$0xff]  ;;  %v8515_v33 = vld [vmem:[%s11193_s2 + $0x91] sm:$0xff] }
 0x116   : > { %977 = vmatmul.mubr.f32.gmra.mrb[4].mxu0 %v11202_v26  ;;  %8914 = vmatprep.subr.bf16.mxu1 %v8913_v50  ;;  %v11239_v50 = vld [vmem:[%s11193_s2 + $0x60] sm:$0xff]  ;;  %v8741_v54 = vpack.c.bf16 %v791_v47, %v789_v46  ;;  %v801_v28 = vld [vmem:[#allocation5 + $0x348] sm:$0xff]  ;;  %v1729_v47 = vld [vmem:[#allocation5 + $0x978] sm:$0xff] }
 0x117   : > { %1899 = vmatmul.mubr.f32.gmra.mrb[4].mxu1 %v11215_v56  ;;  %982 = vmatprep.mubr.f32.mxu0 %v8506_v35  ;;  %v11233_v35 = vld [vmem:[%s11193_s2 + $0x50] sm:$0xff]  ;;  %v1723_v30 = vld [vmem:[#allocation5 + $0x948] sm:$0xff]  ;;  %v11257_v32 = vld [vmem:[%s11193_s2 + $0x80] sm:$0xff] }
 0x118   : > { %8724 = vmatpush1.bf16.msra.mxu0 %v8723_v57  ;;  %1904 = vmatprep.mubr.f32.mxu1 %v8508_v58  ;;  %v790_v57 = vld [vmem:[#allocation5 + $0x2f0] sm:$0xff]  ;;  %v1722_v40 = vld [vmem:[#allocation5 + $0x940] sm:$0xff]  ;;  %v8945_v41 = vpack.c.bf16 %v1725_v31, %v1723_v30  ;;  %v1727_v46 = vld [vmem:[#allocation5 + $0x968] sm:$0xff] }
 0x119   : > { %8916 = vmatpush1.bf16.msra.mxu1 %v8915_v59  ;;  %8726 = vmatprep.subr.bf16.mxu0 %v8725_v60  ;;  %v8933_v59 = vpack.c.bf16 %v1713_v49, %v1711_v48  ;;  %v1712_v60 = vld [vmem:[#allocation5 + $0x8f0] sm:$0xff]  ;;  %v8743_v27 = vpack.c.bf16 %v790_v57, %v788_v55  ;;  %v8516_v49 = vld [vmem:[%s11193_s2 + $0x99] sm:$0xff]  ;;  %v1731_v62 = vld [vmem:[#allocation5 + $0x988] sm:$0xff] }
 0x11a   : > { %983 = vmatmul.mubr.f32.gmra.mrb[6].mxu0 %v11209_v43  ;;  %8918 = vmatprep.subr.bf16.mxu1 %v8917_v0  ;;  %v1717_v0 = vld [vmem:[#allocation5 + $0x918] sm:$0xff]  ;;  %v11263_v48 = vld [vmem:[%s11193_s2 + $0x90] sm:$0xff]  ;;  %v1726_v57 = vld [vmem:[#allocation5 + $0x960] sm:$0xff] }
 0x11b   : > { %1905 = vmatmul.mubr.f32.gmra.mrb[6].mxu1 %v11221_v5  ;;  %988 = vmatprep.mubr.f32.mxu0 %v8507_v45  ;;  %v1708_v45 = vld [vmem:[#allocation5 + $0x8d0] sm:$0xff]  ;;  %v819_v30 = vld [vmem:[#allocation5 + $0x3d8] sm:$0xff]  ;;  %v1739_v31 = vld [vmem:[#allocation5 + $0x9c8] sm:$0xff] }
 0x11c   : > { %1910 = vmatprep.mubr.f32.mxu1 %v8509_v6  ;;  %8728 = vmatpush1.bf16.msra.mxu0 %v8727_v7  ;;  %v8931_v53 = vpack.c.bf16 %v1708_v45, %v1706_v42  ;;  %v794_v7 = vld [vmem:[#allocation5 + $0x310] sm:$0xff]  ;;  %v807_v45 = vld [vmem:[#allocation5 + $0x378] sm:$0xff] }
 0x11d   : > { %8920 = vmatpush1.bf16.msra.mxu1 %v8919_v8  ;;  %8730 = vmatprep.subr.bf16.mxu0 %v8729_v9  ;;  %v1714_v8 = vld [vmem:[#allocation5 + $0x900] sm:$0xff]  ;;  %v8937_v9 = vpack.c.bf16 %v1717_v0, %v1715_v63  ;;  %v1724_v42 = vld [vmem:[#allocation5 + $0x950] sm:$0xff]  ;;  %v1733_v63 = vld [vmem:[#allocation5 + $0x998] sm:$0xff] }
 0x11e   : > { %989 = vmatmul.mubr.f32.gmra.mrb[8].mxu0 %v11215_v56  ;;  %8922 = vmatprep.subr.bf16.mxu1 %v8921_v13  ;;  %v1719_v13 = vld [vmem:[#allocation5 + $0x928] sm:$0xff]  ;;  %v8939_v18 = vpack.c.bf16 %v1716_v10, %v1714_v8  ;;  %v806_v55 = vld [vmem:[#allocation5 + $0x370] sm:$0xff]  ;;  %v11269_v0 = vld [vmem:[%s11193_s2 + $0x98] sm:$0xff] }
 0x11f   : > { %1911 = vmatmul.mubr.f32.gmra.mrb[8].mxu1 %v11227_v19  ;;  %994 = vmatprep.mubr.f32.mxu0 %v8508_v58  ;;  %v1710_v58 = vld [vmem:[#allocation5 + $0x8e0] sm:$0xff]  ;;  %v8941_v24 = vpack.c.bf16 %v1721_v14, %v1719_v13  ;;  %v1732_v10 = vld [vmem:[#allocation5 + $0x990] sm:$0xff]  ;;  %v1735_v13 = vld [vmem:[#allocation5 + $0x9a8] sm:$0xff] }
 0x120   : > { %1916 = vmatprep.mubr.f32.mxu1 %v8510_v20  ;;  %8732 = vmatpush1.bf16.msra.mxu0 %v8731_v21  ;;  %v8935_v3 = vpack.c.bf16 %v1712_v60, %v1710_v58  ;;  %v796_v21 = vld [vmem:[#allocation5 + $0x320] sm:$0xff]  ;;  %v8949_v58 = vpack.c.bf16 %v1729_v47, %v1727_v46  ;;  %v809_v60 = vld [vmem:[#allocation5 + $0x388] sm:$0xff]  ;;  %v1737_v14 = vld [vmem:[#allocation5 + $0x9b8] sm:$0xff] }
 0x121   : > { %8924 = vmatpush1.bf16.msra.mxu1 %v8923_v22  ;;  %8734 = vmatprep.subr.bf16.mxu0 %v8733_v23  ;;  %v798_v22 = vld [vmem:[#allocation5 + $0x330] sm:$0xff]  ;;  %v1718_v23 = vld [vmem:[#allocation5 + $0x920] sm:$0xff]  ;;  %v821_v46 = vld [vmem:[#allocation5 + $0x3e8] sm:$0xff] }
 0x122   : > { %995 = vmatmul.mubr.f32.gmra.mrb[10].mxu0 %v11221_v5  ;;  %8926 = vmatprep.subr.bf16.mxu1 %v8925_v29  ;;  %v803_v29 = vld [vmem:[#allocation5 + $0x358] sm:$0xff]  ;;  %v8751_v34 = vpack.c.bf16 %v798_v22, %v796_v21  ;;  %v1730_v8 = vld [vmem:[#allocation5 + $0x980] sm:$0xff] }
 0x123   : > { %1917 = vmatmul.mubr.f32.gmra.mrb[10].mxu1 %v11233_v35  ;;  %1000 = vmatprep.mubr.f32.mxu0 %v8509_v6  ;;  %v792_v6 = vld [vmem:[#allocation5 + $0x300] sm:$0xff]  ;;  %v823_v47 = vld [vmem:[#allocation5 + $0x3f8] sm:$0xff] }
 0x124   : > { %1922 = vmatprep.mubr.f32.mxu1 %v8511_v36  ;;  %8736 = vmatpush1.bf16.msra.mxu0 %v8735_v37  ;;  %v8747_v17 = vpack.c.bf16 %v794_v7, %v792_v6  ;;  %v8753_v37 = vpack.c.bf16 %v803_v29, %v801_v28  ;;  %v808_v6 = vld [vmem:[#allocation5 + $0x380] sm:$0xff]  ;;  %v810_v7 = vld [vmem:[#allocation5 + $0x390] sm:$0xff]  ;;  %v817_v29 = vld [vmem:[#allocation5 + $0x3c8] sm:$0xff] }
 0x125   : > { %8928 = vmatpush1.bf16.msra.mxu1 %v8927_v38  ;;  %8738 = vmatprep.subr.bf16.mxu0 %v8737_v39  ;;  %v800_v38 = vld [vmem:[#allocation5 + $0x340] sm:$0xff]  ;;  %v802_v39 = vld [vmem:[#allocation5 + $0x350] sm:$0xff] }
 0x126   : > { %1001 = vmatmul.mubr.f32.gmra.mrb[12].mxu0 %v11227_v19  ;;  %8930 = vmatprep.subr.bf16.mxu1 %v8929_v44  ;;  %v805_v44 = vld [vmem:[#allocation5 + $0x368] sm:$0xff]  ;;  %v812_v22 = vld [vmem:[#allocation5 + $0x3a0] sm:$0xff]  ;;  %v1736_v28 = vld [vmem:[#allocation5 + $0x9b0] sm:$0xff] }
 0x127   : > { %1923 = vmatmul.mubr.f32.gmra.mrb[12].mxu1 %v11239_v50  ;;  %1006 = vmatprep.mubr.f32.mxu0 %v8510_v20  ;;  %v8749_v20 = vpack.c.bf16 %v799_v12, %v797_v11  ;;  %v813_v11 = vld [vmem:[#allocation5 + $0x3a8] sm:$0xff]  ;;  %v815_v12 = vld [vmem:[#allocation5 + $0x3b8] sm:$0xff] }
 0x128   : > { %1928 = vmatprep.mubr.f32.mxu1 %v8512_v51  ;;  %8740 = vmatpush1.bf16.msra.mxu0 %v8739_v52  ;;  %v8947_v52 = vpack.c.bf16 %v1724_v42, %v1722_v40  ;;  %v8765_v21 = vpack.c.bf16 %v815_v12, %v813_v11  ;;  %v816_v40 = vld [vmem:[#allocation5 + $0x3c0] sm:$0xff]  ;;  %v11299_v11 = vld [vmem:[%s11193_s2 + $0xd8] sm:$0xff] }
 0x129   : > { %8932 = vmatpush1.bf16.msra.mxu1 %v8931_v53  ;;  %8742 = vmatprep.subr.bf16.mxu0 %v8741_v54  ;;  %v8757_v53 = vpack.c.bf16 %v807_v45, %v805_v44  ;;  %v804_v54 = vld [vmem:[#allocation5 + $0x360] sm:$0xff]  ;;  %v1740_v45 = vld [vmem:[#allocation5 + $0x9d0] sm:$0xff] }
 0x12a   : > { %1007 = vmatmul.mubr.f32.gmra.mrb[14].mxu0 %v11233_v35  ;;  %8934 = vmatprep.subr.bf16.mxu1 %v8933_v59  ;;  %v1728_v59 = vld [vmem:[#allocation5 + $0x970] sm:$0xff]  ;;  %v1738_v42 = vld [vmem:[#allocation5 + $0x9c0] sm:$0xff] }
 0x12b   : > { %1929 = vmatmul.mubr.f32.gmra.mrb[14].mxu1 %v11245_v1  ;;  %1012 = vmatprep.mubr.f32.mxu0 %v8511_v36  ;;  %v8943_v36 = vpack.c.bf16 %v1720_v25, %v1718_v23  ;;  %v814_v23 = vld [vmem:[#allocation5 + $0x3b0] sm:$0xff]  ;;  %v8957_v25 = vpack.c.bf16 %v1737_v14, %v1735_v13  ;;  %v8522_v12 = vld [vmem:[%s11193_s2 + $0xe1] sm:$0xff] }
 0x12c   : > { %1934 = vmatprep.mubr.f32.mxu1 %v8513_v2  ;;  %8744 = vmatpush1.bf16.msra.mxu0 %v8743_v27  ;;  %v8759_v27 = vpack.c.bf16 %v806_v55, %v804_v54  ;;  %v8963_v55 = vpack.c.bf16 %v1740_v45, %v1738_v42  ;;  %v11305_v13 = vld [vmem:[%s11193_s2 + $0xe0] sm:$0xff]  ;;  %v8523_v14 = vld [vmem:[%s11193_s2 + $0xf1] sm:$0xff]  ;;  %v833_v45 = vld [vmem:[#allocation5 + $0x448] sm:$0xff] }
 0x12d   : > { %8936 = vmatpush1.bf16.msra.mxu1 %v8935_v3  ;;  %8746 = vmatprep.subr.bf16.mxu0 %v8745_v4  ;;  %v8951_v3 = vpack.c.bf16 %v1728_v59, %v1726_v57  ;;  %v8761_v4 = vpack.c.bf16 %v811_v61, %v809_v60  ;;  %v8773_v57 = vpack.c.bf16 %v823_v47, %v821_v46  ;;  %v822_v59 = vld [vmem:[#allocation5 + $0x3f0] sm:$0xff]  ;;  %v1742_v60 = vld [vmem:[#allocation5 + $0x9e0] sm:$0xff] }
 0x12e   : > { %1013 = vmatmul.mubr.f32.gmra.mrb[16].mxu0 %v11239_v50  ;;  %8938 = vmatprep.subr.bf16.mxu1 %v8937_v9  ;;  %v8953_v9 = vpack.c.bf16 %v1733_v63, %v1731_v62  ;;  %v1744_v62 = vld [vmem:[#allocation5 + $0x9f0] sm:$0xff]  ;;  %v825_v63 = vld [vmem:[#allocation5 + $0x408] sm:$0xff] }
 0x12f   : > { %1935 = vmatmul.mubr.f32.gmra.mrb[16].mxu1 %v11251_v15  ;;  %1018 = vmatprep.mubr.f32.mxu0 %v8512_v51  ;;  %v8755_v51 = vpack.c.bf16 %v802_v39, %v800_v38  ;;  %v8769_v39 = vpack.c.bf16 %v819_v30, %v817_v29  ;;  %v614_v29 = vld [vmem:[%s11193_s2 + $0x2] sm:$0xff]  ;;  %v1752_v42 = vld [vmem:[#allocation5 + $0xa30] sm:$0xff] }
 0x130   : > { %1940 = vmatprep.mubr.f32.mxu1 %v8514_v16  ;;  %8748 = vmatpush1.bf16.msra.mxu0 %v8747_v17  ;;  %v8518_v17 = vld [vmem:[%s11193_s2 + $0xb1] sm:$0xff] }
 0x131   : > { %8940 = vmatpush1.bf16.msra.mxu1 %v8939_v18  ;;  %8750 = vmatprep.subr.bf16.mxu0 %v8749_v20  ;;  %v8763_v18 = vpack.c.bf16 %v810_v7, %v808_v6  ;;  %v8955_v20 = vpack.c.bf16 %v1732_v10, %v1730_v8  ;;  %v8521_v7 = vld [vmem:[%s11193_s2 + $0xd9] sm:$0xff]  ;;  %v8967_v8 = vpack.c.bf16 %v1744_v62, %v1742_v60  ;;  %v615_v46 = vld [vmem:[%s11193_s2 + $0xa] sm:$0xff] }
 0x132   : > { %1019 = vmatmul.mubr.f32.gmra.mrb[18].mxu0 %v11245_v1  ;;  %8942 = vmatprep.subr.bf16.mxu1 %v8941_v24  ;;  %v1734_v24 = vld [vmem:[#allocation5 + $0x9a0] sm:$0xff]  ;;  %v837_v62 = vld [vmem:[#allocation5 + $0x468] sm:$0xff] }
 0x133   : > { %1941 = vmatmul.mubr.f32.gmra.mrb[18].mxu1 %v11257_v32  ;;  %1024 = vmatprep.mubr.f32.mxu0 %v8513_v2  ;;  %v8517_v2 = vld [vmem:[%s11193_s2 + $0xa9] sm:$0xff]  ;;  %v8959_v38 = vpack.c.bf16 %v1736_v28, %v1734_v24  ;;  %v831_v28 = vld [vmem:[#allocation5 + $0x438] sm:$0xff] }
 0x134   : > { %1946 = vmatprep.mubr.f32.mxu1 %v8515_v33  ;;  %8752 = vmatpush1.bf16.msra.mxu0 %v8751_v34  ;;  %v11281_v34 = vld [vmem:[%s11193_s2 + $0xb0] sm:$0xff] }
 0x135   : > { %8944 = vmatpush1.bf16.msra.mxu1 %v8943_v36  ;;  %8754 = vmatprep.subr.bf16.mxu0 %v8753_v37  ;;  %v8519_v36 = vld [vmem:[%s11193_s2 + $0xc1] sm:$0xff]  ;;  %v8767_v37 = vpack.c.bf16 %v814_v23, %v812_v22  ;;  %v826_v22 = vld [vmem:[#allocation5 + $0x410] sm:$0xff] }
 0x136   : > { %1025 = vmatmul.mubr.f32.gmra.mrb[20].mxu0 %v11251_v15  ;;  %8946 = vmatprep.subr.bf16.mxu1 %v8945_v41  ;;  %v818_v41 = vld [vmem:[#allocation5 + $0x3d0] sm:$0xff]  ;;  %v1746_v23 = vld [vmem:[#allocation5 + $0xa00] sm:$0xff] }
 0x137   : > { %1947 = vmatmul.mubr.f32.gmra.mrb[20].mxu1 %v11263_v48  ;;  %1030 = vmatprep.mubr.f32.mxu0 %v8514_v16  ;;  %v11275_v16 = vld [vmem:[%s11193_s2 + $0xa8] sm:$0xff]  ;;  %v8771_v54 = vpack.c.bf16 %v818_v41, %v816_v40  ;;  %v1748_v24 = vld [vmem:[#allocation5 + $0xa10] sm:$0xff]  ;;  %v1750_v41 = vld [vmem:[#allocation5 + $0xa20] sm:$0xff] }
 0x138   : > { %1952 = vmatprep.mubr.f32.mxu1 %v8516_v49  ;;  %8756 = vmatpush1.bf16.msra.mxu0 %v8755_v51  ;;  %v1745_v51 = vld [vmem:[#allocation5 + $0x9f8] sm:$0xff] }
 0x139   : > { %8948 = vmatpush1.bf16.msra.mxu1 %v8947_v52  ;;  %8758 = vmatprep.subr.bf16.mxu0 %v8757_v53  ;;  %v11287_v52 = vld [vmem:[%s11193_s2 + $0xc0] sm:$0xff]  ;;  %v8520_v53 = vld [vmem:[%s11193_s2 + $0xc9] sm:$0xff] }
 0x13a   : > { %1031 = vmatmul.mubr.f32.gmra.mrb[22].mxu0 %v11257_v32  ;;  %8950 = vmatprep.subr.bf16.mxu1 %v8949_v58  ;;  %v820_v58 = vld [vmem:[#allocation5 + $0x3e0] sm:$0xff] }
 0x13b   : > { %1953 = vmatmul.mubr.f32.gmra.mrb[22].mxu1 %v11269_v0  ;;  %1036 = vmatprep.mubr.f32.mxu0 %v8515_v33  ;;  %v1741_v33 = vld [vmem:[#allocation5 + $0x9d8] sm:$0xff]  ;;  %v8775_v6 = vpack.c.bf16 %v822_v59, %v820_v58  ;;  %v834_v58 = vld [vmem:[#allocation5 + $0x450] sm:$0xff]  ;;  %v1754_v59 = vld [vmem:[#allocation5 + $0xa40] sm:$0xff] }
 0x13c   : > { %1958 = vmatprep.mubr.f32.mxu1 %v8517_v2  ;;  %8760 = vmatpush1.bf16.msra.mxu0 %v8759_v27  ;;  %v8961_v44 = vpack.c.bf16 %v1741_v33, %v1739_v31  ;;  %v1747_v27 = vld [vmem:[#allocation5 + $0xa08] sm:$0xff]  ;;  %v1753_v33 = vld [vmem:[#allocation5 + $0xa38] sm:$0xff] }
 0x13d   : > { %8952 = vmatpush1.bf16.msra.mxu1 %v8951_v3  ;;  %8762 = vmatprep.subr.bf16.mxu0 %v8761_v4  ;;  %v1749_v3 = vld [vmem:[#allocation5 + $0xa18] sm:$0xff]  ;;  %v11293_v4 = vld [vmem:[%s11193_s2 + $0xc8] sm:$0xff] }
 0x13e   : > { %1037 = vmatmul.mubr.f32.gmra.mrb[24].mxu0 %v11263_v48  ;;  %8954 = vmatprep.subr.bf16.mxu1 %v8953_v9  ;;  %v8969_v10 = vpack.c.bf16 %v1749_v3, %v1747_v27  ;;  %v1751_v31 = vld [vmem:[#allocation5 + $0xa28] sm:$0xff]  ;;  %v11337_v27 = vld [vmem:[%s11193_s2 + $0x32] sm:$0xff] }
 0x13f   : > { %1959 = vmatmul.mubr.f32.gmra.mrb[24].mxu1 %v11275_v16  ;;  %1042 = vmatprep.mubr.f32.mxu0 %v8516_v49  ;;  %v1743_v49 = vld [vmem:[#allocation5 + $0x9e8] sm:$0xff] }
 0x140   : > { %1964 = vmatprep.mubr.f32.mxu1 %v8518_v17  ;;  %8764 = vmatpush1.bf16.msra.mxu0 %v8763_v18  ;;  %v8965_v61 = vpack.c.bf16 %v1745_v51, %v1743_v49  ;;  %v8524_v18 = vld [vmem:[%s11193_s2 + $0xf9] sm:$0xff]  ;;  %v1755_v49 = vld [vmem:[#allocation5 + $0xa48] sm:$0xff] }
 0x141   : > { %8956 = vmatpush1.bf16.msra.mxu1 %v8955_v20  ;;  %8766 = vmatprep.subr.bf16.mxu0 %v8765_v21  ;;  %v11317_v20 = vld [vmem:[%s11193_s2 + $0xf8] sm:$0xff]  ;;  %v824_v21 = vld [vmem:[#allocation5 + $0x400] sm:$0xff] }
 0x142   : > { %1043 = vmatmul.mubr.f32.gmra.mrb[26].mxu0 %v11269_v0  ;;  %8958 = vmatprep.subr.bf16.mxu1 %v8957_v25  ;;  %v829_v25 = vld [vmem:[#allocation5 + $0x428] sm:$0xff]  ;;  %v8779_v30 = vpack.c.bf16 %v826_v22, %v824_v21  ;;  %v1757_v51 = vld [vmem:[#allocation5 + $0xa58] sm:$0xff] }
 0x143   : > { %1965 = vmatmul.mubr.f32.gmra.mrb[26].mxu1 %v11281_v34  ;;  %1048 = vmatprep.mubr.f32.mxu0 %v8517_v2  ;;  %v827_v2 = vld [vmem:[#allocation5 + $0x418] sm:$0xff]  ;;  %v8781_v40 = vpack.c.bf16 %v831_v28, %v829_v25  ;;  %v8977_v60 = vpack.c.bf16 %v1757_v51, %v1755_v49  ;;  %v1768_v49 = vld [vmem:[#allocation5 + $0xab0] sm:$0xff]  ;;  %v849_v51 = vld [vmem:[#allocation5 + $0x4c8] sm:$0xff] }
 0x144   : > { %1970 = vmatprep.mubr.f32.mxu1 %v8519_v36  ;;  %8768 = vmatpush1.bf16.msra.mxu0 %v8767_v37  ;;  %v8777_v9 = vpack.c.bf16 %v827_v2, %v825_v63  ;;  %v8971_v37 = vpack.c.bf16 %v1748_v24, %v1746_v23  ;;  %v839_v63 = vld [vmem:[#allocation5 + $0x478] sm:$0xff] }
 0x145   : > { %8960 = vmatpush1.bf16.msra.mxu1 %v8959_v38  ;;  %8770 = vmatprep.subr.bf16.mxu0 %v8769_v39  ;;  %v828_v38 = vld [vmem:[#allocation5 + $0x420] sm:$0xff]  ;;  %v830_v39 = vld [vmem:[#allocation5 + $0x430] sm:$0xff]  ;;  %v1761_v2 = vld [vmem:[#allocation5 + $0xa78] sm:$0xff] }
 0x146   : > { %1049 = vmatmul.mubr.f32.gmra.mrb[28].mxu0 %v11275_v16  ;;  %8962 = vmatprep.subr.bf16.mxu1 %v8961_v44  ;;  %v8973_v44 = vpack.c.bf16 %v1753_v33, %v1751_v31  ;;  %v8783_v47 = vpack.c.bf16 %v830_v39, %v828_v38  ;;  %v843_v21 = vld [vmem:[#allocation5 + $0x498] sm:$0xff]  ;;  %v1762_v31 = vld [vmem:[#allocation5 + $0xa80] sm:$0xff]  ;;  %v1764_v33 = vld [vmem:[#allocation5 + $0xa90] sm:$0xff] }
 0x147   : > { %1971 = vmatmul.mubr.f32.gmra.mrb[28].mxu1 %v11287_v52  ;;  %1054 = vmatprep.mubr.f32.mxu0 %v8518_v17  ;;  %v11311_v17 = vld [vmem:[%s11193_s2 + $0xf0] sm:$0xff]  ;;  %v1765_v22 = vld [vmem:[#allocation5 + $0xa98] sm:$0xff]  ;;  %v1767_v39 = vld [vmem:[#allocation5 + $0xaa8] sm:$0xff] }
 0x148   : > { %1976 = vmatprep.mubr.f32.mxu1 %v8520_v53  ;;  %8772 = vmatpush1.bf16.msra.mxu0 %v8771_v54  ;;  %v8975_v54 = vpack.c.bf16 %v1752_v42, %v1750_v41  ;;  %v11345_v23 = vld [vmem:[%s11193_s2 + $0x3a] sm:$0xff]  ;;  %v11352_v41 = vld [vmem:[%s11193_s2 + $0x4a] sm:$0xff] }
 0x149   : > { %8964 = vmatpush1.bf16.msra.mxu1 %v8963_v55  ;;  %8774 = vmatprep.subr.bf16.mxu0 %v8773_v57  ;;  %v832_v57 = vld [vmem:[#allocation5 + $0x440] sm:$0xff]  ;;  %v847_v38 = vld [vmem:[#allocation5 + $0x4b8] sm:$0xff] }
 0x14a   : > { %1055 = vmatmul.mubr.f32.gmra.mrb[30].mxu0 %v11281_v34  ;;  %8966 = vmatprep.subr.bf16.mxu1 %v8965_v61  ;;  %v1756_v61 = vld [vmem:[#allocation5 + $0xa50] sm:$0xff]  ;;  %v8787_v3 = vpack.c.bf16 %v834_v58, %v832_v57  ;;  %v1773_v57 = vld [vmem:[#allocation5 + $0xad8] sm:$0xff] }
 0x14b   : > { %1977 = vmatmul.mubr.f32.gmra.mrb[30].mxu1 %v11293_v4  ;;  %1060 = vmatprep.mubr.f32.mxu0 %v8519_v36  ;;  %v11325_v36 = vld [vmem:[%s11193_s2 + $0x1a] sm:$0xff]  ;;  %v11359_v58 = vld [vmem:[%s11193_s2 + $0x52] sm:$0xff] }
 0x14c   : > { %1982 = vmatprep.mubr.f32.mxu1 %v8521_v7  ;;  %8776 = vmatpush1.bf16.msra.mxu0 %v8775_v6  ;;  %v8979_v6 = vpack.c.bf16 %v1756_v61, %v1754_v59 }
 0x14d   : > { %8968 = vmatpush1.bf16.msra.mxu1 %v8967_v8  ;;  %8778 = vmatprep.subr.bf16.mxu0 %v8777_v9  ;;  %v836_v8 = vld [vmem:[#allocation5 + $0x460] sm:$0xff]  ;;  %v838_v9 = vld [vmem:[#allocation5 + $0x470] sm:$0xff] }
 0x14e   : > { %1061 = vmatmul.mubr.f32.gmra.mrb[32].mxu0 %v11287_v52  ;;  %8970 = vmatprep.subr.bf16.mxu1 %v8969_v10  ;;  %v1758_v10 = vld [vmem:[#allocation5 + $0xa60] sm:$0xff]  ;;  %v8791_v24 = vpack.c.bf16 %v838_v9, %v836_v8  ;;  %v1777_v8 = vld [vmem:[#allocation5 + $0xaf8] sm:$0xff] }
 0x14f   : > { %1983 = vmatmul.mubr.f32.gmra.mrb[32].mxu1 %v11299_v11  ;;  %1066 = vmatprep.mubr.f32.mxu0 %v8520_v53  ;;  %v11331_v53 = vld [vmem:[%s11193_s2 + $0x22] sm:$0xff] }
 0x150   : > { %1988 = vmatprep.mubr.f32.mxu1 %v8522_v12  ;;  %v11366_v9 = vld [vmem:[%s11193_s2 + $0x62] sm:$0xff] }
 0x152   : > { %1067 = vmatmul.mubr.f32.gmra.mrb[34].mxu0 %v11293_v4 }
 0x153   : > { %1989 = vmatmul.mubr.f32.gmra.mrb[34].mxu1 %v11305_v13  ;;  %1072 = vmatprep.mubr.f32.mxu0 %v8521_v7  ;;  %v8789_v7 = vpack.c.bf16 %v839_v63, %v837_v62  ;;  %v848_v62 = vld [vmem:[#allocation5 + $0x4c0] sm:$0xff]  ;;  %v850_v63 = vld [vmem:[#allocation5 + $0x4d0] sm:$0xff] }
 0x154   : > { %1994 = vmatprep.mubr.f32.mxu1 %v8523_v14  ;;  %v1760_v14 = vld [vmem:[#allocation5 + $0xa70] sm:$0xff] }
 0x155   : > { %v8983_v25 = vpack.c.bf16 %v1760_v14, %v1758_v10  ;;  %v8803_v10 = vpack.c.bf16 %v850_v63, %v848_v62  ;;  %v1789_v62 = vld [vmem:[#allocation5 + $0xb58] sm:$0xff]  ;;  %v11387_v63 = vld [vmem:[%s11193_s2 + $0x82] sm:$0xff] }
 0x156   : > { %1073 = vmatmul.mubr.f32.gmra.mrb[36].mxu0 %v11299_v11 }
 0x157   : > { %1995 = vmatmul.mubr.f32.gmra.mrb[36].mxu1 %v11311_v17  ;;  %1078 = vmatprep.mubr.f32.mxu0 %v8522_v12 }
 0x158   : > { %2000 = vmatprep.mubr.f32.mxu1 %v8524_v18  ;;  %v841_v18 = vld [vmem:[#allocation5 + $0x488] sm:$0xff] }
 0x159   : > { %v8793_v28 = vpack.c.bf16 %v843_v21, %v841_v18  ;;  %v852_v18 = vld [vmem:[#allocation5 + $0x4e0] sm:$0xff]  ;;  %v854_v21 = vld [vmem:[#allocation5 + $0x4f0] sm:$0xff] }
 0x15a   : > { %1079 = vmatmul.mubr.f32.gmra.mrb[38].mxu0 %v11305_v13 }
 0x15b   : > { %2001 = vmatmul.mubr.f32.gmra.mrb[38].mxu1 %v11317_v20  ;;  %1149 = vmatprep.mubr.f32.mxu0 %v11202_v26  ;;  %v835_v26 = vld [vmem:[#allocation5 + $0x458] sm:$0xff] }
 0x15c   : > { %2071 = vmatprep.mubr.f32.mxu1 %v11215_v56  ;;  %v8785_v55 = vpack.c.bf16 %v835_v26, %v833_v45  ;;  %v844_v26 = vld [vmem:[#allocation5 + $0x4a0] sm:$0xff] }
 0x15e   : > { %1150 = vmatmul.mubr.f32.vlgmr.msra.gmra.mrb[0].mxu0 %v614_v29  ;;  %v840_v29 = vld [vmem:[#allocation5 + $0x480] sm:$0xff] }
 0x15f   : > { %2072 = vmatmul.mubr.f32.vlgmr.msra.gmra.mrb[0].mxu1 %v11325_v36  ;;  %8780 = vmatpush1.bf16.msra.mxu0 %v8779_v30  ;;  %v842_v30 = vld [vmem:[#allocation5 + $0x490] sm:$0xff] }
 0x160   : > { %8972 = vmatpush1.bf16.msra.mxu1 %v8971_v37  ;;  %1155 = vmatprep.mubr.f32.mxu0 %v11209_v43  ;;  %v1759_v43 = vld [vmem:[#allocation5 + $0xa68] sm:$0xff]  ;;  %v8795_v42 = vpack.c.bf16 %v842_v30, %v840_v29  ;;  %v1781_v29 = vld [vmem:[#allocation5 + $0xb18] sm:$0xff] }
 0x161   : > { %2077 = vmatprep.mubr.f32.mxu1 %v11221_v5  ;;  %8782 = vmatprep.subr.bf16.mxu0 %v8781_v40  ;;  %v8981_v12 = vpack.c.bf16 %v1761_v2, %v1759_v43  ;;  %v845_v37 = vld [vmem:[#allocation5 + $0x4a8] sm:$0xff]  ;;  %v1769_v40 = vld [vmem:[#allocation5 + $0xab8] sm:$0xff]  ;;  %v1770_v43 = vld [vmem:[#allocation5 + $0xac0] sm:$0xff] }
 0x162   : > { %1156 = vmatmul.mubr.f32.gmra.mrb[2].mxu0 %v615_v46  ;;  %8974 = vmatprep.subr.bf16.mxu1 %v8973_v44  ;;  %v8987_v44 = vpack.c.bf16 %v1764_v33, %v1762_v31  ;;  %v8797_v45 = vpack.c.bf16 %v847_v38, %v845_v37  ;;  %v846_v46 = vld [vmem:[#allocation5 + $0x4b0] sm:$0xff]  ;;  %v8807_v31 = vpack.c.bf16 %v854_v21, %v852_v18  ;;  %v856_v37 = vld [vmem:[#allocation5 + $0x500] sm:$0xff]  ;;  %v1793_v18 = vld [vmem:[#allocation5 + $0xb78] sm:$0xff] }
 0x163   : > { %2078 = vmatmul.mubr.f32.gmra.mrb[2].mxu1 %v11331_v53  ;;  %8784 = vmatpush1.bf16.msra.mxu0 %v8783_v47  ;;  %v1766_v47 = vld [vmem:[#allocation5 + $0xaa0] sm:$0xff]  ;;  %v8799_v59 = vpack.c.bf16 %v846_v46, %v844_v26  ;;  %v1772_v2 = vld [vmem:[#allocation5 + $0xad0] sm:$0xff]  ;;  %v1785_v26 = vld [vmem:[#allocation5 + $0xb38] sm:$0xff] }
 0x164   : > { %8976 = vmatpush1.bf16.msra.mxu1 %v8975_v54  ;;  %1161 = vmatprep.mubr.f32.mxu0 %v11215_v56  ;;  %v1763_v56 = vld [vmem:[#allocation5 + $0xa88] sm:$0xff]  ;;  %v851_v54 = vld [vmem:[#allocation5 + $0x4d8] sm:$0xff]  ;;  %v858_v38 = vld [vmem:[#allocation5 + $0x510] sm:$0xff] }
 0x165   : > { %2083 = vmatprep.mubr.f32.mxu1 %v11227_v19  ;;  %8786 = vmatprep.subr.bf16.mxu0 %v8785_v55  ;;  %v1771_v55 = vld [vmem:[#allocation5 + $0xac8] sm:$0xff]  ;;  %v8801_v61 = vpack.c.bf16 %v851_v54, %v849_v51  ;;  %v11380_v46 = vld [vmem:[%s11193_s2 + $0x7a] sm:$0xff]  ;;  %v862_v54 = vld [vmem:[#allocation5 + $0x530] sm:$0xff] }
 0x166   : > { %1162 = vmatmul.mubr.f32.gmra.mrb[4].mxu0 %v11325_v36  ;;  %8978 = vmatprep.subr.bf16.mxu1 %v8977_v60  ;;  %v8991_v60 = vpack.c.bf16 %v1768_v49, %v1766_v47  ;;  %v11373_v30 = vld [vmem:[%s11193_s2 + $0x6a] sm:$0xff]  ;;  %v8811_v47 = vpack.c.bf16 %v858_v38, %v856_v37  ;;  %v860_v51 = vld [vmem:[#allocation5 + $0x520] sm:$0xff]  ;;  %v11394_v21 = vld [vmem:[%s11193_s2 + $0x92] sm:$0xff] }
 0x167   : > { %2084 = vmatmul.mubr.f32.gmra.mrb[4].mxu1 %v11337_v27  ;;  %1167 = vmatprep.mubr.f32.mxu0 %v11221_v5  ;;  %v8985_v5 = vpack.c.bf16 %v1765_v22, %v1763_v56  ;;  %v1774_v56 = vld [vmem:[#allocation5 + $0xae0] sm:$0xff]  ;;  %v1776_v22 = vld [vmem:[#allocation5 + $0xaf0] sm:$0xff]  ;;  %v1797_v37 = vld [vmem:[#allocation5 + $0xb98] sm:$0xff] }
 0x168   : > { %8788 = vmatpush1.bf16.msra.mxu0 %v8787_v3  ;;  %2089 = vmatprep.mubr.f32.mxu1 %v11233_v35  ;;  %v853_v3 = vld [vmem:[#allocation5 + $0x4e8] sm:$0xff]  ;;  %v11401_v38 = vld [vmem:[%s11193_s2 + $0x9a] sm:$0xff] }
 0x169   : > { %8980 = vmatpush1.bf16.msra.mxu1 %v8979_v6  ;;  %8790 = vmatprep.subr.bf16.mxu0 %v8789_v7  ;;  %v855_v6 = vld [vmem:[#allocation5 + $0x4f8] sm:$0xff]  ;;  %v1775_v7 = vld [vmem:[#allocation5 + $0xae8] sm:$0xff] }
 0x16a   : > { %1168 = vmatmul.mubr.f32.gmra.mrb[6].mxu0 %v11331_v53  ;;  %8982 = vmatprep.subr.bf16.mxu1 %v8981_v12  ;;  %v8995_v12 = vpack.c.bf16 %v1772_v2, %v1770_v43  ;;  %v8805_v14 = vpack.c.bf16 %v855_v6, %v853_v3  ;;  %v8815_v43 = vpack.c.bf16 %v862_v54, %v860_v51  ;;  %v864_v3 = vld [vmem:[#allocation5 + $0x540] sm:$0xff]  ;;  %v866_v6 = vld [vmem:[#allocation5 + $0x550] sm:$0xff]  ;;  %v1801_v51 = vld [vmem:[#allocation5 + $0xbb8] sm:$0xff] }
 0x16b   : > { %2090 = vmatmul.mubr.f32.gmra.mrb[6].mxu1 %v11345_v23  ;;  %1173 = vmatprep.mubr.f32.mxu0 %v11227_v19  ;;  %v8989_v19 = vpack.c.bf16 %v1769_v40, %v1767_v39  ;;  %v1778_v39 = vld [vmem:[#allocation5 + $0xb00] sm:$0xff]  ;;  %v1780_v40 = vld [vmem:[#allocation5 + $0xb10] sm:$0xff] }
 0x16c   : > { %2095 = vmatprep.mubr.f32.mxu1 %v11239_v50  ;;  %8792 = vmatpush1.bf16.msra.mxu0 %v8791_v24  ;;  %v857_v24 = vld [vmem:[#allocation5 + $0x508] sm:$0xff] }
 0x16d   : > { %8984 = vmatpush1.bf16.msra.mxu1 %v8983_v25  ;;  %8794 = vmatprep.subr.bf16.mxu0 %v8793_v28  ;;  %v859_v25 = vld [vmem:[#allocation5 + $0x518] sm:$0xff]  ;;  %v1779_v28 = vld [vmem:[#allocation5 + $0xb08] sm:$0xff] }
 0x16e   : > { %1174 = vmatmul.mubr.f32.gmra.mrb[8].mxu0 %v11337_v27  ;;  %8986 = vmatprep.subr.bf16.mxu1 %v8985_v5  ;;  %v8999_v5 = vpack.c.bf16 %v1776_v22, %v1774_v56  ;;  %v8809_v33 = vpack.c.bf16 %v859_v25, %v857_v24  ;;  %v8819_v56 = vpack.c.bf16 %v866_v6, %v864_v3  ;;  %v868_v24 = vld [vmem:[#allocation5 + $0x560] sm:$0xff]  ;;  %v870_v25 = vld [vmem:[#allocation5 + $0x570] sm:$0xff]  ;;  %v1805_v3 = vld [vmem:[#allocation5 + $0xbd8] sm:$0xff] }
 0x16f   : > { %2096 = vmatmul.mubr.f32.gmra.mrb[8].mxu1 %v11352_v41  ;;  %1179 = vmatprep.mubr.f32.mxu0 %v11233_v35  ;;  %v8993_v35 = vpack.c.bf16 %v1773_v57, %v1771_v55  ;;  %v1782_v55 = vld [vmem:[#allocation5 + $0xb20] sm:$0xff]  ;;  %v1784_v57 = vld [vmem:[#allocation5 + $0xb30] sm:$0xff] }
 0x170   : > { %2101 = vmatprep.mubr.f32.mxu1 %v11245_v1  ;;  %8796 = vmatpush1.bf16.msra.mxu0 %v8795_v42  ;;  %v861_v42 = vld [vmem:[#allocation5 + $0x528] sm:$0xff]  ;;  %v11415_v6 = vld [vmem:[%s11193_s2 + $0xb2] sm:$0xff] }
 0x171   : > { %8988 = vmatpush1.bf16.msra.mxu1 %v8987_v44  ;;  %8798 = vmatprep.subr.bf16.mxu0 %v8797_v45  ;;  %v863_v44 = vld [vmem:[#allocation5 + $0x538] sm:$0xff]  ;;  %v1783_v45 = vld [vmem:[#allocation5 + $0xb28] sm:$0xff] }
 0x172   : > { %1180 = vmatmul.mubr.f32.gmra.mrb[10].mxu0 %v11345_v23  ;;  %8990 = vmatprep.subr.bf16.mxu1 %v8989_v19  ;;  %v9003_v19 = vpack.c.bf16 %v1780_v40, %v1778_v39  ;;  %v8813_v49 = vpack.c.bf16 %v863_v44, %v861_v42  ;;  %v8823_v39 = vpack.c.bf16 %v870_v25, %v868_v24  ;;  %v872_v42 = vld [vmem:[#allocation5 + $0x580] sm:$0xff]  ;;  %v874_v44 = vld [vmem:[#allocation5 + $0x590] sm:$0xff]  ;;  %v1809_v24 = vld [vmem:[#allocation5 + $0xbf8] sm:$0xff] }
 0x173   : > { %2102 = vmatmul.mubr.f32.gmra.mrb[10].mxu1 %v11359_v58  ;;  %1185 = vmatprep.mubr.f32.mxu0 %v11239_v50  ;;  %v8997_v50 = vpack.c.bf16 %v1777_v8, %v1775_v7  ;;  %v1786_v7 = vld [vmem:[#allocation5 + $0xb40] sm:$0xff]  ;;  %v1788_v8 = vld [vmem:[#allocation5 + $0xb50] sm:$0xff] }
 0x174   : > { %2107 = vmatprep.mubr.f32.mxu1 %v11251_v15  ;;  %8800 = vmatpush1.bf16.msra.mxu0 %v8799_v59  ;;  %v865_v59 = vld [vmem:[#allocation5 + $0x548] sm:$0xff] }
 0x175   : > { %8992 = vmatpush1.bf16.msra.mxu1 %v8991_v60  ;;  %8802 = vmatprep.subr.bf16.mxu0 %v8801_v61  ;;  %v867_v60 = vld [vmem:[#allocation5 + $0x558] sm:$0xff]  ;;  %v1787_v61 = vld [vmem:[#allocation5 + $0xb48] sm:$0xff] }
 0x176   : > { %1186 = vmatmul.mubr.f32.gmra.mrb[12].mxu0 %v11352_v41  ;;  %8994 = vmatprep.subr.bf16.mxu1 %v8993_v35  ;;  %v9007_v35 = vpack.c.bf16 %v1784_v57, %v1782_v55  ;;  %v8817_v2 = vpack.c.bf16 %v867_v60, %v865_v59  ;;  %v11408_v54 = vld [vmem:[%s11193_s2 + $0xaa] sm:$0xff]  ;;  %v8827_v55 = vpack.c.bf16 %v874_v44, %v872_v42  ;;  %v876_v59 = vld [vmem:[#allocation5 + $0x5a0] sm:$0xff]  ;;  %v11450_v44 = vld [vmem:[%s11193_s2 + $0xf2] sm:$0xff] }
 0x177   : > { %2108 = vmatmul.mubr.f32.gmra.mrb[12].mxu1 %v11366_v9  ;;  %1191 = vmatprep.mubr.f32.mxu0 %v11245_v1  ;;  %v9001_v1 = vpack.c.bf16 %v1781_v29, %v1779_v28  ;;  %v1790_v28 = vld [vmem:[#allocation5 + $0xb60] sm:$0xff]  ;;  %v1792_v29 = vld [vmem:[#allocation5 + $0xb70] sm:$0xff] }
 0x178   : > { %2113 = vmatprep.mubr.f32.mxu1 %v11257_v32  ;;  %8804 = vmatpush1.bf16.msra.mxu0 %v8803_v10  ;;  %v869_v10 = vld [vmem:[#allocation5 + $0x568] sm:$0xff]  ;;  %v878_v60 = vld [vmem:[#allocation5 + $0x5b0] sm:$0xff] }
 0x179   : > { %8996 = vmatpush1.bf16.msra.mxu1 %v8995_v12  ;;  %8806 = vmatprep.subr.bf16.mxu0 %v8805_v14  ;;  %v871_v12 = vld [vmem:[#allocation5 + $0x578] sm:$0xff]  ;;  %v1791_v14 = vld [vmem:[#allocation5 + $0xb68] sm:$0xff] }
 0x17a   : > { %1192 = vmatmul.mubr.f32.gmra.mrb[14].mxu0 %v11359_v58  ;;  %8998 = vmatprep.subr.bf16.mxu1 %v8997_v50  ;;  %v9011_v50 = vpack.c.bf16 %v1788_v8, %v1786_v7  ;;  %v8821_v22 = vpack.c.bf16 %v871_v12, %v869_v10  ;;  %v8831_v7 = vpack.c.bf16 %v878_v60, %v876_v59  ;;  %v880_v10 = vld [vmem:[#allocation5 + $0x5c0] sm:$0xff]  ;;  %v882_v12 = vld [vmem:[#allocation5 + $0x5d0] sm:$0xff]  ;;  %v10832_v59 = vmov 0.0  }
 0x17b   : > { %2114 = vmatmul.mubr.f32.gmra.mrb[14].mxu1 %v11373_v30  ;;  %1197 = vmatprep.mubr.f32.mxu0 %v11251_v15  ;;  %v9005_v15 = vpack.c.bf16 %v1785_v26, %v1783_v45  ;;  %v1794_v45 = vld [vmem:[#allocation5 + $0xb80] sm:$0xff]  ;;  %v1796_v26 = vld [vmem:[#allocation5 + $0xb90] sm:$0xff]  ;;  %2421 = vst [vmem:[#allocation3 + $0x48] sm:$0xff] %v10832_v59  ;;  %2423 = vst [vmem:[#allocation3 + $0x88] sm:$0xff] %v10832_v59  ;;  %v890_v60 = vlaneseq }
 0x17c   : > { %2119 = vmatprep.mubr.f32.mxu1 %v11263_v48  ;;  %8808 = vmatpush1.bf16.msra.mxu0 %v8807_v31  ;;  %v873_v31 = vld [vmem:[#allocation5 + $0x588] sm:$0xff]  ;;  %2425 = vst [vmem:[#allocation3 + $0xc8] sm:$0xff] %v10832_v59  ;;  %2427 = vst [vmem:[#allocation3 + $0x108] sm:$0xff] %v10832_v59 }
 0x17d   : > { %9000 = vmatpush1.bf16.msra.mxu1 %v8999_v5  ;;  %8810 = vmatprep.subr.bf16.mxu0 %v8809_v33  ;;  %v875_v5 = vld [vmem:[#allocation5 + $0x598] sm:$0xff]  ;;  %v1795_v33 = vld [vmem:[#allocation5 + $0xb88] sm:$0xff]  ;;  %2429 = vst [vmem:[#allocation3 + $0x148] sm:$0xff] %v10832_v59  ;;  %2431 = vst [vmem:[#allocation3 + $0x188] sm:$0xff] %v10832_v59 }
 0x17e   : > { %1198 = vmatmul.mubr.f32.gmra.mrb[16].mxu0 %v11366_v9  ;;  %9002 = vmatprep.subr.bf16.mxu1 %v9001_v1  ;;  %v9015_v1 = vpack.c.bf16 %v1792_v29, %v1790_v28  ;;  %v8825_v40 = vpack.c.bf16 %v875_v5, %v873_v31  ;;  %v11422_v25 = vld [vmem:[%s11193_s2 + $0xc2] sm:$0xff]  ;;  %v8835_v28 = vpack.c.bf16 %v882_v12, %v880_v10  ;;  %v886_v5 = vld [vmem:[#allocation5 + $0x5f0] sm:$0xff] }
 0x17f   : > { %2120 = vmatmul.mubr.f32.gmra.mrb[16].mxu1 %v11380_v46  ;;  %1203 = vmatprep.mubr.f32.mxu0 %v11257_v32  ;;  %v9009_v32 = vpack.c.bf16 %v1789_v62, %v1787_v61  ;;  %v1798_v61 = vld [vmem:[#allocation5 + $0xba0] sm:$0xff]  ;;  %v1800_v62 = vld [vmem:[#allocation5 + $0xbb0] sm:$0xff]  ;;  %2433 = vst [vmem:[#allocation3 + $0x1c8] sm:$0xff] %v10832_v59  ;;  %2435 = vst [vmem:[#allocation3 + $0x208] sm:$0xff] %v10832_v59 }
 0x180   : > { %2125 = vmatprep.mubr.f32.mxu1 %v11269_v0  ;;  %8812 = vmatpush1.bf16.msra.mxu0 %v8811_v47  ;;  %v877_v47 = vld [vmem:[#allocation5 + $0x5a8] sm:$0xff]  ;;  %v884_v31 = vld [vmem:[#allocation5 + $0x5e0] sm:$0xff]  ;;  %2437 = vst [vmem:[#allocation3 + $0x248] sm:$0xff] %v10832_v59  ;;  %2440 = vst [vmem:[#allocation3 + $0x70] sm:$0xff] %v10832_v59 }
 0x181   : > { %9004 = vmatpush1.bf16.msra.mxu1 %v9003_v19  ;;  %8814 = vmatprep.subr.bf16.mxu0 %v8813_v49  ;;  %v879_v19 = vld [vmem:[#allocation5 + $0x5b8] sm:$0xff]  ;;  %v1799_v49 = vld [vmem:[#allocation5 + $0xba8] sm:$0xff]  ;;  %2442 = vst [vmem:[#allocation3 + $0xb0] sm:$0xff] %v10832_v59  ;;  %2444 = vst [vmem:[#allocation3 + $0xf0] sm:$0xff] %v10832_v59 }
 0x182   : > { %1204 = vmatmul.mubr.f32.gmra.mrb[18].mxu0 %v11373_v30  ;;  %9006 = vmatprep.subr.bf16.mxu1 %v9005_v15  ;;  %v9019_v15 = vpack.c.bf16 %v1796_v26, %v1794_v45  ;;  %v8829_v57 = vpack.c.bf16 %v879_v19, %v877_v47  ;;  %v11443_v42 = vld [vmem:[%s11193_s2 + $0xe2] sm:$0xff]  ;;  %v8564_v45 = vld [vmem:[%s11193_s2 + $0x110] sm:$0xff]  ;;  %v8566_v26 = vld [vmem:[%s11193_s2 + $0x39] sm:$0xff]  ;;  %2446 = vst [vmem:[#allocation3 + $0x130] sm:$0xff] %v10832_v59 }
 0x183   : > { %2126 = vmatmul.mubr.f32.gmra.mrb[18].mxu1 %v11387_v63  ;;  %1209 = vmatprep.mubr.f32.mxu0 %v11263_v48  ;;  %v9013_v48 = vpack.c.bf16 %v1793_v18, %v1791_v14  ;;  %v1802_v14 = vld [vmem:[#allocation5 + $0xbc0] sm:$0xff]  ;;  %v1804_v18 = vld [vmem:[#allocation5 + $0xbd0] sm:$0xff]  ;;  %2448 = vst [vmem:[#allocation3 + $0x170] sm:$0xff] %v10832_v59  ;;  %2450 = vst [vmem:[#allocation3 + $0x1b0] sm:$0xff] %v10832_v59 }
 0x184   : > { %2131 = vmatprep.mubr.f32.mxu1 %v11275_v16  ;;  %8816 = vmatpush1.bf16.msra.mxu0 %v8815_v43  ;;  %v881_v43 = vld [vmem:[#allocation5 + $0x5c8] sm:$0xff]  ;;  %v8579_v47 = vld [vmem:[%s11193_s2 + $0xd9] sm:$0xff]  ;;  %2452 = vst [vmem:[#allocation3 + $0x1f0] sm:$0xff] %v10832_v59  ;;  %2454 = vst [vmem:[#allocation3 + $0x230] sm:$0xff] %v10832_v59 }
 0x185   : > { %9008 = vmatpush1.bf16.msra.mxu1 %v9007_v35  ;;  %8818 = vmatprep.subr.bf16.mxu0 %v8817_v2  ;;  %v883_v35 = vld [vmem:[#allocation5 + $0x5d8] sm:$0xff]  ;;  %v1803_v2 = vld [vmem:[#allocation5 + $0xbc8] sm:$0xff]  ;;  %2456 = vst [vmem:[#allocation3 + $0x270] sm:$0xff] %v10832_v59  ;;  %2459 = vst [vmem:[#allocation3 + $0x288] sm:$0xff] %v10832_v59 }
 0x186   : > { %1210 = vmatmul.mubr.f32.gmra.mrb[20].mxu0 %v11380_v46  ;;  %9010 = vmatprep.subr.bf16.mxu1 %v9009_v32  ;;  %v9023_v32 = vpack.c.bf16 %v1800_v62, %v1798_v61  ;;  %v8833_v8 = vpack.c.bf16 %v883_v35, %v881_v43  ;;  %v8580_v19 = vld [vmem:[%s11193_s2 + $0xe1] sm:$0xff]  ;;  %2461 = vst [vmem:[#allocation3 + $0x2c8] sm:$0xff] %v10832_v59  ;;  %2463 = vst [vmem:[#allocation3 + $0x308] sm:$0xff] %v10832_v59  ;;  %v891_v61 = vshrl.u32 %v890_v60, 7 }
 0x187   : > { %2132 = vmatmul.mubr.f32.gmra.mrb[20].mxu1 %v11394_v21  ;;  %1215 = vmatprep.mubr.f32.mxu0 %v11269_v0  ;;  %v9017_v0 = vpack.c.bf16 %v1797_v37, %v1795_v33  ;;  %v1808_v37 = vld [vmem:[#allocation5 + $0xbf0] sm:$0xff]  ;;  %2465 = vst [vmem:[#allocation3 + $0x348] sm:$0xff] %v10832_v59  ;;  %2467 = vst [vmem:[#allocation3 + $0x388] sm:$0xff] %v10832_v59  ;;  %v888_v62 = vld [vmem:[#allocation8] sm:$0x3] }
 0x188   : > { %2137 = vmatprep.mubr.f32.mxu1 %v11281_v34  ;;  %8820 = vmatpush1.bf16.msra.mxu0 %v8819_v56  ;;  %v885_v56 = vld [vmem:[#allocation5 + $0x5e8] sm:$0xff]  ;;  %2469 = vst [vmem:[#allocation3 + $0x3c8] sm:$0xff] %v10832_v59  ;;  %2471 = vst [vmem:[#allocation3 + $0x408] sm:$0xff] %v10832_v59  ;;  %v11525_v43 = vsub.s32 1, %v891_v61  ;;  %v1810_v35 = vld [vmem:[#allocation8] sm:$0x3] }
 0x189   : > { %9012 = vmatpush1.bf16.msra.mxu1 %v9011_v50  ;;  %8822 = vmatprep.subr.bf16.mxu0 %v8821_v22  ;;  %v887_v50 = vld [vmem:[#allocation5 + $0x5f8] sm:$0xff]  ;;  %v1807_v22 = vld [vmem:[#allocation5 + $0xbe8] sm:$0xff]  ;;  %2473 = vst [vmem:[#allocation3 + $0x448] sm:$0xff] %v10832_v59  ;;  %2475 = vst [vmem:[#allocation3 + $0x488] sm:$0xff] %v10832_v59 }
 0x18a   : > { %1216 = vmatmul.mubr.f32.gmra.mrb[22].mxu0 %v11387_v63  ;;  %9014 = vmatprep.subr.bf16.mxu1 %v9013_v48  ;;  %v9027_v48 = vpack.c.bf16 %v1804_v18, %v1802_v14  ;;  %v8837_v29 = vpack.c.bf16 %v887_v50, %v885_v56  ;;  %v9029_v33 = vpack.c.bf16 %v1809_v24, %v1807_v22 }
 0x18b   : > { %2138 = vmatmul.mubr.f32.gmra.mrb[22].mxu1 %v11401_v38  ;;  %1221 = vmatprep.mubr.f32.mxu0 %v11275_v16  ;;  %v9021_v16 = vpack.c.bf16 %v1801_v51, %v1799_v49  ;;  %v8581_v49 = vld [vmem:[%s11193_s2 + $0xf1] sm:$0xff]  ;;  %v8582_v51 = vld [vmem:[%s11193_s2 + $0xf9] sm:$0xff]  ;;  %2478 = vst [vmem:[#allocation3 + $0x2b0] sm:$0xff] %v10832_v59  ;;  %2480 = vst [vmem:[#allocation3 + $0x2f0] sm:$0xff] %v10832_v59 }
 0x18c   : > { %2143 = vmatprep.mubr.f32.mxu1 %v11287_v52  ;;  %8824 = vmatpush1.bf16.msra.mxu0 %v8823_v39  ;;  %v11429_v39 = vld [vmem:[%s11193_s2 + $0xca] sm:$0xff]  ;;  %2482 = vst [vmem:[#allocation3 + $0x330] sm:$0xff] %v10832_v59  ;;  %2484 = vst [vmem:[#allocation3 + $0x370] sm:$0xff] %v10832_v59 }
 0x18d   : > { %9016 = vmatpush1.bf16.msra.mxu1 %v9015_v1  ;;  %8826 = vmatprep.subr.bf16.mxu0 %v8825_v40  ;;  %v8839_v1 = vpack.c.bf16 %v886_v5, %v884_v31  ;;  %2486 = vst [vmem:[#allocation3 + $0x3b0] sm:$0xff] %v10832_v59  ;;  %2488 = vst [vmem:[#allocation3 + $0x3f0] sm:$0xff] %v10832_v59 }
 0x18e   : > { %1222 = vmatmul.mubr.f32.gmra.mrb[24].mxu0 %v11394_v21  ;;  %9018 = vmatprep.subr.bf16.mxu1 %v9017_v0  ;;  %v8565_v0 = vld [vmem:[%s11193_s2 + $0x31] sm:$0xff]  ;;  %2490 = vst [vmem:[#allocation3 + $0x430] sm:$0xff] %v10832_v59  ;;  %2492 = vst [vmem:[#allocation3 + $0x470] sm:$0xff] %v10832_v59 }
 0x18f   : > { %2144 = vmatmul.mubr.f32.gmra.mrb[24].mxu1 %v11408_v54  ;;  %1227 = vmatprep.mubr.f32.mxu0 %v11281_v34  ;;  %v9025_v34 = vpack.c.bf16 %v1805_v3, %v1803_v2  ;;  %2494 = vst [vmem:[#allocation3 + $0x4b0] sm:$0xff] %v10832_v59  ;;  %14735 = vst [vmem:[#allocation29_spill] sm:$0xff] %v11525_v43 }
 0x190   : > { %2149 = vmatprep.mubr.f32.mxu1 %v11293_v4  ;;  %8828 = vmatpush1.bf16.msra.mxu0 %v8827_v55  ;;  %v8583_v55 = vld [vmem:[%s11193_s2 + $0x109] sm:$0xff] }
 0x191   : > { %9020 = vmatpush1.bf16.msra.mxu1 %v9019_v15  ;;  %8830 = vmatprep.subr.bf16.mxu0 %v8829_v57  ;;  %v8604_v15 = vld [vmem:[%s11193_s2 + $0x112] sm:$0xff] }
 0x192   : > { %1228 = vmatmul.mubr.f32.gmra.mrb[26].mxu0 %v11401_v38  ;;  %9022 = vmatprep.subr.bf16.mxu1 %v9021_v16  ;;  %v8584_v57 = vld [vmem:[%s11193_s2 + $0x111] sm:$0xff]  ;;  %v11523_v16 = vsub.s32 0, %v891_v61 }
 0x193   : > { %2150 = vmatmul.mubr.f32.gmra.mrb[26].mxu1 %v11415_v6  ;;  %1233 = vmatprep.mubr.f32.mxu0 %v11287_v52  ;;  %v1806_v52 = vld [vmem:[#allocation5 + $0xbe0] sm:$0xff] }
 0x194   : > { %2155 = vmatprep.mubr.f32.mxu1 %v11299_v11  ;;  %8832 = vmatpush1.bf16.msra.mxu0 %v8831_v7  ;;  %v9031_v40 = vpack.c.bf16 %v1808_v37, %v1806_v52  ;;  %14734 = vst [vmem:[#allocation28_spill] sm:$0xff] %v11523_v16  ;;  %v11528_v2 = vrot.slane %v888_v62, %v11523_v16 }
 0x195   : > { %9024 = vmatpush1.bf16.msra.mxu1 %v9023_v32  ;;  %8834 = vmatprep.subr.bf16.mxu0 %v8833_v8  ;;  %v11531_v3 = vrot.slane %v1810_v35, %v11523_v16  ;;  %v11537_v7 = vrot.slane %v1810_v35, %v11525_v43 }
 0x196   : > { %1234 = vmatmul.mubr.f32.gmra.mrb[28].mxu0 %v11408_v54  ;;  %9026 = vmatprep.subr.bf16.mxu1 %v9025_v34 }
 0x197   : > { %2156 = vmatmul.mubr.f32.gmra.mrb[28].mxu1 %v11422_v25  ;;  %1239 = vmatprep.mubr.f32.mxu0 %v11293_v4  ;;  %v11436_v4 = vld [vmem:[%s11193_s2 + $0xda] sm:$0xff] }
 0x198   : > { %2161 = vmatprep.mubr.f32.mxu1 %v11305_v13  ;;  %8836 = vmatpush1.bf16.msra.mxu0 %v8835_v28 }
 0x199   : > { %9028 = vmatpush1.bf16.msra.mxu1 %v9027_v48  ;;  %8838 = vmatprep.subr.bf16.mxu0 %v8837_v29 }
 0x19a   : > { %1240 = vmatmul.mubr.f32.gmra.mrb[30].mxu0 %v11415_v6  ;;  %9030 = vmatprep.subr.bf16.mxu1 %v9029_v33 }
 0x19b   : > { %2162 = vmatmul.mubr.f32.gmra.mrb[30].mxu1 %v11429_v39  ;;  %1245 = vmatprep.mubr.f32.mxu0 %v11299_v11  ;;  %v8563_v11 = vld [vmem:[%s11193_s2 + $0x108] sm:$0xff] }
 0x19c   : > { %2167 = vmatprep.mubr.f32.mxu1 %v11311_v17  ;;  %8840 = vmatpush1.bf16.msra.mxu0 %v8839_v1 }
 0x19d   : > { %9032 = vmatpush1.bf16.msra.mxu1 %v9031_v40 }
 0x19e   : > { %1246 = vmatmul.mubr.f32.gmra.mrb[32].mxu0 %v11422_v25 }
 0x19f   : > { %2168 = vmatmul.mubr.f32.gmra.mrb[32].mxu1 %v11436_v4  ;;  %1251 = vmatprep.mubr.f32.mxu0 %v11305_v13  ;;  %v11457_v13 = vld [vmem:[%s11193_s2 + $0xfa] sm:$0xff] }
 0x1a0   : > { %2173 = vmatprep.mubr.f32.mxu1 %v11317_v20 }
 0x1a2   : > { %1252 = vmatmul.mubr.f32.gmra.mrb[34].mxu0 %v11429_v39 }
 0x1a3   : > { %2174 = vmatmul.mubr.f32.gmra.mrb[34].mxu1 %v11443_v42  ;;  %1257 = vmatprep.mubr.f32.mxu0 %v11311_v17  ;;  %v8445_v17 = vld [vmem:[%s11193_s2 + $0x19] sm:$0xff] }
 0x1a4   : > { %2179 = vmatprep.mubr.f32.mxu1 %v8563_v11 }
 0x1a6   : > { %1258 = vmatmul.mubr.f32.gmra.mrb[36].mxu0 %v11436_v4 }
 0x1a7   : > { %2180 = vmatmul.mubr.f32.gmra.mrb[36].mxu1 %v11450_v44  ;;  %1263 = vmatprep.mubr.f32.mxu0 %v11317_v20  ;;  %v8446_v20 = vld [vmem:[%s11193_s2 + $0x21] sm:$0xff] }
 0x1a8   : > { %2185 = vmatprep.mubr.f32.mxu1 %v8564_v45 }
 0x1aa   : > { %1264 = vmatmul.mubr.f32.gmra.mrb[38].mxu0 %v11443_v42 }
 0x1ab   : > { %2186 = vmatmul.mubr.f32.gmra.mrb[38].mxu1 %v11457_v13  ;;  %1334 = vmatprep.mubr.f32.mxu0 %v11325_v36  ;;  %v8567_v36 = vld [vmem:[%s11193_s2 + $0x49] sm:$0xff] }
 0x1ac   : > { %2256 = vmatprep.mubr.f32.mxu1 %v11337_v27 }
 0x1ae   : > { %1335 = vmatmul.mubr.f32.vlgmr.msra.gmra.mrb[0].mxu0 %v8445_v17 }
 0x1af   : > { %2257 = vmatmul.mubr.f32.vlgmr.msra.gmra.mrb[0].mxu1 %v8565_v0  ;;  %1340 = vmatprep.mubr.f32.mxu0 %v11331_v53  ;;  %v8568_v53 = vld [vmem:[%s11193_s2 + $0x51] sm:$0xff] }
 0x1b0   : > { %2262 = vmatprep.mubr.f32.mxu1 %v11345_v23 }
 0x1b2   : > { %1341 = vmatmul.mubr.f32.gmra.mrb[2].mxu0 %v8446_v20 }
 0x1b3   : > { %2263 = vmatmul.mubr.f32.gmra.mrb[2].mxu1 %v8566_v26  ;;  %1346 = vmatprep.mubr.f32.mxu0 %v11337_v27  ;;  %v8569_v27 = vld [vmem:[%s11193_s2 + $0x61] sm:$0xff] }
 0x1b4   : > { %2268 = vmatprep.mubr.f32.mxu1 %v11352_v41 }
 0x1b6   : > { %1347 = vmatmul.mubr.f32.gmra.mrb[4].mxu0 %v8565_v0 }
 0x1b7   : > { %2269 = vmatmul.mubr.f32.gmra.mrb[4].mxu1 %v8567_v36  ;;  %1352 = vmatprep.mubr.f32.mxu0 %v11345_v23  ;;  %v8570_v23 = vld [vmem:[%s11193_s2 + $0x69] sm:$0xff] }
 0x1b8   : > { %2274 = vmatprep.mubr.f32.mxu1 %v11359_v58 }
 0x1ba   : > { %1353 = vmatmul.mubr.f32.gmra.mrb[6].mxu0 %v8566_v26 }
 0x1bb   : > { %2275 = vmatmul.mubr.f32.gmra.mrb[6].mxu1 %v8568_v53  ;;  %1358 = vmatprep.mubr.f32.mxu0 %v11352_v41  ;;  %v8571_v41 = vld [vmem:[%s11193_s2 + $0x79] sm:$0xff] }
 0x1bc   : > { %2280 = vmatprep.mubr.f32.mxu1 %v11366_v9 }
 0x1be   : > { %1359 = vmatmul.mubr.f32.gmra.mrb[8].mxu0 %v8567_v36 }
 0x1bf   : > { %2281 = vmatmul.mubr.f32.gmra.mrb[8].mxu1 %v8569_v27  ;;  %1364 = vmatprep.mubr.f32.mxu0 %v11359_v58  ;;  %v8572_v58 = vld [vmem:[%s11193_s2 + $0x81] sm:$0xff] }
 0x1c0   : > { %2286 = vmatprep.mubr.f32.mxu1 %v11373_v30 }
 0x1c2   : > { %1365 = vmatmul.mubr.f32.gmra.mrb[10].mxu0 %v8568_v53 }
 0x1c3   : > { %2287 = vmatmul.mubr.f32.gmra.mrb[10].mxu1 %v8570_v23  ;;  %1370 = vmatprep.mubr.f32.mxu0 %v11366_v9  ;;  %v8573_v9 = vld [vmem:[%s11193_s2 + $0x91] sm:$0xff] }
 0x1c4   : > { %2292 = vmatprep.mubr.f32.mxu1 %v11380_v46 }
 0x1c6   : > { %1371 = vmatmul.mubr.f32.gmra.mrb[12].mxu0 %v8569_v27 }
 0x1c7   : > { %2293 = vmatmul.mubr.f32.gmra.mrb[12].mxu1 %v8571_v41  ;;  %1376 = vmatprep.mubr.f32.mxu0 %v11373_v30  ;;  %v8574_v30 = vld [vmem:[%s11193_s2 + $0x99] sm:$0xff] }
 0x1c8   : > { %2298 = vmatprep.mubr.f32.mxu1 %v11387_v63 }
 0x1ca   : > { %1377 = vmatmul.mubr.f32.gmra.mrb[14].mxu0 %v8570_v23 }
 0x1cb   : > { %2299 = vmatmul.mubr.f32.gmra.mrb[14].mxu1 %v8572_v58  ;;  %1382 = vmatprep.mubr.f32.mxu0 %v11380_v46  ;;  %v8575_v46 = vld [vmem:[%s11193_s2 + $0xa9] sm:$0xff] }
 0x1cc   : > { %2304 = vmatprep.mubr.f32.mxu1 %v11394_v21 }
 0x1ce   : > { %1383 = vmatmul.mubr.f32.gmra.mrb[16].mxu0 %v8571_v41 }
 0x1cf   : > { %2305 = vmatmul.mubr.f32.gmra.mrb[16].mxu1 %v8573_v9  ;;  %1388 = vmatprep.mubr.f32.mxu0 %v11387_v63  ;;  %v8576_v63 = vld [vmem:[%s11193_s2 + $0xb1] sm:$0xff] }
 0x1d0   : > { %2310 = vmatprep.mubr.f32.mxu1 %v11401_v38 }
 0x1d2   : > { %1389 = vmatmul.mubr.f32.gmra.mrb[18].mxu0 %v8572_v58 }
 0x1d3   : > { %2311 = vmatmul.mubr.f32.gmra.mrb[18].mxu1 %v8574_v30  ;;  %1394 = vmatprep.mubr.f32.mxu0 %v11394_v21  ;;  %v8577_v21 = vld [vmem:[%s11193_s2 + $0xc1] sm:$0xff] }
 0x1d4   : > { %2316 = vmatprep.mubr.f32.mxu1 %v11408_v54 }
 0x1d6   : > { %1395 = vmatmul.mubr.f32.gmra.mrb[20].mxu0 %v8573_v9 }
 0x1d7   : > { %2317 = vmatmul.mubr.f32.gmra.mrb[20].mxu1 %v8575_v46  ;;  %1400 = vmatprep.mubr.f32.mxu0 %v11401_v38  ;;  %v8578_v38 = vld [vmem:[%s11193_s2 + $0xc9] sm:$0xff] }
 0x1d8   : > { %2322 = vmatprep.mubr.f32.mxu1 %v11415_v6 }
 0x1da   : > { %1401 = vmatmul.mubr.f32.gmra.mrb[22].mxu0 %v8574_v30 }
 0x1db   : > { %2323 = vmatmul.mubr.f32.gmra.mrb[22].mxu1 %v8576_v63  ;;  %1406 = vmatprep.mubr.f32.mxu0 %v11408_v54  ;;  %v8603_v54 = vld [vmem:[%s11193_s2 + $0x10a] sm:$0xff] }
 0x1dc   : > { %2328 = vmatprep.mubr.f32.mxu1 %v11422_v25 }
 0x1de   : > { %1407 = vmatmul.mubr.f32.gmra.mrb[24].mxu0 %v8575_v46 }
 0x1df   : > { %2329 = vmatmul.mubr.f32.gmra.mrb[24].mxu1 %v8577_v21  ;;  %1412 = vmatprep.mubr.f32.mxu0 %v11415_v6  ;;  %v11534_v6 = vrot.slane %v888_v62, %v11525_v43 }
 0x1e0   : > { %2334 = vmatprep.mubr.f32.mxu1 %v11429_v39 }
 0x1e2   : > { %1413 = vmatmul.mubr.f32.gmra.mrb[26].mxu0 %v8576_v63 }
 0x1e3   : > { %2335 = vmatmul.mubr.f32.gmra.mrb[26].mxu1 %v8578_v38  ;;  %1418 = vmatprep.mubr.f32.mxu0 %v11422_v25 }
 0x1e4   : > { %2340 = vmatprep.mubr.f32.mxu1 %v11436_v4 }
 0x1e6   : > { %1419 = vmatmul.mubr.f32.gmra.mrb[28].mxu0 %v8577_v21 }
 0x1e7   : > { %2341 = vmatmul.mubr.f32.gmra.mrb[28].mxu1 %v8579_v47  ;;  %1424 = vmatprep.mubr.f32.mxu0 %v11429_v39 }
 0x1e8   : > { %2346 = vmatprep.mubr.f32.mxu1 %v11443_v42 }
 0x1ea   : > { %1425 = vmatmul.mubr.f32.gmra.mrb[30].mxu0 %v8578_v38 }
 0x1eb   : > { %2347 = vmatmul.mubr.f32.gmra.mrb[30].mxu1 %v8580_v19  ;;  %1430 = vmatprep.mubr.f32.mxu0 %v11436_v4 }
 0x1ec   : > { %2352 = vmatprep.mubr.f32.mxu1 %v11450_v44 }
 0x1ee   : > { %1431 = vmatmul.mubr.f32.gmra.mrb[32].mxu0 %v8579_v47 }
 0x1ef   : > { %2353 = vmatmul.mubr.f32.gmra.mrb[32].mxu1 %v8581_v49  ;;  %1436 = vmatprep.mubr.f32.mxu0 %v11443_v42 }
 0x1f0   : > { %2358 = vmatprep.mubr.f32.mxu1 %v11457_v13 }
 0x1f2   : > { %1437 = vmatmul.mubr.f32.gmra.mrb[34].mxu0 %v8580_v19 }
 0x1f3   : > { %2359 = vmatmul.mubr.f32.gmra.mrb[34].mxu1 %v8582_v51  ;;  %1442 = vmatprep.mubr.f32.mxu0 %v11450_v44 }
 0x1f4   : > { %2364 = vmatprep.mubr.f32.mxu1 %v8603_v54 }
 0x1f6   : > { %1443 = vmatmul.mubr.f32.gmra.mrb[36].mxu0 %v8581_v49 }
 0x1f7   : > { %2365 = vmatmul.mubr.f32.gmra.mrb[36].mxu1 %v8583_v55  ;;  %1448 = vmatprep.mubr.f32.mxu0 %v11457_v13 }
 0x1f8   : > { %2370 = vmatprep.mubr.f32.mxu1 %v8604_v15 }
 0x1fa   : > { %1449 = vmatmul.mubr.f32.gmra.mrb[38].mxu0 %v8582_v51 }
 0x1fb   : > { %2371 = vmatmul.mubr.f32.gmra.mrb[38].mxu1 %v8584_v57 }
 0x281   : > { %v1336_v32 = vpop.f32.mrb[0].mxu0 }
 0x282   : > { %v2258_v8 = vpop.f32.mrb[0].mxu1  ;;  %v1338_v10 = vpop.f32.mrb[1].mxu0 }
 0x283   : > { %v9841_v12 = vadd.f32 %v2258_v8, %v11531_v3  ;;  %v2260_v14 = vpop.f32.mrb[1].mxu1 }
 0x284   : > { %v9842_v34 = vadd.f32 %v2260_v14, %v11537_v7 }
 0x285   : > { %2378 = vst [vmem:[#allocation3 + $0x290] sm:$0xff] %v9841_v12  ;;  %v1342_v18 = vpop.f32.mrb[2].mxu0 }
 0x286   : > { %2379 = vst [vmem:[#allocation3 + $0x298] sm:$0xff] %v9842_v34  ;;  %v2264_v56 = vpop.f32.mrb[2].mxu1  ;;  %v1344_v50 = vpop.f32.mrb[3].mxu0 }
 0x287   : > { %v9843_v22 = vadd.f32 %v2264_v56, %v11531_v3  ;;  %v2266_v24 = vpop.f32.mrb[3].mxu1 }
 0x288   : > { %v9844_v25 = vadd.f32 %v2266_v24, %v11537_v7 }
 0x289   : > { %2380 = vst [vmem:[#allocation3 + $0x2a0] sm:$0xff] %v9843_v22  ;;  %v1348_v28 = vpop.f32.mrb[4].mxu0 }
 0x28a   : > { %2381 = vst [vmem:[#allocation3 + $0x2a8] sm:$0xff] %v9844_v25  ;;  %v9805_v48 = vadd.f32 %v1348_v28, %v11528_v2  ;;  %v2270_v29 = vpop.f32.mrb[4].mxu1  ;;  %v1350_v31 = vpop.f32.mrb[5].mxu0 }
 0x28b   : > { %v9845_v5 = vadd.f32 %v2270_v29, %v11531_v3  ;;  %v9806_v33 = vadd.f32 %v1350_v31, %v11534_v6  ;;  %v2272_v52 = vpop.f32.mrb[5].mxu1 }
 0x28c   : > { %1459 = vst [vmem:[#allocation3 + $0x50] sm:$0xff] %v9805_v48  ;;  %v9846_v37 = vadd.f32 %v2272_v52, %v11537_v7 }
 0x28d   : > { %2382 = vst [vmem:[#allocation3 + $0x2d0] sm:$0xff] %v9845_v5  ;;  %1460 = vst [vmem:[#allocation3 + $0x58] sm:$0xff] %v9806_v33  ;;  %v1354_v39 = vpop.f32.mrb[6].mxu0 }
 0x28e   : > { %2383 = vst [vmem:[#allocation3 + $0x2d8] sm:$0xff] %v9846_v37  ;;  %v9807_v1 = vadd.f32 %v1354_v39, %v11528_v2  ;;  %v2276_v40 = vpop.f32.mrb[6].mxu1  ;;  %v1356_v4 = vpop.f32.mrb[7].mxu0 }
 0x28f   : > { %v9847_v42 = vadd.f32 %v2276_v40, %v11531_v3  ;;  %v9808_v11 = vadd.f32 %v1356_v4, %v11534_v6  ;;  %v2278_v44 = vpop.f32.mrb[7].mxu1 }
 0x290   : > { %1461 = vst [vmem:[#allocation3 + $0x60] sm:$0xff] %v9807_v1  ;;  %v9848_v45 = vadd.f32 %v2278_v44, %v11537_v7 }
 0x291   : > { %2384 = vst [vmem:[#allocation3 + $0x2e0] sm:$0xff] %v9847_v42  ;;  %1462 = vst [vmem:[#allocation3 + $0x68] sm:$0xff] %v9808_v11  ;;  %v1360_v13 = vpop.f32.mrb[8].mxu0 }
 0x292   : > { %2385 = vst [vmem:[#allocation3 + $0x2e8] sm:$0xff] %v9848_v45  ;;  %v9809_v17 = vadd.f32 %v1360_v13, %v11528_v2  ;;  %v2282_v0 = vpop.f32.mrb[8].mxu1  ;;  %v1362_v20 = vpop.f32.mrb[9].mxu0 }
 0x293   : > { %v9849_v26 = vadd.f32 %v2282_v0, %v11531_v3  ;;  %v9810_v36 = vadd.f32 %v1362_v20, %v11534_v6  ;;  %v2284_v53 = vpop.f32.mrb[9].mxu1 }
 0x294   : > { %1463 = vst [vmem:[#allocation3 + $0x90] sm:$0xff] %v9809_v17  ;;  %v9850_v27 = vadd.f32 %v2284_v53, %v11537_v7 }
 0x295   : > { %2386 = vst [vmem:[#allocation3 + $0x310] sm:$0xff] %v9849_v26  ;;  %1464 = vst [vmem:[#allocation3 + $0x98] sm:$0xff] %v9810_v36  ;;  %v1366_v23 = vpop.f32.mrb[10].mxu0 }
 0x296   : > { %2387 = vst [vmem:[#allocation3 + $0x318] sm:$0xff] %v9850_v27  ;;  %v9811_v41 = vadd.f32 %v1366_v23, %v11528_v2  ;;  %v2288_v58 = vpop.f32.mrb[10].mxu1  ;;  %v1368_v9 = vpop.f32.mrb[11].mxu0 }
 0x297   : > { %v9851_v30 = vadd.f32 %v2288_v58, %v11531_v3  ;;  %v9812_v46 = vadd.f32 %v1368_v9, %v11534_v6  ;;  %v2290_v63 = vpop.f32.mrb[11].mxu1 }
 0x298   : > { %1465 = vst [vmem:[#allocation3 + $0xa0] sm:$0xff] %v9811_v41  ;;  %v9852_v21 = vadd.f32 %v2290_v63, %v11537_v7 }
 0x299   : > { %2388 = vst [vmem:[#allocation3 + $0x320] sm:$0xff] %v9851_v30  ;;  %1466 = vst [vmem:[#allocation3 + $0xa8] sm:$0xff] %v9812_v46  ;;  %v1372_v38 = vpop.f32.mrb[12].mxu0 }
 0x29a   : > { %2389 = vst [vmem:[#allocation3 + $0x328] sm:$0xff] %v9852_v21  ;;  %v9813_v47 = vadd.f32 %v1372_v38, %v11528_v2  ;;  %v2294_v19 = vpop.f32.mrb[12].mxu1  ;;  %v1374_v49 = vpop.f32.mrb[13].mxu0 }
 0x29b   : > { %v9853_v51 = vadd.f32 %v2294_v19, %v11531_v3  ;;  %v9814_v54 = vadd.f32 %v1374_v49, %v11534_v6  ;;  %v2296_v55 = vpop.f32.mrb[13].mxu1 }
 0x29c   : > { %1467 = vst [vmem:[#allocation3 + $0xd0] sm:$0xff] %v9813_v47  ;;  %v9854_v15 = vadd.f32 %v2296_v55, %v11537_v7 }
 0x29d   : > { %2390 = vst [vmem:[#allocation3 + $0x350] sm:$0xff] %v9853_v51  ;;  %1468 = vst [vmem:[#allocation3 + $0xd8] sm:$0xff] %v9814_v54  ;;  %v1378_v57 = vpop.f32.mrb[14].mxu0 }
 0x29e   : > { %2391 = vst [vmem:[#allocation3 + $0x358] sm:$0xff] %v9854_v15  ;;  %v9815_v59 = vadd.f32 %v1378_v57, %v11528_v2  ;;  %v2300_v60 = vpop.f32.mrb[14].mxu1  ;;  %v1380_v61 = vpop.f32.mrb[15].mxu0 }
 0x29f   : > { %v9855_v62 = vadd.f32 %v2300_v60, %v11531_v3  ;;  %v9816_v35 = vadd.f32 %v1380_v61, %v11534_v6  ;;  %v2302_v32 = vpop.f32.mrb[15].mxu1 }
 0x2a0   : > { %1469 = vst [vmem:[#allocation3 + $0xe0] sm:$0xff] %v9815_v59  ;;  %v9856_v8 = vadd.f32 %v2302_v32, %v11537_v7 }
 0x2a1   : > { %2392 = vst [vmem:[#allocation3 + $0x360] sm:$0xff] %v9855_v62  ;;  %1470 = vst [vmem:[#allocation3 + $0xe8] sm:$0xff] %v9816_v35  ;;  %v1384_v10 = vpop.f32.mrb[16].mxu0 }
 0x2a2   : > { %2393 = vst [vmem:[#allocation3 + $0x368] sm:$0xff] %v9856_v8  ;;  %v9817_v12 = vadd.f32 %v1384_v10, %v11528_v2  ;;  %v2306_v14 = vpop.f32.mrb[16].mxu1  ;;  %v1386_v34 = vpop.f32.mrb[17].mxu0 }
 0x2a3   : > { %v9857_v18 = vadd.f32 %v2306_v14, %v11531_v3  ;;  %v9818_v56 = vadd.f32 %v1386_v34, %v11534_v6  ;;  %v2308_v50 = vpop.f32.mrb[17].mxu1 }
 0x2a4   : > { %1471 = vst [vmem:[#allocation3 + $0x110] sm:$0xff] %v9817_v12  ;;  %v9858_v22 = vadd.f32 %v2308_v50, %v11537_v7 }
 0x2a5   : > { %2394 = vst [vmem:[#allocation3 + $0x390] sm:$0xff] %v9857_v18  ;;  %1472 = vst [vmem:[#allocation3 + $0x118] sm:$0xff] %v9818_v56  ;;  %v1390_v24 = vpop.f32.mrb[18].mxu0 }
 0x2a6   : > { %2395 = vst [vmem:[#allocation3 + $0x398] sm:$0xff] %v9858_v22  ;;  %v9819_v25 = vadd.f32 %v1390_v24, %v11528_v2  ;;  %v2312_v28 = vpop.f32.mrb[18].mxu1  ;;  %v1392_v48 = vpop.f32.mrb[19].mxu0 }
 0x2a7   : > { %v9859_v29 = vadd.f32 %v2312_v28, %v11531_v3  ;;  %v9820_v31 = vadd.f32 %v1392_v48, %v11534_v6  ;;  %v2314_v5 = vpop.f32.mrb[19].mxu1 }
 0x2a8   : > { %1473 = vst [vmem:[#allocation3 + $0x120] sm:$0xff] %v9819_v25  ;;  %v9860_v33 = vadd.f32 %v2314_v5, %v11537_v7 }
 0x2a9   : > { %2396 = vst [vmem:[#allocation3 + $0x3a0] sm:$0xff] %v9859_v29  ;;  %1474 = vst [vmem:[#allocation3 + $0x128] sm:$0xff] %v9820_v31  ;;  %v1396_v52 = vpop.f32.mrb[20].mxu0 }
 0x2aa   : > { %2397 = vst [vmem:[#allocation3 + $0x3a8] sm:$0xff] %v9860_v33  ;;  %v9821_v37 = vadd.f32 %v1396_v52, %v11528_v2  ;;  %v2318_v39 = vpop.f32.mrb[20].mxu1  ;;  %v1398_v1 = vpop.f32.mrb[21].mxu0 }
 0x2ab   : > { %v9861_v40 = vadd.f32 %v2318_v39, %v11531_v3  ;;  %v9822_v4 = vadd.f32 %v1398_v1, %v11534_v6  ;;  %v2320_v42 = vpop.f32.mrb[21].mxu1 }
 0x2ac   : > { %1475 = vst [vmem:[#allocation3 + $0x150] sm:$0xff] %v9821_v37  ;;  %v9862_v11 = vadd.f32 %v2320_v42, %v11537_v7 }
 0x2ad   : > { %2398 = vst [vmem:[#allocation3 + $0x3d0] sm:$0xff] %v9861_v40  ;;  %1476 = vst [vmem:[#allocation3 + $0x158] sm:$0xff] %v9822_v4  ;;  %v1402_v44 = vpop.f32.mrb[22].mxu0 }
 0x2ae   : > { %2399 = vst [vmem:[#allocation3 + $0x3d8] sm:$0xff] %v9862_v11  ;;  %v9823_v45 = vadd.f32 %v1402_v44, %v11528_v2  ;;  %v2324_v13 = vpop.f32.mrb[22].mxu1  ;;  %v1404_v17 = vpop.f32.mrb[23].mxu0 }
 0x2af   : > { %v9863_v0 = vadd.f32 %v2324_v13, %v11531_v3  ;;  %v9824_v20 = vadd.f32 %v1404_v17, %v11534_v6  ;;  %v2326_v26 = vpop.f32.mrb[23].mxu1 }
 0x2b0   : > { %1477 = vst [vmem:[#allocation3 + $0x160] sm:$0xff] %v9823_v45  ;;  %v9864_v36 = vadd.f32 %v2326_v26, %v11537_v7 }
 0x2b1   : > { %2400 = vst [vmem:[#allocation3 + $0x3e0] sm:$0xff] %v9863_v0  ;;  %1478 = vst [vmem:[#allocation3 + $0x168] sm:$0xff] %v9824_v20  ;;  %v1408_v53 = vpop.f32.mrb[24].mxu0 }
 0x2b2   : > { %2401 = vst [vmem:[#allocation3 + $0x3e8] sm:$0xff] %v9864_v36  ;;  %v9825_v27 = vadd.f32 %v1408_v53, %v11528_v2  ;;  %v2330_v23 = vpop.f32.mrb[24].mxu1  ;;  %v1410_v41 = vpop.f32.mrb[25].mxu0  ;;  %v10833_v53 = vmov (!%p8350_p10), 0.0  }
 0x2b3   : > { %v9865_v58 = vadd.f32 %v2330_v23, %v11531_v3  ;;  %v9826_v9 = vadd.f32 %v1410_v41, %v11534_v6  ;;  %v2332_v30 = vpop.f32.mrb[25].mxu1  ;;  %2502 = vst [vmem:[#allocation3 + $0x288] sm:$0xff] (!%p8350_p10), %v10833_v53  ;;  %2503 = vst [vmem:[#allocation3 + $0x290] sm:$0xff] (!%p8350_p10), %v10833_v53 }
 0x2b4   : > { %1479 = vst [vmem:[#allocation3 + $0x190] sm:$0xff] %v9825_v27  ;;  %v9866_v46 = vadd.f32 %v2332_v30, %v11537_v7  ;;  %2504 = vst [vmem:[#allocation3 + $0x298] sm:$0xff] (!%p8350_p10), %v10833_v53 }
 0x2b5   : > { %2402 = vst [vmem:[#allocation3 + $0x410] sm:$0xff] %v9865_v58  ;;  %1480 = vst [vmem:[#allocation3 + $0x198] sm:$0xff] %v9826_v9  ;;  %v1414_v63 = vpop.f32.mrb[26].mxu0 }
 0x2b6   : > { %2403 = vst [vmem:[#allocation3 + $0x418] sm:$0xff] %v9866_v46  ;;  %v9827_v21 = vadd.f32 %v1414_v63, %v11528_v2  ;;  %v2336_v38 = vpop.f32.mrb[26].mxu1  ;;  %v1416_v47 = vpop.f32.mrb[27].mxu0  ;;  %2505 = vst [vmem:[#allocation3 + $0x2a0] sm:$0xff] (!%p8350_p10), %v10833_v53 }
 0x2b7   : > { %v9867_v19 = vadd.f32 %v2336_v38, %v11531_v3  ;;  %v9828_v49 = vadd.f32 %v1416_v47, %v11534_v6  ;;  %v2338_v51 = vpop.f32.mrb[27].mxu1  ;;  %2506 = vst [vmem:[#allocation3 + $0x2a8] sm:$0xff] (!%p8350_p10), %v10833_v53  ;;  %2507 = vst [vmem:[#allocation3 + $0x2b0] sm:$0xff] (!%p8350_p10), %v10833_v53 }
 0x2b8   : > { %1481 = vst [vmem:[#allocation3 + $0x1a0] sm:$0xff] %v9827_v21  ;;  %v9868_v54 = vadd.f32 %v2338_v51, %v11537_v7 }
 0x2b9   : > { %2404 = vst [vmem:[#allocation3 + $0x420] sm:$0xff] %v9867_v19  ;;  %1482 = vst [vmem:[#allocation3 + $0x1a8] sm:$0xff] %v9828_v49  ;;  %v1420_v55 = vpop.f32.mrb[28].mxu0 }
 0x2ba   : > { %2405 = vst [vmem:[#allocation3 + $0x428] sm:$0xff] %v9868_v54  ;;  %v9829_v15 = vadd.f32 %v1420_v55, %v11528_v2  ;;  %v2342_v57 = vpop.f32.mrb[28].mxu1  ;;  %v1422_v59 = vpop.f32.mrb[29].mxu0 }
 0x2bb   : > { %v9869_v60 = vadd.f32 %v2342_v57, %v11531_v3  ;;  %v9830_v61 = vadd.f32 %v1422_v59, %v11534_v6  ;;  %v2344_v62 = vpop.f32.mrb[29].mxu1 }
 0x2bc   : > { %1483 = vst [vmem:[#allocation3 + $0x1d0] sm:$0xff] %v9829_v15  ;;  %v9870_v35 = vadd.f32 %v2344_v62, %v11537_v7 }
 0x2bd   : > { %2406 = vst [vmem:[#allocation3 + $0x450] sm:$0xff] %v9869_v60  ;;  %1484 = vst [vmem:[#allocation3 + $0x1d8] sm:$0xff] %v9830_v61  ;;  %v1426_v32 = vpop.f32.mrb[30].mxu0 }
 0x2be   : > { %2407 = vst [vmem:[#allocation3 + $0x458] sm:$0xff] %v9870_v35  ;;  %v9831_v8 = vadd.f32 %v1426_v32, %v11528_v2  ;;  %v2348_v10 = vpop.f32.mrb[30].mxu1  ;;  %v1428_v12 = vpop.f32.mrb[31].mxu0 }
 0x2bf   : > { %v9871_v14 = vadd.f32 %v2348_v10, %v11531_v3  ;;  %v9832_v34 = vadd.f32 %v1428_v12, %v11534_v6  ;;  %v2350_v18 = vpop.f32.mrb[31].mxu1 }
 0x2c0   : > { %1485 = vst [vmem:[#allocation3 + $0x1e0] sm:$0xff] %v9831_v8  ;;  %v9872_v56 = vadd.f32 %v2350_v18, %v11537_v7 }
 0x2c1   : > { %2408 = vst [vmem:[#allocation3 + $0x460] sm:$0xff] %v9871_v14  ;;  %1486 = vst [vmem:[#allocation3 + $0x1e8] sm:$0xff] %v9832_v34  ;;  %v1432_v50 = vpop.f32.mrb[32].mxu0 }
 0x2c2   : > { %2409 = vst [vmem:[#allocation3 + $0x468] sm:$0xff] %v9872_v56  ;;  %v9833_v22 = vadd.f32 %v1432_v50, %v11528_v2  ;;  %v2354_v24 = vpop.f32.mrb[32].mxu1  ;;  %v1434_v25 = vpop.f32.mrb[33].mxu0 }
 0x2c3   : > { %v9873_v28 = vadd.f32 %v2354_v24, %v11531_v3  ;;  %v9834_v48 = vadd.f32 %v1434_v25, %v11534_v6  ;;  %v2356_v29 = vpop.f32.mrb[33].mxu1 }
 0x2c4   : > { %1487 = vst [vmem:[#allocation3 + $0x210] sm:$0xff] %v9833_v22  ;;  %v9874_v31 = vadd.f32 %v2356_v29, %v11537_v7 }
 0x2c5   : > { %2410 = vst [vmem:[#allocation3 + $0x490] sm:$0xff] %v9873_v28  ;;  %1488 = vst [vmem:[#allocation3 + $0x218] sm:$0xff] %v9834_v48  ;;  %v1438_v5 = vpop.f32.mrb[34].mxu0 }
 0x2c6   : > { %2411 = vst [vmem:[#allocation3 + $0x498] sm:$0xff] %v9874_v31  ;;  %v9835_v33 = vadd.f32 %v1438_v5, %v11528_v2  ;;  %v2360_v52 = vpop.f32.mrb[34].mxu1  ;;  %v1440_v37 = vpop.f32.mrb[35].mxu0 }
 0x2c7   : > { %v9875_v39 = vadd.f32 %v2360_v52, %v11531_v3  ;;  %v9836_v1 = vadd.f32 %v1440_v37, %v11534_v6  ;;  %v2362_v40 = vpop.f32.mrb[35].mxu1 }
 0x2c8   : > { %1489 = vst [vmem:[#allocation3 + $0x220] sm:$0xff] %v9835_v33  ;;  %v9876_v4 = vadd.f32 %v2362_v40, %v11537_v7 }
 0x2c9   : > { %2412 = vst [vmem:[#allocation3 + $0x4a0] sm:$0xff] %v9875_v39  ;;  %1490 = vst [vmem:[#allocation3 + $0x228] sm:$0xff] %v9836_v1  ;;  %v1444_v42 = vpop.f32.mrb[36].mxu0 }
 0x2ca   : > { %2413 = vst [vmem:[#allocation3 + $0x4a8] sm:$0xff] %v9876_v4  ;;  %v9837_v11 = vadd.f32 %v1444_v42, %v11528_v2  ;;  %v2366_v44 = vpop.f32.mrb[36].mxu1  ;;  %v1446_v45 = vpop.f32.mrb[37].mxu0 }
 0x2cb   : > { %v9838_v13 = vadd.f32 %v1446_v45, %v11534_v6  ;;  %v2368_v17 = vpop.f32.mrb[37].mxu1  ;;  %2500 = sbr.rel (%p8350_p10) target bundleno = 722 (0x2d2), region = 138 }
 0x2cc   : > { %1491 = vst [vmem:[#allocation3 + $0x250] sm:$0xff] %v9837_v11 }
 0x2cd   : > { %1492 = vst [vmem:[#allocation3 + $0x258] sm:$0xff] %v9838_v13  ;;  %v1450_v3 = vpop.f32.mrb[38].mxu0 }
 0x2ce   : > { %v9839_v0 = vadd.f32 %v1450_v3, %v11528_v2  ;;  %v2372_v20 = vpop.f32.mrb[38].mxu1  ;;  %v1452_v26 = vpop.f32.mrb[39].mxu0 }
 0x2cf   : > { %v9840_v7 = vadd.f32 %v1452_v26, %v11534_v6  ;;  %v2374_v36 = vpop.f32.mrb[39].mxu1 }
 0x2d0   : > { %1493 = vst [vmem:[#allocation3 + $0x260] sm:$0xff] %v9839_v0 }
 0x2d1   : > { %1494 = vst [vmem:[#allocation3 + $0x268] sm:$0xff] %v9840_v7 }
 0x2d2 PF: > { %p8606_p1 = scmp.ne.s32.totalorder %s10808_s21, 1 }
 0x2d3   : > { %v10834_v2 = vmov (!%p8606_p1), 0.0  }
 0x2d4   : > { %2512 = sbr.rel (%p8606_p1) target bundleno = 731 (0x2db), region = 142  ;;  %2515 = vst [vmem:[#allocation3 + $0x248] sm:$0xff] (!%p8606_p1), %v10834_v2  ;;  %2516 = vst [vmem:[#allocation3 + $0x250] sm:$0xff] (!%p8606_p1), %v10834_v2 }
 0x2d5   : > { %2517 = vst [vmem:[#allocation3 + $0x258] sm:$0xff] (!%p8606_p1), %v10834_v2  ;;  %2518 = vst [vmem:[#allocation3 + $0x260] sm:$0xff] (!%p8606_p1), %v10834_v2 }
 0x2d6   : > { %2519 = vst [vmem:[#allocation3 + $0x268] sm:$0xff] (!%p8606_p1), %v10834_v2  ;;  %2520 = vst [vmem:[#allocation3 + $0x270] sm:$0xff] (!%p8606_p1), %v10834_v2 }
 0x2db PF: > { %v2967_v6 = vld [vmem:[#allocation10 + $0x8] sm:$0xff]  ;;  %v2969_v27 = vld [vmem:[#allocation10 + $0x18] sm:$0xff]  ;;  %v2966_v23 = vld [vmem:[#allocation10] sm:$0xff]  ;;  %vm2619_vm0 = vcmask 1046528   ;;  %vm2741_vm1 = vcmask 1040384   ;;  %vm2684_vm2 = vcmask 1045504  }
 0x2dc   : > { %v9033_v41 = vpack.c.bf16 %v2969_v27, %v2967_v6  ;;  %v2968_v58 = vld [vmem:[#allocation10 + $0x10] sm:$0xff]  ;;  %v2971_v9 = vld [vmem:[#allocation10 + $0x28] sm:$0xff]  ;;  %v2973_v30 = vld [vmem:[#allocation10 + $0x38] sm:$0xff]  ;;  %s8648_s9 = sshll.u32 %s10808_s21, 6  ;;  %s8642_s13 = sshll.u32 %s10812_s22, 7 }
 0x2dd   : > { %v9035_v46 = vpack.c.bf16 %v2968_v58, %v2966_v23  ;;  %v9037_v63 = vpack.c.bf16 %v2973_v30, %v2971_v9  ;;  %v2970_v21 = vld [vmem:[#allocation10 + $0x20] sm:$0xff]  ;;  %v2972_v38 = vld [vmem:[#allocation10 + $0x30] sm:$0xff]  ;;  %v2975_v47 = vld [vmem:[#allocation10 + $0x48] sm:$0xff]  ;;  %s8165_s20 = sadd.s32 %s8648_s9, %s8642_s13  ;;  %s8168_s22 = sshll.u32 %s11055_s12, 4  ;;  %s14573_s22 = int_to_ptr.vmem [resolvable:$true] %s8168_s22 }
 0x2de   : > { %9034 = vmatprep.subr.bf16.mxu0 %v9033_v41  ;;  %9418 = vmatprep.subr.bf16.mxu1 %v9033_v41  ;;  %v2977_v19 = vld [vmem:[#allocation10 + $0x58] sm:$0xff]  ;;  %v9039_v49 = vpack.c.bf16 %v2972_v38, %v2970_v21  ;;  %v2974_v54 = vld [vmem:[#allocation10 + $0x40] sm:$0xff]  ;;  %v2976_v55 = vld [vmem:[#allocation10 + $0x50] sm:$0xff]  ;;  %s8643_s21 = sshll.u32 %s8165_s20, 7  ;;  %s14583_s27 = scalar_lea.sflag [#allocation7], %s243_s11 }
 0x2df   : > { %9036 = vmatpush1.bf16.msra.mxu0 %v9035_v46  ;;  %9420 = vmatpush1.bf16.msra.mxu1 %v9035_v46  ;;  %v9041_v51 = vpack.c.bf16 %v2977_v19, %v2975_v47  ;;  %v2979_v15 = vld [vmem:[#allocation10 + $0x68] sm:$0xff]  ;;  %v2981_v57 = vld [vmem:[#allocation10 + $0x78] sm:$0xff]  ;;  %v9043_v59 = vpack.c.bf16 %v2976_v55, %v2974_v54  ;;  %v2978_v61 = vld [vmem:[#allocation10 + $0x60] sm:$0xff]  ;;  %s14571_s29 = scalar_lea.hbm %s14640_s5, %s8643_s21  ;;  %s10716_s26 = scalar_lea.vmem %s14573_s22, 8192 }
 0x2e0   : > { %9038 = vmatprep.subr.bf16.mxu0 %v9037_v63  ;;  %9422 = vmatprep.subr.bf16.mxu1 %v9037_v63  ;;  %v9045_v60 = vpack.c.bf16 %v2981_v57, %v2979_v15  ;;  %v2980_v62 = vld [vmem:[#allocation10 + $0x70] sm:$0xff]  ;;  %v2983_v35 = vld [vmem:[#allocation10 + $0x88] sm:$0xff]  ;;  %v2985_v32 = vld [vmem:[#allocation10 + $0x98] sm:$0xff]  ;;  %p10717_p4 = scmp.ne.s32.totalorder %s14573_s22, %s10716_s26  ;;  %p14940_p5 = scmp.ne.s32.totalorder %s14722_s7, 0 }
 0x2e1   : > { %v2982_v8 = vld [vmem:[#allocation10 + $0x80] sm:$0xff]  ;;  %v2984_v10 = vld [vmem:[#allocation10 + $0x90] sm:$0xff]  ;;  %v2987_v12 = vld [vmem:[#allocation10 + $0xa8] sm:$0xff]  ;;  %v9047_v34 = vpack.c.bf16 %v2980_v62, %v2978_v61  ;;  %v9049_v28 = vpack.c.bf16 %v2985_v32, %v2983_v35  ;;  %s10835_s15 = smov [#allocation13]  }
 0x2e2   : > { %v2989_v14 = vld [vmem:[#allocation10 + $0xb8] sm:$0xff]  ;;  %v2986_v18 = vld [vmem:[#allocation10 + $0xa0] sm:$0xff]  ;;  %v2988_v56 = vld [vmem:[#allocation10 + $0xb0] sm:$0xff]  ;;  %v9051_v26 = vpack.c.bf16 %v2984_v10, %v2982_v8  ;;  %p10718_p6 = pnand %p10717_p4, %p14940_p5  ;;  %s10720_s17 = sshll.u32 %s10835_s15, 4  ;;  %s10721_s17 = int_to_ptr.vmem [resolvable:$false] %s10720_s17 }
 0x2e3   : > { %9040 = vmatpush1.bf16.msra.mxu0 %v9039_v49  ;;  %9424 = vmatpush1.bf16.msra.mxu1 %v9039_v49  ;;  %v2991_v50 = vld [vmem:[#allocation10 + $0xc8] sm:$0xff]  ;;  %v2993_v22 = vld [vmem:[#allocation10 + $0xd8] sm:$0xff]  ;;  %v2990_v24 = vld [vmem:[#allocation10 + $0xc0] sm:$0xff]  ;;  %v9053_v7 = vpack.c.bf16 %v2989_v14, %v2987_v12  ;;  %v9055_v6 = vpack.c.bf16 %v2988_v56, %v2986_v18  ;;  %s10722_s24 = scalar_lea.vmem %s10721_s17, 16384  ;;  %p10723_p9 = scmp.lt.s32.totalorder %s14573_s22, %s10721_s17 }
 0x2e4   : > { %9042 = vmatprep.subr.bf16.mxu0 %v9041_v51  ;;  %9426 = vmatprep.subr.bf16.mxu1 %v9041_v51  ;;  %v2992_v25 = vld [vmem:[#allocation10 + $0xd0] sm:$0xff]  ;;  %v2995_v48 = vld [vmem:[#allocation10 + $0xe8] sm:$0xff]  ;;  %v2997_v29 = vld [vmem:[#allocation10 + $0xf8] sm:$0xff]  ;;  %v9057_v27 = vpack.c.bf16 %v2993_v22, %v2991_v50  ;;  %p10719_p7 = pneg %p10718_p6  ;;  %p10724_p11 = scmp.lt.s32.totalorder %s10722_s24, %s10716_s26 }
 0x2e5   : > { %v2994_v31 = vld [vmem:[#allocation10 + $0xe0] sm:$0xff]  ;;  %v2996_v5 = vld [vmem:[#allocation10 + $0xf0] sm:$0xff]  ;;  %v2999_v33 = vld [vmem:[#allocation10 + $0x108] sm:$0xff]  ;;  %v11614_v23 = vpack.c.bf16 %v2992_v25, %v2990_v24  ;;  %v11616_v30 = vpack.c.bf16 %v2997_v29, %v2995_v48 }
 0x2e6   : > { %v3001_v52 = vld [vmem:[#allocation10 + $0x118] sm:$0xff]  ;;  %v2998_v37 = vld [vmem:[#allocation10 + $0x100] sm:$0xff]  ;;  %v3000_v39 = vld [vmem:[#allocation10 + $0x110] sm:$0xff]  ;;  %v11618_v46 = vpack.c.bf16 %v2996_v5, %v2994_v31  ;;  %p10725_p13 = por %p10724_p11, %p10723_p9 }
 0x2e7   : > { %9044 = vmatpush1.bf16.msra.mxu0 %v9043_v59  ;;  %9428 = vmatpush1.bf16.msra.mxu1 %v9043_v59  ;;  %v3003_v1 = vld [vmem:[#allocation10 + $0x128] sm:$0xff]  ;;  %v3005_v40 = vld [vmem:[#allocation10 + $0x138] sm:$0xff]  ;;  %v3002_v4 = vld [vmem:[#allocation10 + $0x120] sm:$0xff]  ;;  %v11620_v63 = vpack.c.bf16 %v3001_v52, %v2999_v33  ;;  %v11622_v21 = vpack.c.bf16 %v3000_v39, %v2998_v37 }
 0x2e8   : > { %9046 = vmatprep.subr.bf16.mxu0 %v9045_v60  ;;  %9430 = vmatprep.subr.bf16.mxu1 %v9045_v60  ;;  %v3004_v42 = vld [vmem:[#allocation10 + $0x130] sm:$0xff]  ;;  %v3007_v11 = vld [vmem:[#allocation10 + $0x148] sm:$0xff]  ;;  %v3009_v44 = vld [vmem:[#allocation10 + $0x158] sm:$0xff]  ;;  %v11624_v49 = vpack.c.bf16 %v3005_v40, %v3003_v1  ;;  %p10726_p3 = pnand %p10725_p13, %p10719_p7 }
 0x2e9   : > { %v3006_v45 = vld [vmem:[#allocation10 + $0x140] sm:$0xff]  ;;  %v3008_v13 = vld [vmem:[#allocation10 + $0x150] sm:$0xff]  ;;  %v3011_v17 = vld [vmem:[#allocation10 + $0x168] sm:$0xff]  ;;  %v11626_v51 = vpack.c.bf16 %v3004_v42, %v3002_v4  ;;  %v11628_v54 = vpack.c.bf16 %v3009_v44, %v3007_v11 }
 0x2ea   : > { %v3013_v3 = vld [vmem:[#allocation10 + $0x178] sm:$0xff]  ;;  %v3010_v0 = vld [vmem:[#allocation10 + $0x160] sm:$0xff]  ;;  %v3012_v20 = vld [vmem:[#allocation10 + $0x170] sm:$0xff]  ;;  %v11630_v55 = vpack.c.bf16 %v3008_v13, %v3006_v45 }
 0x2eb   : > { %9048 = vmatpush1.bf16.msra.mxu0 %v9047_v34  ;;  %9432 = vmatpush1.bf16.msra.mxu1 %v9047_v34  ;;  %v3015_v36 = vld [vmem:[#allocation10 + $0x188] sm:$0xff]  ;;  %v3017_v53 = vld [vmem:[#allocation10 + $0x198] sm:$0xff]  ;;  %v3014_v2 = vld [vmem:[#allocation10 + $0x180] sm:$0xff]  ;;  %v11632_v60 = vpack.c.bf16 %v3013_v3, %v3011_v17  ;;  %v11634_v61 = vpack.c.bf16 %v3012_v20, %v3010_v0 }
 0x2ec   : > { %9050 = vmatprep.subr.bf16.mxu0 %v9049_v28  ;;  %9434 = vmatprep.subr.bf16.mxu1 %v9049_v28  ;;  %v3016_v41 = vld [vmem:[#allocation10 + $0x190] sm:$0xff]  ;;  %v3019_v58 = vld [vmem:[#allocation10 + $0x1a8] sm:$0xff]  ;;  %v3021_v9 = vld [vmem:[#allocation10 + $0x1b8] sm:$0xff]  ;;  %v11636_v62 = vpack.c.bf16 %v3017_v53, %v3015_v36 }
 0x2ed   : > { %v3018_v38 = vld [vmem:[#allocation10 + $0x1a0] sm:$0xff]  ;;  %v3020_v47 = vld [vmem:[#allocation10 + $0x1b0] sm:$0xff]  ;;  %v3023_v19 = vld [vmem:[#allocation10 + $0x1c8] sm:$0xff]  ;;  %v11638_v10 = vpack.c.bf16 %v3016_v41, %v3014_v2  ;;  %v11640_v12 = vpack.c.bf16 %v3021_v9, %v3019_v58 }
 0x2ee   : > { %v3025_v15 = vld [vmem:[#allocation10 + $0x1d8] sm:$0xff]  ;;  %v3022_v57 = vld [vmem:[#allocation10 + $0x1c0] sm:$0xff]  ;;  %v3024_v59 = vld [vmem:[#allocation10 + $0x1d0] sm:$0xff]  ;;  %v11642_v14 = vpack.c.bf16 %v3020_v47, %v3018_v38 }
 0x2ef   : > { %9052 = vmatpush1.bf16.msra.mxu0 %v9051_v26  ;;  %9436 = vmatpush1.bf16.msra.mxu1 %v9051_v26  ;;  %v3027_v35 = vld [vmem:[#allocation10 + $0x1e8] sm:$0xff]  ;;  %v3029_v32 = vld [vmem:[#allocation10 + $0x1f8] sm:$0xff]  ;;  %v3026_v8 = vld [vmem:[#allocation10 + $0x1e0] sm:$0xff]  ;;  %v11646_v50 = vpack.c.bf16 %v3025_v15, %v3023_v19  ;;  %v11648_v22 = vpack.c.bf16 %v3024_v59, %v3022_v57 }
 0x2f0   : > { %9054 = vmatprep.subr.bf16.mxu0 %v9053_v7  ;;  %9438 = vmatprep.subr.bf16.mxu1 %v9053_v7  ;;  %v3028_v34 = vld [vmem:[#allocation10 + $0x1f0] sm:$0xff]  ;;  %v11644_v56 = vld [vmem:[#allocation3 + $0x2a0] sm:$0xff]  ;;  %v2523_v29 = vld [vmem:[#allocation3 + $0x288] sm:$0x80]  ;;  %v11653_v31 = vpack.c.bf16 %v3029_v32, %v3027_v35 }
 0x2f1   : > { %v2547_v18 = vld [vmem:[#allocation3 + $0x290] sm:$0xff]  ;;  %14736 = vst [vmem:[#allocation30_spill] sm:$0xff] %v11644_v56  ;;  %v2622_v25 = vrot.slane %v11644_v56, 1  ;;  %v11651_v48 = vld [vmem:[#allocation3 + $0x60] sm:$0xff]  ;;  %v11656_v52 = vld [vmem:[#allocation3 + $0x298] sm:$0xff]  ;;  %v2742_v37 = vrot.slane %v2523_v29, 7  ;;  %v11663_v13 = vpack.c.bf16 %v3028_v34, %v3026_v8 }
 0x2f2   : > { %v2620_v24 = vrot.slane %v2547_v18, 1  ;;  %v5364_v28 = vld [vmem:[#allocation3 + $0x50] sm:$0xff]  ;;  %14737 = vst [vmem:[#allocation31_spill] sm:$0xff] %v11651_v48  ;;  %v5438_v33 = vrot.slane %v11651_v48, 1  ;;  %14738 = vst [vmem:[#allocation32_spill] sm:$0xff] %v11656_v52  ;;  %v3033_v1 = vld [vmem:[#allocation10 + $0x218] sm:$0xff] }
 0x2f3   : > { %v5436_v5 = vrot.slane %v5364_v28, 1  ;;  %v3031_v39 = vld [vmem:[#allocation10 + $0x208] sm:$0xff]  ;;  %9056 = vmatpush1.bf16.msra.mxu0 %v9055_v6  ;;  %9440 = vmatpush1.bf16.msra.mxu1 %v9055_v6  ;;  %v2743_v11 = vrot.slane %v11656_v52, 7  ;;  %v11661_v45 = vld [vmem:[#allocation3 + $0x58] sm:$0xff]  ;;  %v3030_v20 = vld [vmem:[#allocation10 + $0x200] sm:$0xff]  ;;  %v2756_v19 = vrot.slane %v2622_v25, 7 }
 0x2f4   : > { %v2623_v40 = vsel %vm2619_vm0, %v2620_v24, %v2622_v25  ;;  %v2745_v4 = vrot.slane %v2620_v24, 7  ;;  %v5340_v44 = vld [vmem:[#allocation3 + $0x48] sm:$0x80]  ;;  %14739 = vst [vmem:[#allocation33_spill] sm:$0xff] %v11661_v45  ;;  %9058 = vmatprep.subr.bf16.mxu0 %v9057_v27  ;;  %9442 = vmatprep.subr.bf16.mxu1 %v9057_v27  ;;  %v3032_v26 = vld [vmem:[#allocation10 + $0x210] sm:$0xff]  ;;  %v11666_v53 = vpack.c.bf16 %v3033_v1, %v3031_v39  ;;  %v3037_v58 = vld [vmem:[#allocation10 + $0x238] sm:$0xff] }
 0x2f5   : > { %v2746_v17 = vrot.slane %v2623_v40, 7  ;;  %v5439_v3 = vsel %vm2619_vm0, %v5436_v5, %v5438_v33  ;;  %v5559_v0 = vrot.slane %v5436_v5, 7  ;;  %v2525_v7 = vld [vmem:[#allocation3 + $0x2a8] sm:$0x7f]  ;;  %v5556_v6 = vrot.slane %v5340_v44, 7  ;;  %v3036_v57 = vld [vmem:[#allocation10 + $0x230] sm:$0xff] }
 0x2f6   : > { %v5560_v36 = vrot.slane %v5439_v3, 7  ;;  %v3035_v41 = vld [vmem:[#allocation10 + $0x228] sm:$0xff]  ;;  %v3034_v9 = vld [vmem:[#allocation10 + $0x220] sm:$0xff]  ;;  %v11671_v38 = vsel %vm2741_vm1, %v2742_v37, %v2743_v11  ;;  %v5557_v47 = vrot.slane %v11661_v45, 7  ;;  %v11677_v32 = vpack.c.bf16 %v3032_v26, %v3030_v20  ;;  %v11693_v37 = vld [vmem:[#allocation3 + $0x2d8] sm:$0xff] }
 0x2f7   : > { %v2747_v27 = vsel %vm2741_vm1, %v2745_v4, %v2746_v17  ;;  %v5342_v15 = vld [vmem:[#allocation3 + $0x68] sm:$0x7f]  ;;  %v2550_v59 = vld [vmem:[#allocation3 + $0x2d0] sm:$0xff]  ;;  %9060 = vmatpush1.bf16.msra.mxu0 %v11614_v23  ;;  %9444 = vmatpush1.bf16.msra.mxu1 %v11614_v23  ;;  %v5570_v8 = vrot.slane %v5438_v33, 7  ;;  %v2754_v34 = vrot.slane %v2525_v7, 7  ;;  %v11679_v18 = vld [vmem:[#allocation3 + $0x2e0] sm:$0xff]  ;;  %v11689_v23 = vsel %vm2741_vm1, %v2746_v17, %v2756_v19 }
 0x2f8   : > { %v5561_v35 = vsel %vm2741_vm1, %v5559_v0, %v5560_v36  ;;  %14740 = vst [vmem:[#allocation34_spill] sm:$0xff] %v11679_v18  ;;  %v5367_v24 = vld [vmem:[#allocation3 + $0x90] sm:$0xff]  ;;  %v11681_v28 = vld [vmem:[#allocation3 + $0xa0] sm:$0xff]  ;;  %9062 = vmatprep.subr.bf16.mxu0 %v11616_v30  ;;  %9446 = vmatprep.subr.bf16.mxu1 %v11616_v30  ;;  %v11686_v25 = vsel %vm2741_vm1, %v5556_v6, %v5557_v47  ;;  %v5568_v5 = vrot.slane %v5342_v15, 7  ;;  %v2526_v33 = vld [vmem:[#allocation3 + $0x2c8] sm:$0x80] }
 0x2f9   : > { %14741 = vst [vmem:[#allocation35_spill] sm:$0xff] %v11681_v28  ;;  %v11691_v29 = vpack.c.bf16 %v3037_v58, %v3035_v41  ;;  %14742 = vst [vmem:[#allocation36_spill] sm:$0xff] %v11693_v37  ;;  %3158 = vmatprep.mubr.f32.mxu0 %v2747_v27  ;;  %5972 = vmatprep.mubr.f32.mxu1 %v5561_v35  ;;  %v11696_v39 = vsel %vm2741_vm1, %v5560_v36, %v5570_v8  ;;  %v2626_v30 = vrot.slane %v2550_v59, 1  ;;  %v5343_v4 = vld [vmem:[#allocation3 + $0x88] sm:$0x80]  ;;  %v3041_v26 = vld [vmem:[#allocation10 + $0x258] sm:$0xff] }
 0x2fa   : > { %v11698_v1 = vpack.c.bf16 %v3036_v57, %v3034_v9  ;;  %v2628_v40 = vrot.slane %v11679_v18, 1  ;;  %v11702_v44 = vsel %vm2741_vm1, %v2743_v11, %v2754_v34  ;;  %v5442_v17 = vrot.slane %v5367_v24, 1  ;;  %v3039_v20 = vld [vmem:[#allocation10 + $0x248] sm:$0xff]  ;;  %v11705_v7 = vld [vmem:[#allocation3 + $0x98] sm:$0xff]  ;;  %v3038_v58 = vld [vmem:[#allocation10 + $0x240] sm:$0xff] }
 0x2fb   : > { %v5444_v3 = vrot.slane %v11681_v28, 1  ;;  %v2762_v0 = vrot.slane %v2526_v33, 7  ;;  %14743 = vst [vmem:[#allocation37_spill] sm:$0xff] %v11705_v7  ;;  %9064 = vmatpush1.bf16.msra.mxu0 %v11618_v46  ;;  %9448 = vmatpush1.bf16.msra.mxu1 %v11618_v46  ;;  %v11710_v36 = vsel %vm2741_vm1, %v5557_v47, %v5568_v5  ;;  %v2765_v41 = vrot.slane %v2626_v30, 7  ;;  %v3040_v9 = vld [vmem:[#allocation10 + $0x250] sm:$0xff]  ;;  %v3043_v24 = vld [vmem:[#allocation10 + $0x268] sm:$0xff] }
 0x2fc   : > { %v2629_v6 = vsel %vm2619_vm0, %v2626_v30, %v2628_v40  ;;  %v2763_v11 = vrot.slane %v11693_v37, 7  ;;  %v2528_v27 = vld [vmem:[#allocation3 + $0x2e8] sm:$0x7f]  ;;  %9066 = vmatprep.subr.bf16.mxu0 %v11620_v63  ;;  %9450 = vmatprep.subr.bf16.mxu1 %v11620_v63  ;;  %v5579_v57 = vrot.slane %v5442_v17, 7  ;;  %v5576_v46 = vrot.slane %v5343_v4, 7  ;;  %v3045_v5 = vld [vmem:[#allocation10 + $0x278] sm:$0xff] }
 0x2fd   : > { %v2766_v19 = vrot.slane %v2629_v6, 7  ;;  %v5445_v15 = vsel %vm2619_vm0, %v5442_v17, %v5444_v3  ;;  %v5345_v59 = vld [vmem:[#allocation3 + $0xa8] sm:$0x7f]  ;;  %v11720_v8 = vpack.c.bf16 %v3041_v26, %v3039_v20  ;;  %v5577_v34 = vrot.slane %v11705_v7, 7  ;;  %v2553_v33 = vld [vmem:[#allocation3 + $0x310] sm:$0xff]  ;;  %v2554_v42 = vld [vmem:[#allocation3 + $0x320] sm:$0xff] }
 0x2fe   : > { %v5580_v47 = vrot.slane %v5445_v15, 7  ;;  %v11718_v35 = vsel %vm2741_vm1, %v2762_v0, %v2763_v11  ;;  %v11723_v30 = vpack.c.bf16 %v3040_v9, %v3038_v58  ;;  %v2776_v63 = vrot.slane %v2628_v40, 7  ;;  %v5370_v17 = vld [vmem:[#allocation3 + $0xd0] sm:$0xff]  ;;  %v11736_v58 = vld [vmem:[#allocation3 + $0xe0] sm:$0xff]  ;;  %v2529_v40 = vld [vmem:[#allocation3 + $0x308] sm:$0x80] }
 0x2ff   : > { %v5590_v6 = vrot.slane %v5444_v3, 7  ;;  %v2774_v2 = vrot.slane %v2528_v27, 7  ;;  %9068 = vmatpush1.bf16.msra.mxu0 %v11622_v21  ;;  %9452 = vmatpush1.bf16.msra.mxu1 %v11622_v21  ;;  %v11728_v4 = vsel %vm2741_vm1, %v2765_v41, %v2766_v19  ;;  %v11734_v20 = vsel %vm2741_vm1, %v5576_v46, %v5577_v34  ;;  %14744 = vst [vmem:[#allocation38_spill] sm:$0xff] %v11736_v58  ;;  %v11738_v3 = vld [vmem:[#allocation3 + $0x318] sm:$0xff]  ;;  %v3042_v27 = vld [vmem:[#allocation10 + $0x260] sm:$0xff]  ;;  %v3047_v7 = vld [vmem:[#allocation10 + $0x288] sm:$0xff] }
 0x300   : > { %v11731_v0 = vsel %vm2741_vm1, %v5579_v57, %v5580_v47  ;;  %v5588_v26 = vrot.slane %v5345_v59, 7  ;;  %14745 = vst [vmem:[#allocation39_spill] sm:$0xff] %v11738_v3  ;;  %9070 = vmatprep.subr.bf16.mxu0 %v11624_v49  ;;  %9454 = vmatprep.subr.bf16.mxu1 %v11624_v49  ;;  %v11743_v21 = vsel %vm2741_vm1, %v2766_v19, %v2776_v63  ;;  %v3044_v15 = vld [vmem:[#allocation10 + $0x270] sm:$0xff]  ;;  %v2632_v57 = vrot.slane %v2553_v33, 1  ;;  %v5346_v46 = vld [vmem:[#allocation3 + $0xc8] sm:$0x80] }
 0x301   : > { %v11746_v41 = vsel %vm2741_vm1, %v5580_v47, %v5590_v6  ;;  %v11748_v9 = vpack.c.bf16 %v3045_v5, %v3043_v24  ;;  %v11751_v59 = vsel %vm2741_vm1, %v2763_v11, %v2774_v2  ;;  %v2634_v16 = vrot.slane %v2554_v42, 1  ;;  %v3049_v19 = vld [vmem:[#allocation10 + $0x298] sm:$0xff]  ;;  %v3046_v6 = vld [vmem:[#allocation10 + $0x280] sm:$0xff]  ;;  %v3048_v33 = vld [vmem:[#allocation10 + $0x290] sm:$0xff] }
 0x302   : > { %v11754_v43 = vsel %vm2741_vm1, %v5577_v34, %v5588_v26  ;;  %v5448_v49 = vrot.slane %v5370_v17, 1  ;;  %v5347_v63 = vld [vmem:[#allocation3 + $0xd8] sm:$0xff]  ;;  %v2785_v37 = vrot.slane %v2632_v57, 7  ;;  %v5450_v47 = vrot.slane %v11736_v58, 1  ;;  %v2531_v17 = vld [vmem:[#allocation3 + $0x328] sm:$0x7f] }
 0x303   : > { %v2782_v24 = vrot.slane %v2529_v40, 7  ;;  %v2783_v5 = vrot.slane %v11738_v3, 7  ;;  %9072 = vmatpush1.bf16.msra.mxu0 %v11626_v51  ;;  %9456 = vmatpush1.bf16.msra.mxu1 %v11626_v51  ;;  %v11760_v2 = vpack.c.bf16 %v3044_v15, %v3042_v27  ;;  %v2635_v11 = vsel %vm2619_vm0, %v2632_v57, %v2634_v16  ;;  %v3051_v26 = vld [vmem:[#allocation10 + $0x2a8] sm:$0xff]  ;;  %v3053_v51 = vld [vmem:[#allocation10 + $0x2b8] sm:$0xff]  ;;  %v3050_v15 = vld [vmem:[#allocation10 + $0x2a0] sm:$0xff] }
 0x304   : > { %v5599_v42 = vrot.slane %v5448_v49, 7  ;;  %v5596_v34 = vrot.slane %v5346_v46, 7  ;;  %9074 = vmatprep.subr.bf16.mxu0 %v11628_v54  ;;  %9458 = vmatprep.subr.bf16.mxu1 %v11628_v54  ;;  %v2786_v40 = vrot.slane %v2635_v11, 7  ;;  %v5451_v3 = vsel %vm2619_vm0, %v5448_v49, %v5450_v47  ;;  %v5348_v27 = vld [vmem:[#allocation3 + $0xe8] sm:$0x7f]  ;;  %v3052_v52 = vld [vmem:[#allocation10 + $0x2b0] sm:$0xff] }
 0x305   : > { %v11766_v58 = vpack.c.bf16 %v3049_v19, %v3047_v7  ;;  %v5597_v28 = vrot.slane %v5347_v63, 7  ;;  %v5600_v18 = vrot.slane %v5451_v3, 7  ;;  %v11769_v57 = vsel %vm2741_vm1, %v2782_v24, %v2783_v5  ;;  %v2556_v48 = vld [vmem:[#allocation3 + $0x350] sm:$0xff]  ;;  %v2557_v56 = vld [vmem:[#allocation3 + $0x360] sm:$0xff]  ;;  %v2532_v3 = vld [vmem:[#allocation3 + $0x348] sm:$0x80] }
 0x306   : > { %v2796_v46 = vrot.slane %v2634_v16, 7  ;;  %v5610_v45 = vrot.slane %v5450_v47, 7  ;;  %v11772_v54 = vsel %vm2741_vm1, %v2785_v37, %v2786_v40  ;;  %v11777_v7 = vpack.c.bf16 %v3048_v33, %v3046_v6  ;;  %v5373_v63 = vld [vmem:[#allocation3 + $0x110] sm:$0xff]  ;;  %v5374_v11 = vld [vmem:[#allocation3 + $0x120] sm:$0xff] }
 0x307   : > { %v11775_v49 = vsel %vm2741_vm1, %v5596_v34, %v5597_v28  ;;  %v2794_v19 = vrot.slane %v2531_v17, 7  ;;  %9076 = vmatpush1.bf16.msra.mxu0 %v11630_v55  ;;  %9460 = vmatpush1.bf16.msra.mxu1 %v11630_v55  ;;  %v11782_v16 = vsel %vm2741_vm1, %v5599_v42, %v5600_v18  ;;  %v11787_v37 = vpack.c.bf16 %v3053_v51, %v3051_v26  ;;  %v11789_v34 = vld [vmem:[#allocation3 + $0x358] sm:$0xff]  ;;  %v5349_v17 = vld [vmem:[#allocation3 + $0x108] sm:$0x80] }
 0x308   : > { %14746 = vst [vmem:[#allocation40_spill] sm:$0xff] %v11775_v49  ;;  %14747 = vst [vmem:[#allocation41_spill] sm:$0xff] %v11777_v7  ;;  %v11785_v47 = vsel %vm2741_vm1, %v2786_v40, %v2796_v46  ;;  %v5608_v24 = vrot.slane %v5348_v27, 7  ;;  %9078 = vmatprep.subr.bf16.mxu0 %v11632_v60  ;;  %9462 = vmatprep.subr.bf16.mxu1 %v11632_v60  ;;  %v11794_v6 = vsel %vm2741_vm1, %v5600_v18, %v5610_v45  ;;  %v3055_v46 = vld [vmem:[#allocation10 + $0x2c8] sm:$0xff] }
 0x309   : > { %14748 = vst [vmem:[#allocation42_spill] sm:$0xff] %v11785_v47  ;;  %14749 = vst [vmem:[#allocation43_spill] sm:$0xff] %v11787_v37  ;;  %v11797_v55 = vsel %vm2741_vm1, %v2783_v5, %v2794_v19  ;;  %v2638_v42 = vrot.slane %v2556_v48, 1  ;;  %v2640_v33 = vrot.slane %v2557_v56, 1  ;;  %v11799_v40 = vpack.c.bf16 %v3052_v52, %v3050_v15  ;;  %v3057_v37 = vld [vmem:[#allocation10 + $0x2d8] sm:$0xff]  ;;  %v3054_v5 = vld [vmem:[#allocation10 + $0x2c0] sm:$0xff] }
 0x30a   : > { %14750 = vst [vmem:[#allocation44_spill] sm:$0xff] %v11794_v6  ;;  %14751 = vst [vmem:[#allocation45_spill] sm:$0xff] %v11797_v55  ;;  %v5454_v26 = vrot.slane %v5373_v63, 1  ;;  %v5456_v51 = vrot.slane %v5374_v11, 1  ;;  %v2802_v27 = vrot.slane %v2532_v3, 7  ;;  %v5350_v47 = vld [vmem:[#allocation3 + $0x118] sm:$0xff]  ;;  %v11802_v7 = vsel %vm2741_vm1, %v5597_v28, %v5608_v24 }
 0x30b   : > { %14752 = vst [vmem:[#allocation46_spill] sm:$0xff] %v11799_v40  ;;  %14753 = vst [vmem:[#allocation47_spill] sm:$0xff] %v11802_v7  ;;  %v2641_v60 = vsel %vm2619_vm0, %v2638_v42, %v2640_v33  ;;  %v2805_v45 = vrot.slane %v2638_v42, 7  ;;  %v2803_v18 = vrot.slane %v11789_v34, 7  ;;  %v3056_v48 = vld [vmem:[#allocation10 + $0x2d0] sm:$0xff]  ;;  %9080 = vmatpush1.bf16.msra.mxu0 %v11634_v61  ;;  %9464 = vmatpush1.bf16.msra.mxu1 %v11634_v61  ;;  %v5616_v63 = vrot.slane %v5349_v17, 7 }
 0x30c   : > { %v2534_v56 = vld [vmem:[#allocation3 + $0x368] sm:$0x7f]  ;;  %v2806_v52 = vrot.slane %v2641_v60, 7  ;;  %v5457_v15 = vsel %vm2619_vm0, %v5454_v26, %v5456_v51  ;;  %v5619_v19 = vrot.slane %v5454_v26, 7  ;;  %9082 = vmatprep.subr.bf16.mxu0 %v11636_v62  ;;  %9466 = vmatprep.subr.bf16.mxu1 %v11636_v62  ;;  %v11814_v24 = vpack.c.bf16 %v3057_v37, %v3055_v46  ;;  %v3061_v40 = vld [vmem:[#allocation10 + $0x2f8] sm:$0xff]  ;;  %v2559_v61 = vld [vmem:[#allocation3 + $0x390] sm:$0xff] }
 0x30d   : > { %v5351_v11 = vld [vmem:[#allocation3 + $0x128] sm:$0x7f]  ;;  %v5620_v28 = vrot.slane %v5457_v15, 7  ;;  %v11812_v3 = vsel %vm2741_vm1, %v2802_v27, %v2803_v18  ;;  %v5617_v34 = vrot.slane %v5350_v47, 7  ;;  %v11816_v60 = vpack.c.bf16 %v3056_v48, %v3054_v5  ;;  %v2560_v55 = vld [vmem:[#allocation3 + $0x3a0] sm:$0xff]  ;;  %v5376_v6 = vld [vmem:[#allocation3 + $0x150] sm:$0xff] }
 0x30e   : > { %v3059_v42 = vld [vmem:[#allocation10 + $0x2e8] sm:$0xff]  ;;  %v2816_v7 = vrot.slane %v2640_v33, 7  ;;  %v5630_v26 = vrot.slane %v5456_v51, 7  ;;  %v2814_v17 = vrot.slane %v2534_v56, 7  ;;  %v11819_v49 = vsel %vm2741_vm1, %v2805_v45, %v2806_v52  ;;  %v5377_v27 = vld [vmem:[#allocation3 + $0x160] sm:$0xff]  ;;  %v11827_v15 = vld [vmem:[#allocation3 + $0x398] sm:$0xff] }
 0x30f   : > { %14754 = vst [vmem:[#allocation48_spill] sm:$0xff] %v11816_v60  ;;  %v11822_v62 = vsel %vm2741_vm1, %v5619_v19, %v5620_v28  ;;  %v11825_v37 = vsel %vm2741_vm1, %v5616_v63, %v5617_v34  ;;  %v5628_v47 = vrot.slane %v5351_v11, 7  ;;  %v2535_v46 = vld [vmem:[#allocation3 + $0x388] sm:$0x80]  ;;  %9084 = vmatpush1.bf16.msra.mxu0 %v11638_v10  ;;  %9468 = vmatpush1.bf16.msra.mxu1 %v11638_v10  ;;  %v3058_v5 = vld [vmem:[#allocation10 + $0x2e0] sm:$0xff]  ;;  %v3060_v48 = vld [vmem:[#allocation10 + $0x2f0] sm:$0xff] }
 0x310   : > { %v11832_v33 = vsel %vm2741_vm1, %v2806_v52, %v2816_v7  ;;  %v11835_v51 = vsel %vm2741_vm1, %v5620_v28, %v5630_v26  ;;  %v11837_v45 = vpack.c.bf16 %v3061_v40, %v3059_v42  ;;  %v2644_v56 = vrot.slane %v2559_v61, 1  ;;  %v5352_v19 = vld [vmem:[#allocation3 + $0x148] sm:$0x80]  ;;  %9086 = vmatprep.subr.bf16.mxu0 %v11640_v12  ;;  %9470 = vmatprep.subr.bf16.mxu1 %v11640_v12  ;;  %v3065_v28 = vld [vmem:[#allocation10 + $0x318] sm:$0xff] }
 0x311   : > { %14755 = vst [vmem:[#allocation49_spill] sm:$0xff] %v11832_v33  ;;  %14756 = vst [vmem:[#allocation50_spill] sm:$0xff] %v11835_v51  ;;  %v11842_v63 = vsel %vm2741_vm1, %v2803_v18, %v2814_v17  ;;  %v11845_v10 = vsel %vm2741_vm1, %v5617_v34, %v5628_v47  ;;  %v2646_v7 = vrot.slane %v2560_v55, 1  ;;  %v5460_v52 = vrot.slane %v5376_v6, 1  ;;  %v3063_v11 = vld [vmem:[#allocation10 + $0x308] sm:$0xff]  ;;  %v5353_v40 = vld [vmem:[#allocation3 + $0x158] sm:$0xff] }
 0x312   : > { %14757 = vst [vmem:[#allocation51_spill] sm:$0xff] %v11837_v45  ;;  %14758 = vst [vmem:[#allocation52_spill] sm:$0xff] %v11842_v63  ;;  %v2825_v42 = vrot.slane %v2644_v56, 7  ;;  %v5462_v26 = vrot.slane %v5377_v27, 1  ;;  %v2822_v45 = vrot.slane %v2535_v46, 7  ;;  %v2823_v61 = vrot.slane %v11827_v15, 7 }
 0x313   : > { %14759 = vst [vmem:[#allocation53_spill] sm:$0xff] %v11845_v10  ;;  %v3062_v51 = vld [vmem:[#allocation10 + $0x300] sm:$0xff]  ;;  %v11848_v33 = vpack.c.bf16 %v3060_v48, %v3058_v5  ;;  %v2647_v12 = vsel %vm2619_vm0, %v2644_v56, %v2646_v7  ;;  %v5639_v18 = vrot.slane %v5460_v52, 7  ;;  %v5636_v17 = vrot.slane %v5352_v19, 7  ;;  %v3064_v63 = vld [vmem:[#allocation10 + $0x310] sm:$0xff]  ;;  %v3067_v47 = vld [vmem:[#allocation10 + $0x328] sm:$0xff]  ;;  %9088 = vmatpush1.bf16.msra.mxu0 %v11642_v14  ;;  %9472 = vmatpush1.bf16.msra.mxu1 %v11642_v14 }
 0x314   : > { %v2537_v34 = vld [vmem:[#allocation3 + $0x3a8] sm:$0x7f]  ;;  %v2826_v6 = vrot.slane %v2647_v12, 7  ;;  %v5463_v55 = vsel %vm2619_vm0, %v5460_v52, %v5462_v26  ;;  %v11854_v27 = vpack.c.bf16 %v3065_v28, %v3063_v11  ;;  %v5637_v46 = vrot.slane %v5353_v40, 7  ;;  %v3069_v15 = vld [vmem:[#allocation10 + $0x338] sm:$0xff]  ;;  %9090 = vmatprep.subr.bf16.mxu0 %v11646_v50  ;;  %9474 = vmatprep.subr.bf16.mxu1 %v11646_v50  ;;  %v3068_v14 = vld [vmem:[#allocation10 + $0x330] sm:$0xff] }
 0x315   : > { %14760 = vst [vmem:[#allocation54_spill] sm:$0xff] %v11848_v33  ;;  %v5354_v5 = vld [vmem:[#allocation3 + $0x168] sm:$0x7f]  ;;  %v5640_v56 = vrot.slane %v5463_v55, 7  ;;  %v11859_v19 = vsel %vm2741_vm1, %v2822_v45, %v2823_v61  ;;  %v2836_v33 = vrot.slane %v2646_v7, 7  ;;  %v5650_v10 = vrot.slane %v5462_v26, 7 }
 0x316   : > { %14761 = vst [vmem:[#allocation55_spill] sm:$0xff] %v11854_v27  ;;  %v3066_v48 = vld [vmem:[#allocation10 + $0x320] sm:$0xff]  ;;  %14762 = vst [vmem:[#allocation56_spill] sm:$0xff] %v11859_v19  ;;  %v2562_v12 = vld [vmem:[#allocation3 + $0x3d0] sm:$0xff]  ;;  %v11862_v52 = vsel %vm2741_vm1, %v2825_v42, %v2826_v6  ;;  %v11865_v11 = vsel %vm2741_vm1, %v5636_v17, %v5637_v46  ;;  %v11867_v28 = vpack.c.bf16 %v3064_v63, %v3062_v51  ;;  %v2834_v40 = vrot.slane %v2537_v34, 7 }
 0x317   : > { %v2563_v60 = vld [vmem:[#allocation3 + $0x3e0] sm:$0xff]  ;;  %v5379_v27 = vld [vmem:[#allocation3 + $0x190] sm:$0xff]  ;;  %v2538_v55 = vld [vmem:[#allocation3 + $0x3c8] sm:$0x80]  ;;  %v11870_v45 = vsel %vm2741_vm1, %v5639_v18, %v5640_v56  ;;  %v11873_v7 = vsel %vm2741_vm1, %v2826_v6, %v2836_v33  ;;  %v11875_v26 = vpack.c.bf16 %v3069_v15, %v3067_v47  ;;  %v5648_v19 = vrot.slane %v5354_v5, 7  ;;  %9092 = vmatpush1.bf16.msra.mxu0 %v11648_v22  ;;  %9476 = vmatpush1.bf16.msra.mxu1 %v11648_v22 }
 0x318   : > { %v5380_v50 = vld [vmem:[#allocation3 + $0x1a0] sm:$0xff]  ;;  %v11877_v42 = vld [vmem:[#allocation3 + $0x3d8] sm:$0xff]  ;;  %v11882_v51 = vsel %vm2741_vm1, %v5640_v56, %v5650_v10  ;;  %v11885_v63 = vsel %vm2741_vm1, %v2823_v61, %v2834_v40  ;;  %v2650_v18 = vrot.slane %v2562_v12, 1  ;;  %v2652_v17 = vrot.slane %v2563_v60, 1  ;;  %v5355_v34 = vld [vmem:[#allocation3 + $0x188] sm:$0x80]  ;;  %9094 = vmatprep.subr.bf16.mxu0 %v11653_v31  ;;  %9478 = vmatprep.subr.bf16.mxu1 %v11653_v31 }
 0x319   : > { %14763 = vst [vmem:[#allocation57_spill] sm:$0xff] %v11875_v26  ;;  %14764 = vst [vmem:[#allocation58_spill] sm:$0xff] %v11882_v51  ;;  %v11889_v33 = vpack.c.bf16 %v3068_v14, %v3066_v48  ;;  %v5466_v47 = vrot.slane %v5379_v27, 1  ;;  %v5468_v6 = vrot.slane %v5380_v50, 1  ;;  %v2842_v15 = vrot.slane %v2538_v55, 7  ;;  %v3071_v5 = vld [vmem:[#allocation10 + $0x348] sm:$0xff] }
 0x31a   : > { %14765 = vst [vmem:[#allocation59_spill] sm:$0xff] %v11885_v63  ;;  %v3073_v22 = vld [vmem:[#allocation10 + $0x358] sm:$0xff]  ;;  %v11892_v10 = vsel %vm2741_vm1, %v5637_v46, %v5648_v19  ;;  %v2653_v61 = vsel %vm2619_vm0, %v2650_v18, %v2652_v17  ;;  %v2845_v56 = vrot.slane %v2650_v18, 7  ;;  %v2843_v60 = vrot.slane %v11877_v42, 7  ;;  %v3070_v12 = vld [vmem:[#allocation10 + $0x340] sm:$0xff]  ;;  %v3072_v40 = vld [vmem:[#allocation10 + $0x350] sm:$0xff] }
 0x31b   : > { %14766 = vst [vmem:[#allocation60_spill] sm:$0xff] %v11889_v33  ;;  %v5356_v26 = vld [vmem:[#allocation3 + $0x198] sm:$0xff]  ;;  %14767 = vst [vmem:[#allocation61_spill] sm:$0xff] %v11892_v10  ;;  %v2540_v63 = vld [vmem:[#allocation3 + $0x3e8] sm:$0x7f]  ;;  %v2846_v31 = vrot.slane %v2653_v61, 7  ;;  %v5469_v48 = vsel %vm2619_vm0, %v5466_v47, %v5468_v6  ;;  %9096 = vmatpush1.bf16.msra.mxu0 %v11663_v13  ;;  %9480 = vmatpush1.bf16.msra.mxu1 %v11663_v13  ;;  %v11902_v55 = vpack.c.bf16 %v3073_v22, %v3071_v5 }
 0x31c   : > { %v5659_v27 = vrot.slane %v5466_v47, 7  ;;  %v5656_v14 = vrot.slane %v5355_v34, 7  ;;  %v5357_v50 = vld [vmem:[#allocation3 + $0x1a8] sm:$0x7f]  ;;  %v5660_v46 = vrot.slane %v5469_v48, 7  ;;  %v11900_v19 = vsel %vm2741_vm1, %v2842_v15, %v2843_v60  ;;  %v3077_v33 = vld [vmem:[#allocation10 + $0x378] sm:$0xff]  ;;  %9098 = vmatprep.subr.bf16.mxu0 %v11666_v53  ;;  %9482 = vmatprep.subr.bf16.mxu1 %v11666_v53 }
 0x31d   : > { %14768 = vst [vmem:[#allocation62_spill] sm:$0xff] %v11900_v19  ;;  %14769 = vst [vmem:[#allocation63_spill] sm:$0xff] %v11902_v55  ;;  %v5657_v42 = vrot.slane %v5356_v26, 7  ;;  %v3075_v18 = vld [vmem:[#allocation10 + $0x368] sm:$0xff]  ;;  %v11906_v34 = vpack.c.bf16 %v3072_v40, %v3070_v12  ;;  %v2856_v47 = vrot.slane %v2652_v17, 7  ;;  %v5670_v61 = vrot.slane %v5468_v6, 7 }
 0x31e   : > { %v2565_v10 = vld [vmem:[#allocation3 + $0x410] sm:$0xff]  ;;  %v2854_v51 = vrot.slane %v2540_v63, 7  ;;  %v2566_v13 = vld [vmem:[#allocation3 + $0x420] sm:$0xff]  ;;  %v11909_v15 = vsel %vm2741_vm1, %v2845_v56, %v2846_v31  ;;  %v11912_v5 = vsel %vm2741_vm1, %v5659_v27, %v5660_v46  ;;  %v5668_v22 = vrot.slane %v5357_v50, 7  ;;  %v2541_v55 = vld [vmem:[#allocation3 + $0x408] sm:$0x80]  ;;  %3159 = vmatmul.mubr.f32.vlgmr.msra.gmra.mrb[40].mxu0 %v11671_v38  ;;  %5973 = vmatmul.mubr.f32.vlgmr.msra.gmra.mrb[40].mxu1 %v11686_v25 }
 0x31f   : > { %v5382_v48 = vld [vmem:[#allocation3 + $0x1d0] sm:$0xff]  ;;  %v11915_v26 = vsel %vm2741_vm1, %v5656_v14, %v5657_v42  ;;  %v5383_v19 = vld [vmem:[#allocation3 + $0x1e0] sm:$0xff]  ;;  %v11917_v53 = vld [vmem:[#allocation3 + $0x418] sm:$0xff]  ;;  %v11922_v63 = vsel %vm2741_vm1, %v2846_v31, %v2856_v47  ;;  %v11925_v17 = vsel %vm2741_vm1, %v5660_v46, %v5670_v61  ;;  %v11927_v6 = vpack.c.bf16 %v3077_v33, %v3075_v18  ;;  %9100 = vmatpush1.bf16.msra.mxu0 %v11677_v32 }
 0x320   : > { %v3074_v56 = vld [vmem:[#allocation10 + $0x360] sm:$0xff]  ;;  %v3076_v12 = vld [vmem:[#allocation10 + $0x370] sm:$0xff]  ;;  %v2656_v40 = vrot.slane %v2565_v10, 1  ;;  %v5358_v27 = vld [vmem:[#allocation3 + $0x1c8] sm:$0x80]  ;;  %9484 = vmatpush1.bf16.msra.mxu1 %v11677_v32  ;;  %v11932_v38 = vsel %vm2741_vm1, %v2843_v60, %v2854_v51  ;;  %v11935_v25 = vsel %vm2741_vm1, %v5657_v42, %v5668_v22  ;;  %v2658_v31 = vrot.slane %v2566_v13, 1  ;;  %3164 = vmatprep.mubr.f32.mxu0 %v11689_v23 }
 0x321   : > { %v5472_v14 = vrot.slane %v5382_v48, 1  ;;  %v3079_v50 = vld [vmem:[#allocation10 + $0x388] sm:$0xff]  ;;  %v3081_v46 = vld [vmem:[#allocation10 + $0x398] sm:$0xff]  ;;  %5978 = vmatprep.mubr.f32.mxu1 %v11696_v39  ;;  %v5474_v18 = vrot.slane %v5383_v19, 1  ;;  %v2862_v47 = vrot.slane %v2541_v55, 7  ;;  %v2863_v32 = vrot.slane %v11917_v53, 7  ;;  %9102 = vmatprep.subr.bf16.mxu0 %v11691_v29 }
 0x322   : > { %v11937_v33 = vld [vmem:[#allocation3 + $0x1d8] sm:$0xff]  ;;  %v2865_v10 = vrot.slane %v2656_v40, 7  ;;  %v3078_v51 = vld [vmem:[#allocation10 + $0x380] sm:$0xff]  ;;  %9486 = vmatprep.subr.bf16.mxu1 %v11691_v29  ;;  %v11944_v60 = vpack.c.bf16 %v3076_v12, %v3074_v56  ;;  %v2659_v42 = vsel %vm2619_vm0, %v2656_v40, %v2658_v31  ;;  %v5676_v13 = vrot.slane %v5358_v27, 7  ;;  %v3083_v22 = vld [vmem:[#allocation10 + $0x3a8] sm:$0xff]  ;;  %3165 = vmatmul.mubr.f32.gmra.mrb[42].mxu0 %v11702_v44 }
 0x323   : > { %v5679_v61 = vrot.slane %v5472_v14, 7  ;;  %v3080_v48 = vld [vmem:[#allocation10 + $0x390] sm:$0xff]  ;;  %v2543_v23 = vld [vmem:[#allocation3 + $0x428] sm:$0x7f]  ;;  %5979 = vmatmul.mubr.f32.gmra.mrb[42].mxu1 %v11710_v36  ;;  %v2866_v39 = vrot.slane %v2659_v42, 7  ;;  %v5475_v19 = vsel %vm2619_vm0, %v5472_v14, %v5474_v18  ;;  %v11950_v55 = vpack.c.bf16 %v3081_v46, %v3079_v50  ;;  %v3085_v53 = vld [vmem:[#allocation10 + $0x3b8] sm:$0xff]  ;;  %9104 = vmatpush1.bf16.msra.mxu0 %v11698_v1 }
 0x324   : > { %14770 = vst [vmem:[#allocation64_spill] sm:$0xff] %v11944_v60  ;;  %v5677_v29 = vrot.slane %v11937_v33, 7  ;;  %v5360_v56 = vld [vmem:[#allocation3 + $0x1e8] sm:$0x7f]  ;;  %9488 = vmatpush1.bf16.msra.mxu1 %v11698_v1  ;;  %v5680_v40 = vrot.slane %v5475_v19, 7  ;;  %v11956_v27 = vsel %vm2741_vm1, %v2862_v47, %v2863_v32  ;;  %v2876_v44 = vrot.slane %v2658_v31, 7  ;;  %3170 = vmatprep.mubr.f32.mxu0 %v11728_v4 }
 0x325   : > { %v3082_v12 = vld [vmem:[#allocation10 + $0x3a0] sm:$0xff]  ;;  %v5690_v36 = vrot.slane %v5474_v18, 7  ;;  %v3084_v42 = vld [vmem:[#allocation10 + $0x3b0] sm:$0xff]  ;;  %5984 = vmatprep.mubr.f32.mxu1 %v11731_v0  ;;  %v11961_v50 = vsel %vm2741_vm1, %v2865_v10, %v2866_v39  ;;  %v11966_v1 = vpack.c.bf16 %v3080_v48, %v3078_v51  ;;  %v2874_v33 = vrot.slane %v2543_v23, 7  ;;  %v2544_v31 = vld [vmem:[#allocation3 + $0x448] sm:$0x80]  ;;  %9106 = vmatprep.subr.bf16.mxu0 %v11720_v8 }
 0x326   : > { %v2568_v60 = vld [vmem:[#allocation3 + $0x450] sm:$0xff]  ;;  %v2569_v14 = vld [vmem:[#allocation3 + $0x460] sm:$0xff]  ;;  %v11964_v46 = vsel %vm2741_vm1, %v5676_v13, %v5677_v29  ;;  %9490 = vmatprep.subr.bf16.mxu1 %v11720_v8  ;;  %v11971_v4 = vsel %vm2741_vm1, %v5679_v61, %v5680_v40  ;;  %v11974_v0 = vsel %vm2741_vm1, %v2866_v39, %v2876_v44  ;;  %v11976_v10 = vpack.c.bf16 %v3085_v53, %v3083_v22  ;;  %v11978_v13 = vld [vmem:[#allocation3 + $0x458] sm:$0xff] }
 0x327   : > { %v5385_v47 = vld [vmem:[#allocation3 + $0x210] sm:$0xff]  ;;  %v5386_v19 = vld [vmem:[#allocation3 + $0x220] sm:$0xff]  ;;  %v5688_v18 = vrot.slane %v5360_v56, 7  ;;  %3171 = vmatmul.mubr.f32.gmra.mrb[44].mxu0 %v11718_v35  ;;  %5985 = vmatmul.mubr.f32.gmra.mrb[44].mxu1 %v11734_v20  ;;  %v11983_v51 = vsel %vm2741_vm1, %v5680_v40, %v5690_v36  ;;  %v11986_v8 = vsel %vm2741_vm1, %v2863_v32, %v2874_v33  ;;  %v2662_v61 = vrot.slane %v2568_v60, 1  ;;  %v5361_v23 = vld [vmem:[#allocation3 + $0x208] sm:$0x80] }
 0x328   : > { %v2664_v48 = vrot.slane %v2569_v14, 1  ;;  %9108 = vmatpush1.bf16.msra.mxu0 %v11723_v30  ;;  %9492 = vmatpush1.bf16.msra.mxu1 %v11723_v30  ;;  %v11990_v22 = vpack.c.bf16 %v3084_v42, %v3082_v12  ;;  %v5478_v39 = vrot.slane %v5385_v47, 1  ;;  %v5480_v53 = vrot.slane %v5386_v19, 1  ;;  %v3087_v56 = vld [vmem:[#allocation10 + $0x3c8] sm:$0xff]  ;;  %v3089_v20 = vld [vmem:[#allocation10 + $0x3d8] sm:$0xff]  ;;  %v3086_v12 = vld [vmem:[#allocation10 + $0x3c0] sm:$0xff] }
 0x329   : > { %v2882_v35 = vrot.slane %v2544_v31, 7  ;;  %v5362_v44 = vld [vmem:[#allocation3 + $0x218] sm:$0xff]  ;;  %3176 = vmatprep.mubr.f32.mxu0 %v11743_v21  ;;  %5990 = vmatprep.mubr.f32.mxu1 %v11746_v41  ;;  %v11995_v32 = vsel %vm2741_vm1, %v5677_v29, %v5688_v18  ;;  %v2885_v40 = vrot.slane %v2662_v61, 7  ;;  %v2883_v30 = vrot.slane %v11978_v13, 7  ;;  %v2546_v42 = vld [vmem:[#allocation3 + $0x468] sm:$0x7f] }
 0x32a   : > { %v2665_v60 = vsel %vm2619_vm0, %v2662_v61, %v2664_v48  ;;  %v3088_v36 = vld [vmem:[#allocation10 + $0x3d0] sm:$0xff]  ;;  %9110 = vmatprep.subr.bf16.mxu0 %v11748_v9  ;;  %9494 = vmatprep.subr.bf16.mxu1 %v11748_v9  ;;  %v5481_v21 = vsel %vm2619_vm0, %v5478_v39, %v5480_v53  ;;  %v5699_v33 = vrot.slane %v5478_v39, 7  ;;  %v5696_v41 = vrot.slane %v5361_v23, 7  ;;  %v5363_v47 = vld [vmem:[#allocation3 + $0x228] sm:$0x7f]  ;;  %v3093_v61 = vld [vmem:[#allocation10 + $0x3f8] sm:$0xff] }
 0x32b   : > { %v2886_v14 = vrot.slane %v2665_v60, 7  ;;  %3177 = vmatmul.mubr.f32.gmra.mrb[46].mxu0 %v11751_v59  ;;  %5991 = vmatmul.mubr.f32.gmra.mrb[46].mxu1 %v11754_v43  ;;  %v5700_v29 = vrot.slane %v5481_v21, 7  ;;  %v12005_v19 = vsel %vm2741_vm1, %v2882_v35, %v2883_v30  ;;  %v12007_v31 = vpack.c.bf16 %v3089_v20, %v3087_v56  ;;  %v3091_v13 = vld [vmem:[#allocation10 + $0x3e8] sm:$0xff] }
 0x32c   : > { %14771 = vst [vmem:[#allocation65_spill] sm:$0xff] %v12005_v19  ;;  %v5697_v18 = vrot.slane %v5362_v44, 7  ;;  %v2571_v9 = vld [vmem:[#allocation3 + $0x290] sm:$0xfe]  ;;  %9112 = vmatpush1.bf16.msra.mxu0 %v11760_v2  ;;  %9496 = vmatpush1.bf16.msra.mxu1 %v11760_v2  ;;  %v12011_v23 = vpack.c.bf16 %v3088_v36, %v3086_v12  ;;  %v2896_v39 = vrot.slane %v2664_v48, 7  ;;  %v5710_v59 = vrot.slane %v5480_v53, 7 }
 0x32d   : > { %v2894_v60 = vrot.slane %v2546_v42, 7  ;;  %v5388_v43 = vld [vmem:[#allocation3 + $0x50] sm:$0xfe]  ;;  %3182 = vmatprep.mubr.f32.mxu0 %v11772_v54  ;;  %5996 = vmatprep.mubr.f32.mxu1 %v11782_v16  ;;  %v12016_v35 = vsel %vm2741_vm1, %v2885_v40, %v2886_v14  ;;  %v12019_v56 = vsel %vm2741_vm1, %v5699_v33, %v5700_v29  ;;  %v5708_v2 = vrot.slane %v5363_v47, 7  ;;  %v3090_v44 = vld [vmem:[#allocation10 + $0x3e0] sm:$0xff]  ;;  %v3908_v19 = vld [vmem:[#allocation10 + $0x438] sm:$0xff] }
 0x32e   : > { %14772 = vst [vmem:[#allocation66_spill] sm:$0xff] %v12011_v23  ;;  %v12022_v20 = vsel %vm2741_vm1, %v5696_v41, %v5697_v18  ;;  %v3092_v12 = vld [vmem:[#allocation10 + $0x3f0] sm:$0xff]  ;;  %v2549_v48 = vld [vmem:[#allocation3 + $0x2a8] sm:$0xff]  ;;  %9114 = vmatprep.subr.bf16.mxu0 %v11766_v58  ;;  %9498 = vmatprep.subr.bf16.mxu1 %v11766_v58  ;;  %v12027_v54 = vsel %vm2741_vm1, %v2886_v14, %v2896_v39  ;;  %v2685_v40 = vrot.slane %v2571_v9, 2  ;;  %v5500_v41 = vrot.slane %v5388_v43, 2 }
 0x32f   : > { %14773 = vst [vmem:[#allocation67_spill] sm:$0xff] %v12022_v20  ;;  %14774 = vst [vmem:[#allocation68_spill] sm:$0xff] %v12027_v54  ;;  %v12030_v16 = vsel %vm2741_vm1, %v5700_v29, %v5710_v59  ;;  %v12032_v53 = vpack.c.bf16 %v3093_v61, %v3091_v13  ;;  %v5366_v36 = vld [vmem:[#allocation3 + $0x68] sm:$0xff]  ;;  %3183 = vmatmul.mubr.f32.gmra.mrb[48].mxu0 %v11769_v57  ;;  %v12037_v21 = vsel %vm2741_vm1, %v2883_v30, %v2894_v60  ;;  %v14780_v58 = vld [vmem:[#allocation30_spill] sm:$0xff] }
 0x330   : > { %14775 = vst [vmem:[#allocation69_spill] sm:$0xff] %v12030_v16  ;;  %v14777_v42 = vld [vmem:[#allocation40_spill] sm:$0xff]  ;;  %v12040_v33 = vsel %vm2741_vm1, %v5697_v18, %v5708_v2  ;;  %v2686_v14 = vrot.slane %v14780_v58, 2  ;;  %v3904_v29 = vld [vmem:[#allocation10 + $0x418] sm:$0xff]  ;;  %v14781_v39 = vld [vmem:[#allocation41_spill] sm:$0xff]  ;;  %v12045_v13 = vpack.c.bf16 %v3092_v12, %v3090_v44  ;;  %v2751_v57 = vrot.slane %v2685_v40, 7 }
 0x331   : > { %14776 = vst [vmem:[#allocation70_spill] sm:$0xff] %v12032_v53  ;;  %5997 = vmatmul.mubr.f32.gmra.mrb[48].mxu1 %v14777_v42  ;;  %14778 = vst [vmem:[#allocation40_spill] sm:$0xff] %v12037_v21  ;;  %v3902_v47 = vld [vmem:[#allocation10 + $0x408] sm:$0xff]  ;;  %9116 = vmatpush1.bf16.msra.mxu0 %v14781_v39  ;;  %v14783_v61 = vld [vmem:[#allocation31_spill] sm:$0xff]  ;;  %v2624_v59 = vrot.slane %v2549_v48, 1  ;;  %v5565_v2 = vrot.slane %v5500_v41, 7 }
 0x332   : > { %14779 = vst [vmem:[#allocation71_spill] sm:$0xff] %v12040_v33  ;;  %9500 = vmatpush1.bf16.msra.mxu1 %v14781_v39  ;;  %14782 = vst [vmem:[#allocation30_spill] sm:$0xff] %v12045_v13  ;;  %v5501_v9 = vrot.slane %v14783_v61, 2  ;;  %v3901_v30 = vld [vmem:[#allocation10 + $0x400] sm:$0xff]  ;;  %v2572_v60 = vld [vmem:[#allocation3 + $0x2b0] sm:$0x1]  ;;  %v2687_v43 = vsel %vm2684_vm2, %v2685_v40, %v2686_v14  ;;  %v12059_v13 = vpack.c.bf16 %v3904_v29, %v3902_v47 }
 0x333   : > { %v14784_v42 = vld [vmem:[#allocation42_spill] sm:$0xff]  ;;  %v14785_v18 = vld [vmem:[#allocation44_spill] sm:$0xff]  ;;  %v5440_v53 = vrot.slane %v5366_v36, 1  ;;  %v5389_v44 = vld [vmem:[#allocation3 + $0x70] sm:$0x1]  ;;  %v2752_v48 = vrot.slane %v2687_v43, 7 }
 0x334   : > { %3188 = vmatprep.mubr.f32.mxu0 %v14784_v42  ;;  %6002 = vmatprep.mubr.f32.mxu1 %v14785_v18  ;;  %v14786_v58 = vld [vmem:[#allocation32_spill] sm:$0xff]  ;;  %v3903_v39 = vld [vmem:[#allocation10 + $0x410] sm:$0xff]  ;;  %v14788_v12 = vld [vmem:[#allocation43_spill] sm:$0xff]  ;;  %v5502_v61 = vsel %vm2684_vm2, %v5500_v41, %v5501_v9 }
 0x335   : > { %v14787_v33 = vrot.slane %v14786_v58, 1  ;;  %9118 = vmatprep.subr.bf16.mxu0 %v14788_v12  ;;  %9502 = vmatprep.subr.bf16.mxu1 %v14788_v12  ;;  %v14790_v40 = vld [vmem:[#allocation45_spill] sm:$0xff]  ;;  %v14791_v16 = vld [vmem:[#allocation47_spill] sm:$0xff]  ;;  %v5566_v36 = vrot.slane %v5502_v61, 7  ;;  %v14795_v58 = vld [vmem:[#allocation46_spill] sm:$0xff]  ;;  %v12070_v29 = vpack.c.bf16 %v3903_v39, %v3901_v30 }
 0x336   : > { %3189 = vmatmul.mubr.f32.gmra.mrb[50].mxu0 %v14790_v40  ;;  %6003 = vmatmul.mubr.f32.gmra.mrb[50].mxu1 %v14791_v16  ;;  %v14792_v54 = vld [vmem:[#allocation33_spill] sm:$0xff]  ;;  %v5503_v16 = vrot.slane %v5389_v44, 2  ;;  %v3905_v61 = vld [vmem:[#allocation10 + $0x420] sm:$0xff]  ;;  %v2758_v40 = vrot.slane %v2624_v59, 7 }
 0x337   : > { %v2748_v21 = vrot.slane %v14787_v33, 7  ;;  %v14789_v42 = vmov %v14787_v33  ;;  %v14793_v23 = vrot.slane %v14792_v54, 1  ;;  %v3906_v41 = vld [vmem:[#allocation10 + $0x428] sm:$0xff]  ;;  %9120 = vmatpush1.bf16.msra.mxu0 %v14795_v58  ;;  %9504 = vmatpush1.bf16.msra.mxu1 %v14795_v58  ;;  %v12078_v54 = vsel %vm2741_vm1, %v5565_v2, %v5566_v36  ;;  %v14804_v58 = vld [vmem:[#allocation35_spill] sm:$0xff] }
 0x338   : > { %v2625_v18 = vsel %vm2619_vm0, %v14789_v42, %v2624_v59  ;;  %v2688_v42 = vrot.slane %v2572_v60, 2  ;;  %3194 = vmatprep.mubr.f32.mxu0 %v11819_v49  ;;  %6008 = vmatprep.mubr.f32.mxu1 %v11822_v62  ;;  %v2573_v30 = vld [vmem:[#allocation3 + $0x2d0] sm:$0xfe]  ;;  %v5504_v62 = vsel %vm2684_vm2, %v5501_v9, %v5503_v16  ;;  %v5572_v60 = vrot.slane %v5440_v53, 7  ;;  %v14805_v16 = vld [vmem:[#allocation36_spill] sm:$0xff] }
 0x339   : > { %v2749_v33 = vrot.slane %v2625_v18, 7  ;;  %v5441_v20 = vsel %vm2619_vm0, %v14793_v23, %v5440_v53  ;;  %v14794_v43 = vmov %v14793_v23  ;;  %v12075_v23 = vsel %vm2741_vm1, %v2751_v57, %v2752_v48  ;;  %v5390_v39 = vld [vmem:[#allocation3 + $0x90] sm:$0xfe]  ;;  %9122 = vmatprep.subr.bf16.mxu0 %v11814_v24  ;;  %9506 = vmatprep.subr.bf16.mxu1 %v11814_v24  ;;  %v2552_v24 = vld [vmem:[#allocation3 + $0x2e8] sm:$0xff] }
 0x33a   : > { %v5562_v12 = vrot.slane %v14794_v43, 7  ;;  %v5563_v47 = vrot.slane %v5441_v20, 7  ;;  %v3907_v20 = vld [vmem:[#allocation10 + $0x430] sm:$0xff]  ;;  %v2689_v49 = vsel %vm2684_vm2, %v2686_v14, %v2688_v42  ;;  %v12087_v57 = vpack.c.bf16 %v3908_v19, %v3906_v41  ;;  %3195 = vmatmul.mubr.f32.gmra.mrb[52].mxu0 %v11812_v3  ;;  %6009 = vmatmul.mubr.f32.gmra.mrb[52].mxu1 %v11825_v37  ;;  %v14798_v43 = vld [vmem:[#allocation48_spill] sm:$0xff] }
 0x33b   : > { %v12081_v18 = vsel %vm2741_vm1, %v2748_v21, %v2749_v33  ;;  %v2760_v59 = vrot.slane %v2689_v49, 7  ;;  %v5574_v2 = vrot.slane %v5504_v62, 7  ;;  %v12095_v44 = vsel %vm2741_vm1, %v2749_v33, %v2758_v40  ;;  %9124 = vmatpush1.bf16.msra.mxu0 %v14798_v43  ;;  %9508 = vmatpush1.bf16.msra.mxu1 %v14798_v43  ;;  %v14800_v14 = vld [vmem:[#allocation34_spill] sm:$0xff]  ;;  %v14801_v37 = vld [vmem:[#allocation49_spill] sm:$0xff]  ;;  %v14807_v43 = vld [vmem:[#allocation52_spill] sm:$0xff] }
 0x33c   : > { %14796 = vst [vmem:[#allocation41_spill] sm:$0xff] %v12087_v57  ;;  %v12092_v21 = vsel %vm2741_vm1, %v5562_v12, %v5563_v47  ;;  %14797 = vst [vmem:[#allocation31_spill] sm:$0xff] %v12095_v44  ;;  %v12099_v19 = vpack.c.bf16 %v3907_v20, %v3905_v61  ;;  %v2690_v53 = vrot.slane %v2573_v30, 2  ;;  %v2691_v3 = vrot.slane %v14800_v14, 2  ;;  %3200 = vmatprep.mubr.f32.mxu0 %v14801_v37  ;;  %v14802_v12 = vld [vmem:[#allocation50_spill] sm:$0xff]  ;;  %v3910_v61 = vld [vmem:[#allocation10 + $0x448] sm:$0xff] }
 0x33d   : > { %v5505_v9 = vrot.slane %v5390_v39, 2  ;;  %6014 = vmatprep.mubr.f32.mxu1 %v14802_v12  ;;  %v12105_v41 = vsel %vm2741_vm1, %v2752_v48, %v2760_v59  ;;  %v12108_v33 = vsel %vm2741_vm1, %v5563_v47, %v5572_v60  ;;  %v5506_v42 = vrot.slane %v14804_v58, 2  ;;  %v5369_v20 = vld [vmem:[#allocation3 + $0xa8] sm:$0xff]  ;;  %v14806_v30 = vld [vmem:[#allocation51_spill] sm:$0xff]  ;;  %v2574_v60 = vld [vmem:[#allocation3 + $0x2f0] sm:$0x1] }
 0x33e   : > { %14799 = vst [vmem:[#allocation42_spill] sm:$0xff] %v12099_v19  ;;  %14803 = vst [vmem:[#allocation44_spill] sm:$0xff] %v12108_v33  ;;  %v2627_v40 = vrot.slane %v14805_v16, 1  ;;  %9126 = vmatprep.subr.bf16.mxu0 %v14806_v30  ;;  %9510 = vmatprep.subr.bf16.mxu1 %v14806_v30  ;;  %v12115_v39 = vsel %vm2741_vm1, %v5566_v36, %v5574_v2  ;;  %v2692_v49 = vsel %vm2684_vm2, %v2690_v53, %v2691_v3  ;;  %v3912_v59 = vld [vmem:[#allocation10 + $0x458] sm:$0xff]  ;;  %v3909_v47 = vld [vmem:[#allocation10 + $0x440] sm:$0xff] }
 0x33f   : > { %v2771_v48 = vrot.slane %v2690_v53, 7  ;;  %v2630_v62 = vrot.slane %v2552_v24, 1  ;;  %3201 = vmatmul.mubr.f32.gmra.mrb[54].mxu0 %v14807_v43  ;;  %v14808_v14 = vld [vmem:[#allocation53_spill] sm:$0xff]  ;;  %v2772_v37 = vrot.slane %v2692_v49, 7  ;;  %v12121_v12 = vsel %vm2684_vm2, %v5505_v9, %v5506_v42  ;;  %v14809_v2 = vld [vmem:[#allocation54_spill] sm:$0xff]  ;;  %v14812_v57 = vld [vmem:[#allocation55_spill] sm:$0xff] }
 0x340   : > { %6015 = vmatmul.mubr.f32.gmra.mrb[54].mxu1 %v14808_v14  ;;  %v5585_v58 = vrot.slane %v5505_v9, 7  ;;  %v2768_v16 = vrot.slane %v2627_v40, 7  ;;  %v3911_v30 = vld [vmem:[#allocation10 + $0x450] sm:$0xff]  ;;  %v5391_v36 = vld [vmem:[#allocation3 + $0xb0] sm:$0x1]  ;;  %9128 = vmatpush1.bf16.msra.mxu0 %v14809_v2  ;;  %v5586_v24 = vrot.slane %v12121_v12, 7  ;;  %v12133_v14 = vpack.c.bf16 %v3912_v59, %v3910_v61 }
 0x341   : > { %9512 = vmatpush1.bf16.msra.mxu1 %v14809_v2  ;;  %v2631_v53 = vsel %vm2619_vm0, %v2627_v40, %v2630_v62  ;;  %v14810_v19 = vld [vmem:[#allocation37_spill] sm:$0xff]  ;;  %v5446_v33 = vrot.slane %v5369_v20, 1  ;;  %3206 = vmatprep.mubr.f32.mxu0 %v11862_v52  ;;  %v12131_v9 = vsel %vm2741_vm1, %v2771_v48, %v2772_v37  ;;  %v2693_v44 = vrot.slane %v2574_v60, 2  ;;  %v3916_v2 = vld [vmem:[#allocation10 + $0x478] sm:$0xff] }
 0x342   : > { %v5443_v43 = vrot.slane %v14810_v19, 1  ;;  %6020 = vmatprep.mubr.f32.mxu1 %v11870_v45  ;;  %v2769_v49 = vrot.slane %v2631_v53, 7  ;;  %14811 = vst [vmem:[#allocation32_spill] sm:$0xff] %v12133_v14  ;;  %9130 = vmatprep.subr.bf16.mxu0 %v14812_v57  ;;  %v12138_v19 = vpack.c.bf16 %v3911_v30, %v3909_v47  ;;  %v5508_v20 = vrot.slane %v5391_v36, 2  ;;  %v3914_v52 = vld [vmem:[#allocation10 + $0x468] sm:$0xff]  ;;  %v3915_v53 = vld [vmem:[#allocation10 + $0x470] sm:$0xff] }
 0x343   : > { %9514 = vmatprep.subr.bf16.mxu1 %v14812_v57  ;;  %v14813_v45 = vld [vmem:[#allocation56_spill] sm:$0xff]  ;;  %v12143_v61 = vsel %vm2741_vm1, %v5585_v58, %v5586_v24  ;;  %v2694_v59 = vsel %vm2684_vm2, %v2691_v3, %v2693_v44  ;;  %v2778_v60 = vrot.slane %v2630_v62, 7  ;;  %v2575_v14 = vld [vmem:[#allocation3 + $0x310] sm:$0xfe]  ;;  %v5592_v36 = vrot.slane %v5446_v33, 7 }
 0x344   : > { %v5447_v40 = vsel %vm2619_vm0, %v5443_v43, %v5446_v33  ;;  %v5582_v12 = vrot.slane %v5443_v43, 7  ;;  %3207 = vmatmul.mubr.f32.gmra.mrb[56].mxu0 %v14813_v45  ;;  %6021 = vmatmul.mubr.f32.gmra.mrb[56].mxu1 %v11865_v11  ;;  %v3913_v57 = vld [vmem:[#allocation10 + $0x460] sm:$0xff]  ;;  %v12149_v47 = vsel %vm2741_vm1, %v2768_v16, %v2769_v49  ;;  %v2780_v30 = vrot.slane %v2694_v59, 7  ;;  %v5392_v58 = vld [vmem:[#allocation3 + $0xd0] sm:$0xfe] }
 0x345   : > { %v5583_v48 = vrot.slane %v5447_v40, 7  ;;  %9132 = vmatpush1.bf16.msra.mxu0 %v11867_v28  ;;  %9516 = vmatpush1.bf16.msra.mxu1 %v11867_v28  ;;  %v5509_v11 = vsel %vm2684_vm2, %v5506_v42, %v5508_v20  ;;  %v14814_v43 = vld [vmem:[#allocation58_spill] sm:$0xff]  ;;  %v12158_v62 = vsel %vm2741_vm1, %v2769_v49, %v2778_v60  ;;  %v12160_v28 = vpack.c.bf16 %v3916_v2, %v3914_v52  ;;  %v2555_v16 = vld [vmem:[#allocation3 + $0x328] sm:$0xff]  ;;  %v10544_v20 = vld [vmem:[#allocation3 + $0x320] sm:$0xff] }
 0x346   : > { %3212 = vmatprep.mubr.f32.mxu0 %v11873_v7  ;;  %6026 = vmatprep.mubr.f32.mxu1 %v14814_v43  ;;  %v5594_v3 = vrot.slane %v5509_v11, 7  ;;  %14815 = vst [vmem:[#allocation43_spill] sm:$0xff] %v12158_v62  ;;  %v14817_v40 = vld [vmem:[#allocation57_spill] sm:$0xff]  ;;  %v12165_v33 = vsel %vm2741_vm1, %v2772_v37, %v2780_v30  ;;  %v12167_v7 = vpack.c.bf16 %v3915_v53, %v3913_v57  ;;  %v2695_v42 = vrot.slane %v2575_v14, 2  ;;  %v14819_v45 = vld [vmem:[#allocation59_spill] sm:$0xff]  ;;  %v14822_v2 = vld [vmem:[#allocation38_spill] sm:$0xff] }
 0x347   : > { %v12155_v44 = vsel %vm2741_vm1, %v5582_v12, %v5583_v48  ;;  %14816 = vst [vmem:[#allocation45_spill] sm:$0xff] %v12160_v28  ;;  %9134 = vmatprep.subr.bf16.mxu0 %v14817_v40  ;;  %9518 = vmatprep.subr.bf16.mxu1 %v14817_v40  ;;  %v2696_v12 = vrot.slane %v10544_v20, 2  ;;  %v14820_v59 = vld [vmem:[#allocation61_spill] sm:$0xff]  ;;  %v12172_v49 = vsel %vm2741_vm1, %v5583_v48, %v5592_v36  ;;  %v5510_v52 = vrot.slane %v5392_v58, 2  ;;  %v14823_v11 = vld [vmem:[#allocation39_spill] sm:$0xff]  ;;  %v14824_v30 = vld [vmem:[#allocation60_spill] sm:$0xff] }
 0x348   : > { %14818 = vst [vmem:[#allocation47_spill] sm:$0xff] %v12167_v7  ;;  %3213 = vmatmul.mubr.f32.gmra.mrb[58].mxu0 %v14819_v45  ;;  %6027 = vmatmul.mubr.f32.gmra.mrb[58].mxu1 %v14820_v59  ;;  %14821 = vst [vmem:[#allocation33_spill] sm:$0xff] %v12172_v49  ;;  %v5511_v60 = vrot.slane %v14822_v2, 2  ;;  %v2633_v43 = vrot.slane %v14823_v11, 1  ;;  %v3918_v40 = vld [vmem:[#allocation10 + $0x488] sm:$0xff]  ;;  %v12179_v14 = vsel %vm2741_vm1, %v5586_v24, %v5594_v3  ;;  %v2791_v53 = vrot.slane %v2695_v42, 7 }
 0x349   : > { %v5372_v37 = vld [vmem:[#allocation3 + $0xe8] sm:$0xff]  ;;  %9136 = vmatpush1.bf16.msra.mxu0 %v14824_v30  ;;  %9520 = vmatpush1.bf16.msra.mxu1 %v14824_v30  ;;  %v2697_v57 = vsel %vm2684_vm2, %v2695_v42, %v2696_v12  ;;  %v2636_v20 = vrot.slane %v2555_v16, 1  ;;  %v3920_v48 = vld [vmem:[#allocation10 + $0x498] sm:$0xff]  ;;  %v2576_v58 = vld [vmem:[#allocation3 + $0x330] sm:$0x1]  ;;  %v5605_v2 = vrot.slane %v5510_v52, 7 }
 0x34a   : > { %v3917_v36 = vld [vmem:[#allocation10 + $0x480] sm:$0xff]  ;;  %3218 = vmatprep.mubr.f32.mxu0 %v11909_v15  ;;  %6032 = vmatprep.mubr.f32.mxu1 %v11912_v5  ;;  %v2792_v45 = vrot.slane %v2697_v57, 7  ;;  %v12185_v59 = vsel %vm2684_vm2, %v5510_v52, %v5511_v60  ;;  %v2788_v11 = vrot.slane %v2633_v43, 7  ;;  %v3919_v30 = vld [vmem:[#allocation10 + $0x490] sm:$0xff]  ;;  %v5393_v24 = vld [vmem:[#allocation3 + $0xf0] sm:$0x1]  ;;  %v12196_v62 = vpack.c.bf16 %v3920_v48, %v3918_v40 }
 0x34b   : > { %v14825_v3 = vld [vmem:[#allocation63_spill] sm:$0xff]  ;;  %v5606_v16 = vrot.slane %v12185_v59, 7  ;;  %v2637_v42 = vsel %vm2619_vm0, %v2633_v43, %v2636_v20  ;;  %v5452_v49 = vrot.slane %v5372_v37, 1  ;;  %v14826_v5 = vld [vmem:[#allocation62_spill] sm:$0xff]  ;;  %v2698_v28 = vrot.slane %v2576_v58, 2 }
 0x34c   : > { %9138 = vmatprep.subr.bf16.mxu0 %v14825_v3  ;;  %9522 = vmatprep.subr.bf16.mxu1 %v14825_v3  ;;  %v10545_v7 = vld [vmem:[#allocation3 + $0xd8] sm:$0xff]  ;;  %v12194_v52 = vsel %vm2741_vm1, %v2791_v53, %v2792_v45  ;;  %v2789_v57 = vrot.slane %v2637_v42, 7  ;;  %v5513_v37 = vrot.slane %v5393_v24, 2  ;;  %v3922_v3 = vld [vmem:[#allocation10 + $0x4a8] sm:$0xff]  ;;  %v2798_v48 = vrot.slane %v2636_v20, 7 }
 0x34d   : > { %v5449_v15 = vrot.slane %v10545_v7, 1  ;;  %3219 = vmatmul.mubr.f32.gmra.mrb[60].mxu0 %v14826_v5  ;;  %6033 = vmatmul.mubr.f32.gmra.mrb[60].mxu1 %v11915_v26  ;;  %v12201_v7 = vpack.c.bf16 %v3919_v30, %v3917_v36  ;;  %v3924_v5 = vld [vmem:[#allocation10 + $0x4b8] sm:$0xff]  ;;  %v12206_v26 = vsel %vm2741_vm1, %v5605_v2, %v5606_v16  ;;  %v2699_v53 = vsel %vm2684_vm2, %v2696_v12, %v2698_v28  ;;  %v3923_v58 = vld [vmem:[#allocation10 + $0x4b0] sm:$0xff]  ;;  %v14827_v24 = vld [vmem:[#allocation64_spill] sm:$0xff] }
 0x34e   : > { %9140 = vmatpush1.bf16.msra.mxu0 %v11906_v34  ;;  %9524 = vmatpush1.bf16.msra.mxu1 %v11906_v34  ;;  %v3921_v34 = vld [vmem:[#allocation10 + $0x4a0] sm:$0xff]  ;;  %v2577_v42 = vld [vmem:[#allocation3 + $0x350] sm:$0xfe]  ;;  %v12212_v36 = vsel %vm2741_vm1, %v2788_v11, %v2789_v57  ;;  %v5612_v30 = vrot.slane %v5452_v49, 7  ;;  %v12221_v20 = vsel %vm2741_vm1, %v2789_v57, %v2798_v48 }
 0x34f   : > { %v5453_v43 = vsel %vm2619_vm0, %v5449_v15, %v5452_v49  ;;  %v5602_v59 = vrot.slane %v5449_v15, 7  ;;  %3224 = vmatprep.mubr.f32.mxu0 %v11922_v63  ;;  %6038 = vmatprep.mubr.f32.mxu1 %v11925_v17  ;;  %v2800_v63 = vrot.slane %v2699_v53, 7  ;;  %v5514_v17 = vsel %vm2684_vm2, %v5511_v60, %v5513_v37  ;;  %v5394_v2 = vld [vmem:[#allocation3 + $0x110] sm:$0xfe]  ;;  %v2558_v11 = vld [vmem:[#allocation3 + $0x368] sm:$0xff]  ;;  %v10546_v60 = vld [vmem:[#allocation3 + $0x360] sm:$0xff] }
 0x350   : > { %v5603_v40 = vrot.slane %v5453_v43, 7  ;;  %9142 = vmatprep.subr.bf16.mxu0 %v11927_v6  ;;  %9526 = vmatprep.subr.bf16.mxu1 %v11927_v6  ;;  %v5614_v12 = vrot.slane %v5514_v17, 7  ;;  %v12223_v6 = vpack.c.bf16 %v3924_v5, %v3922_v3  ;;  %v2701_v15 = vrot.slane %v10546_v60, 2  ;;  %v10548_v3 = vld [vmem:[#allocation3 + $0x358] sm:$0xff]  ;;  %v3926_v53 = vld [vmem:[#allocation10 + $0x4c8] sm:$0xff] }
 0x351   : > { %3225 = vmatmul.mubr.f32.gmra.mrb[62].mxu0 %v11932_v38  ;;  %6039 = vmatmul.mubr.f32.gmra.mrb[62].mxu1 %v11935_v25  ;;  %v12228_v49 = vsel %vm2741_vm1, %v2792_v45, %v2800_v63  ;;  %v12230_v38 = vpack.c.bf16 %v3923_v58, %v3921_v34  ;;  %v2700_v25 = vrot.slane %v2577_v42, 2  ;;  %v5515_v43 = vrot.slane %v5394_v2, 2  ;;  %v5375_v45 = vld [vmem:[#allocation3 + $0x128] sm:$0xff]  ;;  %v2578_v42 = vld [vmem:[#allocation3 + $0x370] sm:$0x1]  ;;  %v3927_v2 = vld [vmem:[#allocation10 + $0x4d0] sm:$0xff] }
 0x352   : > { %v12218_v28 = vsel %vm2741_vm1, %v5602_v59, %v5603_v40  ;;  %9144 = vmatpush1.bf16.msra.mxu0 %v14827_v24  ;;  %9528 = vmatpush1.bf16.msra.mxu1 %v14827_v24  ;;  %v12235_v57 = vsel %vm2741_vm1, %v5603_v40, %v5612_v30  ;;  %v10547_v59 = vld [vmem:[#allocation3 + $0x120] sm:$0xff]  ;;  %v2639_v5 = vrot.slane %v10548_v3, 1  ;;  %v12240_v48 = vsel %vm2741_vm1, %v5606_v16, %v5614_v12  ;;  %v5395_v16 = vld [vmem:[#allocation3 + $0x130] sm:$0x1]  ;;  %v10549_v24 = vld [vmem:[#allocation3 + $0x118] sm:$0xff] }
 0x353   : > { %3230 = vmatprep.mubr.f32.mxu0 %v11961_v50  ;;  %6044 = vmatprep.mubr.f32.mxu1 %v11971_v4  ;;  %v5516_v37 = vrot.slane %v10547_v59, 2  ;;  %v2702_v50 = vsel %vm2684_vm2, %v2700_v25, %v2701_v15  ;;  %v2811_v4 = vrot.slane %v2700_v25, 7  ;;  %v2642_v34 = vrot.slane %v2558_v11, 1  ;;  %v3928_v40 = vld [vmem:[#allocation10 + $0x4d8] sm:$0xff]  ;;  %v3925_v58 = vld [vmem:[#allocation10 + $0x4c0] sm:$0xff] }
 0x354   : > { %9146 = vmatprep.subr.bf16.mxu0 %v11950_v55  ;;  %9530 = vmatprep.subr.bf16.mxu1 %v11950_v55  ;;  %v2812_v63 = vrot.slane %v2702_v50, 7  ;;  %v5625_v30 = vrot.slane %v5515_v43, 7  ;;  %v2808_v55 = vrot.slane %v2639_v5, 7  ;;  %v5458_v25 = vrot.slane %v5375_v45, 1  ;;  %v3932_v50 = vld [vmem:[#allocation10 + $0x4f8] sm:$0xff] }
 0x355   : > { %3231 = vmatmul.mubr.f32.gmra.mrb[64].mxu0 %v11956_v27  ;;  %6045 = vmatmul.mubr.f32.gmra.mrb[64].mxu1 %v11964_v46  ;;  %v12246_v17 = vsel %vm2684_vm2, %v5515_v43, %v5516_v37  ;;  %v2643_v11 = vsel %vm2619_vm0, %v2639_v5, %v2642_v34  ;;  %v5455_v27 = vrot.slane %v10549_v24, 1  ;;  %v12257_v43 = vpack.c.bf16 %v3928_v40, %v3926_v53 }
 0x356   : > { %9148 = vmatpush1.bf16.msra.mxu0 %v11966_v1  ;;  %9532 = vmatpush1.bf16.msra.mxu1 %v11966_v1  ;;  %v5626_v12 = vrot.slane %v12246_v17, 7  ;;  %v12255_v46 = vsel %vm2741_vm1, %v2811_v4, %v2812_v63  ;;  %v2809_v60 = vrot.slane %v2643_v11, 7  ;;  %v2703_v59 = vrot.slane %v2578_v42, 2  ;;  %v3931_v42 = vld [vmem:[#allocation10 + $0x4f0] sm:$0xff]  ;;  %v10550_v11 = vld [vmem:[#allocation3 + $0x3a0] sm:$0xff] }
 0x357   : > { %3236 = vmatprep.mubr.f32.mxu0 %v11974_v0  ;;  %6050 = vmatprep.mubr.f32.mxu1 %v11983_v51  ;;  %v5459_v1 = vsel %vm2619_vm0, %v5455_v27, %v5458_v25  ;;  %v5622_v3 = vrot.slane %v5455_v27, 7  ;;  %v12262_v5 = vpack.c.bf16 %v3927_v2, %v3925_v58  ;;  %v5518_v45 = vrot.slane %v5395_v16, 2  ;;  %v3930_v0 = vld [vmem:[#allocation10 + $0x4e8] sm:$0xff] }
 0x358   : > { %9150 = vmatprep.subr.bf16.mxu0 %v11976_v10  ;;  %9534 = vmatprep.subr.bf16.mxu1 %v11976_v10  ;;  %v12267_v51 = vsel %vm2741_vm1, %v5625_v30, %v5626_v12  ;;  %v5623_v53 = vrot.slane %v5459_v1, 7  ;;  %v2704_v4 = vsel %vm2684_vm2, %v2701_v15, %v2703_v59  ;;  %v2818_v40 = vrot.slane %v2642_v34, 7  ;;  %v3929_v10 = vld [vmem:[#allocation10 + $0x4e0] sm:$0xff]  ;;  %v2579_v17 = vld [vmem:[#allocation3 + $0x390] sm:$0xfe] }
 0x359   : > { %3237 = vmatmul.mubr.f32.gmra.mrb[66].mxu0 %v11986_v8  ;;  %6051 = vmatmul.mubr.f32.gmra.mrb[66].mxu1 %v11995_v32  ;;  %v12273_v58 = vsel %vm2741_vm1, %v2808_v55, %v2809_v60  ;;  %v2820_v8 = vrot.slane %v2704_v4, 7  ;;  %v5519_v32 = vsel %vm2684_vm2, %v5516_v37, %v5518_v45  ;;  %v5632_v2 = vrot.slane %v5458_v25, 7  ;;  %v5396_v30 = vld [vmem:[#allocation3 + $0x150] sm:$0xfe]  ;;  %v2561_v55 = vld [vmem:[#allocation3 + $0x3a8] sm:$0xff]  ;;  %v14832_v25 = vld [vmem:[#allocation67_spill] sm:$0xff] }
 0x35a   : > { %9152 = vmatpush1.bf16.msra.mxu0 %v11990_v22  ;;  %9536 = vmatpush1.bf16.msra.mxu1 %v11990_v22  ;;  %v12279_v15 = vsel %vm2741_vm1, %v5622_v3, %v5623_v53  ;;  %v5634_v34 = vrot.slane %v5519_v32, 7  ;;  %v12282_v16 = vsel %vm2741_vm1, %v2809_v60, %v2818_v40  ;;  %v12284_v22 = vpack.c.bf16 %v3932_v50, %v3930_v0  ;;  %v14831_v27 = vld [vmem:[#allocation65_spill] sm:$0xff]  ;;  %v10551_v1 = vld [vmem:[#allocation3 + $0x160] sm:$0xff]  ;;  %v10552_v45 = vld [vmem:[#allocation3 + $0x398] sm:$0xff] }
 0x35b   : > { %3242 = vmatprep.mubr.f32.mxu0 %v12016_v35  ;;  %6056 = vmatprep.mubr.f32.mxu1 %v12019_v56  ;;  %14828 = vst [vmem:[#allocation46_spill] sm:$0xff] %v12282_v16  ;;  %v12289_v37 = vsel %vm2741_vm1, %v2812_v63, %v2820_v8  ;;  %v12291_v35 = vpack.c.bf16 %v3931_v42, %v3929_v10  ;;  %v2705_v56 = vrot.slane %v2579_v17, 2  ;;  %v2706_v24 = vrot.slane %v10550_v11, 2  ;;  %v3934_v0 = vld [vmem:[#allocation10 + $0x508] sm:$0xff]  ;;  %v14834_v50 = vld [vmem:[#allocation66_spill] sm:$0xff]  ;;  %v3933_v17 = vld [vmem:[#allocation10 + $0x500] sm:$0xff] }
 0x35c   : > { %14829 = vst [vmem:[#allocation48_spill] sm:$0xff] %v12284_v22  ;;  %9154 = vmatprep.subr.bf16.mxu0 %v12007_v31  ;;  %9538 = vmatprep.subr.bf16.mxu1 %v12007_v31  ;;  %v12296_v60 = vsel %vm2741_vm1, %v5623_v53, %v5632_v2  ;;  %v5520_v59 = vrot.slane %v5396_v30, 2  ;;  %v5521_v3 = vrot.slane %v10551_v1, 2  ;;  %v2645_v31 = vrot.slane %v10552_v45, 1  ;;  %v5378_v63 = vld [vmem:[#allocation3 + $0x168] sm:$0xff]  ;;  %v3936_v53 = vld [vmem:[#allocation10 + $0x518] sm:$0xff] }
 0x35d   : > { %14830 = vst [vmem:[#allocation34_spill] sm:$0xff] %v12291_v35  ;;  %3243 = vmatmul.mubr.f32.gmra.mrb[68].mxu0 %v14831_v27  ;;  %6057 = vmatmul.mubr.f32.gmra.mrb[68].mxu1 %v14832_v25  ;;  %14833 = vst [vmem:[#allocation49_spill] sm:$0xff] %v12296_v60  ;;  %v12301_v4 = vsel %vm2741_vm1, %v5626_v12, %v5634_v34  ;;  %v2707_v40 = vsel %vm2684_vm2, %v2705_v56, %v2706_v24  ;;  %v2831_v10 = vrot.slane %v2705_v56, 7  ;;  %v2580_v8 = vld [vmem:[#allocation3 + $0x3b0] sm:$0x1]  ;;  %v14835_v32 = vld [vmem:[#allocation68_spill] sm:$0xff] }
 0x35e   : > { %9156 = vmatpush1.bf16.msra.mxu0 %v14834_v50  ;;  %9540 = vmatpush1.bf16.msra.mxu1 %v14834_v50  ;;  %v2648_v42 = vrot.slane %v2561_v55, 1  ;;  %v14836_v2 = vld [vmem:[#allocation69_spill] sm:$0xff]  ;;  %v2832_v30 = vrot.slane %v2707_v40, 7  ;;  %v12307_v11 = vsel %vm2684_vm2, %v5520_v59, %v5521_v3  ;;  %v5645_v27 = vrot.slane %v5520_v59, 7  ;;  %v14837_v34 = vld [vmem:[#allocation70_spill] sm:$0xff]  ;;  %v14839_v40 = vld [vmem:[#allocation71_spill] sm:$0xff] }
 0x35f   : > { %3248 = vmatprep.mubr.f32.mxu0 %v14835_v32  ;;  %6062 = vmatprep.mubr.f32.mxu1 %v14836_v2  ;;  %v2828_v25 = vrot.slane %v2645_v31, 7  ;;  %v3935_v1 = vld [vmem:[#allocation10 + $0x510] sm:$0xff]  ;;  %v5397_v12 = vld [vmem:[#allocation3 + $0x170] sm:$0x1]  ;;  %v5646_v55 = vrot.slane %v12307_v11, 7  ;;  %v5464_v32 = vrot.slane %v5378_v63, 1  ;;  %v12318_v60 = vpack.c.bf16 %v3936_v53, %v3934_v0 }
 0x360   : > { %9158 = vmatprep.subr.bf16.mxu0 %v14837_v34  ;;  %9542 = vmatprep.subr.bf16.mxu1 %v14837_v34  ;;  %v2649_v56 = vsel %vm2619_vm0, %v2645_v31, %v2648_v42  ;;  %v10553_v45 = vld [vmem:[#allocation3 + $0x158] sm:$0xff]  ;;  %v14838_v2 = vld [vmem:[#allocation40_spill] sm:$0xff]  ;;  %v12316_v59 = vsel %vm2741_vm1, %v2831_v10, %v2832_v30  ;;  %v2708_v16 = vrot.slane %v2580_v8, 2  ;;  %v12323_v34 = vpack.c.bf16 %v3935_v1, %v3933_v17 }
 0x361   : > { %v5461_v50 = vrot.slane %v10553_v45, 1  ;;  %3249 = vmatmul.mubr.f32.gmra.mrb[70].mxu0 %v14838_v2  ;;  %6063 = vmatmul.mubr.f32.gmra.mrb[70].mxu1 %v14839_v40  ;;  %v2829_v35 = vrot.slane %v2649_v56, 7  ;;  %v14840_v22 = vld [vmem:[#allocation30_spill] sm:$0xff]  ;;  %v5523_v63 = vrot.slane %v5397_v12, 2  ;;  %v3938_v45 = vld [vmem:[#allocation10 + $0x528] sm:$0xff]  ;;  %v12328_v0 = vsel %vm2741_vm1, %v5645_v27, %v5646_v55  ;;  %v10554_v12 = vld [vmem:[#allocation3 + $0x3e0] sm:$0xff] }
 0x362   : > { %9160 = vmatpush1.bf16.msra.mxu0 %v14840_v22  ;;  %9544 = vmatpush1.bf16.msra.mxu1 %v14840_v22  ;;  %v3940_v2 = vld [vmem:[#allocation10 + $0x538] sm:$0xff]  ;;  %v2709_v53 = vsel %vm2684_vm2, %v2706_v24, %v2708_v16  ;;  %v2838_v8 = vrot.slane %v2648_v42, 7  ;;  %v3937_v22 = vld [vmem:[#allocation10 + $0x520] sm:$0xff]  ;;  %v3939_v56 = vld [vmem:[#allocation10 + $0x530] sm:$0xff]  ;;  %v5652_v1 = vrot.slane %v5464_v32, 7 }
 0x363   : > { %v5465_v31 = vsel %vm2619_vm0, %v5461_v50, %v5464_v32  ;;  %v5642_v11 = vrot.slane %v5461_v50, 7  ;;  %3319 = vmatprep.mubr.f32.mxu0 %v12075_v23  ;;  %6133 = vmatprep.mubr.f32.mxu1 %v12078_v54  ;;  %v2581_v40 = vld [vmem:[#allocation3 + $0x3d0] sm:$0xfe]  ;;  %v12334_v17 = vsel %vm2741_vm1, %v2828_v25, %v2829_v35  ;;  %v2840_v23 = vrot.slane %v2709_v53, 7  ;;  %v2564_v25 = vld [vmem:[#allocation3 + $0x3e8] sm:$0xff] }
 0x364   : > { %v5643_v10 = vrot.slane %v5465_v31, 7  ;;  %9162 = vmatprep.subr.bf16.mxu0 %v12059_v13  ;;  %9546 = vmatprep.subr.bf16.mxu1 %v12059_v13  ;;  %v5524_v54 = vsel %vm2684_vm2, %v5521_v3, %v5523_v63  ;;  %v5398_v27 = vld [vmem:[#allocation3 + $0x190] sm:$0xfe]  ;;  %v12343_v42 = vsel %vm2741_vm1, %v2829_v35, %v2838_v8  ;;  %v12345_v13 = vpack.c.bf16 %v3940_v2, %v3938_v45  ;;  %v10555_v31 = vld [vmem:[#allocation3 + $0x1a0] sm:$0xff]  ;;  %v10556_v63 = vld [vmem:[#allocation3 + $0x3d8] sm:$0xff] }
 0x365   : > { %3320 = vmatmul.mubr.f32.vlgmr.msra.gmra.mrb[40].mxu0 %v12081_v18  ;;  %6134 = vmatmul.mubr.f32.vlgmr.msra.gmra.mrb[40].mxu1 %v12092_v21  ;;  %v5654_v24 = vrot.slane %v5524_v54, 7  ;;  %v12350_v3 = vsel %vm2741_vm1, %v2832_v30, %v2840_v23  ;;  %v12352_v18 = vpack.c.bf16 %v3939_v56, %v3937_v22  ;;  %v2710_v21 = vrot.slane %v2581_v40, 2  ;;  %v3942_v45 = vld [vmem:[#allocation10 + $0x548] sm:$0xff]  ;;  %v3941_v22 = vld [vmem:[#allocation10 + $0x540] sm:$0xff] }
 0x366   : > { %v12340_v16 = vsel %vm2741_vm1, %v5642_v11, %v5643_v10  ;;  %9164 = vmatpush1.bf16.msra.mxu0 %v12070_v29  ;;  %9548 = vmatpush1.bf16.msra.mxu1 %v12070_v29  ;;  %v2711_v50 = vrot.slane %v10554_v12, 2  ;;  %v12357_v35 = vsel %vm2741_vm1, %v5643_v10, %v5652_v1  ;;  %v5525_v32 = vrot.slane %v5398_v27, 2  ;;  %v5381_v30 = vld [vmem:[#allocation3 + $0x1a8] sm:$0xff]  ;;  %v3944_v10 = vld [vmem:[#allocation10 + $0x558] sm:$0xff]  ;;  %v2582_v56 = vld [vmem:[#allocation3 + $0x3f0] sm:$0x1] }
 0x367   : > { %14841 = vst [vmem:[#allocation50_spill] sm:$0xff] %v12352_v18  ;;  %3325 = vmatprep.mubr.f32.mxu0 %v12105_v41  ;;  %6139 = vmatprep.mubr.f32.mxu1 %v12115_v39  ;;  %14842 = vst [vmem:[#allocation35_spill] sm:$0xff] %v12357_v35  ;;  %v5526_v11 = vrot.slane %v10555_v31, 2  ;;  %v2651_v29 = vrot.slane %v10556_v63, 1  ;;  %v14843_v2 = vld [vmem:[#allocation41_spill] sm:$0xff]  ;;  %v12362_v53 = vsel %vm2741_vm1, %v5646_v55, %v5654_v24  ;;  %v2851_v39 = vrot.slane %v2710_v21, 7 }
 0x368   : > { %9166 = vmatprep.subr.bf16.mxu0 %v14843_v2  ;;  %9550 = vmatprep.subr.bf16.mxu1 %v14843_v2  ;;  %v2712_v41 = vsel %vm2684_vm2, %v2710_v21, %v2711_v50  ;;  %v2654_v8 = vrot.slane %v2564_v25, 1  ;;  %v14844_v40 = vld [vmem:[#allocation31_spill] sm:$0xff]  ;;  %v14845_v23 = vld [vmem:[#allocation44_spill] sm:$0xff]  ;;  %v5665_v27 = vrot.slane %v5525_v32, 7  ;;  %v3943_v31 = vld [vmem:[#allocation10 + $0x550] sm:$0xff]  ;;  %v2713_v18 = vrot.slane %v2582_v56, 2 }
 0x369   : > { %3326 = vmatmul.mubr.f32.gmra.mrb[42].mxu0 %v14844_v40  ;;  %6140 = vmatmul.mubr.f32.gmra.mrb[42].mxu1 %v14845_v23  ;;  %v2852_v54 = vrot.slane %v2712_v41, 7  ;;  %v12368_v1 = vsel %vm2684_vm2, %v5525_v32, %v5526_v11  ;;  %v2848_v12 = vrot.slane %v2651_v29, 7  ;;  %v5399_v55 = vld [vmem:[#allocation3 + $0x1b0] sm:$0x1]  ;;  %v14846_v24 = vld [vmem:[#allocation42_spill] sm:$0xff]  ;;  %v5470_v40 = vrot.slane %v5381_v30, 1 }
 0x36a   : > { %9168 = vmatpush1.bf16.msra.mxu0 %v14846_v24  ;;  %9552 = vmatpush1.bf16.msra.mxu1 %v14846_v24  ;;  %v5666_v25 = vrot.slane %v12368_v1, 7  ;;  %v2655_v21 = vsel %vm2619_vm0, %v2651_v29, %v2654_v8  ;;  %v10557_v63 = vld [vmem:[#allocation3 + $0x198] sm:$0xff]  ;;  %v12379_v23 = vpack.c.bf16 %v3944_v10, %v3942_v45  ;;  %v14847_v35 = vld [vmem:[#allocation32_spill] sm:$0xff]  ;;  %v12384_v24 = vpack.c.bf16 %v3943_v31, %v3941_v22 }
 0x36b   : > { %v5467_v2 = vrot.slane %v10557_v63, 1  ;;  %3331 = vmatprep.mubr.f32.mxu0 %v12131_v9  ;;  %6145 = vmatprep.mubr.f32.mxu1 %v12143_v61  ;;  %v12377_v32 = vsel %vm2741_vm1, %v2851_v39, %v2852_v54  ;;  %v2849_v41 = vrot.slane %v2655_v21, 7  ;;  %v5528_v30 = vrot.slane %v5399_v55, 2  ;;  %v3946_v9 = vld [vmem:[#allocation10 + $0x568] sm:$0xff]  ;;  %v3948_v63 = vld [vmem:[#allocation10 + $0x578] sm:$0xff]  ;;  %v3947_v56 = vld [vmem:[#allocation10 + $0x570] sm:$0xff] }
 0x36c   : > { %9170 = vmatprep.subr.bf16.mxu0 %v14847_v35  ;;  %9554 = vmatprep.subr.bf16.mxu1 %v14847_v35  ;;  %v12389_v61 = vsel %vm2741_vm1, %v5665_v27, %v5666_v25  ;;  %v2714_v39 = vsel %vm2684_vm2, %v2711_v50, %v2713_v18  ;;  %v2858_v10 = vrot.slane %v2654_v8, 7  ;;  %v3945_v35 = vld [vmem:[#allocation10 + $0x560] sm:$0xff]  ;;  %v2583_v21 = vld [vmem:[#allocation3 + $0x410] sm:$0xfe]  ;;  %v5672_v31 = vrot.slane %v5470_v40, 7 }
 0x36d   : > { %v5471_v29 = vsel %vm2619_vm0, %v5467_v2, %v5470_v40  ;;  %v5662_v1 = vrot.slane %v5467_v2, 7  ;;  %3332 = vmatmul.mubr.f32.gmra.mrb[44].mxu0 %v12149_v47  ;;  %6146 = vmatmul.mubr.f32.gmra.mrb[44].mxu1 %v12155_v44  ;;  %v12395_v22 = vsel %vm2741_vm1, %v2848_v12, %v2849_v41  ;;  %v2860_v47 = vrot.slane %v2714_v39, 7  ;;  %v5400_v27 = vld [vmem:[#allocation3 + $0x1d0] sm:$0xfe]  ;;  %v2567_v12 = vld [vmem:[#allocation3 + $0x428] sm:$0xff]  ;;  %v10558_v2 = vld [vmem:[#allocation3 + $0x420] sm:$0xff] }
 0x36e   : > { %v5663_v45 = vrot.slane %v5471_v29, 7  ;;  %9172 = vmatpush1.bf16.msra.mxu0 %v12138_v19  ;;  %9556 = vmatpush1.bf16.msra.mxu1 %v12138_v19  ;;  %v5529_v44 = vsel %vm2684_vm2, %v5526_v11, %v5528_v30  ;;  %v12404_v8 = vsel %vm2741_vm1, %v2849_v41, %v2858_v10  ;;  %v12406_v19 = vpack.c.bf16 %v3948_v63, %v3946_v9  ;;  %v14848_v55 = vld [vmem:[#allocation45_spill] sm:$0xff]  ;;  %v14850_v29 = vld [vmem:[#allocation43_spill] sm:$0xff] }
 0x36f   : > { %3337 = vmatprep.mubr.f32.mxu0 %v12165_v33  ;;  %6151 = vmatprep.mubr.f32.mxu1 %v12179_v14  ;;  %v5674_v50 = vrot.slane %v5529_v44, 7  ;;  %v12411_v11 = vsel %vm2741_vm1, %v2852_v54, %v2860_v47  ;;  %v12413_v33 = vpack.c.bf16 %v3947_v56, %v3945_v35  ;;  %v2715_v14 = vrot.slane %v2583_v21, 2  ;;  %v10559_v9 = vld [vmem:[#allocation3 + $0x1e0] sm:$0xff]  ;;  %v10560_v39 = vld [vmem:[#allocation3 + $0x418] sm:$0xff]  ;;  %v3950_v44 = vld [vmem:[#allocation10 + $0x588] sm:$0xff] }
 0x370   : > { %v12401_v18 = vsel %vm2741_vm1, %v5662_v1, %v5663_v45  ;;  %9174 = vmatprep.subr.bf16.mxu0 %v14848_v55  ;;  %9558 = vmatprep.subr.bf16.mxu1 %v14848_v55  ;;  %v2716_v40 = vrot.slane %v10558_v2, 2  ;;  %v14851_v1 = vld [vmem:[#allocation33_spill] sm:$0xff]  ;;  %v12418_v41 = vsel %vm2741_vm1, %v5663_v45, %v5672_v31  ;;  %v5530_v30 = vrot.slane %v5400_v27, 2  ;;  %v14852_v47 = vld [vmem:[#allocation47_spill] sm:$0xff] }
 0x371   : > { %14849 = vst [vmem:[#allocation36_spill] sm:$0xff] %v12413_v33  ;;  %3338 = vmatmul.mubr.f32.gmra.mrb[46].mxu0 %v14850_v29  ;;  %6152 = vmatmul.mubr.f32.gmra.mrb[46].mxu1 %v14851_v1  ;;  %v5531_v63 = vrot.slane %v10559_v9, 2  ;;  %v2657_v10 = vrot.slane %v10560_v39, 1  ;;  %v5384_v54 = vld [vmem:[#allocation3 + $0x1e8] sm:$0xff]  ;;  %v12423_v35 = vsel %vm2741_vm1, %v5666_v25, %v5674_v50  ;;  %v2871_v21 = vrot.slane %v2715_v14, 7  ;;  %v3952_v45 = vld [vmem:[#allocation10 + $0x598] sm:$0xff] }
 0x372   : > { %9176 = vmatpush1.bf16.msra.mxu0 %v14852_v47  ;;  %9560 = vmatpush1.bf16.msra.mxu1 %v14852_v47  ;;  %v2717_v56 = vsel %vm2684_vm2, %v2715_v14, %v2716_v40  ;;  %v2660_v55 = vrot.slane %v2567_v12, 1  ;;  %v3949_v31 = vld [vmem:[#allocation10 + $0x580] sm:$0xff]  ;;  %v2584_v27 = vld [vmem:[#allocation3 + $0x430] sm:$0x1]  ;;  %v5685_v1 = vrot.slane %v5530_v30, 7  ;;  %v3951_v39 = vld [vmem:[#allocation10 + $0x590] sm:$0xff] }
 0x373   : > { %3343 = vmatprep.mubr.f32.mxu0 %v12194_v52  ;;  %6157 = vmatprep.mubr.f32.mxu1 %v12206_v26  ;;  %v2872_v2 = vrot.slane %v2717_v56, 7  ;;  %v12429_v29 = vsel %vm2684_vm2, %v5530_v30, %v5531_v63  ;;  %v2868_v9 = vrot.slane %v2657_v10, 7  ;;  %v5401_v25 = vld [vmem:[#allocation3 + $0x1f0] sm:$0x1]  ;;  %v10561_v14 = vld [vmem:[#allocation3 + $0x1d8] sm:$0xff]  ;;  %v5476_v47 = vrot.slane %v5384_v54, 1 }
 0x374   : > { %9178 = vmatprep.subr.bf16.mxu0 %v12196_v62  ;;  %9562 = vmatprep.subr.bf16.mxu1 %v12196_v62  ;;  %v5686_v50 = vrot.slane %v12429_v29, 7  ;;  %v2661_v12 = vsel %vm2619_vm0, %v2657_v10, %v2660_v55  ;;  %v5473_v52 = vrot.slane %v10561_v14, 1  ;;  %v12440_v56 = vpack.c.bf16 %v3952_v45, %v3950_v44  ;;  %v3956_v14 = vld [vmem:[#allocation10 + $0x5b8] sm:$0xff] }
 0x375   : > { %3344 = vmatmul.mubr.f32.gmra.mrb[48].mxu0 %v12212_v36  ;;  %6158 = vmatmul.mubr.f32.gmra.mrb[48].mxu1 %v12218_v28  ;;  %v12438_v26 = vsel %vm2741_vm1, %v2871_v21, %v2872_v2  ;;  %v2869_v30 = vrot.slane %v2661_v12, 7  ;;  %v2718_v33 = vrot.slane %v2584_v27, 2  ;;  %v12445_v29 = vpack.c.bf16 %v3951_v39, %v3949_v31  ;;  %v3954_v36 = vld [vmem:[#allocation10 + $0x5a8] sm:$0xff]  ;;  %v3955_v27 = vld [vmem:[#allocation10 + $0x5b0] sm:$0xff] }
 0x376   : > { %9180 = vmatpush1.bf16.msra.mxu0 %v12201_v7  ;;  %9564 = vmatpush1.bf16.msra.mxu1 %v12201_v7  ;;  %v5477_v62 = vsel %vm2619_vm0, %v5473_v52, %v5476_v47  ;;  %v5682_v10 = vrot.slane %v5473_v52, 7  ;;  %v5533_v54 = vrot.slane %v5401_v25, 2  ;;  %v12450_v28 = vsel %vm2741_vm1, %v5685_v1, %v5686_v50  ;;  %v3953_v7 = vld [vmem:[#allocation10 + $0x5a0] sm:$0xff]  ;;  %v2585_v12 = vld [vmem:[#allocation3 + $0x450] sm:$0xfe] }
 0x377   : > { %3349 = vmatprep.mubr.f32.mxu0 %v12228_v49  ;;  %6163 = vmatprep.mubr.f32.mxu1 %v12240_v48  ;;  %v5683_v44 = vrot.slane %v5477_v62, 7  ;;  %v2719_v21 = vsel %vm2684_vm2, %v2716_v40, %v2718_v33  ;;  %v2878_v45 = vrot.slane %v2660_v55, 7  ;;  %v12456_v31 = vsel %vm2741_vm1, %v2868_v9, %v2869_v30  ;;  %v5402_v1 = vld [vmem:[#allocation3 + $0x210] sm:$0xfe]  ;;  %v12469_v9 = vld [vmem:[#allocation3 + $0x468] sm:$0xff]  ;;  %v10562_v25 = vld [vmem:[#allocation3 + $0x460] sm:$0xff] }
 0x378   : > { %9182 = vmatprep.subr.bf16.mxu0 %v12223_v6  ;;  %9566 = vmatprep.subr.bf16.mxu1 %v12223_v6  ;;  %v2880_v49 = vrot.slane %v2719_v21, 7  ;;  %v5534_v48 = vsel %vm2684_vm2, %v5531_v63, %v5533_v54  ;;  %v5692_v39 = vrot.slane %v5476_v47, 7  ;;  %v12467_v6 = vpack.c.bf16 %v3956_v14, %v3954_v36  ;;  %v10563_v62 = vld [vmem:[#allocation3 + $0x220] sm:$0xff]  ;;  %v10564_v54 = vld [vmem:[#allocation3 + $0x458] sm:$0xff]  ;;  %v3958_v36 = vld [vmem:[#allocation10 + $0x5c8] sm:$0xff] }
 0x379   : > { %3350 = vmatmul.mubr.f32.gmra.mrb[50].mxu0 %v12221_v20  ;;  %6164 = vmatmul.mubr.f32.gmra.mrb[50].mxu1 %v12235_v57  ;;  %v12462_v33 = vsel %vm2741_vm1, %v5682_v10, %v5683_v44  ;;  %v5694_v40 = vrot.slane %v5534_v48, 7  ;;  %v12465_v55 = vsel %vm2741_vm1, %v2869_v30, %v2878_v45  ;;  %v12476_v20 = vpack.c.bf16 %v3955_v27, %v3953_v7  ;;  %v3960_v21 = vld [vmem:[#allocation10 + $0x5d8] sm:$0xff]  ;;  %v3957_v45 = vld [vmem:[#allocation10 + $0x5c0] sm:$0xff]  ;;  %v2586_v7 = vld [vmem:[#allocation3 + $0x470] sm:$0x1] }
 0x37a   : > { %9184 = vmatpush1.bf16.msra.mxu0 %v12230_v38  ;;  %9568 = vmatpush1.bf16.msra.mxu1 %v12230_v38  ;;  %v12474_v63 = vsel %vm2741_vm1, %v2872_v2, %v2880_v49  ;;  %v2720_v57 = vrot.slane %v2585_v12, 2  ;;  %v2721_v52 = vrot.slane %v10562_v25, 2  ;;  %v12481_v47 = vsel %vm2741_vm1, %v5683_v44, %v5692_v39  ;;  %v5387_v2 = vld [vmem:[#allocation3 + $0x228] sm:$0xff]  ;;  %v3959_v49 = vld [vmem:[#allocation10 + $0x5d0] sm:$0xff]  ;;  %v5403_v48 = vld [vmem:[#allocation3 + $0x230] sm:$0x1] }
 0x37b   : > { %3355 = vmatprep.mubr.f32.mxu0 %v12255_v46  ;;  %6169 = vmatprep.mubr.f32.mxu1 %v12267_v51  ;;  %v5535_v30 = vrot.slane %v5402_v1, 2  ;;  %v5536_v10 = vrot.slane %v10563_v62, 2  ;;  %v2663_v38 = vrot.slane %v10564_v54, 1  ;;  %v12486_v14 = vsel %vm2741_vm1, %v5686_v50, %v5694_v40  ;;  %v14853_v62 = vld [vmem:[#allocation48_spill] sm:$0xff] }
 0x37c   : > { %9186 = vmatprep.subr.bf16.mxu0 %v12257_v43  ;;  %9570 = vmatprep.subr.bf16.mxu1 %v12257_v43  ;;  %v12489_v46 = vsel %vm2684_vm2, %v2720_v57, %v2721_v52  ;;  %v2891_v51 = vrot.slane %v2720_v57, 7  ;;  %v2666_v44 = vrot.slane %v12469_v9, 1  ;;  %v12507_v25 = vpack.c.bf16 %v3960_v21, %v3958_v36 }
 0x37d   : > { %3356 = vmatmul.mubr.f32.gmra.mrb[52].mxu0 %v12273_v58  ;;  %6170 = vmatmul.mubr.f32.gmra.mrb[52].mxu1 %v12279_v15  ;;  %v2892_v27 = vrot.slane %v12489_v46, 7  ;;  %v12496_v43 = vsel %vm2684_vm2, %v5535_v30, %v5536_v10  ;;  %v5705_v50 = vrot.slane %v5535_v30, 7  ;;  %v2888_v12 = vrot.slane %v2663_v38, 7  ;;  %v10565_v58 = vld [vmem:[#allocation3 + $0x218] sm:$0xff] }
 0x37e   : > { %9188 = vmatpush1.bf16.msra.mxu0 %v12262_v5  ;;  %9572 = vmatpush1.bf16.msra.mxu1 %v12262_v5  ;;  %v14691_v39 = vrot.slane %v12496_v43, 7  ;;  %v2667_v1 = vsel %vm2619_vm0, %v2663_v38, %v2666_v44  ;;  %v5479_v40 = vrot.slane %v10565_v58, 1  ;;  %v5482_v15 = vrot.slane %v5387_v2, 1  ;;  %v3964_v46 = vld [vmem:[#allocation10 + $0x5f8] sm:$0xff] }
 0x37f   : > { %3361 = vmatprep.mubr.f32.mxu0 %v12289_v37  ;;  %6175 = vmatprep.mubr.f32.mxu1 %v12301_v4  ;;  %v12505_v9 = vsel %vm2741_vm1, %v2891_v51, %v2892_v27  ;;  %v2889_v57 = vrot.slane %v2667_v1, 7  ;;  %v2723_v30 = vrot.slane %v2586_v7, 2  ;;  %v12512_v38 = vpack.c.bf16 %v3959_v49, %v3957_v45  ;;  %v3962_v37 = vld [vmem:[#allocation10 + $0x5e8] sm:$0xff]  ;;  %v3961_v4 = vld [vmem:[#allocation10 + $0x5e0] sm:$0xff]  ;;  %v14855_v58 = vld [vmem:[#allocation46_spill] sm:$0xff] }
 0x380   : > { %9190 = vmatprep.subr.bf16.mxu0 %v14853_v62  ;;  %9574 = vmatprep.subr.bf16.mxu1 %v14853_v62  ;;  %v5483_v5 = vsel %vm2619_vm0, %v5479_v40, %v5482_v15  ;;  %v5702_v54 = vrot.slane %v5479_v40, 7  ;;  %v5538_v2 = vrot.slane %v5403_v48, 2  ;;  %v14856_v51 = vld [vmem:[#allocation49_spill] sm:$0xff]  ;;  %v12519_v36 = vsel %vm2741_vm1, %v5705_v50, %v14691_v39  ;;  %v3485_v49 = vld [vmem:[#allocation3 + $0x60] sm:$0xff]  ;;  %v14857_v48 = vld [vmem:[#allocation34_spill] sm:$0xff] }
 0x381   : > { %14854 = vst [vmem:[#allocation51_spill] sm:$0xff] %v12512_v38  ;;  %3362 = vmatmul.mubr.f32.gmra.mrb[54].mxu0 %v14855_v58  ;;  %6176 = vmatmul.mubr.f32.gmra.mrb[54].mxu1 %v14856_v51  ;;  %v5703_v21 = vrot.slane %v5483_v5, 7  ;;  %v2724_v7 = vsel %vm2684_vm2, %v2721_v52, %v2723_v30  ;;  %v2898_v1 = vrot.slane %v2666_v44, 7  ;;  %v3963_v40 = vld [vmem:[#allocation10 + $0x5f0] sm:$0xff]  ;;  %v12525_v62 = vsel %vm2741_vm1, %v2888_v12, %v2889_v57  ;;  %v6298_v39 = vld [vmem:[#allocation3 + $0x2e0] sm:$0xff] }
 0x382   : > { %v3484_v45 = vld [vmem:[#allocation3 + $0x50] sm:$0xff]  ;;  %9192 = vmatpush1.bf16.msra.mxu0 %v14857_v48  ;;  %9576 = vmatpush1.bf16.msra.mxu1 %v14857_v48  ;;  %v2900_v58 = vrot.slane %v2724_v7, 7  ;;  %v5539_v51 = vsel %vm2684_vm2, %v5536_v10, %v5538_v2  ;;  %v5712_v38 = vrot.slane %v5482_v15, 7  ;;  %v3460_v5 = vld [vmem:[#allocation3 + $0x48] sm:$0x80]  ;;  %v12536_v12 = vpack.c.bf16 %v3964_v46, %v3962_v37  ;;  %v12538_v7 = vld [vmem:[#allocation3 + $0x58] sm:$0xff] }
 0x383   : > { %v6297_v50 = vld [vmem:[#allocation3 + $0x2d0] sm:$0xff]  ;;  %3367 = vmatprep.mubr.f32.mxu0 %v12316_v59  ;;  %6181 = vmatprep.mubr.f32.mxu1 %v12328_v0  ;;  %v12531_v52 = vsel %vm2741_vm1, %v5702_v54, %v5703_v21  ;;  %v5714_v44 = vrot.slane %v5539_v51, 7  ;;  %v12534_v30 = vsel %vm2741_vm1, %v2889_v57, %v2898_v1  ;;  %v12545_v59 = vpack.c.bf16 %v3963_v40, %v3961_v4  ;;  %v6273_v54 = vld [vmem:[#allocation3 + $0x2c8] sm:$0x80]  ;;  %v6274_v48 = vld [vmem:[#allocation3 + $0x2d8] sm:$0xff] }
 0x384   : > { %9194 = vmatprep.subr.bf16.mxu0 %v12318_v60  ;;  %9578 = vmatprep.subr.bf16.mxu1 %v12318_v60  ;;  %v12543_v10 = vsel %vm2741_vm1, %v2892_v27, %v2900_v58  ;;  %v3556_v0 = vrot.slane %v3484_v45, 1  ;;  %v3558_v15 = vrot.slane %v3485_v49, 1  ;;  %v12550_v57 = vsel %vm2741_vm1, %v5703_v21, %v5712_v38  ;;  %v3966_v1 = vld [vmem:[#allocation10 + $0x608] sm:$0xff]  ;;  %v3968_v60 = vld [vmem:[#allocation10 + $0x618] sm:$0xff]  ;;  %v3965_v21 = vld [vmem:[#allocation10 + $0x600] sm:$0xff] }
 0x385   : > { %14858 = vst [vmem:[#allocation52_spill] sm:$0xff] %v12545_v59  ;;  %3368 = vmatmul.mubr.f32.gmra.mrb[56].mxu0 %v12334_v17  ;;  %6182 = vmatmul.mubr.f32.gmra.mrb[56].mxu1 %v12340_v16  ;;  %v6369_v2 = vrot.slane %v6297_v50, 1  ;;  %v6371_v37 = vrot.slane %v6298_v39, 1  ;;  %v3676_v46 = vrot.slane %v3460_v5, 7  ;;  %v14859_v27 = vrot.slane %v12496_v43, 7  ;;  %v3967_v39 = vld [vmem:[#allocation10 + $0x610] sm:$0xff] }
 0x386   : > { %9196 = vmatpush1.bf16.msra.mxu0 %v12323_v34  ;;  %9580 = vmatpush1.bf16.msra.mxu1 %v12323_v34  ;;  %v3559_v17 = vsel %vm2619_vm0, %v3556_v0, %v3558_v15  ;;  %v3679_v16 = vrot.slane %v3556_v0, 7  ;;  %v3677_v38 = vrot.slane %v12538_v7, 7  ;;  %v3462_v40 = vld [vmem:[#allocation3 + $0x68] sm:$0x7f]  ;;  %v6489_v43 = vrot.slane %v6273_v54, 7  ;;  %v3972_v7 = vld [vmem:[#allocation10 + $0x638] sm:$0xff] }
 0x387   : > { %v12557_v4 = vsel %vm2741_vm1, %v14859_v27, %v5714_v44  ;;  %3373 = vmatprep.mubr.f32.mxu0 %v12350_v3  ;;  %6187 = vmatprep.mubr.f32.mxu1 %v12362_v53  ;;  %v3680_v45 = vrot.slane %v3559_v17, 7  ;;  %v6372_v34 = vsel %vm2619_vm0, %v6369_v2, %v6371_v37  ;;  %v6492_v49 = vrot.slane %v6369_v2, 7  ;;  %v6275_v58 = vld [vmem:[#allocation3 + $0x2e8] sm:$0x7f]  ;;  %v3487_v53 = vld [vmem:[#allocation3 + $0x90] sm:$0xff]  ;;  %v14860_v0 = vld [vmem:[#allocation35_spill] sm:$0xff] }
 0x388   : > { %9198 = vmatprep.subr.bf16.mxu0 %v12345_v13  ;;  %9582 = vmatprep.subr.bf16.mxu1 %v12345_v13  ;;  %v6493_v51 = vrot.slane %v6372_v34, 7  ;;  %v12567_v50 = vsel %vm2741_vm1, %v3676_v46, %v3677_v38  ;;  %v12569_v5 = vpack.c.bf16 %v3968_v60, %v3966_v1  ;;  %v6490_v44 = vrot.slane %v6274_v48, 7  ;;  %v3970_v3 = vld [vmem:[#allocation10 + $0x628] sm:$0xff]  ;;  %v3488_v13 = vld [vmem:[#allocation3 + $0xa0] sm:$0xff]  ;;  %v14861_v59 = vld [vmem:[#allocation50_spill] sm:$0xff] }
 0x389   : > { %3374 = vmatmul.mubr.f32.gmra.mrb[58].mxu0 %v12343_v42  ;;  %6188 = vmatmul.mubr.f32.gmra.mrb[58].mxu1 %v14860_v0  ;;  %v12573_v54 = vpack.c.bf16 %v3967_v39, %v3965_v21  ;;  %v3690_v2 = vrot.slane %v3558_v15, 7  ;;  %v6503_v27 = vrot.slane %v6371_v37, 7  ;;  %v3688_v17 = vrot.slane %v3462_v40, 7  ;;  %v6300_v34 = vld [vmem:[#allocation3 + $0x310] sm:$0xff]  ;;  %v6301_v48 = vld [vmem:[#allocation3 + $0x320] sm:$0xff]  ;;  %v12586_v37 = vld [vmem:[#allocation3 + $0x98] sm:$0xff] }
 0x38a   : > { %9200 = vmatpush1.bf16.msra.mxu0 %v14861_v59  ;;  %9584 = vmatpush1.bf16.msra.mxu1 %v14861_v59  ;;  %v12578_v46 = vsel %vm2741_vm1, %v3679_v16, %v3680_v45  ;;  %v12581_v1 = vsel %vm2741_vm1, %v6492_v49, %v6493_v51  ;;  %v12584_v42 = vsel %vm2741_vm1, %v6489_v43, %v6490_v44  ;;  %v6501_v60 = vrot.slane %v6275_v58, 7  ;;  %v3463_v15 = vld [vmem:[#allocation3 + $0x88] sm:$0x80]  ;;  %v3969_v39 = vld [vmem:[#allocation10 + $0x620] sm:$0xff]  ;;  %v3971_v40 = vld [vmem:[#allocation10 + $0x630] sm:$0xff] }
 0x38b   : > { %3379 = vmatprep.mubr.f32.mxu0 %v12377_v32  ;;  %6193 = vmatprep.mubr.f32.mxu1 %v12389_v61  ;;  %v12591_v59 = vsel %vm2741_vm1, %v3680_v45, %v3690_v2  ;;  %v12594_v16 = vsel %vm2741_vm1, %v6493_v51, %v6503_v27  ;;  %v12596_v21 = vpack.c.bf16 %v3972_v7, %v3970_v3  ;;  %v3562_v49 = vrot.slane %v3487_v53, 1  ;;  %v6276_v43 = vld [vmem:[#allocation3 + $0x308] sm:$0x80]  ;;  %v3976_v0 = vld [vmem:[#allocation10 + $0x658] sm:$0xff] }
 0x38c   : > { %9202 = vmatprep.subr.bf16.mxu0 %v12379_v23  ;;  %9586 = vmatprep.subr.bf16.mxu1 %v12379_v23  ;;  %v12601_v32 = vsel %vm2741_vm1, %v3677_v38, %v3688_v17  ;;  %v12604_v61 = vsel %vm2741_vm1, %v6490_v44, %v6501_v60  ;;  %v3564_v45 = vrot.slane %v3488_v13, 1  ;;  %v6375_v58 = vrot.slane %v6300_v34, 1  ;;  %v3974_v51 = vld [vmem:[#allocation10 + $0x648] sm:$0xff]  ;;  %v12606_v3 = vld [vmem:[#allocation3 + $0x318] sm:$0xff]  ;;  %v3973_v38 = vld [vmem:[#allocation10 + $0x640] sm:$0xff] }
 0x38d   : > { %3380 = vmatmul.mubr.f32.gmra.mrb[60].mxu0 %v12395_v22  ;;  %6194 = vmatmul.mubr.f32.gmra.mrb[60].mxu1 %v12401_v18  ;;  %v3699_v7 = vrot.slane %v3562_v49, 7  ;;  %v6377_v53 = vrot.slane %v6301_v48, 1  ;;  %v3696_v2 = vrot.slane %v3463_v15, 7  ;;  %v3697_v23 = vrot.slane %v12586_v37, 7  ;;  %v3975_v34 = vld [vmem:[#allocation10 + $0x650] sm:$0xff]  ;;  %v3978_v60 = vld [vmem:[#allocation10 + $0x668] sm:$0xff] }
 0x38e   : > { %9204 = vmatpush1.bf16.msra.mxu0 %v12384_v24  ;;  %9588 = vmatpush1.bf16.msra.mxu1 %v12384_v24  ;;  %v12613_v44 = vpack.c.bf16 %v3971_v40, %v3969_v39  ;;  %v3565_v27 = vsel %vm2619_vm0, %v3562_v49, %v3564_v45  ;;  %v6512_v17 = vrot.slane %v6375_v58, 7  ;;  %v6509_v13 = vrot.slane %v6276_v43, 7  ;;  %v3465_v22 = vld [vmem:[#allocation3 + $0xa8] sm:$0x7f]  ;;  %v3980_v37 = vld [vmem:[#allocation10 + $0x678] sm:$0xff] }
 0x38f   : > { %3385 = vmatprep.mubr.f32.mxu0 %v12411_v11  ;;  %6199 = vmatprep.mubr.f32.mxu1 %v12423_v35  ;;  %v3700_v18 = vrot.slane %v3565_v27, 7  ;;  %v6378_v48 = vsel %vm2619_vm0, %v6375_v58, %v6377_v53  ;;  %v12619_v15 = vpack.c.bf16 %v3976_v0, %v3974_v51  ;;  %v6510_v24 = vrot.slane %v12606_v3, 7  ;;  %v6278_v39 = vld [vmem:[#allocation3 + $0x328] sm:$0x7f]  ;;  %v3979_v27 = vld [vmem:[#allocation10 + $0x670] sm:$0xff]  ;;  %v3491_v58 = vld [vmem:[#allocation3 + $0xe0] sm:$0xff] }
 0x390   : > { %14862 = vst [vmem:[#allocation53_spill] sm:$0xff] %v12613_v44  ;;  %v3977_v40 = vld [vmem:[#allocation10 + $0x660] sm:$0xff]  ;;  %9206 = vmatprep.subr.bf16.mxu0 %v12406_v19  ;;  %9590 = vmatprep.subr.bf16.mxu1 %v12406_v19  ;;  %v6513_v49 = vrot.slane %v6378_v48, 7  ;;  %v12625_v43 = vsel %vm2741_vm1, %v3696_v2, %v3697_v23  ;;  %v3710_v11 = vrot.slane %v3564_v45, 7  ;;  %v6523_v35 = vrot.slane %v6377_v53, 7  ;;  %v3490_v44 = vld [vmem:[#allocation3 + $0xd0] sm:$0xff] }
 0x391   : > { %3386 = vmatmul.mubr.f32.gmra.mrb[62].mxu0 %v12404_v8  ;;  %6200 = vmatmul.mubr.f32.gmra.mrb[62].mxu1 %v12418_v41  ;;  %v12630_v51 = vsel %vm2741_vm1, %v3699_v7, %v3700_v18  ;;  %v12633_v0 = vsel %vm2741_vm1, %v6509_v13, %v6510_v24  ;;  %v12635_v19 = vpack.c.bf16 %v3975_v34, %v3973_v38  ;;  %v3708_v3 = vrot.slane %v3465_v22, 7  ;;  %v6303_v2 = vld [vmem:[#allocation3 + $0x350] sm:$0xff]  ;;  %v6304_v48 = vld [vmem:[#allocation3 + $0x360] sm:$0xff]  ;;  %v3466_v45 = vld [vmem:[#allocation3 + $0xc8] sm:$0x80] }
 0x392   : > { %14863 = vst [vmem:[#allocation54_spill] sm:$0xff] %v12633_v0  ;;  %v14864_v53 = vld [vmem:[#allocation36_spill] sm:$0xff]  ;;  %v12640_v8 = vsel %vm2741_vm1, %v6512_v17, %v6513_v49  ;;  %v12643_v41 = vsel %vm2741_vm1, %v3700_v18, %v3710_v11  ;;  %v12645_v7 = vpack.c.bf16 %v3980_v37, %v3978_v60  ;;  %v6521_v13 = vrot.slane %v6278_v39, 7  ;;  %v12647_v0 = vld [vmem:[#allocation3 + $0xd8] sm:$0xff]  ;;  %3391 = vmatprep.mubr.f32.mxu0 %v12438_v26 }
 0x393   : > { %9208 = vmatpush1.bf16.msra.mxu0 %v14864_v53  ;;  %9592 = vmatpush1.bf16.msra.mxu1 %v14864_v53  ;;  %v12652_v38 = vsel %vm2741_vm1, %v6513_v49, %v6523_v35  ;;  %v12655_v34 = vsel %vm2741_vm1, %v3697_v23, %v3708_v3  ;;  %v3568_v17 = vrot.slane %v3490_v44, 1  ;;  %v3570_v22 = vrot.slane %v3491_v58, 1  ;;  %v6279_v53 = vld [vmem:[#allocation3 + $0x348] sm:$0x80]  ;;  %v6280_v11 = vld [vmem:[#allocation3 + $0x358] sm:$0xff] }
 0x394   : > { %6205 = vmatprep.mubr.f32.mxu1 %v12450_v28  ;;  %9210 = vmatprep.subr.bf16.mxu0 %v12440_v56  ;;  %v12659_v60 = vpack.c.bf16 %v3979_v27, %v3977_v40  ;;  %v6381_v18 = vrot.slane %v6303_v2, 1  ;;  %v6383_v37 = vrot.slane %v6304_v48, 1  ;;  %v3716_v26 = vrot.slane %v3466_v45, 7  ;;  %v3982_v39 = vld [vmem:[#allocation10 + $0x688] sm:$0xff]  ;;  %v3984_v28 = vld [vmem:[#allocation10 + $0x698] sm:$0xff]  ;;  %v3981_v40 = vld [vmem:[#allocation10 + $0x680] sm:$0xff] }
 0x395   : > { %9594 = vmatprep.subr.bf16.mxu1 %v12440_v56  ;;  %3392 = vmatmul.mubr.f32.gmra.mrb[64].mxu0 %v12456_v31  ;;  %v12664_v23 = vsel %vm2741_vm1, %v6510_v24, %v6521_v13  ;;  %v3571_v44 = vsel %vm2619_vm0, %v3568_v17, %v3570_v22  ;;  %v3719_v49 = vrot.slane %v3568_v17, 7  ;;  %v3717_v56 = vrot.slane %v12647_v0, 7  ;;  %v3983_v35 = vld [vmem:[#allocation10 + $0x690] sm:$0xff]  ;;  %v3468_v27 = vld [vmem:[#allocation3 + $0xe8] sm:$0x7f]  ;;  %v3988_v17 = vld [vmem:[#allocation10 + $0x6b8] sm:$0xff] }
 0x396   : > { %6206 = vmatmul.mubr.f32.gmra.mrb[64].mxu1 %v12462_v33  ;;  %v3720_v58 = vrot.slane %v3571_v44, 7  ;;  %v6384_v31 = vsel %vm2619_vm0, %v6381_v18, %v6383_v37  ;;  %v6532_v3 = vrot.slane %v6381_v18, 7  ;;  %v6529_v33 = vrot.slane %v6279_v53, 7  ;;  %v6281_v2 = vld [vmem:[#allocation3 + $0x368] sm:$0x7f]  ;;  %3397 = vmatprep.mubr.f32.mxu0 %v12474_v63 }
 0x397   : > { %9212 = vmatpush1.bf16.msra.mxu0 %v12445_v29  ;;  %9596 = vmatpush1.bf16.msra.mxu1 %v12445_v29  ;;  %v6533_v24 = vrot.slane %v6384_v31, 7  ;;  %v12674_v0 = vsel %vm2741_vm1, %v3716_v26, %v3717_v56  ;;  %v12676_v48 = vpack.c.bf16 %v3984_v28, %v3982_v39  ;;  %v6530_v45 = vrot.slane %v6280_v11, 7  ;;  %v3986_v13 = vld [vmem:[#allocation10 + $0x6a8] sm:$0xff]  ;;  %v6307_v11 = vld [vmem:[#allocation3 + $0x3a0] sm:$0xff] }
 0x398   : > { %6211 = vmatprep.mubr.f32.mxu1 %v12486_v14  ;;  %v3493_v29 = vld [vmem:[#allocation3 + $0x110] sm:$0xff]  ;;  %9214 = vmatprep.subr.bf16.mxu0 %v12467_v6  ;;  %v12680_v53 = vpack.c.bf16 %v3983_v35, %v3981_v40  ;;  %v3730_v18 = vrot.slane %v3570_v22, 7  ;;  %v6543_v63 = vrot.slane %v6383_v37, 7  ;;  %v3728_v44 = vrot.slane %v3468_v27, 7  ;;  %v3494_v14 = vld [vmem:[#allocation3 + $0x120] sm:$0xff]  ;;  %v12693_v37 = vld [vmem:[#allocation3 + $0x118] sm:$0xff] }
 0x399   : > { %9598 = vmatprep.subr.bf16.mxu1 %v12467_v6  ;;  %v6306_v31 = vld [vmem:[#allocation3 + $0x390] sm:$0xff]  ;;  %3398 = vmatmul.mubr.f32.gmra.mrb[66].mxu0 %v12465_v55  ;;  %v12685_v26 = vsel %vm2741_vm1, %v3719_v49, %v3720_v58  ;;  %v12688_v39 = vsel %vm2741_vm1, %v6532_v3, %v6533_v24  ;;  %v12691_v28 = vsel %vm2741_vm1, %v6529_v33, %v6530_v45  ;;  %v6541_v6 = vrot.slane %v6281_v2, 7  ;;  %v3469_v22 = vld [vmem:[#allocation3 + $0x108] sm:$0x80]  ;;  %v3985_v40 = vld [vmem:[#allocation10 + $0x6a0] sm:$0xff] }
 0x39a   : > { %6212 = vmatmul.mubr.f32.gmra.mrb[66].mxu1 %v12481_v47  ;;  %v12698_v55 = vsel %vm2741_vm1, %v3720_v58, %v3730_v18  ;;  %v12701_v47 = vsel %vm2741_vm1, %v6533_v24, %v6543_v63  ;;  %v12703_v49 = vpack.c.bf16 %v3988_v17, %v3986_v13  ;;  %v3987_v35 = vld [vmem:[#allocation10 + $0x6b0] sm:$0xff]  ;;  %v3574_v27 = vrot.slane %v3493_v29, 1  ;;  %v6282_v3 = vld [vmem:[#allocation3 + $0x388] sm:$0x80]  ;;  %3403 = vmatprep.mubr.f32.mxu0 %v12505_v9  ;;  %v3992_v18 = vld [vmem:[#allocation10 + $0x6d8] sm:$0xff] }
 0x39b   : > { %9216 = vmatpush1.bf16.msra.mxu0 %v12476_v20  ;;  %9600 = vmatpush1.bf16.msra.mxu1 %v12476_v20  ;;  %v12708_v33 = vsel %vm2741_vm1, %v3717_v56, %v3728_v44  ;;  %v12711_v20 = vsel %vm2741_vm1, %v6530_v45, %v6541_v6  ;;  %v3576_v58 = vrot.slane %v3494_v14, 1  ;;  %v6387_v2 = vrot.slane %v6306_v31, 1  ;;  %v3990_v24 = vld [vmem:[#allocation10 + $0x6c8] sm:$0xff]  ;;  %v12713_v13 = vld [vmem:[#allocation3 + $0x398] sm:$0xff]  ;;  %v3989_v56 = vld [vmem:[#allocation10 + $0x6c0] sm:$0xff] }
 0x39c   : > { %6217 = vmatprep.mubr.f32.mxu1 %v12519_v36  ;;  %14865 = vst [vmem:[#allocation37_spill] sm:$0xff] %v12708_v33  ;;  %14866 = vst [vmem:[#allocation55_spill] sm:$0xff] %v12711_v20  ;;  %9218 = vmatprep.subr.bf16.mxu0 %v12507_v25  ;;  %v3739_v17 = vrot.slane %v3574_v27, 7  ;;  %v6389_v9 = vrot.slane %v6307_v11, 1  ;;  %v3736_v29 = vrot.slane %v3469_v22, 7  ;;  %v3737_v36 = vrot.slane %v12693_v37, 7 }
 0x39d   : > { %9602 = vmatprep.subr.bf16.mxu1 %v12507_v25  ;;  %3404 = vmatmul.mubr.f32.gmra.mrb[68].mxu0 %v12525_v62  ;;  %v12720_v45 = vpack.c.bf16 %v3987_v35, %v3985_v40  ;;  %v3577_v63 = vsel %vm2619_vm0, %v3574_v27, %v3576_v58  ;;  %v6552_v44 = vrot.slane %v6387_v2, 7  ;;  %v6549_v14 = vrot.slane %v6282_v3, 7  ;;  %v3991_v31 = vld [vmem:[#allocation10 + $0x6d0] sm:$0xff]  ;;  %v3471_v6 = vld [vmem:[#allocation3 + $0x128] sm:$0x7f]  ;;  %v14868_v25 = vld [vmem:[#allocation51_spill] sm:$0xff] }
 0x39e   : > { %6218 = vmatmul.mubr.f32.gmra.mrb[68].mxu1 %v12531_v52  ;;  %v3994_v20 = vld [vmem:[#allocation10 + $0x6e8] sm:$0xff]  ;;  %v3740_v11 = vrot.slane %v3577_v63, 7  ;;  %v6390_v22 = vsel %vm2619_vm0, %v6387_v2, %v6389_v9  ;;  %v12726_v37 = vpack.c.bf16 %v3992_v18, %v3990_v24  ;;  %v6550_v62 = vrot.slane %v12713_v13, 7  ;;  %v3996_v52 = vld [vmem:[#allocation10 + $0x6f8] sm:$0xff]  ;;  %v3993_v35 = vld [vmem:[#allocation10 + $0x6e0] sm:$0xff]  ;;  %3409 = vmatprep.mubr.f32.mxu0 %v12543_v10 }
 0x39f   : > { %14867 = vst [vmem:[#allocation56_spill] sm:$0xff] %v12720_v45  ;;  %9220 = vmatpush1.bf16.msra.mxu0 %v14868_v25  ;;  %9604 = vmatpush1.bf16.msra.mxu1 %v14868_v25  ;;  %v6284_v40 = vld [vmem:[#allocation3 + $0x3a8] sm:$0x7f]  ;;  %v6553_v27 = vrot.slane %v6390_v22, 7  ;;  %v12732_v3 = vsel %vm2741_vm1, %v3736_v29, %v3737_v36  ;;  %v3750_v45 = vrot.slane %v3576_v58, 7  ;;  %v6563_v25 = vrot.slane %v6389_v9, 7 }
 0x3a0   : > { %6223 = vmatprep.mubr.f32.mxu1 %v12557_v4  ;;  %v3995_v63 = vld [vmem:[#allocation10 + $0x6f0] sm:$0xff]  ;;  %v3497_v2 = vld [vmem:[#allocation3 + $0x160] sm:$0xff]  ;;  %9222 = vmatprep.subr.bf16.mxu0 %v12536_v12  ;;  %v12737_v24 = vsel %vm2741_vm1, %v3739_v17, %v3740_v11  ;;  %v12740_v10 = vsel %vm2741_vm1, %v6549_v14, %v6550_v62  ;;  %v12742_v4 = vpack.c.bf16 %v3991_v31, %v3989_v56  ;;  %v3748_v18 = vrot.slane %v3471_v6, 7  ;;  %v3472_v58 = vld [vmem:[#allocation3 + $0x148] sm:$0x80] }
 0x3a1   : > { %v3496_v33 = vld [vmem:[#allocation3 + $0x150] sm:$0xff]  ;;  %9606 = vmatprep.subr.bf16.mxu1 %v12536_v12  ;;  %v6310_v29 = vld [vmem:[#allocation3 + $0x3e0] sm:$0xff]  ;;  %3410 = vmatmul.mubr.f32.gmra.mrb[70].mxu0 %v12534_v30  ;;  %v12747_v9 = vsel %vm2741_vm1, %v6552_v44, %v6553_v27  ;;  %v12750_v12 = vsel %vm2741_vm1, %v3740_v11, %v3750_v45  ;;  %v12752_v17 = vpack.c.bf16 %v3996_v52, %v3994_v20  ;;  %v6561_v14 = vrot.slane %v6284_v40, 7  ;;  %v12754_v22 = vld [vmem:[#allocation3 + $0x158] sm:$0xff] }
 0x3a2   : > { %v6309_v13 = vld [vmem:[#allocation3 + $0x3d0] sm:$0xff]  ;;  %6224 = vmatmul.mubr.f32.gmra.mrb[70].mxu1 %v12550_v57  ;;  %v14870_v56 = vld [vmem:[#allocation52_spill] sm:$0xff]  ;;  %v12759_v31 = vsel %vm2741_vm1, %v6553_v27, %v6563_v25  ;;  %v12762_v30 = vsel %vm2741_vm1, %v3737_v36, %v3748_v18  ;;  %v3580_v57 = vrot.slane %v3496_v33, 1  ;;  %v3582_v44 = vrot.slane %v3497_v2, 1  ;;  %v6285_v6 = vld [vmem:[#allocation3 + $0x3c8] sm:$0x80]  ;;  %4093 = vmatprep.mubr.f32.mxu0 %v12578_v46 }
 0x3a3   : > { %14869 = vst [vmem:[#allocation58_spill] sm:$0xff] %v12752_v17  ;;  %9224 = vmatpush1.bf16.msra.mxu0 %v14870_v56  ;;  %9608 = vmatpush1.bf16.msra.mxu1 %v14870_v56  ;;  %v12766_v20 = vpack.c.bf16 %v3995_v63, %v3993_v35  ;;  %v6393_v45 = vrot.slane %v6309_v13, 1  ;;  %v6395_v11 = vrot.slane %v6310_v29, 1  ;;  %v3756_v52 = vrot.slane %v3472_v58, 7  ;;  %v3998_v40 = vld [vmem:[#allocation10 + $0x708] sm:$0xff]  ;;  %v4000_v56 = vld [vmem:[#allocation10 + $0x718] sm:$0xff] }
 0x3a4   : > { %6905 = vmatprep.mubr.f32.mxu1 %v12581_v1  ;;  %v6286_v17 = vld [vmem:[#allocation3 + $0x3d8] sm:$0xff]  ;;  %9226 = vmatprep.subr.bf16.mxu0 %v12569_v5  ;;  %v12771_v33 = vsel %vm2741_vm1, %v6550_v62, %v6561_v14  ;;  %v3583_v36 = vsel %vm2619_vm0, %v3580_v57, %v3582_v44  ;;  %v3759_v46 = vrot.slane %v3580_v57, 7  ;;  %v3757_v1 = vrot.slane %v12754_v22, 7  ;;  %v3997_v35 = vld [vmem:[#allocation10 + $0x700] sm:$0xff] }
 0x3a5   : > { %9610 = vmatprep.subr.bf16.mxu1 %v12569_v5  ;;  %v3999_v27 = vld [vmem:[#allocation10 + $0x710] sm:$0xff]  ;;  %v3474_v25 = vld [vmem:[#allocation3 + $0x168] sm:$0x7f]  ;;  %v3760_v63 = vrot.slane %v3583_v36, 7  ;;  %v6396_v2 = vsel %vm2619_vm0, %v6393_v45, %v6395_v11  ;;  %v6572_v18 = vrot.slane %v6393_v45, 7  ;;  %v6569_v5 = vrot.slane %v6285_v6, 7 }
 0x3a6   : > { %4094 = vmatmul.mubr.f32.vlgmr.msra.gmra.mrb[40].mxu0 %v12567_v50  ;;  %6906 = vmatmul.mubr.f32.vlgmr.msra.gmra.mrb[40].mxu1 %v12584_v42  ;;  %v6287_v13 = vld [vmem:[#allocation3 + $0x3e8] sm:$0x7f]  ;;  %v6573_v62 = vrot.slane %v6396_v2, 7  ;;  %v12781_v29 = vsel %vm2741_vm1, %v3756_v52, %v3757_v1  ;;  %v12783_v58 = vpack.c.bf16 %v4000_v56, %v3998_v40  ;;  %v6570_v14 = vrot.slane %v6286_v17, 7  ;;  %v4004_v22 = vld [vmem:[#allocation10 + $0x738] sm:$0xff]  ;;  %v3499_v42 = vld [vmem:[#allocation3 + $0x190] sm:$0xff] }
 0x3a7   : > { %9228 = vmatpush1.bf16.msra.mxu0 %v12573_v54  ;;  %9612 = vmatpush1.bf16.msra.mxu1 %v12573_v54  ;;  %v4002_v50 = vld [vmem:[#allocation10 + $0x728] sm:$0xff]  ;;  %v12787_v57 = vpack.c.bf16 %v3999_v27, %v3997_v35  ;;  %v3770_v6 = vrot.slane %v3582_v44, 7  ;;  %v6583_v45 = vrot.slane %v6395_v11, 7  ;;  %v3768_v36 = vrot.slane %v3474_v25, 7  ;;  %v3500_v54 = vld [vmem:[#allocation3 + $0x1a0] sm:$0xff]  ;;  %v12800_v11 = vld [vmem:[#allocation3 + $0x198] sm:$0xff] }
 0x3a8   : > { %4099 = vmatprep.mubr.f32.mxu0 %v12591_v59  ;;  %6911 = vmatprep.mubr.f32.mxu1 %v12594_v16  ;;  %v6312_v2 = vld [vmem:[#allocation3 + $0x410] sm:$0xff]  ;;  %v12792_v17 = vsel %vm2741_vm1, %v3759_v46, %v3760_v63  ;;  %v12795_v52 = vsel %vm2741_vm1, %v6572_v18, %v6573_v62  ;;  %v12798_v59 = vsel %vm2741_vm1, %v6569_v5, %v6570_v14  ;;  %v6581_v16 = vrot.slane %v6287_v13, 7  ;;  %v6313_v40 = vld [vmem:[#allocation3 + $0x420] sm:$0xff]  ;;  %v3475_v44 = vld [vmem:[#allocation3 + $0x188] sm:$0x80] }
 0x3a9   : > { %9230 = vmatprep.subr.bf16.mxu0 %v12596_v21  ;;  %9614 = vmatprep.subr.bf16.mxu1 %v12596_v21  ;;  %v12805_v21 = vsel %vm2741_vm1, %v3760_v63, %v3770_v6  ;;  %v12808_v56 = vsel %vm2741_vm1, %v6573_v62, %v6583_v45  ;;  %v12810_v46 = vpack.c.bf16 %v4004_v22, %v4002_v50  ;;  %v4001_v35 = vld [vmem:[#allocation10 + $0x720] sm:$0xff]  ;;  %v4003_v27 = vld [vmem:[#allocation10 + $0x730] sm:$0xff]  ;;  %v3586_v25 = vrot.slane %v3499_v42, 1  ;;  %v6288_v18 = vld [vmem:[#allocation3 + $0x408] sm:$0x80] }
 0x3aa   : > { %4100 = vmatmul.mubr.f32.gmra.mrb[42].mxu0 %v12601_v32  ;;  %6912 = vmatmul.mubr.f32.gmra.mrb[42].mxu1 %v12604_v61  ;;  %v14871_v5 = vld [vmem:[#allocation53_spill] sm:$0xff]  ;;  %v12815_v32 = vsel %vm2741_vm1, %v3757_v1, %v3768_v36  ;;  %v12818_v61 = vsel %vm2741_vm1, %v6570_v14, %v6581_v16  ;;  %v3588_v63 = vrot.slane %v3500_v54, 1  ;;  %v6399_v13 = vrot.slane %v6312_v2, 1  ;;  %v4008_v6 = vld [vmem:[#allocation10 + $0x758] sm:$0xff]  ;;  %v4005_v2 = vld [vmem:[#allocation10 + $0x740] sm:$0xff] }
 0x3ab   : > { %9232 = vmatpush1.bf16.msra.mxu0 %v14871_v5  ;;  %9616 = vmatpush1.bf16.msra.mxu1 %v14871_v5  ;;  %14872 = vst [vmem:[#allocation57_spill] sm:$0xff] %v12818_v61  ;;  %v4006_v62 = vld [vmem:[#allocation10 + $0x748] sm:$0xff]  ;;  %v12820_v50 = vld [vmem:[#allocation3 + $0x418] sm:$0xff]  ;;  %v3779_v22 = vrot.slane %v3586_v25, 7  ;;  %v6401_v42 = vrot.slane %v6313_v40, 1  ;;  %v3776_v45 = vrot.slane %v3475_v44, 7  ;;  %v12827_v1 = vpack.c.bf16 %v4003_v27, %v4001_v35 }
 0x3ac   : > { %4105 = vmatprep.mubr.f32.mxu0 %v12630_v51  ;;  %6917 = vmatprep.mubr.f32.mxu1 %v12640_v8  ;;  %v3777_v5 = vrot.slane %v12800_v11, 7  ;;  %v3589_v14 = vsel %vm2619_vm0, %v3586_v25, %v3588_v63  ;;  %v6592_v36 = vrot.slane %v6399_v13, 7  ;;  %v6589_v54 = vrot.slane %v6288_v18, 7  ;;  %v4007_v16 = vld [vmem:[#allocation10 + $0x750] sm:$0xff]  ;;  %v3477_v51 = vld [vmem:[#allocation3 + $0x1a8] sm:$0x7f] }
 0x3ad   : > { %9234 = vmatprep.subr.bf16.mxu0 %v12619_v15  ;;  %9618 = vmatprep.subr.bf16.mxu1 %v12619_v15  ;;  %14873 = vst [vmem:[#allocation59_spill] sm:$0xff] %v12827_v1  ;;  %v14874_v8 = vld [vmem:[#allocation54_spill] sm:$0xff]  ;;  %v3780_v40 = vrot.slane %v3589_v14, 7  ;;  %v6402_v44 = vsel %vm2619_vm0, %v6399_v13, %v6401_v42  ;;  %v12833_v11 = vpack.c.bf16 %v4008_v6, %v4006_v62  ;;  %v14697_v15 = vrot.slane %v12820_v50, 7  ;;  %v4010_v35 = vld [vmem:[#allocation10 + $0x768] sm:$0xff]  ;;  %v12841_v61 = vld [vmem:[#allocation3 + $0x1e0] sm:$0xff] }
 0x3ae   : > { %4106 = vmatmul.mubr.f32.gmra.mrb[44].mxu0 %v12625_v43  ;;  %6918 = vmatmul.mubr.f32.gmra.mrb[44].mxu1 %v14874_v8  ;;  %v4012_v27 = vld [vmem:[#allocation10 + $0x778] sm:$0xff]  ;;  %v6290_v1 = vld [vmem:[#allocation3 + $0x428] sm:$0x7f]  ;;  %v6593_v25 = vrot.slane %v6402_v44, 7  ;;  %v12839_v18 = vsel %vm2741_vm1, %v3776_v45, %v3777_v5  ;;  %v3790_v43 = vrot.slane %v3588_v63, 7  ;;  %v6603_v8 = vrot.slane %v6401_v42, 7 }
 0x3af   : > { %9236 = vmatpush1.bf16.msra.mxu0 %v12635_v19  ;;  %9620 = vmatpush1.bf16.msra.mxu1 %v12635_v19  ;;  %v3502_v14 = vld [vmem:[#allocation3 + $0x1d0] sm:$0xff]  ;;  %v12846_v13 = vsel %vm2741_vm1, %v3779_v22, %v3780_v40  ;;  %v12851_v19 = vsel %vm2741_vm1, %v6589_v54, %v14697_v15  ;;  %v12853_v62 = vpack.c.bf16 %v4007_v16, %v4005_v2  ;;  %v3788_v6 = vrot.slane %v3477_v51, 7  ;;  %v6316_v42 = vld [vmem:[#allocation3 + $0x460] sm:$0xff]  ;;  %v3478_v45 = vld [vmem:[#allocation3 + $0x1c8] sm:$0x80] }
 0x3b0   : > { %4111 = vmatprep.mubr.f32.mxu0 %v12643_v41  ;;  %6923 = vmatprep.mubr.f32.mxu1 %v12652_v38  ;;  %v6315_v63 = vld [vmem:[#allocation3 + $0x450] sm:$0xff]  ;;  %v12858_v41 = vsel %vm2741_vm1, %v6592_v36, %v6593_v25  ;;  %v12861_v38 = vsel %vm2741_vm1, %v3780_v40, %v3790_v43  ;;  %v12863_v22 = vpack.c.bf16 %v4012_v27, %v4010_v35  ;;  %v4009_v54 = vld [vmem:[#allocation10 + $0x760] sm:$0xff]  ;;  %v12865_v2 = vld [vmem:[#allocation3 + $0x1d8] sm:$0xff]  ;;  %v3592_v51 = vrot.slane %v3502_v14, 1 }
 0x3b1   : > { %9238 = vmatprep.subr.bf16.mxu0 %v12645_v7  ;;  %9622 = vmatprep.subr.bf16.mxu1 %v12645_v7  ;;  %v4011_v44 = vld [vmem:[#allocation10 + $0x770] sm:$0xff]  ;;  %v12870_v16 = vsel %vm2741_vm1, %v6593_v25, %v6603_v8  ;;  %v6601_v7 = vrot.slane %v6290_v1, 7  ;;  %v3594_v36 = vrot.slane %v12841_v61, 1  ;;  %v6291_v15 = vld [vmem:[#allocation3 + $0x448] sm:$0x80]  ;;  %v12876_v40 = vsel %vm2741_vm1, %v3777_v5, %v3788_v6  ;;  %v4013_v5 = vld [vmem:[#allocation10 + $0x780] sm:$0xff] }
 0x3b2   : > { %14875 = vst [vmem:[#allocation61_spill] sm:$0xff] %v12863_v22  ;;  %4112 = vmatmul.mubr.f32.gmra.mrb[46].mxu0 %v12655_v34  ;;  %6924 = vmatmul.mubr.f32.gmra.mrb[46].mxu1 %v12664_v23  ;;  %v6405_v35 = vrot.slane %v6315_v63, 1  ;;  %v6407_v27 = vrot.slane %v6316_v42, 1  ;;  %v3796_v34 = vrot.slane %v3478_v45, 7  ;;  %v4014_v43 = vld [vmem:[#allocation10 + $0x788] sm:$0xff]  ;;  %v4016_v23 = vld [vmem:[#allocation10 + $0x798] sm:$0xff]  ;;  %v12882_v61 = vpack.c.bf16 %v4011_v44, %v4009_v54 }
 0x3b3   : > { %9240 = vmatpush1.bf16.msra.mxu0 %v12659_v60  ;;  %9624 = vmatpush1.bf16.msra.mxu1 %v12659_v60  ;;  %v12878_v22 = vld [vmem:[#allocation3 + $0x458] sm:$0xff]  ;;  %v3595_v1 = vsel %vm2619_vm0, %v3592_v51, %v3594_v36  ;;  %v3799_v25 = vrot.slane %v3592_v51, 7  ;;  %v3797_v60 = vrot.slane %v12865_v2, 7  ;;  %v3480_v8 = vld [vmem:[#allocation3 + $0x1e8] sm:$0x7f]  ;;  %v14876_v45 = vrot.slane %v12820_v50, 7 }
 0x3b4   : > { %4117 = vmatprep.mubr.f32.mxu0 %v12685_v26  ;;  %6929 = vmatprep.mubr.f32.mxu1 %v12688_v39  ;;  %v3800_v14 = vrot.slane %v3595_v1, 7  ;;  %v6408_v6 = vsel %vm2619_vm0, %v6405_v35, %v6407_v27  ;;  %v6612_v63 = vrot.slane %v6405_v35, 7  ;;  %v6609_v26 = vrot.slane %v6291_v15, 7  ;;  %v4015_v42 = vld [vmem:[#allocation10 + $0x790] sm:$0xff]  ;;  %v6293_v39 = vld [vmem:[#allocation3 + $0x468] sm:$0x7f] }
 0x3b5   : > { %9242 = vmatprep.subr.bf16.mxu0 %v12676_v48  ;;  %9626 = vmatprep.subr.bf16.mxu1 %v12676_v48  ;;  %v12894_v54 = vsel %vm2741_vm1, %v14876_v45, %v6601_v7  ;;  %v6613_v44 = vrot.slane %v6408_v6, 7  ;;  %v12896_v2 = vpack.c.bf16 %v4016_v23, %v4014_v43  ;;  %v6610_v48 = vrot.slane %v12878_v22, 7  ;;  %v4018_v51 = vld [vmem:[#allocation10 + $0x7a8] sm:$0xff]  ;;  %v4020_v1 = vld [vmem:[#allocation10 + $0x7b8] sm:$0xff] }
 0x3b6   : > { %4118 = vmatmul.mubr.f32.gmra.mrb[48].mxu0 %v12674_v0  ;;  %6930 = vmatmul.mubr.f32.gmra.mrb[48].mxu1 %v12691_v28  ;;  %v3505_v35 = vld [vmem:[#allocation3 + $0x210] sm:$0xff]  ;;  %v12902_v0 = vsel %vm2741_vm1, %v3796_v34, %v3797_v60  ;;  %v3810_v28 = vrot.slane %v3594_v36, 7  ;;  %v6623_v50 = vrot.slane %v6407_v27, 7  ;;  %v3808_v15 = vrot.slane %v3480_v8, 7  ;;  %v3506_v7 = vld [vmem:[#allocation3 + $0x220] sm:$0xff]  ;;  %v12914_v36 = vld [vmem:[#allocation3 + $0x218] sm:$0xff] }
 0x3b7   : > { %9244 = vmatpush1.bf16.msra.mxu0 %v12680_v53  ;;  %9628 = vmatpush1.bf16.msra.mxu1 %v12680_v53  ;;  %v6318_v45 = vld [vmem:[#allocation3 + $0x490] sm:$0xff]  ;;  %v12907_v22 = vsel %vm2741_vm1, %v3799_v25, %v3800_v14  ;;  %v12910_v43 = vsel %vm2741_vm1, %v6612_v63, %v6613_v44  ;;  %v12912_v23 = vpack.c.bf16 %v4015_v42, %v4013_v5  ;;  %v6621_v53 = vrot.slane %v6293_v39, 7  ;;  %v6319_v34 = vld [vmem:[#allocation3 + $0x4a0] sm:$0xff]  ;;  %v3481_v6 = vld [vmem:[#allocation3 + $0x208] sm:$0x80] }
 0x3b8   : > { %4123 = vmatprep.mubr.f32.mxu0 %v12698_v55  ;;  %6935 = vmatprep.mubr.f32.mxu1 %v12701_v47  ;;  %v12919_v55 = vsel %vm2741_vm1, %v6609_v26, %v6610_v48  ;;  %v12922_v47 = vsel %vm2741_vm1, %v3800_v14, %v3810_v28  ;;  %v12924_v27 = vpack.c.bf16 %v4020_v1, %v4018_v51  ;;  %v3598_v25 = vrot.slane %v3505_v35, 1  ;;  %v6294_v5 = vld [vmem:[#allocation3 + $0x488] sm:$0x80]  ;;  %v14881_v63 = vld [vmem:[#allocation55_spill] sm:$0xff]  ;;  %v4019_v26 = vld [vmem:[#allocation10 + $0x7b0] sm:$0xff] }
 0x3b9   : > { %14877 = vst [vmem:[#allocation38_spill] sm:$0xff] %v12912_v23  ;;  %9246 = vmatprep.subr.bf16.mxu0 %v12703_v49  ;;  %9630 = vmatprep.subr.bf16.mxu1 %v12703_v49  ;;  %14878 = vst [vmem:[#allocation39_spill] sm:$0xff] %v12919_v55  ;;  %v14880_v8 = vld [vmem:[#allocation37_spill] sm:$0xff]  ;;  %v12929_v42 = vsel %vm2741_vm1, %v6613_v44, %v6623_v50  ;;  %v12932_v39 = vsel %vm2741_vm1, %v3797_v60, %v3808_v15  ;;  %v4017_v49 = vld [vmem:[#allocation10 + $0x7a0] sm:$0xff]  ;;  %v3600_v23 = vrot.slane %v3506_v7, 1 }
 0x3ba   : > { %14879 = vst [vmem:[#allocation60_spill] sm:$0xff] %v12924_v27  ;;  %4124 = vmatmul.mubr.f32.gmra.mrb[50].mxu0 %v14880_v8  ;;  %6936 = vmatmul.mubr.f32.gmra.mrb[50].mxu1 %v14881_v63  ;;  %14882 = vst [vmem:[#allocation63_spill] sm:$0xff] %v12932_v39  ;;  %v6411_v55 = vrot.slane %v6318_v45, 1  ;;  %v12934_v14 = vld [vmem:[#allocation3 + $0x498] sm:$0xff]  ;;  %v14883_v51 = vld [vmem:[#allocation56_spill] sm:$0xff]  ;;  %v3819_v1 = vrot.slane %v3598_v25, 7  ;;  %v12942_v60 = vsel %vm2741_vm1, %v6610_v48, %v6621_v53 }
 0x3bb   : > { %9248 = vmatpush1.bf16.msra.mxu0 %v14883_v51  ;;  %9632 = vmatpush1.bf16.msra.mxu1 %v14883_v51  ;;  %v6413_v35 = vrot.slane %v6319_v34, 1  ;;  %v3816_v28 = vrot.slane %v3481_v6, 7  ;;  %v3817_v8 = vrot.slane %v12914_v36, 7  ;;  %v4022_v44 = vld [vmem:[#allocation10 + $0x7c8] sm:$0xff]  ;;  %v4024_v50 = vld [vmem:[#allocation10 + $0x7d8] sm:$0xff]  ;;  %14884 = vst [vmem:[#allocation62_spill] sm:$0xff] %v12942_v60  ;;  %v3601_v15 = vsel %vm2619_vm0, %v3598_v25, %v3600_v23 }
 0x3bc   : > { %4129 = vmatprep.mubr.f32.mxu0 %v12737_v24  ;;  %6941 = vmatprep.mubr.f32.mxu1 %v12747_v9  ;;  %v6632_v7 = vrot.slane %v6411_v55, 7  ;;  %v6629_v45 = vrot.slane %v6294_v5, 7  ;;  %v4021_v63 = vld [vmem:[#allocation10 + $0x7c0] sm:$0xff]  ;;  %v4023_v51 = vld [vmem:[#allocation10 + $0x7d0] sm:$0xff]  ;;  %v12947_v34 = vpack.c.bf16 %v4019_v26, %v4017_v49  ;;  %v3820_v6 = vrot.slane %v3601_v15, 7  ;;  %v4026_v48 = vld [vmem:[#allocation10 + $0x7e8] sm:$0xff] }
 0x3bd   : > { %v3483_v39 = vld [vmem:[#allocation3 + $0x228] sm:$0x7f]  ;;  %9250 = vmatprep.subr.bf16.mxu0 %v12726_v37  ;;  %9634 = vmatprep.subr.bf16.mxu1 %v12726_v37  ;;  %v6414_v24 = vsel %vm2619_vm0, %v6411_v55, %v6413_v35  ;;  %v6630_v9 = vrot.slane %v12934_v14, 7  ;;  %v4028_v53 = vld [vmem:[#allocation10 + $0x7f8] sm:$0xff]  ;;  %v12953_v5 = vpack.c.bf16 %v4024_v50, %v4022_v44  ;;  %v3830_v60 = vrot.slane %v3600_v23, 7 }
 0x3be   : > { %v6296_v36 = vld [vmem:[#allocation3 + $0x4a8] sm:$0x7f]  ;;  %4130 = vmatmul.mubr.f32.gmra.mrb[52].mxu0 %v12732_v3  ;;  %6942 = vmatmul.mubr.f32.gmra.mrb[52].mxu1 %v12740_v10  ;;  %v6633_v25 = vrot.slane %v6414_v24, 7  ;;  %v6643_v27 = vrot.slane %v6413_v35, 7  ;;  %v3508_v37 = vld [vmem:[#allocation3 + $0x50] sm:$0xfe]  ;;  %v12958_v55 = vsel %vm2741_vm1, %v3819_v1, %v3820_v6  ;;  %v12961_v49 = vsel %vm2741_vm1, %v3816_v28, %v3817_v8 }
 0x3bf   : > { %9252 = vmatpush1.bf16.msra.mxu0 %v12742_v4  ;;  %9636 = vmatpush1.bf16.msra.mxu1 %v12742_v4  ;;  %v12963_v26 = vpack.c.bf16 %v4023_v51, %v4021_v63  ;;  %v3828_v3 = vrot.slane %v3483_v39, 7  ;;  %v6321_v10 = vld [vmem:[#allocation3 + $0x2d0] sm:$0xfe]  ;;  %v12971_v14 = vsel %vm2741_vm1, %v6629_v45, %v6630_v9  ;;  %v12973_v4 = vpack.c.bf16 %v4028_v53, %v4026_v48  ;;  %v4025_v35 = vld [vmem:[#allocation10 + $0x7e0] sm:$0xff]  ;;  %v10568_v48 = vld [vmem:[#allocation3 + $0x58] sm:$0xff] }
 0x3c0   : > { %4135 = vmatprep.mubr.f32.mxu0 %v12750_v12  ;;  %6947 = vmatprep.mubr.f32.mxu1 %v12759_v31  ;;  %v12968_v23 = vsel %vm2741_vm1, %v6632_v7, %v6633_v25  ;;  %v6641_v1 = vrot.slane %v6296_v36, 7  ;;  %v4027_v28 = vld [vmem:[#allocation10 + $0x7f0] sm:$0xff]  ;;  %v3486_v44 = vld [vmem:[#allocation3 + $0x68] sm:$0xff]  ;;  %v12978_v12 = vsel %vm2741_vm1, %v3820_v6, %v3830_v60  ;;  %v12981_v31 = vsel %vm2741_vm1, %v6633_v25, %v6643_v27  ;;  %v10566_v15 = vld [vmem:[#allocation3 + $0x60] sm:$0xff] }
 0x3c1   : > { %v14885_v50 = vld [vmem:[#allocation58_spill] sm:$0xff]  ;;  %v3620_v39 = vrot.slane %v3508_v37, 2  ;;  %v3621_v7 = vrot.slane %v10566_v15, 2  ;;  %v12986_v45 = vsel %vm2741_vm1, %v3817_v8, %v3828_v3  ;;  %v6433_v63 = vrot.slane %v6321_v10, 2  ;;  %v10567_v51 = vld [vmem:[#allocation3 + $0x2e0] sm:$0xff]  ;;  %v6299_v60 = vld [vmem:[#allocation3 + $0x2e8] sm:$0xff] }
 0x3c2   : > { %9254 = vmatprep.subr.bf16.mxu0 %v14885_v50  ;;  %9638 = vmatprep.subr.bf16.mxu1 %v14885_v50  ;;  %v6434_v24 = vrot.slane %v10567_v51, 2  ;;  %v3557_v53 = vrot.slane %v10568_v48, 1  ;;  %v12990_v27 = vpack.c.bf16 %v4027_v28, %v4025_v35  ;;  %v4826_v36 = vld [vmem:[#allocation10 + $0x808] sm:$0xff]  ;;  %v4828_v8 = vld [vmem:[#allocation10 + $0x818] sm:$0xff]  ;;  %v12998_v37 = vsel %vm2741_vm1, %v6630_v9, %v6641_v1  ;;  %v4825_v9 = vld [vmem:[#allocation10 + $0x800] sm:$0xff] }
 0x3c3   : > { %4136 = vmatmul.mubr.f32.gmra.mrb[54].mxu0 %v12762_v30  ;;  %6948 = vmatmul.mubr.f32.gmra.mrb[54].mxu1 %v12771_v33  ;;  %v12993_v6 = vsel %vm2684_vm2, %v3620_v39, %v3621_v7  ;;  %v3685_v30 = vrot.slane %v3620_v39, 7  ;;  %v3560_v33 = vrot.slane %v3486_v44, 1  ;;  %v3509_v25 = vld [vmem:[#allocation3 + $0x70] sm:$0x1]  ;;  %v6498_v10 = vrot.slane %v6433_v63, 7  ;;  %v10569_v44 = vld [vmem:[#allocation3 + $0x2d8] sm:$0xff] }
 0x3c4   : > { %9256 = vmatpush1.bf16.msra.mxu0 %v12766_v20  ;;  %9640 = vmatpush1.bf16.msra.mxu1 %v12766_v20  ;;  %v3686_v3 = vrot.slane %v12993_v6, 7  ;;  %v13002_v20 = vsel %vm2684_vm2, %v6433_v63, %v6434_v24  ;;  %v6322_v35 = vld [vmem:[#allocation3 + $0x2f0] sm:$0x1]  ;;  %v6373_v50 = vrot.slane %v6299_v60, 1  ;;  %v4827_v1 = vld [vmem:[#allocation10 + $0x810] sm:$0xff]  ;;  %v3682_v39 = vrot.slane %v3557_v53, 7 }
 0x3c5   : > { %4141 = vmatprep.mubr.f32.mxu0 %v12792_v17  ;;  %6953 = vmatprep.mubr.f32.mxu1 %v12795_v52  ;;  %v6499_v28 = vrot.slane %v13002_v20, 7  ;;  %v3561_v17 = vsel %vm2619_vm0, %v3557_v53, %v3560_v33  ;;  %v6370_v52 = vrot.slane %v10569_v44, 1  ;;  %v13010_v63 = vpack.c.bf16 %v4828_v8, %v4826_v36  ;;  %v4830_v44 = vld [vmem:[#allocation10 + $0x828] sm:$0xff] }
 0x3c6   : > { %9258 = vmatprep.subr.bf16.mxu0 %v12783_v58  ;;  %9642 = vmatprep.subr.bf16.mxu1 %v12783_v58  ;;  %v3683_v15 = vrot.slane %v3561_v17, 7  ;;  %v3623_v51 = vrot.slane %v3509_v25, 2  ;;  %v13015_v58 = vsel %vm2741_vm1, %v3685_v30, %v3686_v3  ;;  %v6436_v6 = vrot.slane %v6322_v35, 2  ;;  %v4831_v25 = vld [vmem:[#allocation10 + $0x830] sm:$0xff] }
 0x3c7   : > { %4142 = vmatmul.mubr.f32.gmra.mrb[56].mxu0 %v12781_v29  ;;  %6954 = vmatmul.mubr.f32.gmra.mrb[56].mxu1 %v12798_v59  ;;  %v6374_v48 = vsel %vm2619_vm0, %v6370_v52, %v6373_v50  ;;  %v6495_v60 = vrot.slane %v6370_v52, 7  ;;  %v4832_v29 = vld [vmem:[#allocation10 + $0x838] sm:$0xff]  ;;  %v13020_v53 = vpack.c.bf16 %v4827_v1, %v4825_v9  ;;  %v3692_v8 = vrot.slane %v3560_v33, 7  ;;  %v3510_v30 = vld [vmem:[#allocation3 + $0x90] sm:$0xfe] }
 0x3c8   : > { %9260 = vmatpush1.bf16.msra.mxu0 %v12787_v57  ;;  %9644 = vmatpush1.bf16.msra.mxu1 %v12787_v57  ;;  %v6496_v59 = vrot.slane %v6374_v48, 7  ;;  %v3624_v36 = vsel %vm2684_vm2, %v3621_v7, %v3623_v51  ;;  %v4829_v57 = vld [vmem:[#allocation10 + $0x820] sm:$0xff]  ;;  %v13028_v35 = vsel %vm2741_vm1, %v6498_v10, %v6499_v28  ;;  %v6505_v17 = vrot.slane %v6373_v50, 7  ;;  %v6323_v52 = vld [vmem:[#allocation3 + $0x310] sm:$0xfe] }
 0x3c9   : > { %4147 = vmatprep.mubr.f32.mxu0 %v12805_v21  ;;  %6959 = vmatprep.mubr.f32.mxu1 %v12808_v56  ;;  %v3694_v21 = vrot.slane %v3624_v36, 7  ;;  %v6437_v56 = vsel %vm2684_vm2, %v6434_v24, %v6436_v6  ;;  %v14886_v7 = vld [vmem:[#allocation57_spill] sm:$0xff]  ;;  %v13034_v33 = vsel %vm2741_vm1, %v3682_v39, %v3683_v15  ;;  %v13039_v1 = vpack.c.bf16 %v4832_v29, %v4830_v44  ;;  %v14887_v51 = vld [vmem:[#allocation59_spill] sm:$0xff] }
 0x3ca   : > { %9262 = vmatprep.subr.bf16.mxu0 %v12810_v46  ;;  %9646 = vmatprep.subr.bf16.mxu1 %v12810_v46  ;;  %v13037_v9 = vsel %vm2741_vm1, %v6495_v60, %v6496_v59  ;;  %v6507_v46 = vrot.slane %v6437_v56, 7  ;;  %v3489_v10 = vld [vmem:[#allocation3 + $0xa8] sm:$0xff]  ;;  %v13044_v24 = vsel %vm2741_vm1, %v3683_v15, %v3692_v8  ;;  %v3625_v50 = vrot.slane %v3510_v30, 2  ;;  %v10570_v48 = vld [vmem:[#allocation3 + $0xa0] sm:$0xff]  ;;  %v10572_v36 = vld [vmem:[#allocation3 + $0x98] sm:$0xff] }
 0x3cb   : > { %4148 = vmatmul.mubr.f32.gmra.mrb[58].mxu0 %v12815_v32  ;;  %6960 = vmatmul.mubr.f32.gmra.mrb[58].mxu1 %v14886_v7  ;;  %v13046_v32 = vpack.c.bf16 %v4831_v25, %v4829_v57  ;;  %v3626_v39 = vrot.slane %v10570_v48, 2  ;;  %v13051_v60 = vsel %vm2741_vm1, %v3686_v3, %v3694_v21  ;;  %v6438_v6 = vrot.slane %v6323_v52, 2  ;;  %v10571_v44 = vld [vmem:[#allocation3 + $0x320] sm:$0xff]  ;;  %v6302_v7 = vld [vmem:[#allocation3 + $0x328] sm:$0xff]  ;;  %v3511_v25 = vld [vmem:[#allocation3 + $0xb0] sm:$0x1] }
 0x3cc   : > { %9264 = vmatpush1.bf16.msra.mxu0 %v14887_v51  ;;  %9648 = vmatpush1.bf16.msra.mxu1 %v14887_v51  ;;  %v6439_v29 = vrot.slane %v10571_v44, 2  ;;  %v3563_v56 = vrot.slane %v10572_v36, 1  ;;  %v13056_v15 = vsel %vm2741_vm1, %v6496_v59, %v6505_v17  ;;  %v3566_v8 = vrot.slane %v3489_v10, 1  ;;  %v4834_v3 = vld [vmem:[#allocation10 + $0x848] sm:$0xff]  ;;  %v4836_v57 = vld [vmem:[#allocation10 + $0x858] sm:$0xff] }
 0x3cd   : > { %4153 = vmatprep.mubr.f32.mxu0 %v12846_v13  ;;  %6965 = vmatprep.mubr.f32.mxu1 %v12858_v41  ;;  %v13059_v13 = vsel %vm2684_vm2, %v3625_v50, %v3626_v39  ;;  %v3705_v41 = vrot.slane %v3625_v50, 7  ;;  %v13066_v30 = vsel %vm2741_vm1, %v6499_v28, %v6507_v46  ;;  %v6518_v21 = vrot.slane %v6438_v6, 7  ;;  %v6324_v17 = vld [vmem:[#allocation3 + $0x330] sm:$0x1]  ;;  %v10573_v52 = vld [vmem:[#allocation3 + $0x318] sm:$0xff]  ;;  %v4833_v28 = vld [vmem:[#allocation10 + $0x840] sm:$0xff] }
 0x3ce   : > { %9266 = vmatprep.subr.bf16.mxu0 %v12833_v11  ;;  %9650 = vmatprep.subr.bf16.mxu1 %v12833_v11  ;;  %v3706_v11 = vrot.slane %v13059_v13, 7  ;;  %v13070_v59 = vsel %vm2684_vm2, %v6438_v6, %v6439_v29  ;;  %v6376_v20 = vrot.slane %v10573_v52, 1  ;;  %v6379_v10 = vrot.slane %v6302_v7, 1  ;;  %v4835_v46 = vld [vmem:[#allocation10 + $0x850] sm:$0xff]  ;;  %v4838_v52 = vld [vmem:[#allocation10 + $0x868] sm:$0xff] }
 0x3cf   : > { %4154 = vmatmul.mubr.f32.gmra.mrb[60].mxu0 %v12839_v18  ;;  %6966 = vmatmul.mubr.f32.gmra.mrb[60].mxu1 %v12851_v19  ;;  %v6519_v18 = vrot.slane %v13070_v59, 7  ;;  %v3567_v19 = vsel %vm2619_vm0, %v3563_v56, %v3566_v8  ;;  %v3702_v51 = vrot.slane %v3563_v56, 7  ;;  %v13078_v48 = vpack.c.bf16 %v4836_v57, %v4834_v3  ;;  %v14888_v44 = vld [vmem:[#allocation61_spill] sm:$0xff] }
 0x3d0   : > { %9268 = vmatpush1.bf16.msra.mxu0 %v12853_v62  ;;  %9652 = vmatpush1.bf16.msra.mxu1 %v12853_v62  ;;  %v3703_v50 = vrot.slane %v3567_v19, 7  ;;  %v3628_v6 = vrot.slane %v3511_v25, 2  ;;  %v13083_v62 = vsel %vm2741_vm1, %v3705_v41, %v3706_v11  ;;  %v6380_v36 = vsel %vm2619_vm0, %v6376_v20, %v6379_v10  ;;  %v4837_v25 = vld [vmem:[#allocation10 + $0x860] sm:$0xff]  ;;  %v4839_v19 = vld [vmem:[#allocation10 + $0x870] sm:$0xff] }
 0x3d1   : > { %4159 = vmatprep.mubr.f32.mxu0 %v12861_v38  ;;  %6971 = vmatprep.mubr.f32.mxu1 %v12870_v16  ;;  %v6515_v7 = vrot.slane %v6376_v20, 7  ;;  %v6441_v13 = vrot.slane %v6324_v17, 2  ;;  %v4840_v38 = vld [vmem:[#allocation10 + $0x878] sm:$0xff]  ;;  %v6516_v16 = vrot.slane %v6380_v36, 7  ;;  %v13088_v56 = vpack.c.bf16 %v4835_v46, %v4833_v28  ;;  %v3512_v41 = vld [vmem:[#allocation3 + $0xd0] sm:$0xfe] }
 0x3d2   : > { %9270 = vmatprep.subr.bf16.mxu0 %v14888_v44  ;;  %9654 = vmatprep.subr.bf16.mxu1 %v14888_v44  ;;  %v3629_v3 = vsel %vm2684_vm2, %v3626_v39, %v3628_v6  ;;  %v3712_v57 = vrot.slane %v3566_v8, 7  ;;  %v13096_v17 = vsel %vm2741_vm1, %v6518_v21, %v6519_v18  ;;  %v6525_v20 = vrot.slane %v6379_v10, 7  ;;  %v6325_v28 = vld [vmem:[#allocation3 + $0x350] sm:$0xfe]  ;;  %v3492_v21 = vld [vmem:[#allocation3 + $0xe8] sm:$0xff]  ;;  %v10574_v10 = vld [vmem:[#allocation3 + $0xe0] sm:$0xff] }
 0x3d3   : > { %4160 = vmatmul.mubr.f32.gmra.mrb[62].mxu0 %v12876_v40  ;;  %6972 = vmatmul.mubr.f32.gmra.mrb[62].mxu1 %v12894_v54  ;;  %v3714_v40 = vrot.slane %v3629_v3, 7  ;;  %v6442_v54 = vsel %vm2684_vm2, %v6439_v29, %v6441_v13  ;;  %v13102_v39 = vsel %vm2741_vm1, %v3702_v51, %v3703_v50  ;;  %v13105_v8 = vsel %vm2741_vm1, %v6515_v7, %v6516_v16  ;;  %v14890_v6 = vld [vmem:[#allocation39_spill] sm:$0xff] }
 0x3d4   : > { %9272 = vmatpush1.bf16.msra.mxu0 %v12882_v61  ;;  %9656 = vmatpush1.bf16.msra.mxu1 %v12882_v61  ;;  %v6527_v61 = vrot.slane %v6442_v54, 7  ;;  %v13107_v46 = vpack.c.bf16 %v4840_v38, %v4838_v52  ;;  %v13112_v29 = vsel %vm2741_vm1, %v3703_v50, %v3712_v57  ;;  %v3631_v51 = vrot.slane %v10574_v10, 2  ;;  %v10575_v7 = vld [vmem:[#allocation3 + $0x360] sm:$0xff]  ;;  %v10576_v52 = vld [vmem:[#allocation3 + $0xd8] sm:$0xff]  ;;  %v6305_v38 = vld [vmem:[#allocation3 + $0x368] sm:$0xff] }
 0x3d5   : > { %4165 = vmatprep.mubr.f32.mxu0 %v12907_v22  ;;  %6977 = vmatprep.mubr.f32.mxu1 %v12910_v43  ;;  %v13114_v22 = vpack.c.bf16 %v4839_v19, %v4837_v25  ;;  %v3630_v43 = vrot.slane %v3512_v41, 2  ;;  %v13119_v44 = vsel %vm2741_vm1, %v3706_v11, %v3714_v40  ;;  %v6443_v36 = vrot.slane %v6325_v28, 2  ;;  %v14891_v50 = vld [vmem:[#allocation38_spill] sm:$0xff]  ;;  %v4842_v11 = vld [vmem:[#allocation10 + $0x888] sm:$0xff] }
 0x3d6   : > { %9274 = vmatprep.subr.bf16.mxu0 %v12896_v2  ;;  %9658 = vmatprep.subr.bf16.mxu1 %v12896_v2  ;;  %v6444_v13 = vrot.slane %v10575_v7, 2  ;;  %v3569_v2 = vrot.slane %v10576_v52, 1  ;;  %v13124_v3 = vsel %vm2741_vm1, %v6516_v16, %v6525_v20  ;;  %v3572_v25 = vrot.slane %v3492_v21, 1  ;;  %v4844_v19 = vld [vmem:[#allocation10 + $0x898] sm:$0xff]  ;;  %v3513_v41 = vld [vmem:[#allocation3 + $0xf0] sm:$0x1] }
 0x3d7   : > { %14889 = vst [vmem:[#allocation64_spill] sm:$0xff] %v13114_v22  ;;  %4166 = vmatmul.mubr.f32.gmra.mrb[64].mxu0 %v12902_v0  ;;  %6978 = vmatmul.mubr.f32.gmra.mrb[64].mxu1 %v14890_v6  ;;  %v13127_v0 = vsel %vm2684_vm2, %v3630_v43, %v3631_v51  ;;  %v3725_v57 = vrot.slane %v3630_v43, 7  ;;  %v13134_v40 = vsel %vm2741_vm1, %v6519_v18, %v6527_v61  ;;  %v6538_v20 = vrot.slane %v6443_v36, 7  ;;  %v6326_v28 = vld [vmem:[#allocation3 + $0x370] sm:$0x1]  ;;  %v14892_v21 = vld [vmem:[#allocation60_spill] sm:$0xff] }
 0x3d8   : > { %9276 = vmatpush1.bf16.msra.mxu0 %v14891_v50  ;;  %9660 = vmatpush1.bf16.msra.mxu1 %v14891_v50  ;;  %v3726_v16 = vrot.slane %v13127_v0, 7  ;;  %v13138_v54 = vsel %vm2684_vm2, %v6443_v36, %v6444_v13  ;;  %v10577_v43 = vld [vmem:[#allocation3 + $0x358] sm:$0xff]  ;;  %v6385_v10 = vrot.slane %v6305_v38, 1  ;;  %v4841_v18 = vld [vmem:[#allocation10 + $0x880] sm:$0xff]  ;;  %v3722_v52 = vrot.slane %v3569_v2, 7  ;;  %v4846_v22 = vld [vmem:[#allocation10 + $0x8a8] sm:$0xff] }
 0x3d9   : > { %4171 = vmatprep.mubr.f32.mxu0 %v12922_v47  ;;  %6983 = vmatprep.mubr.f32.mxu1 %v12929_v42  ;;  %v3573_v42 = vsel %vm2619_vm0, %v3569_v2, %v3572_v25  ;;  %v6382_v59 = vrot.slane %v10577_v43, 1  ;;  %v4843_v61 = vld [vmem:[#allocation10 + $0x890] sm:$0xff]  ;;  %v14893_v6 = vld [vmem:[#allocation63_spill] sm:$0xff]  ;;  %v13146_v50 = vpack.c.bf16 %v4844_v19, %v4842_v11  ;;  %v3633_v0 = vrot.slane %v3513_v41, 2 }
 0x3da   : > { %9278 = vmatprep.subr.bf16.mxu0 %v14892_v21  ;;  %9662 = vmatprep.subr.bf16.mxu1 %v14892_v21  ;;  %v14894_v7 = vld [vmem:[#allocation62_spill] sm:$0xff]  ;;  %v3723_v36 = vrot.slane %v3573_v42, 7  ;;  %v13151_v21 = vsel %vm2741_vm1, %v3725_v57, %v3726_v16  ;;  %v6446_v47 = vrot.slane %v6326_v28, 2  ;;  %v13156_v11 = vpack.c.bf16 %v4843_v61, %v4841_v18 }
 0x3db   : > { %4172 = vmatmul.mubr.f32.gmra.mrb[66].mxu0 %v14893_v6  ;;  %6984 = vmatmul.mubr.f32.gmra.mrb[66].mxu1 %v14894_v7  ;;  %v6386_v38 = vsel %vm2619_vm0, %v6382_v59, %v6385_v10  ;;  %v6535_v43 = vrot.slane %v6382_v59, 7  ;;  %v4848_v6 = vld [vmem:[#allocation10 + $0x8b8] sm:$0xff]  ;;  %v3634_v19 = vsel %vm2684_vm2, %v3631_v51, %v3633_v0  ;;  %v3732_v41 = vrot.slane %v3572_v25, 7  ;;  %v4847_v42 = vld [vmem:[#allocation10 + $0x8b0] sm:$0xff] }
 0x3dc   : > { %9280 = vmatpush1.bf16.msra.mxu0 %v12947_v34  ;;  %9664 = vmatpush1.bf16.msra.mxu1 %v12947_v34  ;;  %v6536_v2 = vrot.slane %v6386_v38, 7  ;;  %v4845_v34 = vld [vmem:[#allocation10 + $0x8a0] sm:$0xff]  ;;  %v3514_v57 = vld [vmem:[#allocation3 + $0x110] sm:$0xfe]  ;;  %v14895_v28 = vrot.slane %v13138_v54, 7  ;;  %v6545_v18 = vrot.slane %v6385_v10, 7  ;;  %v13170_v51 = vsel %vm2741_vm1, %v3722_v52, %v3723_v36 }
 0x3dd   : > { %4177 = vmatprep.mubr.f32.mxu0 %v12958_v55  ;;  %6989 = vmatprep.mubr.f32.mxu1 %v12968_v23  ;;  %v3734_v55 = vrot.slane %v3634_v19, 7  ;;  %v6447_v23 = vsel %vm2684_vm2, %v6444_v13, %v6446_v47  ;;  %v6327_v61 = vld [vmem:[#allocation3 + $0x390] sm:$0xfe]  ;;  %v13175_v7 = vpack.c.bf16 %v4848_v6, %v4846_v22  ;;  %v13180_v13 = vsel %vm2741_vm1, %v3723_v36, %v3732_v41  ;;  %v10578_v47 = vld [vmem:[#allocation3 + $0x120] sm:$0xff]  ;;  %v6308_v6 = vld [vmem:[#allocation3 + $0x3a8] sm:$0xff] }
 0x3de   : > { %9282 = vmatprep.subr.bf16.mxu0 %v12953_v5  ;;  %9666 = vmatprep.subr.bf16.mxu1 %v12953_v5  ;;  %v13164_v59 = vsel %vm2741_vm1, %v6538_v20, %v14895_v28  ;;  %v13173_v25 = vsel %vm2741_vm1, %v6535_v43, %v6536_v2  ;;  %v6547_v5 = vrot.slane %v6447_v23, 7  ;;  %v3495_v20 = vld [vmem:[#allocation3 + $0x128] sm:$0xff]  ;;  %v3636_v10 = vrot.slane %v10578_v47, 2  ;;  %v10579_v0 = vld [vmem:[#allocation3 + $0x3a0] sm:$0xff]  ;;  %v10580_v43 = vld [vmem:[#allocation3 + $0x118] sm:$0xff] }
 0x3df   : > { %4178 = vmatmul.mubr.f32.gmra.mrb[68].mxu0 %v12961_v49  ;;  %6990 = vmatmul.mubr.f32.gmra.mrb[68].mxu1 %v12971_v14  ;;  %v13182_v49 = vpack.c.bf16 %v4847_v42, %v4845_v34  ;;  %v3635_v14 = vrot.slane %v3514_v57, 2  ;;  %v13187_v22 = vsel %vm2741_vm1, %v3726_v16, %v3734_v55  ;;  %v6448_v52 = vrot.slane %v6327_v61, 2  ;;  %v4850_v16 = vld [vmem:[#allocation10 + $0x8c8] sm:$0xff]  ;;  %v4852_v41 = vld [vmem:[#allocation10 + $0x8d8] sm:$0xff]  ;;  %v4849_v61 = vld [vmem:[#allocation10 + $0x8c0] sm:$0xff] }
 0x3e0   : > { %9284 = vmatpush1.bf16.msra.mxu0 %v12963_v26  ;;  %9668 = vmatpush1.bf16.msra.mxu1 %v12963_v26  ;;  %v6449_v38 = vrot.slane %v10579_v0, 2  ;;  %v3575_v26 = vrot.slane %v10580_v43, 1  ;;  %v13192_v36 = vsel %vm2741_vm1, %v6536_v2, %v6545_v18  ;;  %v3578_v19 = vrot.slane %v3495_v20, 1  ;;  %v3515_v34 = vld [vmem:[#allocation3 + $0x130] sm:$0x1]  ;;  %v10581_v23 = vld [vmem:[#allocation3 + $0x398] sm:$0xff] }
 0x3e1   : > { %4183 = vmatprep.mubr.f32.mxu0 %v12978_v12  ;;  %6995 = vmatprep.mubr.f32.mxu1 %v12981_v31  ;;  %v13195_v12 = vsel %vm2684_vm2, %v3635_v14, %v3636_v10  ;;  %v3745_v31 = vrot.slane %v3635_v14, 7  ;;  %v14896_v42 = vmov %v14895_v28  ;;  %v6558_v28 = vrot.slane %v6448_v52, 7  ;;  %v6328_v55 = vld [vmem:[#allocation3 + $0x3b0] sm:$0x1] }
 0x3e2   : > { %9286 = vmatprep.subr.bf16.mxu0 %v12973_v4  ;;  %9670 = vmatprep.subr.bf16.mxu1 %v12973_v4  ;;  %v13202_v57 = vsel %vm2741_vm1, %v14896_v42, %v6547_v5  ;;  %v3746_v4 = vrot.slane %v13195_v12, 7  ;;  %v13206_v2 = vsel %vm2684_vm2, %v6448_v52, %v6449_v38  ;;  %v6388_v54 = vrot.slane %v10581_v23, 1  ;;  %v4851_v5 = vld [vmem:[#allocation10 + $0x8d0] sm:$0xff]  ;;  %v4854_v12 = vld [vmem:[#allocation10 + $0x8e8] sm:$0xff] }
 0x3e3   : > { %4184 = vmatmul.mubr.f32.gmra.mrb[70].mxu0 %v12986_v45  ;;  %6996 = vmatmul.mubr.f32.gmra.mrb[70].mxu1 %v12998_v37  ;;  %v6559_v45 = vrot.slane %v13206_v2, 7  ;;  %v3579_v37 = vsel %vm2619_vm0, %v3575_v26, %v3578_v19  ;;  %v6391_v18 = vrot.slane %v6308_v6, 1  ;;  %v3742_v20 = vrot.slane %v3575_v26, 7 }
 0x3e4   : > { %9288 = vmatpush1.bf16.msra.mxu0 %v12990_v27  ;;  %9672 = vmatpush1.bf16.msra.mxu1 %v12990_v27  ;;  %v3743_v14 = vrot.slane %v3579_v37, 7  ;;  %v13214_v47 = vpack.c.bf16 %v4852_v41, %v4850_v16  ;;  %v3638_v52 = vrot.slane %v3515_v34, 2  ;;  %v13219_v27 = vsel %vm2741_vm1, %v3745_v31, %v3746_v4  ;;  %v4855_v34 = vld [vmem:[#allocation10 + $0x8f0] sm:$0xff] }
 0x3e5   : > { %4254 = vmatprep.mubr.f32.mxu0 %v13015_v58  ;;  %7066 = vmatprep.mubr.f32.mxu1 %v13028_v35  ;;  %v6392_v0 = vsel %vm2619_vm0, %v6388_v54, %v6391_v18  ;;  %v6555_v43 = vrot.slane %v6388_v54, 7  ;;  %v6451_v6 = vrot.slane %v6328_v55, 2  ;;  %v4856_v58 = vld [vmem:[#allocation10 + $0x8f8] sm:$0xff]  ;;  %v13224_v26 = vpack.c.bf16 %v4851_v5, %v4849_v61  ;;  %v3516_v31 = vld [vmem:[#allocation3 + $0x150] sm:$0xfe] }
 0x3e6   : > { %9290 = vmatprep.subr.bf16.mxu0 %v13010_v63  ;;  %9674 = vmatprep.subr.bf16.mxu1 %v13010_v63  ;;  %v6556_v35 = vrot.slane %v6392_v0, 7  ;;  %v3639_v16 = vsel %vm2684_vm2, %v3636_v10, %v3638_v52  ;;  %v3752_v41 = vrot.slane %v3578_v19, 7  ;;  %v4853_v63 = vld [vmem:[#allocation10 + $0x8e0] sm:$0xff]  ;;  %v13232_v42 = vsel %vm2741_vm1, %v6558_v28, %v6559_v45  ;;  %v6329_v37 = vld [vmem:[#allocation3 + $0x3d0] sm:$0xfe]  ;;  %v10584_v0 = vld [vmem:[#allocation3 + $0x158] sm:$0xff] }
 0x3e7   : > { %4255 = vmatmul.mubr.f32.vlgmr.msra.gmra.mrb[40].mxu0 %v13034_v33  ;;  %7067 = vmatmul.mubr.f32.vlgmr.msra.gmra.mrb[40].mxu1 %v13037_v9  ;;  %v3754_v33 = vrot.slane %v3639_v16, 7  ;;  %v6452_v9 = vsel %vm2684_vm2, %v6449_v38, %v6451_v6  ;;  %v6565_v55 = vrot.slane %v6391_v18, 7  ;;  %v13238_v10 = vsel %vm2741_vm1, %v3742_v20, %v3743_v14  ;;  %v3498_v28 = vld [vmem:[#allocation3 + $0x168] sm:$0xff]  ;;  %v10582_v54 = vld [vmem:[#allocation3 + $0x160] sm:$0xff] }
 0x3e8   : > { %9292 = vmatpush1.bf16.msra.mxu0 %v13020_v53  ;;  %9676 = vmatpush1.bf16.msra.mxu1 %v13020_v53  ;;  %v13241_v19 = vsel %vm2741_vm1, %v6555_v43, %v6556_v35  ;;  %v6567_v53 = vrot.slane %v6452_v9, 7  ;;  %v13243_v23 = vpack.c.bf16 %v4856_v58, %v4854_v12  ;;  %v13248_v38 = vsel %vm2741_vm1, %v3743_v14, %v3752_v41  ;;  %v10583_v20 = vld [vmem:[#allocation3 + $0x3e0] sm:$0xff]  ;;  %v6311_v43 = vld [vmem:[#allocation3 + $0x3e8] sm:$0xff]  ;;  %v3517_v58 = vld [vmem:[#allocation3 + $0x170] sm:$0x1] }
 0x3e9   : > { %4260 = vmatprep.mubr.f32.mxu0 %v13051_v60  ;;  %7072 = vmatprep.mubr.f32.mxu1 %v13066_v30  ;;  %v13250_v60 = vpack.c.bf16 %v4855_v34, %v4853_v63  ;;  %v3640_v30 = vrot.slane %v3516_v31, 2  ;;  %v3641_v18 = vrot.slane %v10582_v54, 2  ;;  %v13255_v61 = vsel %vm2741_vm1, %v3746_v4, %v3754_v33  ;;  %v4858_v4 = vld [vmem:[#allocation10 + $0x908] sm:$0xff]  ;;  %v4860_v12 = vld [vmem:[#allocation10 + $0x918] sm:$0xff]  ;;  %v4859_v33 = vld [vmem:[#allocation10 + $0x910] sm:$0xff] }
 0x3ea   : > { %9294 = vmatprep.subr.bf16.mxu0 %v13039_v1  ;;  %9678 = vmatprep.subr.bf16.mxu1 %v13039_v1  ;;  %v6453_v5 = vrot.slane %v6329_v37, 2  ;;  %v6454_v52 = vrot.slane %v10583_v20, 2  ;;  %v3581_v1 = vrot.slane %v10584_v0, 1  ;;  %v13260_v14 = vsel %vm2741_vm1, %v6556_v35, %v6565_v55  ;;  %v6330_v63 = vld [vmem:[#allocation3 + $0x3f0] sm:$0x1]  ;;  %v10585_v34 = vld [vmem:[#allocation3 + $0x3d8] sm:$0xff] }
 0x3eb   : > { %4261 = vmatmul.mubr.f32.gmra.mrb[42].mxu0 %v13044_v24  ;;  %7073 = vmatmul.mubr.f32.gmra.mrb[42].mxu1 %v13056_v15  ;;  %v13263_v24 = vsel %vm2684_vm2, %v3640_v30, %v3641_v18  ;;  %v3765_v15 = vrot.slane %v3640_v30, 7  ;;  %v3584_v6 = vrot.slane %v3498_v28, 1  ;;  %v13270_v16 = vsel %vm2741_vm1, %v6559_v45, %v6567_v53  ;;  %v4857_v45 = vld [vmem:[#allocation10 + $0x900] sm:$0xff] }
 0x3ec   : > { %9296 = vmatpush1.bf16.msra.mxu0 %v13046_v32  ;;  %9680 = vmatpush1.bf16.msra.mxu1 %v13046_v32  ;;  %v3766_v32 = vrot.slane %v13263_v24, 7  ;;  %v13274_v35 = vsel %vm2684_vm2, %v6453_v5, %v6454_v52  ;;  %v6578_v41 = vrot.slane %v6453_v5, 7  ;;  %v6394_v2 = vrot.slane %v10585_v34, 1  ;;  %v4862_v5 = vld [vmem:[#allocation10 + $0x928] sm:$0xff] }
 0x3ed   : > { %4266 = vmatprep.mubr.f32.mxu0 %v13083_v62  ;;  %7078 = vmatprep.mubr.f32.mxu1 %v13096_v17  ;;  %v6579_v62 = vrot.slane %v13274_v35, 7  ;;  %v3585_v17 = vsel %vm2619_vm0, %v3581_v1, %v3584_v6  ;;  %v6397_v31 = vrot.slane %v6311_v43, 1  ;;  %v3762_v9 = vrot.slane %v3581_v1, 7  ;;  %v4863_v43 = vld [vmem:[#allocation10 + $0x930] sm:$0xff] }
 0x3ee   : > { %9298 = vmatprep.subr.bf16.mxu0 %v13078_v48  ;;  %9682 = vmatprep.subr.bf16.mxu1 %v13078_v48  ;;  %v3763_v55 = vrot.slane %v3585_v17, 7  ;;  %v13282_v37 = vpack.c.bf16 %v4860_v12, %v4858_v4  ;;  %v3643_v53 = vrot.slane %v3517_v58, 2  ;;  %v13287_v48 = vsel %vm2741_vm1, %v3765_v15, %v3766_v32  ;;  %v3518_v24 = vld [vmem:[#allocation3 + $0x190] sm:$0xfe]  ;;  %v10586_v17 = vld [vmem:[#allocation3 + $0x1a0] sm:$0xff] }
 0x3ef   : > { %4267 = vmatmul.mubr.f32.gmra.mrb[44].mxu0 %v13102_v39  ;;  %7079 = vmatmul.mubr.f32.gmra.mrb[44].mxu1 %v13105_v8  ;;  %v6398_v28 = vsel %vm2619_vm0, %v6394_v2, %v6397_v31  ;;  %v6575_v30 = vrot.slane %v6394_v2, 7  ;;  %v6456_v54 = vrot.slane %v6330_v63, 2  ;;  %v4864_v39 = vld [vmem:[#allocation10 + $0x938] sm:$0xff]  ;;  %v13292_v20 = vpack.c.bf16 %v4859_v33, %v4857_v45  ;;  %v6331_v12 = vld [vmem:[#allocation3 + $0x410] sm:$0xfe]  ;;  %v14897_v63 = vld [vmem:[#allocation64_spill] sm:$0xff] }
 0x3f0   : > { %9300 = vmatpush1.bf16.msra.mxu0 %v13088_v56  ;;  %9684 = vmatpush1.bf16.msra.mxu1 %v13088_v56  ;;  %v6576_v8 = vrot.slane %v6398_v28, 7  ;;  %v3644_v0 = vsel %vm2684_vm2, %v3641_v18, %v3643_v53  ;;  %v3772_v1 = vrot.slane %v3584_v6, 7  ;;  %v4861_v56 = vld [vmem:[#allocation10 + $0x920] sm:$0xff]  ;;  %v13300_v15 = vsel %vm2741_vm1, %v6578_v41, %v6579_v62 }
 0x3f1   : > { %4272 = vmatprep.mubr.f32.mxu0 %v13119_v44  ;;  %7084 = vmatprep.mubr.f32.mxu1 %v13134_v40  ;;  %v3774_v44 = vrot.slane %v3644_v0, 7  ;;  %v6457_v40 = vsel %vm2684_vm2, %v6454_v52, %v6456_v54  ;;  %v6585_v4 = vrot.slane %v6397_v31, 7  ;;  %v13306_v18 = vsel %vm2741_vm1, %v3762_v9, %v3763_v55  ;;  %v3501_v41 = vld [vmem:[#allocation3 + $0x1a8] sm:$0xff]  ;;  %v10587_v45 = vld [vmem:[#allocation3 + $0x420] sm:$0xff]  ;;  %v10588_v9 = vld [vmem:[#allocation3 + $0x198] sm:$0xff] }
 0x3f2   : > { %9302 = vmatprep.subr.bf16.mxu0 %v13107_v46  ;;  %9686 = vmatprep.subr.bf16.mxu1 %v13107_v46  ;;  %v13309_v6 = vsel %vm2741_vm1, %v6575_v30, %v6576_v8  ;;  %v6587_v46 = vrot.slane %v6457_v40, 7  ;;  %v13311_v58 = vpack.c.bf16 %v4864_v39, %v4862_v5  ;;  %v13316_v52 = vsel %vm2741_vm1, %v3763_v55, %v3772_v1  ;;  %v6314_v28 = vld [vmem:[#allocation3 + $0x428] sm:$0xff]  ;;  %v4868_v54 = vld [vmem:[#allocation10 + $0x958] sm:$0xff]  ;;  %v3519_v5 = vld [vmem:[#allocation3 + $0x1b0] sm:$0x1] }
 0x3f3   : > { %4273 = vmatmul.mubr.f32.gmra.mrb[46].mxu0 %v13112_v29  ;;  %7085 = vmatmul.mubr.f32.gmra.mrb[46].mxu1 %v13124_v3  ;;  %v13318_v29 = vpack.c.bf16 %v4863_v43, %v4861_v56  ;;  %v3645_v3 = vrot.slane %v3518_v24, 2  ;;  %v3646_v34 = vrot.slane %v10586_v17, 2  ;;  %v13323_v2 = vsel %vm2741_vm1, %v3766_v32, %v3774_v44  ;;  %v4866_v32 = vld [vmem:[#allocation10 + $0x948] sm:$0xff]  ;;  %v10589_v56 = vld [vmem:[#allocation3 + $0x418] sm:$0xff] }
 0x3f4   : > { %9304 = vmatpush1.bf16.msra.mxu0 %v14897_v63  ;;  %9688 = vmatpush1.bf16.msra.mxu1 %v14897_v63  ;;  %v6458_v31 = vrot.slane %v6331_v12, 2  ;;  %v6459_v33 = vrot.slane %v10587_v45, 2  ;;  %v3587_v53 = vrot.slane %v10588_v9, 1  ;;  %v13328_v55 = vsel %vm2741_vm1, %v6576_v8, %v6585_v4  ;;  %v6332_v1 = vld [vmem:[#allocation3 + $0x430] sm:$0x1]  ;;  %v4867_v24 = vld [vmem:[#allocation10 + $0x950] sm:$0xff] }
 0x3f5   : > { %4278 = vmatprep.mubr.f32.mxu0 %v13151_v21  ;;  %7090 = vmatprep.mubr.f32.mxu1 %v13164_v59  ;;  %v13331_v21 = vsel %vm2684_vm2, %v3645_v3, %v3646_v34  ;;  %v3785_v59 = vrot.slane %v3645_v3, 7  ;;  %v3590_v30 = vrot.slane %v3501_v41, 1  ;;  %v13338_v39 = vsel %vm2741_vm1, %v6579_v62, %v6587_v46  ;;  %v4865_v62 = vld [vmem:[#allocation10 + $0x940] sm:$0xff]  ;;  %v4870_v3 = vld [vmem:[#allocation10 + $0x968] sm:$0xff]  ;;  %v4871_v9 = vld [vmem:[#allocation10 + $0x970] sm:$0xff] }
 0x3f6   : > { %9306 = vmatprep.subr.bf16.mxu0 %v13146_v50  ;;  %9690 = vmatprep.subr.bf16.mxu1 %v13146_v50  ;;  %v3786_v50 = vrot.slane %v13331_v21, 7  ;;  %v13342_v8 = vsel %vm2684_vm2, %v6458_v31, %v6459_v33  ;;  %v6598_v0 = vrot.slane %v6458_v31, 7  ;;  %v6400_v35 = vrot.slane %v10589_v56, 1  ;;  %v10591_v56 = vld [vmem:[#allocation3 + $0x460] sm:$0xff] }
 0x3f7   : > { %4279 = vmatmul.mubr.f32.gmra.mrb[48].mxu0 %v13170_v51  ;;  %7091 = vmatmul.mubr.f32.gmra.mrb[48].mxu1 %v13173_v25  ;;  %v6599_v51 = vrot.slane %v13342_v8, 7  ;;  %v3591_v25 = vsel %vm2619_vm0, %v3587_v53, %v3590_v30  ;;  %v6403_v43 = vrot.slane %v6314_v28, 1  ;;  %v3782_v44 = vrot.slane %v3587_v53, 7  ;;  %v3520_v53 = vld [vmem:[#allocation3 + $0x1d0] sm:$0xfe] }
 0x3f8   : > { %9308 = vmatpush1.bf16.msra.mxu0 %v13156_v11  ;;  %9692 = vmatpush1.bf16.msra.mxu1 %v13156_v11  ;;  %v3783_v40 = vrot.slane %v3591_v25, 7  ;;  %v13350_v4 = vpack.c.bf16 %v4868_v54, %v4866_v32  ;;  %v3648_v12 = vrot.slane %v3519_v5, 2  ;;  %v13355_v11 = vsel %vm2741_vm1, %v3785_v59, %v3786_v50  ;;  %v6333_v59 = vld [vmem:[#allocation3 + $0x450] sm:$0xfe]  ;;  %v3504_v54 = vld [vmem:[#allocation3 + $0x1e8] sm:$0xff]  ;;  %v10590_v5 = vld [vmem:[#allocation3 + $0x1e0] sm:$0xff] }
 0x3f9   : > { %4284 = vmatprep.mubr.f32.mxu0 %v13187_v22  ;;  %7096 = vmatprep.mubr.f32.mxu1 %v13202_v57  ;;  %v6404_v46 = vsel %vm2619_vm0, %v6400_v35, %v6403_v43  ;;  %v6595_v41 = vrot.slane %v6400_v35, 7  ;;  %v6461_v63 = vrot.slane %v6332_v1, 2  ;;  %v4872_v22 = vld [vmem:[#allocation10 + $0x978] sm:$0xff]  ;;  %v13360_v17 = vpack.c.bf16 %v4867_v24, %v4865_v62  ;;  %v6317_v62 = vld [vmem:[#allocation3 + $0x468] sm:$0xff] }
 0x3fa   : > { %9310 = vmatprep.subr.bf16.mxu0 %v13175_v7  ;;  %9694 = vmatprep.subr.bf16.mxu1 %v13175_v7  ;;  %v6596_v57 = vrot.slane %v6404_v46, 7  ;;  %v3649_v31 = vsel %vm2684_vm2, %v3646_v34, %v3648_v12  ;;  %v3792_v45 = vrot.slane %v3590_v30, 7  ;;  %v4869_v7 = vld [vmem:[#allocation10 + $0x960] sm:$0xff]  ;;  %v13368_v28 = vsel %vm2741_vm1, %v6598_v0, %v6599_v51  ;;  %v3521_v12 = vld [vmem:[#allocation3 + $0x1f0] sm:$0x1] }
 0x3fb   : > { %4285 = vmatmul.mubr.f32.gmra.mrb[50].mxu0 %v13180_v13  ;;  %7097 = vmatmul.mubr.f32.gmra.mrb[50].mxu1 %v13192_v36  ;;  %v3794_v13 = vrot.slane %v3649_v31, 7  ;;  %v6462_v36 = vsel %vm2684_vm2, %v6459_v33, %v6461_v63  ;;  %v6605_v21 = vrot.slane %v6403_v43, 7  ;;  %v13374_v34 = vsel %vm2741_vm1, %v3782_v44, %v3783_v40  ;;  %v10592_v43 = vld [vmem:[#allocation3 + $0x1d8] sm:$0xff] }
 0x3fc   : > { %9312 = vmatpush1.bf16.msra.mxu0 %v13182_v49  ;;  %9696 = vmatpush1.bf16.msra.mxu1 %v13182_v49  ;;  %v13377_v30 = vsel %vm2741_vm1, %v6595_v41, %v6596_v57  ;;  %v6607_v49 = vrot.slane %v6462_v36, 7  ;;  %v13379_v32 = vpack.c.bf16 %v4872_v22, %v4870_v3  ;;  %v13384_v33 = vsel %vm2741_vm1, %v3783_v40, %v3792_v45  ;;  %v4876_v40 = vld [vmem:[#allocation10 + $0x998] sm:$0xff]  ;;  %v6334_v3 = vld [vmem:[#allocation3 + $0x470] sm:$0x1]  ;;  %v4875_v31 = vld [vmem:[#allocation10 + $0x990] sm:$0xff] }
 0x3fd   : > { %4290 = vmatprep.mubr.f32.mxu0 %v13219_v27  ;;  %7102 = vmatprep.mubr.f32.mxu1 %v13232_v42  ;;  %v13386_v27 = vpack.c.bf16 %v4871_v9, %v4869_v7  ;;  %v3650_v42 = vrot.slane %v3520_v53, 2  ;;  %v3651_v0 = vrot.slane %v10590_v5, 2  ;;  %v13391_v1 = vsel %vm2741_vm1, %v3786_v50, %v3794_v13  ;;  %v4874_v50 = vld [vmem:[#allocation10 + $0x988] sm:$0xff]  ;;  %v10593_v22 = vld [vmem:[#allocation3 + $0x458] sm:$0xff] }
 0x3fe   : > { %9314 = vmatprep.subr.bf16.mxu0 %v13214_v47  ;;  %9698 = vmatprep.subr.bf16.mxu1 %v13214_v47  ;;  %v6463_v25 = vrot.slane %v6333_v59, 2  ;;  %v6464_v35 = vrot.slane %v10591_v56, 2  ;;  %v3593_v47 = vrot.slane %v10592_v43, 1  ;;  %v13396_v24 = vsel %vm2741_vm1, %v6596_v57, %v6605_v21  ;;  %v4878_v21 = vld [vmem:[#allocation10 + $0x9a8] sm:$0xff]  ;;  %v4877_v56 = vld [vmem:[#allocation10 + $0x9a0] sm:$0xff]  ;;  %v4879_v43 = vld [vmem:[#allocation10 + $0x9b0] sm:$0xff] }
 0x3ff   : > { %4291 = vmatmul.mubr.f32.gmra.mrb[52].mxu0 %v13238_v10  ;;  %7103 = vmatmul.mubr.f32.gmra.mrb[52].mxu1 %v13241_v19  ;;  %v13399_v10 = vsel %vm2684_vm2, %v3650_v42, %v3651_v0  ;;  %v3805_v19 = vrot.slane %v3650_v42, 7  ;;  %v3596_v44 = vrot.slane %v3504_v54, 1  ;;  %v13406_v46 = vsel %vm2741_vm1, %v6599_v51, %v6607_v49  ;;  %v4873_v51 = vld [vmem:[#allocation10 + $0x980] sm:$0xff]  ;;  %v3522_v42 = vld [vmem:[#allocation3 + $0x210] sm:$0xfe] }
 0x400   : > { %9316 = vmatpush1.bf16.msra.mxu0 %v13224_v26  ;;  %9700 = vmatpush1.bf16.msra.mxu1 %v13224_v26  ;;  %v3806_v26 = vrot.slane %v13399_v10, 7  ;;  %v13410_v41 = vsel %vm2684_vm2, %v6463_v25, %v6464_v35  ;;  %v6618_v63 = vrot.slane %v6463_v25, 7  ;;  %v6406_v8 = vrot.slane %v10593_v22, 1 }
 0x401   : > { %4296 = vmatprep.mubr.f32.mxu0 %v13255_v61  ;;  %7108 = vmatprep.mubr.f32.mxu1 %v13270_v16  ;;  %v6619_v61 = vrot.slane %v13410_v41, 7  ;;  %v3597_v16 = vsel %vm2619_vm0, %v3593_v47, %v3596_v44  ;;  %v6409_v57 = vrot.slane %v6317_v62, 1  ;;  %v3802_v45 = vrot.slane %v3593_v47, 7  ;;  %v6335_v47 = vld [vmem:[#allocation3 + $0x490] sm:$0xfe] }
 0x402   : > { %9318 = vmatprep.subr.bf16.mxu0 %v13243_v23  ;;  %9702 = vmatprep.subr.bf16.mxu1 %v13243_v23  ;;  %v3803_v7 = vrot.slane %v3597_v16, 7  ;;  %v13418_v9 = vpack.c.bf16 %v4876_v40, %v4874_v50  ;;  %v3653_v53 = vrot.slane %v3521_v12, 2  ;;  %v13425_v23 = vsel %vm2741_vm1, %v3805_v19, %v3806_v26  ;;  %v3507_v19 = vld [vmem:[#allocation3 + $0x228] sm:$0xff]  ;;  %v10594_v50 = vld [vmem:[#allocation3 + $0x220] sm:$0xff]  ;;  %v10596_v16 = vld [vmem:[#allocation3 + $0x218] sm:$0xff] }
 0x403   : > { %4297 = vmatmul.mubr.f32.gmra.mrb[54].mxu0 %v13248_v38  ;;  %7109 = vmatmul.mubr.f32.gmra.mrb[54].mxu1 %v13260_v14  ;;  %v6410_v13 = vsel %vm2619_vm0, %v6406_v8, %v6409_v57  ;;  %v6615_v36 = vrot.slane %v6406_v8, 7  ;;  %v6466_v38 = vrot.slane %v6334_v3, 2  ;;  %v4880_v14 = vld [vmem:[#allocation10 + $0x9b8] sm:$0xff]  ;;  %v13430_v49 = vpack.c.bf16 %v4875_v31, %v4873_v51  ;;  %v6320_v8 = vld [vmem:[#allocation3 + $0x4a8] sm:$0xff]  ;;  %v3523_v31 = vld [vmem:[#allocation3 + $0x230] sm:$0x1] }
 0x404   : > { %9320 = vmatpush1.bf16.msra.mxu0 %v13250_v60  ;;  %9704 = vmatpush1.bf16.msra.mxu1 %v13250_v60  ;;  %v6616_v59 = vrot.slane %v6410_v13, 7  ;;  %v3654_v60 = vsel %vm2684_vm2, %v3651_v0, %v3653_v53  ;;  %v3812_v54 = vrot.slane %v3596_v44, 7  ;;  %v13438_v5 = vsel %vm2741_vm1, %v6618_v63, %v6619_v61  ;;  %v10595_v63 = vld [vmem:[#allocation3 + $0x4a0] sm:$0xff]  ;;  %v4882_v51 = vld [vmem:[#allocation10 + $0x9c8] sm:$0xff] }
 0x405   : > { %4302 = vmatprep.mubr.f32.mxu0 %v13287_v48  ;;  %7114 = vmatprep.mubr.f32.mxu1 %v13300_v15  ;;  %v3814_v25 = vrot.slane %v3654_v60, 7  ;;  %v6467_v48 = vsel %vm2684_vm2, %v6464_v35, %v6466_v38  ;;  %v6625_v15 = vrot.slane %v6409_v57, 7  ;;  %v13444_v0 = vsel %vm2741_vm1, %v3802_v45, %v3803_v7  ;;  %v6336_v53 = vld [vmem:[#allocation3 + $0x4b0] sm:$0x1]  ;;  %v4881_v60 = vld [vmem:[#allocation10 + $0x9c0] sm:$0xff] }
 0x406   : > { %9322 = vmatprep.subr.bf16.mxu0 %v13282_v37  ;;  %9706 = vmatprep.subr.bf16.mxu1 %v13282_v37  ;;  %v13447_v37 = vsel %vm2741_vm1, %v6615_v36, %v6616_v59  ;;  %v13449_v62 = vpack.c.bf16 %v4880_v14, %v4878_v21  ;;  %v6627_v35 = vrot.slane %v6467_v48, 7  ;;  %v13454_v44 = vsel %vm2741_vm1, %v3803_v7, %v3812_v54  ;;  %v4884_v7 = vld [vmem:[#allocation10 + $0x9d8] sm:$0xff]  ;;  %v4886_v41 = vld [vmem:[#allocation10 + $0x9e8] sm:$0xff] }
 0x407   : > { %4303 = vmatmul.mubr.f32.gmra.mrb[56].mxu0 %v13306_v18  ;;  %7115 = vmatmul.mubr.f32.gmra.mrb[56].mxu1 %v13309_v6  ;;  %v3655_v18 = vrot.slane %v3522_v42, 2  ;;  %v3656_v6 = vrot.slane %v10594_v50, 2  ;;  %v13458_v40 = vpack.c.bf16 %v4879_v43, %v4877_v56  ;;  %v6468_v12 = vrot.slane %v6335_v47, 2  ;;  %v4888_v48 = vld [vmem:[#allocation10 + $0x9f8] sm:$0xff]  ;;  %v4885_v43 = vld [vmem:[#allocation10 + $0x9e0] sm:$0xff]  ;;  %v4408_v47 = vld [vmem:[#allocation3 + $0x2d0] sm:$0xff] }
 0x408   : > { %9324 = vmatpush1.bf16.msra.mxu0 %v13292_v20  ;;  %9708 = vmatpush1.bf16.msra.mxu1 %v13292_v20  ;;  %v6469_v3 = vrot.slane %v10595_v63, 2  ;;  %v3599_v22 = vrot.slane %v10596_v16, 1  ;;  %v13465_v20 = vsel %vm2741_vm1, %v3806_v26, %v3814_v25  ;;  %v3602_v57 = vrot.slane %v3507_v19, 1  ;;  %v4409_v19 = vld [vmem:[#allocation3 + $0x2e0] sm:$0xff]  ;;  %v7220_v50 = vld [vmem:[#allocation3 + $0x90] sm:$0xff] }
 0x409   : > { %4308 = vmatprep.mubr.f32.mxu0 %v13323_v2  ;;  %7120 = vmatprep.mubr.f32.mxu1 %v13338_v39  ;;  %v13468_v2 = vsel %vm2741_vm1, %v6616_v59, %v6625_v15  ;;  %v13471_v39 = vsel %vm2684_vm2, %v3655_v18, %v3656_v6  ;;  %v3825_v45 = vrot.slane %v3655_v18, 7  ;;  %v6638_v26 = vrot.slane %v6468_v12, 7  ;;  %v4887_v18 = vld [vmem:[#allocation10 + $0x9f0] sm:$0xff] }
 0x40a   : > { %9326 = vmatprep.subr.bf16.mxu0 %v13311_v58  ;;  %9710 = vmatprep.subr.bf16.mxu1 %v13311_v58  ;;  %v3826_v58 = vrot.slane %v13471_v39, 7  ;;  %v13477_v10 = vsel %vm2684_vm2, %v6468_v12, %v6469_v3  ;;  %v3603_v36 = vsel %vm2619_vm0, %v3599_v22, %v3602_v57  ;;  %v13488_v21 = vsel %vm2741_vm1, %v6619_v61, %v6627_v35 }
 0x40b   : > { %4309 = vmatmul.mubr.f32.gmra.mrb[58].mxu0 %v13316_v52  ;;  %7121 = vmatmul.mubr.f32.gmra.mrb[58].mxu1 %v13328_v55  ;;  %v6639_v13 = vrot.slane %v13477_v10, 7  ;;  %v10597_v52 = vld [vmem:[#allocation3 + $0x498] sm:$0xff]  ;;  %v6415_v55 = vrot.slane %v6320_v8, 1  ;;  %v3822_v14 = vrot.slane %v3599_v22, 7  ;;  %v3823_v59 = vrot.slane %v3603_v36, 7 }
 0x40c   : > { %9328 = vmatpush1.bf16.msra.mxu0 %v13318_v29  ;;  %9712 = vmatpush1.bf16.msra.mxu1 %v13318_v29  ;;  %v6412_v38 = vrot.slane %v10597_v52, 1  ;;  %v4883_v29 = vld [vmem:[#allocation10 + $0x9d0] sm:$0xff]  ;;  %v3658_v54 = vrot.slane %v3523_v31, 2  ;;  %v13492_v42 = vpack.c.bf16 %v4884_v7, %v4882_v51  ;;  %v6471_v25 = vrot.slane %v6336_v53, 2  ;;  %v4384_v22 = vld [vmem:[#allocation3 + $0x2c8] sm:$0x80] }
 0x40d   : > { %4314 = vmatprep.mubr.f32.mxu0 %v13355_v11  ;;  %7126 = vmatprep.mubr.f32.mxu1 %v13368_v28  ;;  %v13502_v61 = vsel %vm2741_vm1, %v3825_v45, %v3826_v58  ;;  %v3832_v56 = vrot.slane %v3602_v57, 7  ;;  %v13519_v12 = vsel %vm2741_vm1, %v3822_v14, %v3823_v59  ;;  %v13521_v63 = vpack.c.bf16 %v4888_v48, %v4886_v41  ;;  %v13523_v8 = vld [vmem:[#allocation3 + $0x2d8] sm:$0xff]  ;;  %v7196_v51 = vld [vmem:[#allocation3 + $0x88] sm:$0x80]  ;;  %v4411_v48 = vld [vmem:[#allocation3 + $0x310] sm:$0xff] }
 0x40e   : > { %9330 = vmatprep.subr.bf16.mxu0 %v13350_v4  ;;  %9714 = vmatprep.subr.bf16.mxu1 %v13350_v4  ;;  %v13495_v11 = vsel %vm2619_vm0, %v6412_v38, %v6415_v55  ;;  %v6635_v28 = vrot.slane %v6412_v38, 7  ;;  %v3659_v15 = vsel %vm2684_vm2, %v3656_v6, %v3658_v54  ;;  %v6472_v35 = vsel %vm2684_vm2, %v6469_v3, %v6471_v25  ;;  %v7221_v6 = vld [vmem:[#allocation3 + $0xa0] sm:$0xff]  ;;  %v13537_v53 = vld [vmem:[#allocation3 + $0x98] sm:$0xff]  ;;  %v4894_v25 = vld [vmem:[#allocation10 + $0xa28] sm:$0xff] }
 0x40f   : > { %4315 = vmatmul.mubr.f32.gmra.mrb[60].mxu0 %v13374_v34  ;;  %7127 = vmatmul.mubr.f32.gmra.mrb[60].mxu1 %v13377_v30  ;;  %v6636_v4 = vrot.slane %v13495_v11, 7  ;;  %v13511_v34 = vsel %vm2741_vm1, %v6638_v26, %v6639_v13  ;;  %v13513_v30 = vpack.c.bf16 %v4883_v29, %v4881_v60  ;;  %v6645_v16 = vrot.slane %v6415_v55, 7  ;;  %v4892_v38 = vld [vmem:[#allocation10 + $0xa18] sm:$0xff]  ;;  %v4889_v55 = vld [vmem:[#allocation10 + $0xa00] sm:$0xff]  ;;  %v4891_v54 = vld [vmem:[#allocation10 + $0xa10] sm:$0xff] }
 0x410   : > { %9332 = vmatpush1.bf16.msra.mxu0 %v13360_v17  ;;  %9716 = vmatpush1.bf16.msra.mxu1 %v13360_v17  ;;  %v3834_v17 = vrot.slane %v3659_v15, 7  ;;  %v4480_v57 = vrot.slane %v4408_v47, 1  ;;  %v13533_v31 = vsel %vm2741_vm1, %v3823_v59, %v3832_v56  ;;  %v13535_v45 = vpack.c.bf16 %v4887_v18, %v4885_v43  ;;  %v4896_v41 = vld [vmem:[#allocation10 + $0xa38] sm:$0xff]  ;;  %v7198_v15 = vld [vmem:[#allocation3 + $0xa8] sm:$0x7f]  ;;  %v7223_v43 = vld [vmem:[#allocation3 + $0xd0] sm:$0xff] }
 0x411   : > { %4320 = vmatprep.mubr.f32.mxu0 %v13391_v1  ;;  %7132 = vmatprep.mubr.f32.mxu1 %v13406_v46  ;;  %v13528_v3 = vsel %vm2741_vm1, %v6635_v28, %v6636_v4  ;;  %v6647_v1 = vrot.slane %v6472_v35, 7  ;;  %v4482_v46 = vrot.slane %v4409_v19, 1  ;;  %v7292_v26 = vrot.slane %v7220_v50, 1  ;;  %v4412_v56 = vld [vmem:[#allocation3 + $0x320] sm:$0xff]  ;;  %v4387_v19 = vld [vmem:[#allocation3 + $0x308] sm:$0x80] }
 0x412   : > { %9334 = vmatprep.subr.bf16.mxu0 %v13379_v32  ;;  %9718 = vmatprep.subr.bf16.mxu1 %v13379_v32  ;;  %v7294_v7 = vrot.slane %v7221_v6, 1  ;;  %v4603_v36 = vrot.slane %v4480_v57, 7  ;;  %v4600_v52 = vrot.slane %v4384_v22, 7  ;;  %v7412_v29 = vrot.slane %v7196_v51, 7  ;;  %v13578_v47 = vld [vmem:[#allocation3 + $0xe0] sm:$0xff]  ;;  %v13580_v35 = vld [vmem:[#allocation3 + $0x318] sm:$0xff] }
 0x413   : > { %4321 = vmatmul.mubr.f32.gmra.mrb[62].mxu0 %v13384_v33  ;;  %7133 = vmatmul.mubr.f32.gmra.mrb[62].mxu1 %v13396_v24  ;;  %v4483_v32 = vsel %vm2619_vm0, %v4480_v57, %v4482_v46  ;;  %v4601_v33 = vrot.slane %v13523_v8, 7  ;;  %v4890_v24 = vld [vmem:[#allocation10 + $0xa08] sm:$0xff]  ;;  %v7415_v60 = vrot.slane %v7292_v26, 7  ;;  %v13551_v11 = vsel %vm2741_vm1, %v3826_v58, %v3834_v17  ;;  %v4895_v51 = vld [vmem:[#allocation10 + $0xa30] sm:$0xff] }
 0x414   : > { %9336 = vmatpush1.bf16.msra.mxu0 %v13386_v27  ;;  %9720 = vmatpush1.bf16.msra.mxu1 %v13386_v27  ;;  %v4604_v14 = vrot.slane %v4483_v32, 7  ;;  %v7295_v59 = vsel %vm2619_vm0, %v7292_v26, %v7294_v7  ;;  %v4386_v27 = vld [vmem:[#allocation3 + $0x2e8] sm:$0x7f]  ;;  %v7413_v28 = vrot.slane %v13537_v53, 7  ;;  %v13564_v39 = vpack.c.bf16 %v4892_v38, %v4890_v24  ;;  %v7199_v17 = vld [vmem:[#allocation3 + $0xc8] sm:$0x80] }
 0x415   : > { %4326 = vmatprep.mubr.f32.mxu0 %v13425_v23  ;;  %7138 = vmatprep.mubr.f32.mxu1 %v13438_v5  ;;  %v13554_v23 = vsel %vm2741_vm1, %v6636_v4, %v6645_v16  ;;  %v7416_v5 = vrot.slane %v7295_v59, 7  ;;  %v4614_v58 = vrot.slane %v4482_v46, 7  ;;  %v7426_v4 = vrot.slane %v7294_v7, 7  ;;  %v4893_v46 = vld [vmem:[#allocation10 + $0xa20] sm:$0xff]  ;;  %v4898_v32 = vld [vmem:[#allocation10 + $0xa48] sm:$0xff] }
 0x416   : > { %9338 = vmatprep.subr.bf16.mxu0 %v13418_v9  ;;  %9722 = vmatprep.subr.bf16.mxu1 %v13418_v9  ;;  %v13562_v9 = vsel %vm2741_vm1, %v6639_v13, %v6647_v1  ;;  %v13576_v10 = vpack.c.bf16 %v4891_v54, %v4889_v55  ;;  %v4612_v13 = vrot.slane %v4386_v27, 7  ;;  %v13590_v18 = vsel %vm2741_vm1, %v7412_v29, %v7413_v28  ;;  %v13599_v1 = vld [vmem:[#allocation3 + $0xd8] sm:$0xff]  ;;  %v4897_v38 = vld [vmem:[#allocation10 + $0xa40] sm:$0xff] }
 0x417   : > { %4327 = vmatmul.mubr.f32.gmra.mrb[64].mxu0 %v13444_v0  ;;  %7139 = vmatmul.mubr.f32.gmra.mrb[64].mxu1 %v13447_v37  ;;  %v13569_v0 = vsel %vm2741_vm1, %v4603_v36, %v4604_v14  ;;  %v13574_v37 = vsel %vm2741_vm1, %v4600_v52, %v4601_v33  ;;  %v13592_v50 = vpack.c.bf16 %v4896_v41, %v4894_v25  ;;  %v4486_v6 = vrot.slane %v4411_v48, 1  ;;  %v4900_v52 = vld [vmem:[#allocation10 + $0xa58] sm:$0xff]  ;;  %v4899_v55 = vld [vmem:[#allocation10 + $0xa50] sm:$0xff]  ;;  %v7201_v48 = vld [vmem:[#allocation3 + $0xe8] sm:$0x7f] }
 0x418   : > { %9340 = vmatpush1.bf16.msra.mxu0 %v13430_v49  ;;  %9724 = vmatpush1.bf16.msra.mxu1 %v13430_v49  ;;  %v13585_v49 = vsel %vm2741_vm1, %v7415_v60, %v7416_v5  ;;  %v4488_v16 = vrot.slane %v4412_v56, 1  ;;  %v7298_v22 = vrot.slane %v7223_v43, 1  ;;  %v13604_v57 = vsel %vm2741_vm1, %v7416_v5, %v7426_v4  ;;  %v4902_v60 = vld [vmem:[#allocation10 + $0xa68] sm:$0xff]  ;;  %v4904_v27 = vld [vmem:[#allocation10 + $0xa78] sm:$0xff] }
 0x419   : > { %4332 = vmatprep.mubr.f32.mxu0 %v13465_v20  ;;  %7144 = vmatprep.mubr.f32.mxu1 %v13488_v21  ;;  %v13597_v20 = vsel %vm2741_vm1, %v4604_v14, %v4614_v58  ;;  %v7424_v21 = vrot.slane %v7198_v15, 7  ;;  %v7300_v26 = vrot.slane %v13578_v47, 1  ;;  %v4621_v7 = vrot.slane %v13580_v35, 7  ;;  %v4414_v5 = vld [vmem:[#allocation3 + $0x350] sm:$0xff]  ;;  %v13634_v25 = vld [vmem:[#allocation3 + $0x360] sm:$0xff] }
 0x41a   : > { %9342 = vmatprep.subr.bf16.mxu0 %v13449_v62  ;;  %9726 = vmatprep.subr.bf16.mxu1 %v13449_v62  ;;  %v4620_v62 = vrot.slane %v4387_v19, 7  ;;  %v4623_v36 = vrot.slane %v4486_v6, 7  ;;  %v7432_v24 = vrot.slane %v7199_v17, 7  ;;  %v7433_v8 = vrot.slane %v13599_v1, 7  ;;  %v7226_v58 = vld [vmem:[#allocation3 + $0x110] sm:$0xff]  ;;  %v13647_v4 = vld [vmem:[#allocation3 + $0x120] sm:$0xff] }
 0x41b   : > { %4333 = vmatmul.mubr.f32.gmra.mrb[66].mxu0 %v13454_v44  ;;  %7145 = vmatmul.mubr.f32.gmra.mrb[66].mxu1 %v13468_v2  ;;  %v13613_v44 = vsel %vm2741_vm1, %v4601_v33, %v4612_v13  ;;  %v4489_v2 = vsel %vm2619_vm0, %v4486_v6, %v4488_v16  ;;  %v13619_v59 = vsel %vm2619_vm0, %v7298_v22, %v7300_v26  ;;  %v13622_v33 = vld [vmem:[#allocation3 + $0x328] sm:$0x7f]  ;;  %v4634_v54 = vrot.slane %v4488_v16, 7  ;;  %v4390_v43 = vld [vmem:[#allocation3 + $0x348] sm:$0x80]  ;;  %v13660_v13 = vld [vmem:[#allocation3 + $0x358] sm:$0xff] }
 0x41c   : > { %9344 = vmatpush1.bf16.msra.mxu0 %v13458_v40  ;;  %9728 = vmatpush1.bf16.msra.mxu1 %v13458_v40  ;;  %v4624_v14 = vrot.slane %v4489_v2, 7  ;;  %v7435_v40 = vrot.slane %v7298_v22, 7  ;;  %v7436_v29 = vrot.slane %v13619_v59, 7  ;;  %v13645_v41 = vpack.c.bf16 %v4899_v55, %v4897_v38  ;;  %v4907_v59 = vld [vmem:[#allocation10 + $0xa90] sm:$0xff] }
 0x41d   : > { %4338 = vmatprep.mubr.f32.mxu0 %v13502_v61  ;;  %7150 = vmatprep.mubr.f32.mxu1 %v13511_v34  ;;  %v13629_v61 = vsel %vm2741_vm1, %v7413_v28, %v7424_v21  ;;  %v13631_v34 = vpack.c.bf16 %v4895_v51, %v4893_v46  ;;  %v13643_v28 = vpack.c.bf16 %v4900_v52, %v4898_v32  ;;  %v7446_v15 = vrot.slane %v7300_v26, 7  ;;  %v7202_v21 = vld [vmem:[#allocation3 + $0x108] sm:$0x80]  ;;  %v4903_v46 = vld [vmem:[#allocation10 + $0xa70] sm:$0xff]  ;;  %v4908_v52 = vld [vmem:[#allocation10 + $0xa98] sm:$0xff] }
 0x41e   : > { %9346 = vmatprep.subr.bf16.mxu0 %v13492_v42  ;;  %9730 = vmatprep.subr.bf16.mxu1 %v13492_v42  ;;  %v13641_v42 = vsel %vm2741_vm1, %v4620_v62, %v4621_v7  ;;  %v4632_v56 = vrot.slane %v13622_v33, 7  ;;  %v13667_v19 = vpack.c.bf16 %v4904_v27, %v4902_v60  ;;  %v4492_v6 = vrot.slane %v4414_v5, 1  ;;  %v13676_v26 = vld [vmem:[#allocation3 + $0x118] sm:$0xff]  ;;  %v4417_v5 = vld [vmem:[#allocation3 + $0x390] sm:$0xff] }
 0x41f   : > { %4339 = vmatmul.mubr.f32.gmra.mrb[68].mxu0 %v13519_v12  ;;  %7151 = vmatmul.mubr.f32.gmra.mrb[68].mxu1 %v13528_v3  ;;  %v13652_v12 = vsel %vm2741_vm1, %v4623_v36, %v4624_v14  ;;  %v13657_v3 = vsel %vm2741_vm1, %v7432_v24, %v7433_v8  ;;  %v4494_v17 = vrot.slane %v13634_v25, 1  ;;  %v13673_v16 = vsel %vm2741_vm1, %v4624_v14, %v4634_v54  ;;  %v4906_v36 = vld [vmem:[#allocation10 + $0xa88] sm:$0xff]  ;;  %v4905_v24 = vld [vmem:[#allocation10 + $0xa80] sm:$0xff]  ;;  %v4912_v27 = vld [vmem:[#allocation10 + $0xab8] sm:$0xff] }
 0x420   : > { %9348 = vmatpush1.bf16.msra.mxu0 %v13513_v30  ;;  %9732 = vmatpush1.bf16.msra.mxu1 %v13513_v30  ;;  %v13665_v30 = vsel %vm2741_vm1, %v7435_v40, %v7436_v29  ;;  %v7444_v22 = vrot.slane %v7201_v48, 7  ;;  %v7306_v51 = vrot.slane %v13647_v4, 1  ;;  %v4643_v32 = vrot.slane %v4492_v6, 7  ;;  %v4910_v54 = vld [vmem:[#allocation10 + $0xaa8] sm:$0xff]  ;;  %v13709_v25 = vld [vmem:[#allocation3 + $0x3a0] sm:$0xff] }
 0x421   : > { %4344 = vmatprep.mubr.f32.mxu0 %v13551_v11  ;;  %7156 = vmatprep.mubr.f32.mxu1 %v13562_v9  ;;  %v4901_v11 = vld [vmem:[#allocation10 + $0xa60] sm:$0xff]  ;;  %v7304_v9 = vrot.slane %v7226_v58, 1  ;;  %v4495_v62 = vsel %vm2619_vm0, %v4492_v6, %v4494_v17  ;;  %v4640_v2 = vrot.slane %v4390_v43, 7  ;;  %v13690_v40 = vsel %vm2741_vm1, %v7436_v29, %v7446_v15  ;;  %v7229_v48 = vld [vmem:[#allocation3 + $0x150] sm:$0xff]  ;;  %v4393_v43 = vld [vmem:[#allocation3 + $0x388] sm:$0x80] }
 0x422   : > { %9350 = vmatprep.subr.bf16.mxu0 %v13521_v63  ;;  %9734 = vmatprep.subr.bf16.mxu1 %v13521_v63  ;;  %v4641_v63 = vrot.slane %v13660_v13, 7  ;;  %v4644_v38 = vrot.slane %v4495_v62, 7  ;;  %v13695_v33 = vsel %vm2741_vm1, %v4621_v7, %v4632_v56  ;;  %v7453_v60 = vrot.slane %v13676_v26, 7  ;;  %v7204_v29 = vld [vmem:[#allocation3 + $0x128] sm:$0x7f]  ;;  %v13723_v56 = vld [vmem:[#allocation3 + $0x160] sm:$0xff] }
 0x423   : > { %4345 = vmatmul.mubr.f32.gmra.mrb[70].mxu0 %v13533_v31  ;;  %7157 = vmatmul.mubr.f32.gmra.mrb[70].mxu1 %v13554_v23  ;;  %v7307_v55 = vsel %vm2619_vm0, %v7304_v9, %v7306_v51  ;;  %v7455_v14 = vrot.slane %v7304_v9, 7  ;;  %v7452_v31 = vrot.slane %v7202_v21, 7  ;;  %v13685_v23 = vld [vmem:[#allocation3 + $0x368] sm:$0x7f]  ;;  %v13707_v35 = vpack.c.bf16 %v4908_v52, %v4906_v36  ;;  %v13725_v6 = vld [vmem:[#allocation3 + $0x398] sm:$0xff] }
 0x424   : > { %9352 = vmatpush1.bf16.msra.mxu0 %v13535_v45  ;;  %9736 = vmatpush1.bf16.msra.mxu1 %v13535_v45  ;;  %v7456_v45 = vrot.slane %v7307_v55, 7  ;;  %v4654_v7 = vrot.slane %v4494_v17, 7  ;;  %v13721_v58 = vpack.c.bf16 %v4907_v59, %v4905_v24  ;;  %v7466_v15 = vrot.slane %v7306_v51, 7  ;;  %v13743_v51 = vld [vmem:[#allocation3 + $0x158] sm:$0xff]  ;;  %v4914_v52 = vld [vmem:[#allocation10 + $0xac8] sm:$0xff] }
 0x425   : > { %5017 = vmatprep.mubr.f32.mxu0 %v13569_v0  ;;  %7828 = vmatprep.mubr.f32.mxu1 %v13585_v49  ;;  %v13703_v0 = vsel %vm2741_vm1, %v7433_v8, %v7444_v22  ;;  %v13705_v49 = vpack.c.bf16 %v4903_v46, %v4901_v11  ;;  %v13719_v8 = vsel %vm2741_vm1, %v4640_v2, %v4641_v63  ;;  %v4652_v17 = vrot.slane %v13685_v23, 7  ;;  %v7205_v22 = vld [vmem:[#allocation3 + $0x148] sm:$0x80]  ;;  %v4911_v2 = vld [vmem:[#allocation10 + $0xab0] sm:$0xff] }
 0x426   : > { %9354 = vmatprep.subr.bf16.mxu0 %v13564_v39  ;;  %9738 = vmatprep.subr.bf16.mxu1 %v13564_v39  ;;  %v13714_v39 = vsel %vm2741_vm1, %v4643_v32, %v4644_v38  ;;  %v4498_v21 = vrot.slane %v4417_v5, 1  ;;  %v13740_v11 = vpack.c.bf16 %v4912_v27, %v4910_v54  ;;  %v7464_v46 = vrot.slane %v7204_v29, 7  ;;  %v4909_v32 = vld [vmem:[#allocation10 + $0xaa0] sm:$0xff]  ;;  %v4915_v59 = vld [vmem:[#allocation10 + $0xad0] sm:$0xff] }
 0x427   : > { %5018 = vmatmul.mubr.f32.vlgmr.msra.gmra.mrb[40].mxu0 %v13574_v37  ;;  %7829 = vmatmul.mubr.f32.vlgmr.msra.gmra.mrb[40].mxu1 %v13590_v18  ;;  %v13730_v37 = vsel %vm2741_vm1, %v7455_v14, %v7456_v45  ;;  %v13735_v18 = vsel %vm2741_vm1, %v7452_v31, %v7453_v60  ;;  %v7310_v9 = vrot.slane %v7229_v48, 1  ;;  %v13748_v62 = vsel %vm2741_vm1, %v4644_v38, %v4654_v7  ;;  %v4916_v38 = vld [vmem:[#allocation10 + $0xad8] sm:$0xff]  ;;  %v4913_v31 = vld [vmem:[#allocation10 + $0xac0] sm:$0xff] }
 0x428   : > { %9356 = vmatpush1.bf16.msra.mxu0 %v13576_v10  ;;  %9740 = vmatpush1.bf16.msra.mxu1 %v13576_v10  ;;  %v4500_v10 = vrot.slane %v13709_v25, 1  ;;  %v4661_v36 = vrot.slane %v13725_v6, 7  ;;  %v13755_v24 = vsel %vm2741_vm1, %v7456_v45, %v7466_v15  ;;  %v4663_v55 = vrot.slane %v4498_v21, 7  ;;  %v13762_v27 = vld [vmem:[#allocation3 + $0x3a8] sm:$0x7f]  ;;  %v4920_v48 = vld [vmem:[#allocation10 + $0xaf8] sm:$0xff] }
 0x429   : > { %5023 = vmatprep.mubr.f32.mxu0 %v13597_v20  ;;  %7834 = vmatprep.mubr.f32.mxu1 %v13604_v57  ;;  %v7312_v20 = vrot.slane %v13723_v56, 1  ;;  %v4660_v57 = vrot.slane %v4393_v43, 7  ;;  %v7472_v14 = vrot.slane %v7205_v22, 7  ;;  %v4918_v45 = vld [vmem:[#allocation10 + $0xae8] sm:$0xff]  ;;  %v13769_v5 = vsel %vm2741_vm1, %v4641_v63, %v4652_v17  ;;  %v13776_v43 = vld [vmem:[#allocation3 + $0x3e0] sm:$0xff] }
 0x42a   : > { %9358 = vmatprep.subr.bf16.mxu0 %v13592_v50  ;;  %9742 = vmatprep.subr.bf16.mxu1 %v13592_v50  ;;  %v4501_v50 = vsel %vm2619_vm0, %v4498_v21, %v4500_v10  ;;  %v4674_v29 = vrot.slane %v4500_v10, 7  ;;  %v4420_v15 = vld [vmem:[#allocation3 + $0x3d0] sm:$0xff]  ;;  %v13787_v63 = vpack.c.bf16 %v4916_v38, %v4914_v52  ;;  %v7207_v17 = vld [vmem:[#allocation3 + $0x168] sm:$0x7f]  ;;  %v13789_v22 = vld [vmem:[#allocation3 + $0x1a0] sm:$0xff]  ;;  %v13801_v10 = vpack.c.bf16 %v4915_v59, %v4913_v31 }
 0x42b   : > { %5024 = vmatmul.mubr.f32.gmra.mrb[42].mxu0 %v13613_v44  ;;  %7835 = vmatmul.mubr.f32.gmra.mrb[42].mxu1 %v13629_v61  ;;  %v4664_v23 = vrot.slane %v4501_v50, 7  ;;  %v7313_v54 = vsel %vm2619_vm0, %v7310_v9, %v7312_v20  ;;  %v7475_v44 = vrot.slane %v7310_v9, 7  ;;  %v7473_v61 = vrot.slane %v13743_v51, 7  ;;  %v7232_v21 = vld [vmem:[#allocation3 + $0x190] sm:$0xff]  ;;  %14898 = vst [vmem:[#allocation65_spill] sm:$0xff] %v13789_v22  ;;  %v13820_v59 = vld [vmem:[#allocation3 + $0x198] sm:$0xff] }
 0x42c   : > { %9360 = vmatpush1.bf16.msra.mxu0 %v13631_v34  ;;  %9744 = vmatpush1.bf16.msra.mxu1 %v13631_v34  ;;  %v13774_v34 = vsel %vm2741_vm1, %v7453_v60, %v7464_v46  ;;  %v7476_v7 = vrot.slane %v7313_v54, 7  ;;  %v7486_v60 = vrot.slane %v7312_v20, 7  ;;  %v4672_v9 = vrot.slane %v13762_v27, 7  ;;  %v4917_v20 = vld [vmem:[#allocation10 + $0xae0] sm:$0xff]  ;;  %v7208_v31 = vld [vmem:[#allocation3 + $0x188] sm:$0x80] }
 0x42d   : > { %5029 = vmatprep.mubr.f32.mxu0 %v13652_v12  ;;  %7840 = vmatprep.mubr.f32.mxu1 %v13665_v30  ;;  %v13780_v12 = vpack.c.bf16 %v4911_v2, %v4909_v32  ;;  %v13785_v30 = vsel %vm2741_vm1, %v4660_v57, %v4661_v36  ;;  %v13799_v46 = vsel %vm2741_vm1, %v7472_v14, %v7473_v61  ;;  %v4396_v32 = vld [vmem:[#allocation3 + $0x3c8] sm:$0x80]  ;;  %v13804_v2 = vld [vmem:[#allocation3 + $0x3d8] sm:$0xff]  ;;  %v4504_v52 = vrot.slane %v4420_v15, 1 }
 0x42e   : > { %9362 = vmatprep.subr.bf16.mxu0 %v13643_v28  ;;  %9746 = vmatprep.subr.bf16.mxu1 %v13643_v28  ;;  %v13794_v28 = vsel %vm2741_vm1, %v4663_v55, %v4664_v23  ;;  %14899 = vst [vmem:[#allocation67_spill] sm:$0xff] %v13804_v2  ;;  %v4919_v57 = vld [vmem:[#allocation10 + $0xaf0] sm:$0xff]  ;;  %v4506_v50 = vrot.slane %v13776_v43, 1  ;;  %v13817_v55 = vsel %vm2741_vm1, %v4664_v23, %v4674_v29  ;;  %v7484_v38 = vrot.slane %v7207_v17, 7  ;;  %v4924_v27 = vld [vmem:[#allocation10 + $0xb18] sm:$0xff] }
 0x42f   : > { %5030 = vmatmul.mubr.f32.gmra.mrb[44].mxu0 %v13641_v42  ;;  %7841 = vmatmul.mubr.f32.gmra.mrb[44].mxu1 %v13657_v3  ;;  %v13809_v42 = vsel %vm2741_vm1, %v7475_v44, %v7476_v7  ;;  %v13811_v3 = vpack.c.bf16 %v4920_v48, %v4918_v45  ;;  %v7316_v14 = vrot.slane %v7232_v21, 1  ;;  %14900 = vst [vmem:[#allocation66_spill] sm:$0xff] %v13820_v59  ;;  %v14702_v23 = vrot.slane %v13804_v2, 7  ;;  %v4922_v44 = vld [vmem:[#allocation10 + $0xb08] sm:$0xff]  ;;  %v4921_v45 = vld [vmem:[#allocation10 + $0xb00] sm:$0xff]  ;;  %v4923_v15 = vld [vmem:[#allocation10 + $0xb10] sm:$0xff] }
 0x430   : > { %9364 = vmatpush1.bf16.msra.mxu0 %v13645_v41  ;;  %9748 = vmatpush1.bf16.msra.mxu1 %v13645_v41  ;;  %v7318_v41 = vrot.slane %v13789_v22, 1  ;;  %v13825_v54 = vsel %vm2741_vm1, %v7476_v7, %v7486_v60  ;;  %v4683_v29 = vrot.slane %v4504_v52, 7  ;;  %v13835_v60 = vld [vmem:[#allocation3 + $0x3e8] sm:$0x7f]  ;;  %v13842_v17 = vsel %vm2741_vm1, %v4661_v36, %v4672_v9  ;;  %v13926_v22 = vld [vmem:[#allocation3 + $0x460] sm:$0xff] }
 0x431   : > { %5035 = vmatprep.mubr.f32.mxu0 %v13673_v16  ;;  %7846 = vmatprep.mubr.f32.mxu1 %v13690_v40  ;;  %v13828_v16 = vsel %vm2619_vm0, %v4504_v52, %v4506_v50  ;;  %v4680_v40 = vrot.slane %v4396_v32, 7  ;;  %v7495_v7 = vrot.slane %v7316_v14, 7  ;;  %v14703_v21 = vrot.slane %v13820_v59, 7  ;;  %v4926_v32 = vld [vmem:[#allocation10 + $0xb28] sm:$0xff]  ;;  %v4928_v52 = vld [vmem:[#allocation10 + $0xb38] sm:$0xff]  ;;  %14907 = vst [vmem:[#allocation71_spill] sm:$0xff] %v13926_v22 }
 0x432   : > { %9366 = vmatprep.subr.bf16.mxu0 %v13667_v19  ;;  %9750 = vmatprep.subr.bf16.mxu1 %v13667_v19  ;;  %v4684_v48 = vrot.slane %v13828_v16, 7  ;;  %v7319_v19 = vsel %vm2619_vm0, %v7316_v14, %v7318_v41  ;;  %v4423_v16 = vld [vmem:[#allocation3 + $0x410] sm:$0xff]  ;;  %v13852_v14 = vpack.c.bf16 %v4919_v57, %v4917_v20  ;;  %v13854_v36 = vpack.c.bf16 %v4924_v27, %v4922_v44  ;;  %v7210_v9 = vld [vmem:[#allocation3 + $0x1a8] sm:$0x7f]  ;;  %v13867_v57 = vld [vmem:[#allocation3 + $0x1e0] sm:$0xff] }
 0x433   : > { %5036 = vmatmul.mubr.f32.gmra.mrb[46].mxu0 %v13695_v33  ;;  %7847 = vmatmul.mubr.f32.gmra.mrb[46].mxu1 %v13703_v0  ;;  %v7496_v33 = vrot.slane %v7319_v19, 7  ;;  %v7492_v0 = vrot.slane %v7208_v31, 7  ;;  %v13856_v31 = vld [vmem:[#allocation3 + $0x420] sm:$0xff]  ;;  %v7235_v19 = vld [vmem:[#allocation3 + $0x1d0] sm:$0xff]  ;;  %v7506_v20 = vrot.slane %v7318_v41, 7  ;;  %14902 = vst [vmem:[#allocation69_spill] sm:$0xff] %v13867_v57 }
 0x434   : > { %9368 = vmatpush1.bf16.msra.mxu0 %v13705_v49  ;;  %9752 = vmatpush1.bf16.msra.mxu1 %v13705_v49  ;;  %v13850_v49 = vsel %vm2741_vm1, %v7473_v61, %v7484_v38  ;;  %14901 = vst [vmem:[#allocation68_spill] sm:$0xff] %v13856_v31  ;;  %v4694_v61 = vrot.slane %v4506_v50, 7  ;;  %v4399_v38 = vld [vmem:[#allocation3 + $0x408] sm:$0x80]  ;;  %v13869_v44 = vld [vmem:[#allocation3 + $0x418] sm:$0xff]  ;;  %v7322_v41 = vrot.slane %v7235_v19, 1 }
 0x435   : > { %5041 = vmatprep.mubr.f32.mxu0 %v13714_v39  ;;  %7852 = vmatprep.mubr.f32.mxu1 %v13730_v37  ;;  %v13863_v39 = vsel %vm2741_vm1, %v4680_v40, %v14702_v23  ;;  %v13865_v37 = vpack.c.bf16 %v4923_v15, %v4921_v45  ;;  %14903 = vst [vmem:[#allocation70_spill] sm:$0xff] %v13869_v44  ;;  %v4692_v40 = vrot.slane %v13835_v60, 7  ;;  %v4510_v45 = vrot.slane %v4423_v16, 1  ;;  %v13888_v15 = vld [vmem:[#allocation3 + $0x1d8] sm:$0xff]  ;;  %v4925_v60 = vld [vmem:[#allocation10 + $0xb20] sm:$0xff] }
 0x436   : > { %9370 = vmatprep.subr.bf16.mxu0 %v13707_v35  ;;  %9754 = vmatprep.subr.bf16.mxu1 %v13707_v35  ;;  %v13874_v35 = vsel %vm2741_vm1, %v4683_v29, %v4684_v48  ;;  %v13877_v27 = vsel %vm2741_vm1, %v7495_v7, %v7496_v33  ;;  %v13885_v50 = vsel %vm2741_vm1, %v7492_v0, %v14703_v21  ;;  %v7211_v29 = vld [vmem:[#allocation3 + $0x1c8] sm:$0x80]  ;;  %v7324_v16 = vrot.slane %v13867_v57, 1  ;;  %v4929_v21 = vld [vmem:[#allocation10 + $0xb40] sm:$0xff] }
 0x437   : > { %5042 = vmatmul.mubr.f32.gmra.mrb[48].mxu0 %v13719_v8  ;;  %7853 = vmatmul.mubr.f32.gmra.mrb[48].mxu1 %v13735_v18  ;;  %v7504_v8 = vrot.slane %v7210_v9, 7  ;;  %v4512_v18 = vrot.slane %v13856_v31, 1  ;;  %14904 = vst [vmem:[#allocation40_spill] sm:$0xff] %v13888_v15  ;;  %v13892_v7 = vpack.c.bf16 %v4928_v52, %v4926_v32  ;;  %v4700_v23 = vrot.slane %v4399_v38, 7  ;;  %v4930_v9 = vld [vmem:[#allocation10 + $0xb48] sm:$0xff]  ;;  %v4932_v52 = vld [vmem:[#allocation10 + $0xb58] sm:$0xff] }
 0x438   : > { %9372 = vmatpush1.bf16.msra.mxu0 %v13721_v58  ;;  %9756 = vmatpush1.bf16.msra.mxu1 %v13721_v58  ;;  %v4927_v58 = vld [vmem:[#allocation10 + $0xb30] sm:$0xff]  ;;  %v13899_v19 = vsel %vm2741_vm1, %v4684_v48, %v4694_v61  ;;  %v4703_v32 = vrot.slane %v4510_v45, 7  ;;  %v7512_v48 = vrot.slane %v7211_v29, 7  ;;  %v7515_v29 = vrot.slane %v7322_v41, 7  ;;  %v4936_v61 = vld [vmem:[#allocation10 + $0xb78] sm:$0xff] }
 0x439   : > { %5047 = vmatprep.mubr.f32.mxu0 %v13748_v62  ;;  %7858 = vmatprep.mubr.f32.mxu1 %v13755_v24  ;;  %v13902_v62 = vsel %vm2741_vm1, %v7496_v33, %v7506_v20  ;;  %v13905_v24 = vsel %vm2619_vm0, %v4510_v45, %v4512_v18  ;;  %v4931_v38 = vld [vmem:[#allocation10 + $0xb50] sm:$0xff]  ;;  %v13912_v33 = vld [vmem:[#allocation3 + $0x428] sm:$0x7f]  ;;  %v14905_v45 = vrot.slane %v13804_v2, 7  ;;  %v14021_v2 = vld [vmem:[#allocation3 + $0x260] sm:$0xff] }
 0x43a   : > { %9374 = vmatprep.subr.bf16.mxu0 %v13740_v11  ;;  %9758 = vmatprep.subr.bf16.mxu1 %v13740_v11  ;;  %v4704_v0 = vrot.slane %v13905_v24, 7  ;;  %v7325_v11 = vsel %vm2619_vm0, %v7322_v41, %v7324_v16  ;;  %v4934_v20 = vld [vmem:[#allocation10 + $0xb68] sm:$0xff]  ;;  %14917 = vst [vmem:[#allocation42_spill] sm:$0xff] %v14021_v2 }
 0x43b   : > { %5048 = vmatmul.mubr.f32.gmra.mrb[50].mxu0 %v13769_v5  ;;  %7859 = vmatmul.mubr.f32.gmra.mrb[50].mxu1 %v13774_v34  ;;  %v13919_v5 = vsel %vm2741_vm1, %v14905_v45, %v4692_v40  ;;  %v14906_v34 = vrot.slane %v13820_v59, 7  ;;  %v7516_v57 = vrot.slane %v7325_v11, 7  ;;  %v4426_v31 = vld [vmem:[#allocation3 + $0x450] sm:$0xff]  ;;  %v14908_v40 = vrot.slane %v13869_v44, 7  ;;  %v13941_v11 = vld [vmem:[#allocation3 + $0x220] sm:$0xff] }
 0x43c   : > { %9376 = vmatpush1.bf16.msra.mxu0 %v13780_v12  ;;  %9760 = vmatpush1.bf16.msra.mxu1 %v13780_v12  ;;  %v13930_v12 = vpack.c.bf16 %v4927_v58, %v4925_v60  ;;  %v13937_v59 = vpack.c.bf16 %v4932_v52, %v4930_v9  ;;  %v7238_v41 = vld [vmem:[#allocation3 + $0x210] sm:$0xff]  ;;  %14909 = vst [vmem:[#allocation30_spill] sm:$0xff] %v13941_v11  ;;  %v4714_v60 = vrot.slane %v4512_v18, 7  ;;  %v7526_v58 = vrot.slane %v7324_v16, 7 }
 0x43d   : > { %v13924_v24 = vsel %vm2741_vm1, %v14906_v34, %v7504_v8  ;;  %5053 = vmatprep.mubr.f32.mxu0 %v13794_v28  ;;  %7864 = vmatprep.mubr.f32.mxu1 %v13809_v42  ;;  %v13935_v45 = vsel %vm2741_vm1, %v4700_v23, %v14908_v40  ;;  %v13939_v8 = vld [vmem:[#allocation3 + $0x1e8] sm:$0x7f]  ;;  %v13946_v28 = vsel %vm2741_vm1, %v4703_v32, %v4704_v0  ;;  %v4402_v23 = vld [vmem:[#allocation3 + $0x448] sm:$0x80]  ;;  %v13950_v34 = vld [vmem:[#allocation3 + $0x458] sm:$0xff]  ;;  %v14911_v9 = vrot.slane %v13888_v15, 7 }
 0x43e   : > { %9378 = vmatprep.subr.bf16.mxu0 %v13787_v63  ;;  %9762 = vmatprep.subr.bf16.mxu1 %v13787_v63  ;;  %v13948_v42 = vpack.c.bf16 %v4931_v38, %v4929_v21  ;;  %14910 = vst [vmem:[#allocation41_spill] sm:$0xff] %v13950_v34  ;;  %v4712_v63 = vrot.slane %v13912_v33, 7  ;;  %v4516_v32 = vrot.slane %v4426_v31, 1  ;;  %v4518_v21 = vrot.slane %v13926_v22, 1  ;;  %v4935_v16 = vld [vmem:[#allocation10 + $0xb70] sm:$0xff]  ;;  %v4938_v40 = vld [vmem:[#allocation10 + $0xb88] sm:$0xff] }
 0x43f   : > { %5054 = vmatmul.mubr.f32.gmra.mrb[52].mxu0 %v13785_v30  ;;  %7865 = vmatmul.mubr.f32.gmra.mrb[52].mxu1 %v13799_v46  ;;  %v13957_v52 = vsel %vm2741_vm1, %v7512_v48, %v14911_v9  ;;  %v13964_v18 = vsel %vm2741_vm1, %v7515_v29, %v7516_v57  ;;  %v13966_v30 = vpack.c.bf16 %v4936_v61, %v4934_v20  ;;  %v4933_v46 = vld [vmem:[#allocation10 + $0xb60] sm:$0xff]  ;;  %v7328_v38 = vrot.slane %v7238_v41, 1  ;;  %v7214_v61 = vld [vmem:[#allocation3 + $0x208] sm:$0x80]  ;;  %v13976_v20 = vld [vmem:[#allocation3 + $0x218] sm:$0xff] }
 0x440   : > { %9380 = vmatpush1.bf16.msra.mxu0 %v13801_v10  ;;  %9764 = vmatpush1.bf16.msra.mxu1 %v13801_v10  ;;  %v7330_v48 = vrot.slane %v13941_v11, 1  ;;  %v7524_v31 = vrot.slane %v13939_v8, 7  ;;  %v13973_v33 = vsel %vm2619_vm0, %v4516_v32, %v4518_v21  ;;  %v4720_v10 = vrot.slane %v4402_v23, 7  ;;  %14912 = vst [vmem:[#allocation31_spill] sm:$0xff] %v13976_v20  ;;  %v4940_v8 = vld [vmem:[#allocation10 + $0xb98] sm:$0xff]  ;;  %v4937_v23 = vld [vmem:[#allocation10 + $0xb80] sm:$0xff] }
 0x441   : > { %5059 = vmatprep.mubr.f32.mxu0 %v13817_v55  ;;  %7870 = vmatprep.mubr.f32.mxu1 %v13825_v54  ;;  %v13981_v41 = vsel %vm2741_vm1, %v4704_v0, %v4714_v60  ;;  %v13984_v55 = vsel %vm2741_vm1, %v7516_v57, %v7526_v58  ;;  %v13989_v9 = vld [vmem:[#allocation3 + $0x468] sm:$0x7f]  ;;  %v4723_v29 = vrot.slane %v4516_v32, 7  ;;  %v7535_v11 = vrot.slane %v7328_v38, 7  ;;  %v4939_v60 = vld [vmem:[#allocation10 + $0xb90] sm:$0xff] }
 0x442   : > { %9382 = vmatprep.subr.bf16.mxu0 %v13811_v3  ;;  %9766 = vmatprep.subr.bf16.mxu1 %v13811_v3  ;;  %v13987_v54 = vsel %vm2619_vm0, %v7328_v38, %v7330_v48  ;;  %v4724_v3 = vrot.slane %v13973_v33, 7  ;;  %v4429_v57 = vld [vmem:[#allocation3 + $0x490] sm:$0xff]  ;;  %v14913_v58 = vrot.slane %v13869_v44, 7  ;;  %v14005_v38 = vld [vmem:[#allocation3 + $0x4a0] sm:$0xff]  ;;  %v7216_v32 = vld [vmem:[#allocation3 + $0x228] sm:$0x7f] }
 0x443   : > { %5060 = vmatmul.mubr.f32.gmra.mrb[54].mxu0 %v13842_v17  ;;  %7871 = vmatmul.mubr.f32.gmra.mrb[54].mxu1 %v13850_v49  ;;  %v7536_v0 = vrot.slane %v13987_v54, 7  ;;  %v14002_v17 = vpack.c.bf16 %v4935_v16, %v4933_v46  ;;  %v7532_v49 = vrot.slane %v7214_v61, 7  ;;  %v4942_v33 = vld [vmem:[#allocation10 + $0xba8] sm:$0xff]  ;;  %14914 = vst [vmem:[#allocation44_spill] sm:$0xff] %v14005_v38  ;;  %v14019_v16 = vpack.c.bf16 %v4940_v8, %v4938_v40 }
 0x444   : > { %9384 = vmatpush1.bf16.msra.mxu0 %v13852_v14  ;;  %9768 = vmatpush1.bf16.msra.mxu1 %v13852_v14  ;;  %v14000_v22 = vsel %vm2741_vm1, %v14913_v58, %v4712_v63  ;;  %v7241_v54 = vld [vmem:[#allocation3 + $0x250] sm:$0xff]  ;;  %v14915_v14 = vrot.slane %v13888_v15, 7  ;;  %v14916_v63 = vrot.slane %v13950_v34, 7  ;;  %v4734_v61 = vrot.slane %v4518_v21, 7  ;;  %v4944_v58 = vld [vmem:[#allocation10 + $0xbb8] sm:$0xff] }
 0x445   : > { %5065 = vmatprep.mubr.f32.mxu0 %v13874_v35  ;;  %7876 = vmatprep.mubr.f32.mxu1 %v13877_v27  ;;  %v14025_v35 = vpack.c.bf16 %v4939_v60, %v4937_v23  ;;  %v7546_v27 = vrot.slane %v7330_v48, 7  ;;  %v4405_v15 = vld [vmem:[#allocation3 + $0x488] sm:$0x80]  ;;  %v14033_v21 = vsel %vm2741_vm1, %v4723_v29, %v4724_v3  ;;  %v14036_v40 = vsel %vm2741_vm1, %v7535_v11, %v7536_v0  ;;  %v4941_v29 = vld [vmem:[#allocation10 + $0xba0] sm:$0xff]  ;;  %v14049_v60 = vld [vmem:[#allocation3 + $0x258] sm:$0xff] }
 0x446   : > { %v14012_v44 = vsel %vm2741_vm1, %v14915_v14, %v7524_v31  ;;  %v14017_v46 = vsel %vm2741_vm1, %v4720_v10, %v14916_v63  ;;  %9386 = vmatprep.subr.bf16.mxu0 %v13854_v36  ;;  %9770 = vmatprep.subr.bf16.mxu1 %v13854_v36  ;;  %v4732_v31 = vrot.slane %v13989_v9, 7  ;;  %v4522_v14 = vrot.slane %v4429_v57, 1  ;;  %v14028_v10 = vld [vmem:[#allocation3 + $0x498] sm:$0xff]  ;;  %v7217_v11 = vld [vmem:[#allocation3 + $0x248] sm:$0x80] }
 0x447   : > { %5066 = vmatmul.mubr.f32.gmra.mrb[56].mxu0 %v13863_v39  ;;  %7877 = vmatmul.mubr.f32.gmra.mrb[56].mxu1 %v13885_v50  ;;  %v4524_v36 = vrot.slane %v14005_v38, 1  ;;  %v7334_v8 = vrot.slane %v7241_v54, 1  ;;  %v14918_v48 = vrot.slane %v13976_v20, 7  ;;  %v14046_v39 = vpack.c.bf16 %v4944_v58, %v4942_v33  ;;  %v4943_v57 = vld [vmem:[#allocation10 + $0xbb0] sm:$0xff]  ;;  %v4946_v54 = vld [vmem:[#allocation10 + $0xbc8] sm:$0xff]  ;;  %v4948_v63 = vld [vmem:[#allocation10 + $0xbd8] sm:$0xff] }
 0x448   : > { %9388 = vmatpush1.bf16.msra.mxu0 %v13865_v37  ;;  %9772 = vmatpush1.bf16.msra.mxu1 %v13865_v37  ;;  %v7544_v50 = vrot.slane %v7216_v32, 7  ;;  %v7336_v9 = vrot.slane %v14021_v2, 1  ;;  %v14054_v37 = vsel %vm2741_vm1, %v4724_v3, %v4734_v61  ;;  %v4740_v33 = vrot.slane %v4405_v15, 7  ;;  %v4945_v15 = vld [vmem:[#allocation10 + $0xbc0] sm:$0xff]  ;;  %v4947_v58 = vld [vmem:[#allocation10 + $0xbd0] sm:$0xff] }
 0x449   : > { %v14044_v23 = vsel %vm2741_vm1, %v7532_v49, %v14918_v48  ;;  %5071 = vmatprep.mubr.f32.mxu0 %v13899_v19  ;;  %7882 = vmatprep.mubr.f32.mxu1 %v13902_v62  ;;  %v14057_v49 = vsel %vm2619_vm0, %v4522_v14, %v4524_v36  ;;  %v14063_v19 = vsel %vm2741_vm1, %v7536_v0, %v7546_v27  ;;  %v14919_v62 = vrot.slane %v13950_v34, 7  ;;  %v4407_v48 = vld [vmem:[#allocation3 + $0x4a8] sm:$0x7f]  ;;  %v14077_v2 = vld [vmem:[#allocation3 + $0x2d0] sm:$0xfe]  ;;  %v10598_v38 = vld [vmem:[#allocation3 + $0x2e0] sm:$0xff] }
 0x44a   : > { %9390 = vmatprep.subr.bf16.mxu0 %v13892_v7  ;;  %9774 = vmatprep.subr.bf16.mxu1 %v13892_v7  ;;  %v14071_v61 = vsel %vm2619_vm0, %v7334_v8, %v7336_v9  ;;  %v4743_v32 = vrot.slane %v4522_v14, 7  ;;  %v4744_v7 = vrot.slane %v14057_v49, 7  ;;  %v7552_v0 = vrot.slane %v7217_v11, 7  ;;  %v14090_v49 = vld [vmem:[#allocation3 + $0x90] sm:$0xfe] }
 0x44b   : > { %v14068_v3 = vsel %vm2741_vm1, %v14919_v62, %v4732_v31  ;;  %5072 = vmatmul.mubr.f32.gmra.mrb[58].mxu0 %v13919_v5  ;;  %7883 = vmatmul.mubr.f32.gmra.mrb[58].mxu1 %v13924_v24  ;;  %v14920_v31 = vrot.slane %v13976_v20, 7  ;;  %v14086_v5 = vpack.c.bf16 %v4943_v57, %v4941_v29  ;;  %v7555_v24 = vrot.slane %v7334_v8, 7  ;;  %v4950_v57 = vld [vmem:[#allocation10 + $0xbe8] sm:$0xff] }
 0x44c   : > { %9392 = vmatpush1.bf16.msra.mxu0 %v13930_v12  ;;  %9776 = vmatpush1.bf16.msra.mxu1 %v13930_v12  ;;  %v14088_v14 = vpack.c.bf16 %v4948_v63, %v4946_v54  ;;  %v7556_v11 = vrot.slane %v14071_v61, 7  ;;  %v14921_v12 = vrot.slane %v14028_v10, 7  ;;  %v4754_v29 = vrot.slane %v4524_v36, 7  ;;  %v7219_v8 = vld [vmem:[#allocation3 + $0x268] sm:$0x7f]  ;;  %v4952_v63 = vld [vmem:[#allocation10 + $0xbf8] sm:$0xff] }
 0x44d   : > { %v14084_v62 = vsel %vm2741_vm1, %v14920_v31, %v7544_v50  ;;  %5077 = vmatprep.mubr.f32.mxu0 %v13946_v28  ;;  %7888 = vmatprep.mubr.f32.mxu1 %v13964_v18  ;;  %v14100_v50 = vpack.c.bf16 %v4947_v58, %v4945_v15  ;;  %v14102_v54 = vld [vmem:[#allocation3 + $0x2e8] sm:$0xff]  ;;  %v7566_v28 = vrot.slane %v7336_v9, 7  ;;  %v4752_v18 = vrot.slane %v4407_v48, 7  ;;  %v10599_v48 = vld [vmem:[#allocation3 + $0xa0] sm:$0xff]  ;;  %v4433_v20 = vld [vmem:[#allocation3 + $0x2f0] sm:$0x1] }
 0x44e   : > { %v14098_v27 = vsel %vm2741_vm1, %v4740_v33, %v14921_v12  ;;  %9394 = vmatprep.subr.bf16.mxu0 %v13937_v59  ;;  %9778 = vmatprep.subr.bf16.mxu1 %v13937_v59  ;;  %v4949_v61 = vld [vmem:[#allocation10 + $0xbe0] sm:$0xff]  ;;  %v4544_v31 = vrot.slane %v14077_v2, 2  ;;  %v4545_v33 = vrot.slane %v10598_v38, 2  ;;  %v14110_v36 = vsel %vm2741_vm1, %v4743_v32, %v4744_v7  ;;  %v4951_v59 = vld [vmem:[#allocation10 + $0xbf0] sm:$0xff] }
 0x44f   : > { %5078 = vmatmul.mubr.f32.gmra.mrb[60].mxu0 %v13935_v45  ;;  %7889 = vmatmul.mubr.f32.gmra.mrb[60].mxu1 %v13957_v52  ;;  %v14922_v15 = vrot.slane %v14049_v60, 7  ;;  %v7356_v9 = vrot.slane %v14090_v49, 2  ;;  %v7357_v12 = vrot.slane %v10599_v48, 2  ;;  %v7222_v2 = vld [vmem:[#allocation3 + $0xa8] sm:$0xff]  ;;  %v7564_v45 = vrot.slane %v7219_v8, 7  ;;  %v10600_v52 = vld [vmem:[#allocation3 + $0x2d8] sm:$0xff] }
 0x450   : > { %9396 = vmatpush1.bf16.msra.mxu0 %v13948_v42  ;;  %9780 = vmatpush1.bf16.msra.mxu1 %v13948_v42  ;;  %v4481_v38 = vrot.slane %v10600_v52, 1  ;;  %v4484_v32 = vrot.slane %v14102_v54, 1  ;;  %v7293_v34 = vrot.slane %v13537_v53, 1  ;;  %v14125_v49 = vsel %vm2741_vm1, %v7555_v24, %v7556_v11  ;;  %v14161_v54 = vld [vmem:[#allocation3 + $0x310] sm:$0xfe] }
 0x451   : > { %v14115_v58 = vsel %vm2741_vm1, %v7552_v0, %v14922_v15  ;;  %v7245_v0 = vld [vmem:[#allocation3 + $0xb0] sm:$0x1]  ;;  %5083 = vmatprep.mubr.f32.mxu0 %v13981_v41  ;;  %7894 = vmatprep.mubr.f32.mxu1 %v13984_v55  ;;  %v14128_v15 = vsel %vm2741_vm1, %v4744_v7, %v4754_v29  ;;  %v14130_v48 = vpack.c.bf16 %v4952_v63, %v4950_v57  ;;  %v14923_v53 = vrot.slane %v14028_v10, 7  ;;  %v7246_v63 = vld [vmem:[#allocation3 + $0xd0] sm:$0xfe] }
 0x452   : > { %9398 = vmatprep.subr.bf16.mxu0 %v13966_v30  ;;  %9782 = vmatprep.subr.bf16.mxu1 %v13966_v30  ;;  %v14135_v42 = vsel %vm2741_vm1, %v7556_v11, %v7566_v28  ;;  %v14143_v55 = vsel %vm2684_vm2, %v4544_v31, %v4545_v33  ;;  %v7296_v24 = vrot.slane %v7222_v2, 1  ;;  %v14147_v7 = vpack.c.bf16 %v4951_v59, %v4949_v61 }
 0x453   : > { %v14140_v41 = vsel %vm2741_vm1, %v14923_v53, %v4752_v18  ;;  %5084 = vmatmul.mubr.f32.gmra.mrb[62].mxu0 %v14000_v22  ;;  %7895 = vmatmul.mubr.f32.gmra.mrb[62].mxu1 %v14012_v44  ;;  %v14150_v30 = vsel %vm2684_vm2, %v7356_v9, %v7357_v12  ;;  %v4547_v11 = vrot.slane %v4433_v20, 2  ;;  %v7359_v29 = vrot.slane %v7245_v0, 2  ;;  %v10602_v53 = vld [vmem:[#allocation3 + $0x318] sm:$0xff] }
 0x454   : > { %9400 = vmatpush1.bf16.msra.mxu0 %v14002_v17  ;;  %9784 = vmatpush1.bf16.msra.mxu1 %v14002_v17  ;;  %v14924_v57 = vrot.slane %v14049_v60, 7  ;;  %v4485_v22 = vsel %vm2619_vm0, %v4481_v38, %v4484_v32  ;;  %v7297_v44 = vsel %vm2619_vm0, %v7293_v34, %v7296_v24  ;;  %v4609_v20 = vrot.slane %v4544_v31, 7 }
 0x455   : > { %5089 = vmatprep.mubr.f32.mxu0 %v14033_v21  ;;  %7900 = vmatprep.mubr.f32.mxu1 %v14036_v40  ;;  %v4610_v28 = vrot.slane %v14143_v55, 7  ;;  %v7421_v18 = vrot.slane %v7356_v9, 7  ;;  %v4606_v17 = vrot.slane %v4481_v38, 7  ;;  %v7422_v61 = vrot.slane %v14150_v30, 7  ;;  %v14171_v21 = vld [vmem:[#allocation3 + $0x328] sm:$0xff] }
 0x456   : > { %v14157_v8 = vsel %vm2741_vm1, %v14924_v57, %v7564_v45  ;;  %9402 = vmatprep.subr.bf16.mxu0 %v14019_v16  ;;  %9786 = vmatprep.subr.bf16.mxu1 %v14019_v16  ;;  %v7418_v59 = vrot.slane %v7293_v34, 7  ;;  %v4548_v2 = vsel %vm2684_vm2, %v4545_v33, %v4547_v11  ;;  %v7360_v45 = vsel %vm2684_vm2, %v7357_v12, %v7359_v29  ;;  %v14175_v38 = vld [vmem:[#allocation3 + $0xe8] sm:$0xff]  ;;  %v10601_v16 = vld [vmem:[#allocation3 + $0x320] sm:$0xff]  ;;  %v7247_v30 = vld [vmem:[#allocation3 + $0xf0] sm:$0x1] }
 0x457   : > { %5090 = vmatmul.mubr.f32.gmra.mrb[64].mxu0 %v14017_v46  ;;  %7901 = vmatmul.mubr.f32.gmra.mrb[64].mxu1 %v14044_v23  ;;  %v4607_v40 = vrot.slane %v4485_v22, 7  ;;  %v7419_v31 = vrot.slane %v7297_v44, 7  ;;  %v4616_v9 = vrot.slane %v4484_v32, 7  ;;  %v7428_v52 = vrot.slane %v7296_v24, 7  ;;  %v4435_v46 = vld [vmem:[#allocation3 + $0x330] sm:$0x1] }
 0x458   : > { %9404 = vmatpush1.bf16.msra.mxu0 %v14025_v35  ;;  %9788 = vmatpush1.bf16.msra.mxu1 %v14025_v35  ;;  %v4549_v34 = vrot.slane %v14161_v54, 2  ;;  %v4550_v33 = vrot.slane %v10601_v16, 2  ;;  %v7361_v12 = vrot.slane %v7246_v63, 2  ;;  %v7362_v0 = vrot.slane %v13578_v47, 2 }
 0x459   : > { %5095 = vmatprep.mubr.f32.mxu0 %v14054_v37  ;;  %7906 = vmatprep.mubr.f32.mxu1 %v14063_v19  ;;  %v4618_v23 = vrot.slane %v4548_v2, 7  ;;  %v7430_v32 = vrot.slane %v7360_v45, 7  ;;  %v4487_v55 = vrot.slane %v10602_v53, 1  ;;  %v4490_v24 = vrot.slane %v14171_v21, 1  ;;  %v14235_v45 = vld [vmem:[#allocation3 + $0x368] sm:$0xff] }
 0x45a   : > { %9406 = vmatprep.subr.bf16.mxu0 %v14046_v39  ;;  %9790 = vmatprep.subr.bf16.mxu1 %v14046_v39  ;;  %v14187_v35 = vsel %vm2741_vm1, %v4609_v20, %v4610_v28  ;;  %v14190_v47 = vsel %vm2741_vm1, %v7421_v18, %v7422_v61  ;;  %v7299_v37 = vrot.slane %v13599_v1, 1  ;;  %v7302_v19 = vrot.slane %v14175_v38, 1  ;;  %v14225_v20 = vld [vmem:[#allocation3 + $0x350] sm:$0xfe] }
 0x45b   : > { %5096 = vmatmul.mubr.f32.gmra.mrb[66].mxu0 %v14068_v3  ;;  %7907 = vmatmul.mubr.f32.gmra.mrb[66].mxu1 %v14084_v62  ;;  %v14197_v11 = vsel %vm2741_vm1, %v4606_v17, %v4607_v40  ;;  %v14200_v39 = vsel %vm2741_vm1, %v7418_v59, %v7419_v31  ;;  %v14203_v29 = vsel %vm2741_vm1, %v4607_v40, %v4616_v9  ;;  %v4552_v57 = vrot.slane %v4435_v46, 2  ;;  %v7248_v17 = vld [vmem:[#allocation3 + $0x110] sm:$0xfe] }
 0x45c   : > { %9408 = vmatpush1.bf16.msra.mxu0 %v14086_v5  ;;  %9792 = vmatpush1.bf16.msra.mxu1 %v14086_v5  ;;  %v4551_v1 = vsel %vm2684_vm2, %v4549_v34, %v4550_v33  ;;  %v14209_v3 = vsel %vm2684_vm2, %v7361_v12, %v7362_v0  ;;  %v14212_v62 = vsel %vm2619_vm0, %v4487_v55, %v4490_v24  ;;  %v7364_v54 = vrot.slane %v7247_v30, 2 }
 0x45d   : > { %5101 = vmatprep.mubr.f32.mxu0 %v14110_v36  ;;  %7912 = vmatprep.mubr.f32.mxu1 %v14125_v49  ;;  %v14217_v22 = vsel %vm2741_vm1, %v4610_v28, %v4618_v23  ;;  %v14220_v44 = vsel %vm2741_vm1, %v7422_v61, %v7430_v32  ;;  %v14223_v5 = vsel %vm2741_vm1, %v7419_v31, %v7428_v52  ;;  %v4629_v18 = vrot.slane %v4549_v34, 7  ;;  %v7249_v23 = vld [vmem:[#allocation3 + $0x130] sm:$0x1] }
 0x45e   : > { %9410 = vmatprep.subr.bf16.mxu0 %v14088_v14  ;;  %9794 = vmatprep.subr.bf16.mxu1 %v14088_v14  ;;  %v7441_v36 = vrot.slane %v7361_v12, 7  ;;  %v7303_v49 = vsel %vm2619_vm0, %v7299_v37, %v7302_v19  ;;  %v4553_v28 = vsel %vm2684_vm2, %v4550_v33, %v4552_v57  ;;  %v4630_v63 = vrot.slane %v4551_v1, 7  ;;  %v7250_v1 = vld [vmem:[#allocation3 + $0x150] sm:$0xfe] }
 0x45f   : > { %5102 = vmatmul.mubr.f32.gmra.mrb[68].mxu0 %v14098_v27  ;;  %7913 = vmatmul.mubr.f32.gmra.mrb[68].mxu1 %v14115_v58  ;;  %v7442_v61 = vrot.slane %v14209_v3, 7  ;;  %v4626_v59 = vrot.slane %v4487_v55, 7  ;;  %v4627_v2 = vrot.slane %v14212_v62, 7  ;;  %v7438_v14 = vrot.slane %v7299_v37, 7  ;;  %v10603_v27 = vld [vmem:[#allocation3 + $0x360] sm:$0xff]  ;;  %v14241_v58 = vld [vmem:[#allocation3 + $0x128] sm:$0xff] }
 0x460   : > { %9412 = vmatpush1.bf16.msra.mxu0 %v14100_v50  ;;  %9796 = vmatpush1.bf16.msra.mxu1 %v14100_v50  ;;  %v7365_v21 = vsel %vm2684_vm2, %v7362_v0, %v7364_v54  ;;  %v4554_v40 = vrot.slane %v14225_v20, 2  ;;  %v4555_v31 = vrot.slane %v10603_v27, 2  ;;  %v7439_v9 = vrot.slane %v7303_v49, 7  ;;  %v4437_v0 = vld [vmem:[#allocation3 + $0x370] sm:$0x1]  ;;  %v4419_v49 = vld [vmem:[#allocation3 + $0x3a8] sm:$0xff] }
 0x461   : > { %5107 = vmatprep.mubr.f32.mxu0 %v14128_v15  ;;  %7918 = vmatprep.mubr.f32.mxu1 %v14135_v42  ;;  %v4638_v52 = vrot.slane %v4553_v28, 7  ;;  %v7366_v38 = vrot.slane %v7248_v17, 2  ;;  %v7367_v34 = vrot.slane %v13647_v4, 2  ;;  %v4636_v50 = vrot.slane %v4490_v24, 7  ;;  %v7231_v28 = vld [vmem:[#allocation3 + $0x168] sm:$0xff] }
 0x462   : > { %9414 = vmatprep.subr.bf16.mxu0 %v14130_v48  ;;  %9798 = vmatprep.subr.bf16.mxu1 %v14130_v48  ;;  %v7448_v16 = vrot.slane %v7302_v19, 7  ;;  %v4493_v33 = vrot.slane %v13660_v13, 1  ;;  %v4496_v12 = vrot.slane %v14235_v45, 1  ;;  %v4631_v15 = vsel %vm2741_vm1, %v4629_v18, %v4630_v63 }
 0x463   : > { %5108 = vmatmul.mubr.f32.gmra.mrb[70].mxu0 %v14140_v41  ;;  %7919 = vmatmul.mubr.f32.gmra.mrb[70].mxu1 %v14157_v8  ;;  %v7450_v42 = vrot.slane %v7365_v21, 7  ;;  %v7305_v4 = vrot.slane %v13676_v26, 1  ;;  %v7308_v46 = vrot.slane %v14241_v58, 1  ;;  %v7443_v13 = vsel %vm2741_vm1, %v7441_v36, %v7442_v61  ;;  %v7251_v21 = vld [vmem:[#allocation3 + $0x170] sm:$0x1] }
 0x464   : > { %9416 = vmatpush1.bf16.msra.mxu0 %v14147_v7  ;;  %9800 = vmatpush1.bf16.msra.mxu1 %v14147_v7  ;;  %v4628_v48 = vsel %vm2741_vm1, %v4626_v59, %v4627_v2  ;;  %v4556_v41 = vsel %vm2684_vm2, %v4554_v40, %v4555_v31  ;;  %v7440_v8 = vsel %vm2741_vm1, %v7438_v14, %v7439_v9  ;;  %v4557_v53 = vrot.slane %v4437_v0, 2 }
 0x465   : > { %5178 = vmatprep.mubr.f32.mxu0 %v14187_v35  ;;  %7989 = vmatprep.mubr.f32.mxu1 %v14190_v47  ;;  %v4639_v26 = vsel %vm2741_vm1, %v4630_v63, %v4638_v52  ;;  %v14265_v32 = vsel %vm2684_vm2, %v7366_v38, %v7367_v34  ;;  %v14268_v7 = vsel %vm2741_vm1, %v4627_v2, %v4636_v50  ;;  %v7369_v37 = vrot.slane %v7249_v23, 2  ;;  %v4438_v35 = vld [vmem:[#allocation3 + $0x390] sm:$0xfe] }
 0x466   : > { %v14271_v55 = vsel %vm2741_vm1, %v7439_v9, %v7448_v16  ;;  %v4497_v24 = vsel %vm2619_vm0, %v4493_v33, %v4496_v12  ;;  %v7451_v47 = vsel %vm2741_vm1, %v7442_v61, %v7450_v42  ;;  %v4649_v19 = vrot.slane %v4554_v40, 7 }
 0x467   : > { %5179 = vmatmul.mubr.f32.vlgmr.msra.gmra.mrb[40].mxu0 %v14197_v11  ;;  %7990 = vmatmul.mubr.f32.vlgmr.msra.gmra.mrb[40].mxu1 %v14200_v39  ;;  %v4650_v30 = vrot.slane %v4556_v41, 7  ;;  %v7309_v57 = vsel %vm2619_vm0, %v7305_v4, %v7308_v46  ;;  %v7461_v3 = vrot.slane %v7366_v38, 7  ;;  %v7462_v62 = vrot.slane %v14265_v32, 7  ;;  %v14311_v41 = vld [vmem:[#allocation3 + $0x3e8] sm:$0xff] }
 0x468   : > { %5184 = vmatprep.mubr.f32.mxu0 %v14217_v22  ;;  %7995 = vmatprep.mubr.f32.mxu1 %v14220_v44  ;;  %v4646_v54 = vrot.slane %v4493_v33, 7  ;;  %v4558_v20 = vsel %vm2684_vm2, %v4555_v31, %v4557_v53  ;;  %v4647_v11 = vrot.slane %v4497_v24, 7  ;;  %v7370_v39 = vsel %vm2684_vm2, %v7367_v34, %v7369_v37  ;;  %v4439_v44 = vld [vmem:[#allocation3 + $0x3b0] sm:$0x1]  ;;  %v4440_v33 = vld [vmem:[#allocation3 + $0x3d0] sm:$0xfe] }
 0x469   : > { %v4559_v18 = vrot.slane %v4438_v35, 2  ;;  %v4560_v36 = vrot.slane %v13709_v25, 2  ;;  %v7458_v17 = vrot.slane %v7305_v4, 7  ;;  %v7459_v63 = vrot.slane %v7309_v57, 7  ;;  %v7252_v4 = vld [vmem:[#allocation3 + $0x190] sm:$0xfe] }
 0x46a   : > { %v7371_v61 = vrot.slane %v7250_v1, 2  ;;  %v7372_v22 = vrot.slane %v13723_v56, 2  ;;  %v4651_v59 = vsel %vm2741_vm1, %v4649_v19, %v4650_v30  ;;  %v4658_v2 = vrot.slane %v4558_v20, 7  ;;  %v14316_v24 = vld [vmem:[#allocation3 + $0x1a8] sm:$0xff] }
 0x46b   : > { %5185 = vmatmul.mubr.f32.gmra.mrb[42].mxu0 %v14203_v29  ;;  %7996 = vmatmul.mubr.f32.gmra.mrb[42].mxu1 %v14223_v5  ;;  %v4656_v45 = vrot.slane %v4496_v12, 7  ;;  %v7468_v14 = vrot.slane %v7308_v46, 7  ;;  %v7470_v25 = vrot.slane %v7370_v39, 7  ;;  %v4499_v40 = vrot.slane %v13725_v6, 1  ;;  %v14925_v1 = vld [vmem:[#allocation65_spill] sm:$0xff] }
 0x46c   : > { %5190 = vmatprep.mubr.f32.mxu0 %v4631_v15  ;;  %8001 = vmatprep.mubr.f32.mxu1 %v7443_v13  ;;  %v4502_v27 = vrot.slane %v4419_v49, 1  ;;  %v7311_v31 = vrot.slane %v13743_v51, 1  ;;  %v7463_v56 = vsel %vm2741_vm1, %v7461_v3, %v7462_v62  ;;  %v4648_v29 = vsel %vm2741_vm1, %v4646_v54, %v4647_v11  ;;  %v7253_v39 = vld [vmem:[#allocation3 + $0x1b0] sm:$0x1] }
 0x46d   : > { %v14293_v5 = vsel %vm2684_vm2, %v4559_v18, %v4560_v36  ;;  %v7314_v58 = vrot.slane %v7231_v28, 1  ;;  %v7460_v9 = vsel %vm2741_vm1, %v7458_v17, %v7459_v63  ;;  %v14297_v52 = vsel %vm2684_vm2, %v7371_v61, %v7372_v22 }
 0x46e   : > { %v4562_v38 = vrot.slane %v4439_v44, 2  ;;  %v7374_v34 = vrot.slane %v7251_v21, 2  ;;  %v4659_v6 = vsel %vm2741_vm1, %v4650_v30, %v4658_v2  ;;  %v14301_v51 = vsel %vm2741_vm1, %v4647_v11, %v4656_v45  ;;  %v4441_v30 = vld [vmem:[#allocation3 + $0x3f0] sm:$0x1]  ;;  %v4442_v44 = vld [vmem:[#allocation3 + $0x410] sm:$0xfe] }
 0x46f   : > { %5191 = vmatmul.mubr.f32.gmra.mrb[44].mxu0 %v4628_v48  ;;  %8002 = vmatmul.mubr.f32.gmra.mrb[44].mxu1 %v7440_v8  ;;  %v14304_v50 = vsel %vm2741_vm1, %v7459_v63, %v7468_v14  ;;  %v4669_v16 = vrot.slane %v4559_v18, 7  ;;  %v7471_v12 = vsel %vm2741_vm1, %v7462_v62, %v7470_v25  ;;  %v4670_v0 = vrot.slane %v14293_v5, 7  ;;  %v14926_v62 = vld [vmem:[#allocation67_spill] sm:$0xff] }
 0x470   : > { %5196 = vmatprep.mubr.f32.mxu0 %v4639_v26  ;;  %8007 = vmatprep.mubr.f32.mxu1 %v7451_v47  ;;  %v4503_v15 = vsel %vm2619_vm0, %v4499_v40, %v4502_v27  ;;  %v7315_v42 = vsel %vm2619_vm0, %v7311_v31, %v7314_v58  ;;  %v7481_v46 = vrot.slane %v7371_v61, 7  ;;  %v7482_v23 = vrot.slane %v14297_v52, 7 }
 0x471   : > { %v4666_v13 = vrot.slane %v4499_v40, 7  ;;  %v7478_v48 = vrot.slane %v7311_v31, 7  ;;  %v4563_v8 = vsel %vm2684_vm2, %v4560_v36, %v4562_v38  ;;  %v7375_v26 = vsel %vm2684_vm2, %v7372_v22, %v7374_v34  ;;  %v14927_v36 = vld [vmem:[#allocation66_spill] sm:$0xff] }
 0x472   : > { %v4564_v32 = vrot.slane %v4440_v33, 2  ;;  %v4565_v53 = vrot.slane %v13776_v43, 2  ;;  %v4667_v37 = vrot.slane %v4503_v15, 7  ;;  %v7479_v35 = vrot.slane %v7315_v42, 7  ;;  %v7254_v31 = vld [vmem:[#allocation3 + $0x1d0] sm:$0xfe] }
 0x473   : > { %5197 = vmatmul.mubr.f32.gmra.mrb[46].mxu0 %v14268_v7  ;;  %8008 = vmatmul.mubr.f32.gmra.mrb[46].mxu1 %v14271_v55  ;;  %v4676_v47 = vrot.slane %v4502_v27, 7  ;;  %v7488_v19 = vrot.slane %v7314_v58, 7  ;;  %v7376_v57 = vrot.slane %v7252_v4, 2  ;;  %v7377_v3 = vrot.slane %v14925_v1, 2  ;;  %v14928_v58 = vld [vmem:[#allocation68_spill] sm:$0xff]  ;;  %v14929_v15 = vld [vmem:[#allocation69_spill] sm:$0xff] }
 0x474   : > { %5202 = vmatprep.mubr.f32.mxu0 %v4651_v59  ;;  %8013 = vmatprep.mubr.f32.mxu1 %v7463_v56  ;;  %v4505_v54 = vrot.slane %v14926_v62, 1  ;;  %v4508_v43 = vrot.slane %v14311_v41, 1  ;;  %v4671_v20 = vsel %vm2741_vm1, %v4669_v16, %v4670_v0  ;;  %v7483_v7 = vsel %vm2741_vm1, %v7481_v46, %v7482_v23  ;;  %v14344_v16 = vld [vmem:[#allocation3 + $0x428] sm:$0xff] }
 0x475   : > { %v4678_v11 = vrot.slane %v4563_v8, 7  ;;  %v7490_v55 = vrot.slane %v7375_v26, 7  ;;  %v14326_v18 = vsel %vm2684_vm2, %v4564_v32, %v4565_v53  ;;  %v7317_v49 = vrot.slane %v14927_v36, 1  ;;  %v7237_v4 = vld [vmem:[#allocation3 + $0x1e8] sm:$0xff]  ;;  %v14930_v8 = vld [vmem:[#allocation70_spill] sm:$0xff] }
 0x476   : > { %v7320_v28 = vrot.slane %v14316_v24, 1  ;;  %v4567_v17 = vrot.slane %v4441_v30, 2  ;;  %v4668_v63 = vsel %vm2741_vm1, %v4666_v13, %v4667_v37  ;;  %v7480_v61 = vsel %vm2741_vm1, %v7478_v48, %v7479_v35  ;;  %v4443_v13 = vld [vmem:[#allocation3 + $0x430] sm:$0x1]  ;;  %v7256_v36 = vld [vmem:[#allocation3 + $0x210] sm:$0xfe] }
 0x477   : > { %5203 = vmatmul.mubr.f32.gmra.mrb[48].mxu0 %v4648_v29  ;;  %8014 = vmatmul.mubr.f32.gmra.mrb[48].mxu1 %v7460_v9  ;;  %v4677_v22 = vsel %vm2741_vm1, %v4667_v37, %v4676_v47  ;;  %v7489_v59 = vsel %vm2741_vm1, %v7479_v35, %v7488_v19  ;;  %v7378_v2 = vsel %vm2684_vm2, %v7376_v57, %v7377_v3  ;;  %v7379_v14 = vrot.slane %v7253_v39, 2  ;;  %v14931_v37 = vld [vmem:[#allocation40_spill] sm:$0xff]  ;;  %v7255_v19 = vld [vmem:[#allocation3 + $0x1f0] sm:$0x1] }
 0x478   : > { %5208 = vmatprep.mubr.f32.mxu0 %v4659_v6  ;;  %8019 = vmatprep.mubr.f32.mxu1 %v7471_v12  ;;  %v4509_v45 = vsel %vm2619_vm0, %v4505_v54, %v4508_v43  ;;  %v4679_v21 = vsel %vm2741_vm1, %v4670_v0, %v4678_v11  ;;  %v7491_v25 = vsel %vm2741_vm1, %v7482_v23, %v7490_v55  ;;  %v4689_v40 = vrot.slane %v4564_v32, 7 }
 0x479   : > { %v4690_v27 = vrot.slane %v14326_v18, 7  ;;  %v7321_v56 = vsel %vm2619_vm0, %v7317_v49, %v7320_v28  ;;  %v4568_v29 = vsel %vm2684_vm2, %v4565_v53, %v4567_v17  ;;  %v4569_v5 = vrot.slane %v4442_v44, 2 }
 0x47a   : > { %v4570_v9 = vrot.slane %v14928_v58, 2  ;;  %v7501_v52 = vrot.slane %v7376_v57, 7  ;;  %v7502_v38 = vrot.slane %v7378_v2, 7  ;;  %v4686_v34 = vrot.slane %v4505_v54, 7  ;;  %v14932_v2 = vld [vmem:[#allocation71_spill] sm:$0xff] }
 0x47b   : > { %5209 = vmatmul.mubr.f32.gmra.mrb[50].mxu0 %v14301_v51  ;;  %8020 = vmatmul.mubr.f32.gmra.mrb[50].mxu1 %v14304_v50  ;;  %v4687_v6 = vrot.slane %v4509_v45, 7  ;;  %v7498_v33 = vrot.slane %v7317_v49, 7  ;;  %v7380_v12 = vsel %vm2684_vm2, %v7377_v3, %v7379_v14  ;;  %v7381_v0 = vrot.slane %v7254_v31, 2  ;;  %v4445_v58 = vld [vmem:[#allocation3 + $0x470] sm:$0x1] }
 0x47c   : > { %5214 = vmatprep.mubr.f32.mxu0 %v4671_v20  ;;  %8025 = vmatprep.mubr.f32.mxu1 %v7483_v7  ;;  %v7382_v42 = vrot.slane %v14929_v15, 2  ;;  %v7499_v46 = vrot.slane %v7321_v56, 7  ;;  %v4698_v23 = vrot.slane %v4568_v29, 7  ;;  %v4696_v51 = vrot.slane %v4508_v43, 7  ;;  %v4444_v7 = vld [vmem:[#allocation3 + $0x450] sm:$0xfe] }
 0x47d   : > { %v14349_v50 = vsel %vm2684_vm2, %v4569_v5, %v4570_v9  ;;  %v4691_v48 = vsel %vm2741_vm1, %v4689_v40, %v4690_v27  ;;  %v7508_v41 = vrot.slane %v7320_v28, 7  ;;  %v4511_v26 = vrot.slane %v14930_v8, 1  ;;  %v14375_v40 = vld [vmem:[#allocation3 + $0x468] sm:$0xff] }
 0x47e   : > { %v4514_v32 = vrot.slane %v14344_v16, 1  ;;  %v7510_v53 = vrot.slane %v7380_v12, 7  ;;  %v14355_v24 = vsel %vm2684_vm2, %v7381_v0, %v7382_v42  ;;  %v7323_v35 = vrot.slane %v14931_v37, 1 }
 0x47f   : > { %5215 = vmatmul.mubr.f32.gmra.mrb[52].mxu0 %v4668_v63  ;;  %8026 = vmatmul.mubr.f32.gmra.mrb[52].mxu1 %v7480_v61  ;;  %v7326_v47 = vrot.slane %v7237_v4, 1  ;;  %v7503_v30 = vsel %vm2741_vm1, %v7501_v52, %v7502_v38  ;;  %v4709_v57 = vrot.slane %v4569_v5, 7  ;;  %v4710_v1 = vrot.slane %v14349_v50, 7 }
 0x480   : > { %5220 = vmatprep.mubr.f32.mxu0 %v4679_v21  ;;  %8031 = vmatprep.mubr.f32.mxu1 %v7491_v25  ;;  %v4572_v3 = vrot.slane %v4443_v13, 2  ;;  %v4688_v62 = vsel %vm2741_vm1, %v4686_v34, %v4687_v6  ;;  %v7500_v54 = vsel %vm2741_vm1, %v7498_v33, %v7499_v46  ;;  %v4699_v43 = vsel %vm2741_vm1, %v4690_v27, %v4698_v23  ;;  %v14933_v21 = vld [vmem:[#allocation30_spill] sm:$0xff]  ;;  %v14377_v27 = vld [vmem:[#allocation3 + $0x228] sm:$0xff] }
 0x481   : > { %v4697_v20 = vsel %vm2741_vm1, %v4687_v6, %v4696_v51  ;;  %v7521_v11 = vrot.slane %v7381_v0, 7  ;;  %v7522_v55 = vrot.slane %v14355_v24, 7  ;;  %v4515_v39 = vsel %vm2619_vm0, %v4511_v26, %v4514_v32  ;;  %v14934_v6 = vld [vmem:[#allocation41_spill] sm:$0xff]  ;;  %v14935_v0 = vld [vmem:[#allocation31_spill] sm:$0xff] }
 0x482   : > { %v7384_v18 = vrot.slane %v7255_v19, 2  ;;  %v7511_v49 = vsel %vm2741_vm1, %v7502_v38, %v7510_v53  ;;  %v7509_v28 = vsel %vm2741_vm1, %v7499_v46, %v7508_v41  ;;  %v7327_v17 = vsel %vm2619_vm0, %v7323_v35, %v7326_v47  ;;  %v4446_v53 = vld [vmem:[#allocation3 + $0x490] sm:$0xfe] }
 0x483   : > { %5221 = vmatmul.mubr.f32.gmra.mrb[54].mxu0 %v4677_v22  ;;  %8032 = vmatmul.mubr.f32.gmra.mrb[54].mxu1 %v7489_v59  ;;  %v4711_v63 = vsel %vm2741_vm1, %v4709_v57, %v4710_v1  ;;  %v4573_v61 = vsel %vm2684_vm2, %v4570_v9, %v4572_v3  ;;  %v4574_v44 = vrot.slane %v4444_v7, 2  ;;  %v4575_v45 = vrot.slane %v14932_v2, 2  ;;  %v7257_v9 = vld [vmem:[#allocation3 + $0x230] sm:$0x1]  ;;  %v7258_v24 = vld [vmem:[#allocation3 + $0x250] sm:$0xfe] }
 0x484   : > { %5226 = vmatprep.mubr.f32.mxu0 %v4691_v48  ;;  %8037 = vmatprep.mubr.f32.mxu1 %v7503_v30  ;;  %v4706_v14 = vrot.slane %v4511_v26, 7  ;;  %v4707_v22 = vrot.slane %v4515_v39, 7  ;;  %v7386_v59 = vrot.slane %v7256_v36, 2  ;;  %v7387_v25 = vrot.slane %v14933_v21, 2  ;;  %v7243_v36 = vld [vmem:[#allocation3 + $0x268] sm:$0xff] }
 0x485   : > { %v7523_v31 = vsel %vm2741_vm1, %v7521_v11, %v7522_v55  ;;  %v7518_v56 = vrot.slane %v7323_v35, 7  ;;  %v7519_v29 = vrot.slane %v7327_v17, 7  ;;  %v7385_v5 = vsel %vm2684_vm2, %v7382_v42, %v7384_v18  ;;  %v14937_v11 = vld [vmem:[#allocation42_spill] sm:$0xff]  ;;  %v14404_v18 = vld [vmem:[#allocation3 + $0x4a8] sm:$0xff]  ;;  %v7259_v2 = vld [vmem:[#allocation3 + $0x270] sm:$0x1] }
 0x486   : > { %v4718_v52 = vrot.slane %v4573_v61, 7  ;;  %v4716_v38 = vrot.slane %v4514_v32, 7  ;;  %v7528_v34 = vrot.slane %v7326_v47, 7  ;;  %v4517_v16 = vrot.slane %v14934_v6, 1 }
 0x487   : > { %5227 = vmatmul.mubr.f32.gmra.mrb[56].mxu0 %v4688_v62  ;;  %8038 = vmatmul.mubr.f32.gmra.mrb[56].mxu1 %v7500_v54  ;;  %v14383_v33 = vsel %vm2684_vm2, %v4574_v44, %v4575_v45  ;;  %v4520_v12 = vrot.slane %v14375_v40, 1  ;;  %v7329_v15 = vrot.slane %v14935_v0, 1  ;;  %v7332_v42 = vrot.slane %v14377_v27, 1 }
 0x488   : > { %5232 = vmatprep.mubr.f32.mxu0 %v4699_v43  ;;  %8043 = vmatprep.mubr.f32.mxu1 %v7511_v49  ;;  %v7530_v4 = vrot.slane %v7385_v5, 7  ;;  %v7388_v46 = vsel %vm2684_vm2, %v7386_v59, %v7387_v25  ;;  %v4577_v23 = vrot.slane %v4445_v58, 2  ;;  %v7389_v51 = vrot.slane %v7257_v9, 2  ;;  %v14936_v43 = vld [vmem:[#allocation44_spill] sm:$0xff] }
 0x489   : > { %v4708_v13 = vsel %vm2741_vm1, %v4706_v14, %v4707_v22  ;;  %v7520_v48 = vsel %vm2741_vm1, %v7518_v56, %v7519_v29  ;;  %v4717_v41 = vsel %vm2741_vm1, %v4707_v22, %v4716_v38  ;;  %v7529_v8 = vsel %vm2741_vm1, %v7519_v29, %v7528_v34 }
 0x48a   : > { %v4729_v26 = vrot.slane %v4574_v44, 7  ;;  %v4730_v32 = vrot.slane %v14383_v33, 7  ;;  %v7541_v37 = vrot.slane %v7386_v59, 7  ;;  %v7542_v35 = vrot.slane %v7388_v46, 7 }
 0x48b   : > { %5233 = vmatmul.mubr.f32.gmra.mrb[58].mxu0 %v4697_v20  ;;  %8044 = vmatmul.mubr.f32.gmra.mrb[58].mxu1 %v7509_v28  ;;  %v4521_v47 = vsel %vm2619_vm0, %v4517_v16, %v4520_v12  ;;  %v7333_v19 = vsel %vm2619_vm0, %v7329_v15, %v7332_v42  ;;  %v4719_v30 = vsel %vm2741_vm1, %v4710_v1, %v4718_v52  ;;  %v4579_v54 = vrot.slane %v4446_v53, 2 }
 0x48c   : > { %5238 = vmatprep.mubr.f32.mxu0 %v4711_v63  ;;  %8049 = vmatprep.mubr.f32.mxu1 %v7523_v31  ;;  %v7531_v57 = vsel %vm2741_vm1, %v7522_v55, %v7530_v4  ;;  %v4578_v3 = vsel %vm2684_vm2, %v4575_v45, %v4577_v23  ;;  %v7390_v62 = vsel %vm2684_vm2, %v7387_v25, %v7389_v51  ;;  %v4580_v20 = vrot.slane %v14936_v43, 2  ;;  %v4447_v55 = vld [vmem:[#allocation3 + $0x4b0] sm:$0x1] }
 0x48d   : > { %v7391_v7 = vrot.slane %v7258_v24, 2  ;;  %v7392_v39 = vrot.slane %v14937_v11, 2  ;;  %v4726_v50 = vrot.slane %v4517_v16, 7  ;;  %v4727_v49 = vrot.slane %v4521_v47, 7  ;;  %v2522_v47 = vld [vmem:[#allocation11] sm:$0x3] }
 0x48e   : > { %v7538_v1 = vrot.slane %v7329_v15, 7  ;;  %v7539_v28 = vrot.slane %v7333_v19, 7  ;;  %v4731_v17 = vsel %vm2741_vm1, %v4729_v26, %v4730_v32  ;;  %v7543_v63 = vsel %vm2741_vm1, %v7541_v37, %v7542_v35  ;;  %v5339_v19 = vld [vmem:[#allocation11] sm:$0x3] }
 0x48f   : > { %5239 = vmatmul.mubr.f32.gmra.mrb[60].mxu0 %v4708_v13  ;;  %8050 = vmatmul.mubr.f32.gmra.mrb[60].mxu1 %v7520_v48  ;;  %v4738_v61 = vrot.slane %v4578_v3, 7  ;;  %v7550_v44 = vrot.slane %v7390_v62, 7  ;;  %v4523_v45 = vrot.slane %v14028_v10, 1  ;;  %v4526_v14 = vrot.slane %v14404_v18, 1  ;;  %v14939_v62 = vld [vmem:[#allocation29_spill] sm:$0xff] }
 0x490   : > { %5244 = vmatprep.mubr.f32.mxu0 %v4719_v30  ;;  %8055 = vmatprep.mubr.f32.mxu1 %v7531_v57  ;;  %v7335_v22 = vrot.slane %v14049_v60, 1  ;;  %v7338_v59 = vrot.slane %v7243_v36, 1  ;;  %v4736_v21 = vrot.slane %v4520_v12, 7  ;;  %v4581_v25 = vsel %vm2684_vm2, %v4579_v54, %v4580_v20  ;;  %v14938_v30 = vld [vmem:[#allocation28_spill] sm:$0xff] }
 0x491   : > { %v7393_v40 = vsel %vm2684_vm2, %v7391_v7, %v7392_v39  ;;  %v4582_v27 = vrot.slane %v4447_v55, 2  ;;  %v4728_v31 = vsel %vm2741_vm1, %v4726_v50, %v4727_v49  ;;  %v7540_v56 = vsel %vm2741_vm1, %v7538_v1, %v7539_v28 }
 0x492   : > { %v7548_v29 = vrot.slane %v7332_v42, 7  ;;  %v7394_v5 = vrot.slane %v7259_v2, 2  ;;  %v4739_v10 = vsel %vm2741_vm1, %v4730_v32, %v4738_v61  ;;  %v7551_v60 = vsel %vm2741_vm1, %v7542_v35, %v7550_v44 }
 0x493   : > { %5245 = vmatmul.mubr.f32.gmra.mrb[62].mxu0 %v4717_v41  ;;  %8056 = vmatmul.mubr.f32.gmra.mrb[62].mxu1 %v7529_v8  ;;  %v4749_v58 = vrot.slane %v4579_v54, 7  ;;  %v7561_v9 = vrot.slane %v7391_v7, 7  ;;  %v4750_v52 = vrot.slane %v4581_v25, 7  ;;  %v7562_v38 = vrot.slane %v7393_v40, 7 }
 0x494   : > { %5250 = vmatprep.mubr.f32.mxu0 %v4731_v17  ;;  %8061 = vmatprep.mubr.f32.mxu1 %v7543_v63  ;;  %v4527_v34 = vsel %vm2619_vm0, %v4523_v45, %v4526_v14  ;;  %v7339_v6 = vsel %vm2619_vm0, %v7335_v22, %v7338_v59  ;;  %v4583_v16 = vsel %vm2684_vm2, %v4580_v20, %v4582_v27  ;;  %v4746_v15 = vrot.slane %v4523_v45, 7 }
 0x495   : > { %v7395_v33 = vsel %vm2684_vm2, %v7392_v39, %v7394_v5  ;;  %v4737_v12 = vsel %vm2741_vm1, %v4727_v49, %v4736_v21  ;;  %v7549_v0 = vsel %vm2741_vm1, %v7539_v28, %v7548_v29  ;;  %v4747_v42 = vrot.slane %v4527_v34, 7 }
 0x496   : > { %v7558_v4 = vrot.slane %v7335_v22, 7  ;;  %v7559_v46 = vrot.slane %v7339_v6, 7  ;;  %v4751_v23 = vsel %vm2741_vm1, %v4749_v58, %v4750_v52  ;;  %v7563_v51 = vsel %vm2741_vm1, %v7561_v9, %v7562_v38 }
 0x497   : > { %5251 = vmatmul.mubr.f32.gmra.mrb[64].mxu0 %v4728_v31  ;;  %8062 = vmatmul.mubr.f32.gmra.mrb[64].mxu1 %v7540_v56  ;;  %v4758_v13 = vrot.slane %v4583_v16, 7  ;;  %v7570_v48 = vrot.slane %v7395_v33, 7  ;;  %v4748_v41 = vsel %vm2741_vm1, %v4746_v15, %v4747_v42  ;;  %v4756_v26 = vrot.slane %v4526_v14, 7 }
 0x498   : > { %5256 = vmatprep.mubr.f32.mxu0 %v4739_v10  ;;  %8067 = vmatprep.mubr.f32.mxu1 %v7551_v60  ;;  %v7560_v8 = vsel %vm2741_vm1, %v7558_v4, %v7559_v46  ;;  %v7568_v32 = vrot.slane %v7338_v59, 7  ;;  %v14432_v57 = vrot.slane %v2522_v47, %v14938_v30  ;;  %v14435_v3 = vrot.slane %v5339_v19, %v14938_v30 }
 0x499   : > { %v4759_v53 = vsel %vm2741_vm1, %v4750_v52, %v4758_v13  ;;  %v7571_v24 = vsel %vm2741_vm1, %v7562_v38, %v7570_v48  ;;  %v4757_v37 = vsel %vm2741_vm1, %v4747_v42, %v4756_v26  ;;  %v14438_v54 = vrot.slane %v2522_v47, %v14939_v62 }
 0x49a   : > { %v7569_v35 = vsel %vm2741_vm1, %v7559_v46, %v7568_v32  ;;  %v14441_v43 = vrot.slane %v5339_v19, %v14939_v62 }
 0x49b   : > { %5257 = vmatmul.mubr.f32.gmra.mrb[66].mxu0 %v4737_v12  ;;  %8068 = vmatmul.mubr.f32.gmra.mrb[66].mxu1 %v7549_v0 }
 0x49c   : > { %5262 = vmatprep.mubr.f32.mxu0 %v4751_v23  ;;  %8073 = vmatprep.mubr.f32.mxu1 %v7563_v51 }
 0x49f   : > { %5263 = vmatmul.mubr.f32.gmra.mrb[68].mxu0 %v4748_v41  ;;  %8074 = vmatmul.mubr.f32.gmra.mrb[68].mxu1 %v7560_v8 }
 0x4a0   : > { %5268 = vmatprep.mubr.f32.mxu0 %v4759_v53  ;;  %8079 = vmatprep.mubr.f32.mxu1 %v7571_v24 }
 0x4a3   : > { %5269 = vmatmul.mubr.f32.gmra.mrb[70].mxu0 %v4757_v37  ;;  %8080 = vmatmul.mubr.f32.gmra.mrb[70].mxu1 %v7569_v35 }
 0x53a   : > { %v5180_v20 = vpop.f32.mrb[40].mxu0  ;;  %v7991_v7 = vpop.f32.mrb[40].mxu1 }
 0x53b   : > { %v9881_v11 = vadd.f32 %v5180_v20, %v14432_v57  ;;  %v9913_v39 = vadd.f32 %v7991_v7, %v14435_v3  ;;  %v5182_v18 = vpop.f32.mrb[41].mxu0  ;;  %v7993_v36 = vpop.f32.mrb[41].mxu1 }
 0x53c   : > { %v9882_v50 = vadd.f32 %v5182_v18, %v14438_v54  ;;  %v9914_v49 = vadd.f32 %v7993_v36, %v14441_v43 }
 0x53d   : > { %5307 = vst [vmem:[%s11055_s12] sm:$0xff] %v9881_v11  ;;  %8607 = vst [vmem:[%s11055_s12 + $0x20] sm:$0xff] %v9913_v39 }
 0x53e   : > { %5308 = vst [vmem:[%s11055_s12 + $0x8] sm:$0xff] %v9882_v50  ;;  %8608 = vst [vmem:[%s11055_s12 + $0x28] sm:$0xff] %v9914_v49  ;;  %v5186_v1 = vpop.f32.mrb[42].mxu0  ;;  %v7997_v28 = vpop.f32.mrb[42].mxu1 }
 0x53f   : > { %v9883_v55 = vadd.f32 %v5186_v1, %v14432_v57  ;;  %v9915_v17 = vadd.f32 %v7997_v28, %v14435_v3  ;;  %v5188_v63 = vpop.f32.mrb[43].mxu0  ;;  %v7999_v61 = vpop.f32.mrb[43].mxu1 }
 0x540   : > { %v9884_v44 = vadd.f32 %v5188_v63, %v14438_v54  ;;  %v9916_v2 = vadd.f32 %v7999_v61, %v14441_v43 }
 0x541   : > { %5309 = vst [vmem:[%s11055_s12 + $0x10] sm:$0xff] %v9883_v55  ;;  %8609 = vst [vmem:[%s11055_s12 + $0x30] sm:$0xff] %v9915_v17 }
 0x542   : > { %5310 = vst [vmem:[%s11055_s12 + $0x18] sm:$0xff] %v9884_v44  ;;  %8610 = vst [vmem:[%s11055_s12 + $0x38] sm:$0xff] %v9916_v2  ;;  %v5192_v45 = vpop.f32.mrb[44].mxu0  ;;  %v8003_v14 = vpop.f32.mrb[44].mxu1 }
 0x543   : > { %v9885_v22 = vadd.f32 %v5192_v45, %v14432_v57  ;;  %v9917_v59 = vadd.f32 %v8003_v14, %v14435_v3  ;;  %v5194_v21 = vpop.f32.mrb[45].mxu0  ;;  %v8005_v25 = vpop.f32.mrb[45].mxu1 }
 0x544   : > { %v9886_v40 = vadd.f32 %v5194_v21, %v14438_v54  ;;  %v9918_v27 = vadd.f32 %v8005_v25, %v14441_v43 }
 0x545   : > { %5311 = vst [vmem:[%s11055_s12 + $0x40] sm:$0xff] %v9885_v22  ;;  %8611 = vst [vmem:[%s11055_s12 + $0x60] sm:$0xff] %v9917_v59 }
 0x546   : > { %5312 = vst [vmem:[%s11055_s12 + $0x48] sm:$0xff] %v9886_v40  ;;  %8612 = vst [vmem:[%s11055_s12 + $0x68] sm:$0xff] %v9918_v27  ;;  %v5198_v31 = vpop.f32.mrb[46].mxu0  ;;  %v8009_v56 = vpop.f32.mrb[46].mxu1 }
 0x547   : > { %v9887_v29 = vadd.f32 %v5198_v31, %v14432_v57  ;;  %v9919_v5 = vadd.f32 %v8009_v56, %v14435_v3  ;;  %v5200_v10 = vpop.f32.mrb[47].mxu0  ;;  %v8011_v60 = vpop.f32.mrb[47].mxu1 }
 0x548   : > { %v9888_v58 = vadd.f32 %v5200_v10, %v14438_v54  ;;  %v9920_v9 = vadd.f32 %v8011_v60, %v14441_v43 }
 0x549   : > { %5313 = vst [vmem:[%s11055_s12 + $0x50] sm:$0xff] %v9887_v29  ;;  %8613 = vst [vmem:[%s11055_s12 + $0x70] sm:$0xff] %v9919_v5 }
 0x54a   : > { %5314 = vst [vmem:[%s11055_s12 + $0x58] sm:$0xff] %v9888_v58  ;;  %8614 = vst [vmem:[%s11055_s12 + $0x78] sm:$0xff] %v9920_v9  ;;  %v5204_v52 = vpop.f32.mrb[48].mxu0  ;;  %v8015_v38 = vpop.f32.mrb[48].mxu1 }
 0x54b   : > { %v9889_v34 = vadd.f32 %v5204_v52, %v14432_v57  ;;  %v9921_v6 = vadd.f32 %v8015_v38, %v14435_v3  ;;  %v5206_v16 = vpop.f32.mrb[49].mxu0  ;;  %v8017_v33 = vpop.f32.mrb[49].mxu1 }
 0x54c   : > { %v9890_v12 = vadd.f32 %v5206_v16, %v14438_v54  ;;  %v9922_v0 = vadd.f32 %v8017_v33, %v14441_v43 }
 0x54d   : > { %5315 = vst [vmem:[%s11055_s12 + $0x80] sm:$0xff] %v9889_v34  ;;  %8615 = vst [vmem:[%s11055_s12 + $0xa0] sm:$0xff] %v9921_v6 }
 0x54e   : > { %5316 = vst [vmem:[%s11055_s12 + $0x88] sm:$0xff] %v9890_v12  ;;  %8616 = vst [vmem:[%s11055_s12 + $0xa8] sm:$0xff] %v9922_v0  ;;  %v5210_v15 = vpop.f32.mrb[50].mxu0  ;;  %v8021_v42 = vpop.f32.mrb[50].mxu1 }
 0x54f   : > { %v9891_v4 = vadd.f32 %v5210_v15, %v14432_v57  ;;  %v9923_v46 = vadd.f32 %v8021_v42, %v14435_v3  ;;  %v5212_v23 = vpop.f32.mrb[51].mxu0  ;;  %v8023_v51 = vpop.f32.mrb[51].mxu1 }
 0x550   : > { %v9892_v13 = vadd.f32 %v5212_v23, %v14438_v54  ;;  %v9924_v48 = vadd.f32 %v8023_v51, %v14441_v43 }
 0x551   : > { %5317 = vst [vmem:[%s11055_s12 + $0x90] sm:$0xff] %v9891_v4  ;;  %8617 = vst [vmem:[%s11055_s12 + $0xb0] sm:$0xff] %v9923_v46 }
 0x552   : > { %5318 = vst [vmem:[%s11055_s12 + $0x98] sm:$0xff] %v9892_v13  ;;  %8618 = vst [vmem:[%s11055_s12 + $0xb8] sm:$0xff] %v9924_v48  ;;  %v5216_v41 = vpop.f32.mrb[52].mxu0  ;;  %v8027_v8 = vpop.f32.mrb[52].mxu1 }
 0x553   : > { %v9893_v26 = vadd.f32 %v5216_v41, %v14432_v57  ;;  %v9925_v32 = vadd.f32 %v8027_v8, %v14435_v3  ;;  %v5218_v53 = vpop.f32.mrb[53].mxu0  ;;  %v8029_v24 = vpop.f32.mrb[53].mxu1 }
 0x554   : > { %v9894_v37 = vadd.f32 %v5218_v53, %v14438_v54  ;;  %v9926_v35 = vadd.f32 %v8029_v24, %v14441_v43 }
 0x555   : > { %5319 = vst [vmem:[%s11055_s12 + $0xc0] sm:$0xff] %v9893_v26  ;;  %8619 = vst [vmem:[%s11055_s12 + $0xe0] sm:$0xff] %v9925_v32 }
 0x556   : > { %5320 = vst [vmem:[%s11055_s12 + $0xc8] sm:$0xff] %v9894_v37  ;;  %8620 = vst [vmem:[%s11055_s12 + $0xe8] sm:$0xff] %v9926_v35  ;;  %v5222_v47 = vpop.f32.mrb[54].mxu0  ;;  %v8033_v19 = vpop.f32.mrb[54].mxu1 }
 0x557   : > { %v9895_v30 = vadd.f32 %v5222_v47, %v14432_v57  ;;  %v9927_v62 = vadd.f32 %v8033_v19, %v14435_v3  ;;  %v5224_v20 = vpop.f32.mrb[55].mxu0  ;;  %v8035_v7 = vpop.f32.mrb[55].mxu1 }
 0x558   : > { %v9896_v11 = vadd.f32 %v5224_v20, %v14438_v54  ;;  %v9928_v39 = vadd.f32 %v8035_v7, %v14441_v43 }
 0x559   : > { %5321 = vst [vmem:[%s11055_s12 + $0xd0] sm:$0xff] %v9895_v30  ;;  %8621 = vst [vmem:[%s11055_s12 + $0xf0] sm:$0xff] %v9927_v62 }
 0x55a   : > { %5322 = vst [vmem:[%s11055_s12 + $0xd8] sm:$0xff] %v9896_v11  ;;  %8622 = vst [vmem:[%s11055_s12 + $0xf8] sm:$0xff] %v9928_v39  ;;  %v5228_v18 = vpop.f32.mrb[56].mxu0  ;;  %v8039_v36 = vpop.f32.mrb[56].mxu1 }
 0x55b   : > { %v9897_v50 = vadd.f32 %v5228_v18, %v14432_v57  ;;  %v9929_v49 = vadd.f32 %v8039_v36, %v14435_v3  ;;  %v5230_v1 = vpop.f32.mrb[57].mxu0  ;;  %v8041_v28 = vpop.f32.mrb[57].mxu1 }
 0x55c   : > { %v9898_v55 = vadd.f32 %v5230_v1, %v14438_v54  ;;  %v9930_v17 = vadd.f32 %v8041_v28, %v14441_v43 }
 0x55d   : > { %5323 = vst [vmem:[%s11055_s12 + $0x100] sm:$0xff] %v9897_v50  ;;  %8623 = vst [vmem:[%s11055_s12 + $0x120] sm:$0xff] %v9929_v49 }
 0x55e   : > { %5324 = vst [vmem:[%s11055_s12 + $0x108] sm:$0xff] %v9898_v55  ;;  %8624 = vst [vmem:[%s11055_s12 + $0x128] sm:$0xff] %v9930_v17  ;;  %v5234_v63 = vpop.f32.mrb[58].mxu0  ;;  %v8045_v61 = vpop.f32.mrb[58].mxu1 }
 0x55f   : > { %v9899_v44 = vadd.f32 %v5234_v63, %v14432_v57  ;;  %v9931_v2 = vadd.f32 %v8045_v61, %v14435_v3  ;;  %v5236_v45 = vpop.f32.mrb[59].mxu0  ;;  %v8047_v14 = vpop.f32.mrb[59].mxu1 }
 0x560   : > { %v9900_v22 = vadd.f32 %v5236_v45, %v14438_v54  ;;  %v9932_v59 = vadd.f32 %v8047_v14, %v14441_v43 }
 0x561   : > { %5325 = vst [vmem:[%s11055_s12 + $0x110] sm:$0xff] %v9899_v44  ;;  %8625 = vst [vmem:[%s11055_s12 + $0x130] sm:$0xff] %v9931_v2 }
 0x562   : > { %5326 = vst [vmem:[%s11055_s12 + $0x118] sm:$0xff] %v9900_v22  ;;  %8626 = vst [vmem:[%s11055_s12 + $0x138] sm:$0xff] %v9932_v59  ;;  %v5240_v21 = vpop.f32.mrb[60].mxu0  ;;  %v8051_v25 = vpop.f32.mrb[60].mxu1 }
 0x563   : > { %v9901_v40 = vadd.f32 %v5240_v21, %v14432_v57  ;;  %v9933_v27 = vadd.f32 %v8051_v25, %v14435_v3  ;;  %v5242_v31 = vpop.f32.mrb[61].mxu0  ;;  %v8053_v56 = vpop.f32.mrb[61].mxu1 }
 0x564   : > { %v9902_v29 = vadd.f32 %v5242_v31, %v14438_v54  ;;  %v9934_v5 = vadd.f32 %v8053_v56, %v14441_v43 }
 0x565   : > { %5327 = vst [vmem:[%s11055_s12 + $0x140] sm:$0xff] %v9901_v40  ;;  %8627 = vst [vmem:[%s11055_s12 + $0x160] sm:$0xff] %v9933_v27 }
 0x566   : > { %5328 = vst [vmem:[%s11055_s12 + $0x148] sm:$0xff] %v9902_v29  ;;  %8628 = vst [vmem:[%s11055_s12 + $0x168] sm:$0xff] %v9934_v5  ;;  %v5246_v10 = vpop.f32.mrb[62].mxu0  ;;  %v8057_v60 = vpop.f32.mrb[62].mxu1 }
 0x567   : > { %v9903_v58 = vadd.f32 %v5246_v10, %v14432_v57  ;;  %v9935_v9 = vadd.f32 %v8057_v60, %v14435_v3  ;;  %v5248_v52 = vpop.f32.mrb[63].mxu0  ;;  %v8059_v38 = vpop.f32.mrb[63].mxu1 }
 0x568   : > { %v9904_v34 = vadd.f32 %v5248_v52, %v14438_v54  ;;  %v9936_v6 = vadd.f32 %v8059_v38, %v14441_v43 }
 0x569   : > { %5329 = vst [vmem:[%s11055_s12 + $0x150] sm:$0xff] %v9903_v58  ;;  %8629 = vst [vmem:[%s11055_s12 + $0x170] sm:$0xff] %v9935_v9 }
 0x56a   : > { %5330 = vst [vmem:[%s11055_s12 + $0x158] sm:$0xff] %v9904_v34  ;;  %8630 = vst [vmem:[%s11055_s12 + $0x178] sm:$0xff] %v9936_v6  ;;  %v5252_v16 = vpop.f32.mrb[64].mxu0  ;;  %v8063_v33 = vpop.f32.mrb[64].mxu1 }
 0x56b   : > { %v9905_v12 = vadd.f32 %v5252_v16, %v14432_v57  ;;  %v9937_v0 = vadd.f32 %v8063_v33, %v14435_v3  ;;  %v5254_v15 = vpop.f32.mrb[65].mxu0  ;;  %v8065_v42 = vpop.f32.mrb[65].mxu1 }
 0x56c   : > { %v9906_v4 = vadd.f32 %v5254_v15, %v14438_v54  ;;  %v9938_v46 = vadd.f32 %v8065_v42, %v14441_v43 }
 0x56d   : > { %5331 = vst [vmem:[%s11055_s12 + $0x180] sm:$0xff] %v9905_v12  ;;  %8631 = vst [vmem:[%s11055_s12 + $0x1a0] sm:$0xff] %v9937_v0 }
 0x56e   : > { %5332 = vst [vmem:[%s11055_s12 + $0x188] sm:$0xff] %v9906_v4  ;;  %8632 = vst [vmem:[%s11055_s12 + $0x1a8] sm:$0xff] %v9938_v46  ;;  %v5258_v23 = vpop.f32.mrb[66].mxu0  ;;  %v8069_v51 = vpop.f32.mrb[66].mxu1 }
 0x56f   : > { %v9907_v13 = vadd.f32 %v5258_v23, %v14432_v57  ;;  %v9939_v48 = vadd.f32 %v8069_v51, %v14435_v3  ;;  %v5260_v41 = vpop.f32.mrb[67].mxu0  ;;  %v8071_v8 = vpop.f32.mrb[67].mxu1 }
 0x570   : > { %v9908_v26 = vadd.f32 %v5260_v41, %v14438_v54  ;;  %v9940_v32 = vadd.f32 %v8071_v8, %v14441_v43 }
 0x571   : > { %5333 = vst [vmem:[%s11055_s12 + $0x190] sm:$0xff] %v9907_v13  ;;  %8633 = vst [vmem:[%s11055_s12 + $0x1b0] sm:$0xff] %v9939_v48 }
 0x572   : > { %5334 = vst [vmem:[%s11055_s12 + $0x198] sm:$0xff] %v9908_v26  ;;  %8634 = vst [vmem:[%s11055_s12 + $0x1b8] sm:$0xff] %v9940_v32  ;;  %v5264_v53 = vpop.f32.mrb[68].mxu0  ;;  %v8075_v24 = vpop.f32.mrb[68].mxu1 }
 0x573   : > { %v9909_v37 = vadd.f32 %v5264_v53, %v14432_v57  ;;  %v9941_v35 = vadd.f32 %v8075_v24, %v14435_v3  ;;  %v5266_v47 = vpop.f32.mrb[69].mxu0  ;;  %v8077_v19 = vpop.f32.mrb[69].mxu1 }
 0x574   : > { %v9910_v30 = vadd.f32 %v5266_v47, %v14438_v54  ;;  %v9942_v62 = vadd.f32 %v8077_v19, %v14441_v43 }
 0x575   : > { %5335 = vst [vmem:[%s11055_s12 + $0x1c0] sm:$0xff] %v9909_v37  ;;  %8635 = vst [vmem:[%s11055_s12 + $0x1e0] sm:$0xff] %v9941_v35 }
 0x576   : > { %5336 = vst [vmem:[%s11055_s12 + $0x1c8] sm:$0xff] %v9910_v30  ;;  %8636 = vst [vmem:[%s11055_s12 + $0x1e8] sm:$0xff] %v9942_v62  ;;  %v5270_v20 = vpop.f32.mrb[70].mxu0  ;;  %v8081_v7 = vpop.f32.mrb[70].mxu1 }
 0x577   : > { %v9911_v11 = vadd.f32 %v5270_v20, %v14432_v57  ;;  %v9943_v39 = vadd.f32 %v8081_v7, %v14435_v3  ;;  %v5272_v18 = vpop.f32.mrb[71].mxu0  ;;  %v8083_v36 = vpop.f32.mrb[71].mxu1 }
 0x578   : > { %v9912_v50 = vadd.f32 %v5272_v18, %v14438_v54  ;;  %v9944_v49 = vadd.f32 %v8083_v36, %v14441_v43 }
 0x579   : > { %5337 = vst [vmem:[%s11055_s12 + $0x1d0] sm:$0xff] %v9911_v11  ;;  %8637 = vst [vmem:[%s11055_s12 + $0x1f0] sm:$0xff] %v9943_v39 }
 0x57a   : > { %5338 = vst [vmem:[%s11055_s12 + $0x1d8] sm:$0xff] %v9912_v50  ;;  %8638 = vst [vmem:[%s11055_s12 + $0x1f8] sm:$0xff] %v9944_v49 }
 0x57b   : > { %10729 = shalt.err (!%p10726_p3)
}
 0x57c   : > { %s10730_s11 = scalar_lea.hbm %s14571_s29, 8192  ;;  %s10734_s14 = scalar_lea.hbm %s14640_s5, 32768 }
 0x57d   : > { %p10731_p8 = scmp.ne.s32.totalorder %s14571_s29, %s10730_s11  ;;  %p10735_p10 = scmp.lt.u32.totalorder %s14571_s29, %s14640_s5 }
 0x57e   : > { %p10736_p12 = scmp.lt.u32.totalorder %s10734_s14, %s10730_s11  ;;  %p10738_p4 = scmp.lt.u32.totalorder %s10730_s11, %s14571_s29 }
 0x57f   : > { %p10732_p0 = pnand %p10731_p8, %p14940_p5 }
 0x580   : > { %p10737_p1 = por %p10736_p12, %p10735_p10 }
 0x581   : > { %p10733_p2 = pneg %p10732_p0 }
 0x582   : > { %p10739_p6 = por %p10738_p4, %p10737_p1 }
 0x584   : > { %p10740_p7 = pnand %p10739_p6, %p10733_p2 }
 0x586   : > { %10743 = shalt.err (!%p10740_p7)
}
 0x587   : > { %s10836_s10 = smov 256   ;;  %s10837_s16 = smov 16  }
 0x588   : > { %10441 = dma.vmem_to_hbm [thread:$0]  (%p14940_p5), %s14573_s22, 8192, %s14571_s29, %s14583_s27, %s10836_s10, %s10836_s10, %s10837_s16  }
 0x589 PF: > { %s14941_s2 = sld [smem:[#allocation26_spill]]  ;;  %p10468_p9 = scmp.ge.s32.totalorder %s10824_s25, 2 }
 0x58a   : > { %s8183_s9 = sand.u32 1, %s10796_s18  }
 0x58b   : > { %s8184_s13 = scalar_lea.sflag [#allocation7], %s8183_s9 }
 0x58f   : > { %p14942_p11 = scmp.ne.s32.totalorder %s14941_s2, 0 }
 0x591   : > { %p10457_p13 = pnand %p10468_p9, %p14942_p11 }
 0x593   : > { %10791 = dma.done.wait (!%p10457_p13), %s8184_s13, 8192  }
 0x594   : > { %10793 = vsyncadd (!%p10457_p13), %s8184_s13, 4294959104  ;;  %s21_s25 = sadd.s32 1, %s10824_s25   ;;  %s14943_s20 = sld [smem:[#allocation21_spill]] }
 0x595   : > { %p18_p3 = scmp.ge.s32.totalorder %s21_s25, 6   ;;  %s14944_s21 = sld [smem:[#allocation27_spill]] }
 0x596   : > { %s14945_s8 = sld [smem:[#allocation22_spill]]  ;;  %s14946_s22 = sld [smem:[#allocation23_spill]] }
 0x597   : > { %s14947_s23 = sld [smem:[#allocation24_spill]]  ;;  %s14948_s24 = sld [smem:[#allocation25_spill]] }
 0x598   : > { %s14949_s18 = smov %s10800_s19  ;;  %20 = sbr.rel (!%p18_p3) target bundleno = 10 (0xa), region = 221 }
 0x59a   : > { %s14950_s19 = smov %s14943_s20 }
 0x59b   : > { %s14951_s20 = smov %s14944_s21 }
 0x59c   : > { %s14952_s21 = smov %s14945_s8 }
 0x59f   :  { %8189 = vsyncpa [#allocation6], 1 }
 0x5a0   :  { %8191 = vsyncpa [#allocation6 + $0x1], 1 }
 0x5a1   :  { %8192 = vsyncpa [#allocation9], 1 }
 0x5a2   :  { %8193 = vsyncpa [#allocation12], 1 }
 0x5a3   :  { %8194 = vsyncpa [#allocation7], 1 }
 0x5a4   :  { %8196 = vsyncpa [#allocation7 + $0x1], 1 }
 0x5a5   :  { %8197 = vsyncmov [#allocation4] }
 0x5a8   :  { %s8198_s7 = vpop.sfrf %8197 }
 0x5a9   :  { %p8646_p5 = scmp.ne.s32.totalorder %s8198_s7, 0 }
 0x5ab   :  { %8202 = shalt.err (%p8646_p5)  }
 0x5ac   :  { %8204 = vsyncmov [#allocation4 + $0x1] }
 0x5af   :  { %s8205_s29 = vpop.sfrf %8204 }
 0x5b0   :  { %p8647_p8 = scmp.ne.s32.totalorder %s8205_s29, 0 }
 0x5b2   :  { %8209 = shalt.err (%p8647_p8)  }

</bundles_post_ra>
